<compile_context>
chip_gen: v7x
topology: tpu7x:2x2x1
jax: 0.10.0
libtpu: 0.0.40
codegen_flags: <defaults>
</compile_context>

<pallas_src>
import jax
import jax.numpy as jnp
from jax.experimental import pallas as pl
from jax.experimental.pallas import tpu as pltpu

LATENT_DIM = 100
DIMS = [LATENT_DIM, 256, 512, 1024, 784]
# Lane-aligned padded input dims per layer; output dims (layer 4 keeps 784 so
# the kernel writes the final array directly, no post-kernel column slice).
PAD_IN = [128, 256, 512, 1024]
PAD_OUT = [256, 512, 1024, 784]
OUT_DIM = DIMS[-1]
BN_EPS = 1e-5
LEAKY_SLOPE = 0.2


def _round_up(n, m):
    return ((n + m - 1) // m) * m


def _tpu_budget():
    """(max_tile_rows, vmem_limit_bytes) chosen per TPU generation."""
    try:
        info = pltpu.get_tpu_info()
        vmem_bytes = int(getattr(info, "vmem_capacity_bytes", 64 * 1024 * 1024))
    except Exception:
        vmem_bytes = 64 * 1024 * 1024
    if vmem_bytes >= 128 * 1024 * 1024:        # v5e / v6e: 128 MiB physical VMEM
        return 2048, 96 * 1024 * 1024
    return 512, 48 * 1024 * 1024               # v7x: 64 MiB physical VMEM


def _make_generator_kernel(batch, tile_rows, grid_steps, needs_mask):
    """Build the kernel; all arguments are static Python values."""
    last_valid = batch - (grid_steps - 1) * tile_rows   # valid rows in last tile
    inv_full = 1.0 / float(tile_rows)
    inv_last = 1.0 / float(last_valid)

    def kernel(x_ref,
               w1_ref, b1_ref, g1_ref, be1_ref,
               w2_ref, b2_ref, g2_ref, be2_ref,
               w3_ref, b3_ref, g3_ref, be3_ref,
               w4_ref, b4_ref,
               o_ref):
        if needs_mask:
            is_last = pl.program_id(0) == pl.num_programs(0) - 1
            inv_n = jnp.where(is_last, inv_last, inv_full)
            row = jax.lax.broadcasted_iota(jnp.int32, (tile_rows, 1), 0)
            mask = (row < last_valid).astype(jnp.float32)          # (TM, 1)
        else:
            inv_n = inv_full

        def linear(h, w_ref, b_ref):
            # bf16 x bf16 MXU matmul with f32 accumulation.
            return jnp.dot(h.astype(jnp.bfloat16), w_ref[...],
                           preferred_element_type=jnp.float32) + b_ref[...]

        def leaky_relu(h):
            return jnp.maximum(h, LEAKY_SLOPE * h)

        def batchnorm(h, g_ref, be_ref):
            # Single-pass biased batch statistics; gamma folded into the scale.
            # Row-validity masking only pays its cost on the last grid tile.
            if needs_mask:
                def masked_stats(hh):
                    hm = hh * mask
                    return (jnp.sum(hm, axis=0, keepdims=True),
                            jnp.sum(hm * hh, axis=0, keepdims=True))

                def full_stats(hh):
                    return (jnp.sum(hh, axis=0, keepdims=True),
                            jnp.sum(hh * hh, axis=0, keepdims=True))

                s, ss = jax.lax.cond(is_last, masked_stats, full_stats, h)
            else:
                s = jnp.sum(h, axis=0, keepdims=True)
                ss = jnp.sum(h * h, axis=0, keepdims=True)
            mean = s * inv_n
            var = jnp.maximum(ss * inv_n - mean * mean, 0.0)
            scale = g_ref[...] * jax.lax.rsqrt(var + BN_EPS)
            shift = be_ref[...] - mean * scale
            return h * scale + shift

        h = x_ref[...]                                  # bf16, (TM, 128)
        h = batchnorm(leaky_relu(linear(h, w1_ref, b1_ref)), g1_ref, be1_ref)
        h = batchnorm(leaky_relu(linear(h, w2_ref, b2_ref)), g2_ref, be2_ref)
        h = batchnorm(leaky_relu(linear(h, w3_ref, b3_ref)), g3_ref, be3_ref)
        o_ref[...] = jnp.tanh(linear(h, w4_ref, b4_ref))

    return kernel


def _prepare_params(params):
    """Zero-pad params to lane-aligned dims; cast weight matrices to bfloat16."""
    flat = []
    for i in range(4):
        entry = params[f"layer{i + 1}"]
        w, b = entry[0], entry[1]
        fan_in, fan_out = DIMS[i], DIMS[i + 1]
        in_p, out_p = PAD_IN[i], PAD_OUT[i]
        w = jnp.pad(jnp.asarray(w, jnp.float32),
                    ((0, in_p - fan_in), (0, out_p - fan_out))).astype(jnp.bfloat16)
        b = jnp.pad(jnp.asarray(b, jnp.float32).reshape(1, fan_out),
                    ((0, 0), (0, out_p - fan_out)))
        flat += [w, b]
        if i < 3:
            g, be = entry[2], entry[3]
            g = jnp.pad(jnp.asarray(g, jnp.float32).reshape(1, fan_out),
                        ((0, 0), (0, out_p - fan_out)))
            be = jnp.pad(jnp.asarray(be, jnp.float32).reshape(1, fan_out),
                         ((0, 0), (0, out_p - fan_out)))
            flat += [g, be]
    return flat


def generator_forward(x, params):
    B = x.shape[0]
    assert x.shape[1] == LATENT_DIM, x.shape

    max_rows, vmem_limit = _tpu_budget()
    # Batch tile rounded to 16 (bf16 sublane packing). The whole batch lives in
    # one tile (exact full-batch BN) whenever it fits the per-chip cap.
    tm = min(_round_up(max(B, 1), 16), max_rows)
    b_pad = _round_up(B, tm)
    grid_steps = b_pad // tm
    needs_mask = (B % tm) != 0

    # Input pre-cast to bf16 (halves input DMA; matmuls accumulate in f32).
    x_p = jnp.pad(jnp.asarray(x, jnp.float32),
                  ((0, b_pad - B), (0, PAD_IN[0] - LATENT_DIM))).astype(jnp.bfloat16)
    flat_params = _prepare_params(params)

    kernel = _make_generator_kernel(B, tm, grid_steps, needs_mask)

    act_spec = pl.BlockSpec((tm, PAD_IN[0]), lambda i: (i, 0))
    # Output block last dim == full array dim (784): no post-kernel column slice.
    out_spec = pl.BlockSpec((tm, OUT_DIM), lambda i: (i, 0))

    flops = 2 * b_pad * sum(PAD_IN[i] * PAD_OUT[i] for i in range(4))
    transcendentals = b_pad * OUT_DIM  # tanh
    bytes_accessed = (x_p.size * 2 + b_pad * OUT_DIM * 4
                      + sum(int(p.size) * p.dtype.itemsize for p in flat_params))

    def _param_specs(pipeline_mode):
        # Constant index_map -> params DMA'd once and stay VMEM-resident.
        if pipeline_mode is None:
            return [pl.BlockSpec(p.shape, lambda i: (0, 0)) for p in flat_params]
        return [pl.BlockSpec(p.shape, lambda i: (0, 0),
                             pipeline_mode=pipeline_mode) for p in flat_params]

    def _run(pipeline_mode):
        return pl.pallas_call(
            kernel,
            out_shape=jax.ShapeDtypeStruct((b_pad, OUT_DIM), jnp.float32),
            grid=(grid_steps,),
            in_specs=[act_spec] + _param_specs(pipeline_mode),
            out_specs=out_spec,
            compiler_params=pltpu.CompilerParams(
                dimension_semantics=("parallel",),
                vmem_limit_bytes=vmem_limit),
            cost_estimate=pl.CostEstimate(
                flops=flops,
                transcendentals=transcendentals,
                bytes_accessed=bytes_accessed),
        )(x_p, *flat_params)

    try:
        # Constant blocks never change across grid steps -> single-buffer them.
        out = _run(pl.Buffered(1))
    except Exception:
        # Fallback if this JAX build rejects pipeline_mode on pallas_call specs.
        out = _run(None)

    return out[:B]


def init_params(key):
    """Deterministic init mimicking PyTorch's default Linear init (+/- 1/sqrt(fan_in))."""
    params = {}
    keys = jax.random.split(key, 8)
    k_iter = iter(keys)
    for i in range(4):
        fan_in, fan_out = DIMS[i], DIMS[i + 1]
        bound = 1.0 / jnp.sqrt(fan_in)
        w = jax.random.uniform(next(k_iter), (fan_in, fan_out),
                               minval=-bound, maxval=bound, dtype=jnp.float32)
        b = jax.random.uniform(next(k_iter), (1, fan_out),
                               minval=-bound, maxval=bound, dtype=jnp.float32)
        if i < 3:
            gamma = jnp.ones((1, fan_out), dtype=jnp.float32)
            beta = jnp.zeros((1, fan_out), dtype=jnp.float32)
            params[f"layer{i + 1}"] = (w, b, gamma, beta)
        else:
            params["layer4"] = (w, b)
    return params


def generator_reference(x, params):
    """Pure-JAX f32 reference (training-mode BatchNorm, biased variance)."""
    h = jnp.asarray(x, jnp.float32)
    for i in range(3):
        w, b, g, be = params[f"layer{i + 1}"]
        h = h @ w + b
        h = jnp.where(h >= 0, h, LEAKY_SLOPE * h)
        mean = jnp.mean(h, axis=0, keepdims=True)
        var = jnp.mean((h - mean) ** 2, axis=0, keepdims=True)
        h = (h - mean) * jax.lax.rsqrt(var + BN_EPS) * g + be
    w, b = params["layer4"]
    return jnp.tanh(h @ w + b)


if __name__ == "__main__":
    key = jax.random.PRNGKey(0)
    k_param, k_x = jax.random.split(key)
    params = init_params(k_param)

    B = 8  # batch (>=2 needed for batch-statistics BatchNorm)
    x = jax.random.normal(k_x, (B, LATENT_DIM), dtype=jnp.float32)

    out = jax.block_until_ready(generator_forward(x, params))

    assert out.shape == (B, 784), out.shape
    assert bool(jnp.all(jnp.isfinite(out)))
    assert bool(jnp.all(jnp.abs(out) <= 1.0 + 1e-6))  # tanh output range

    # Sanity check vs f32 reference (loose tol: kernel uses bf16 weights/inputs on the MXU).
    ref = jax.block_until_ready(generator_reference(x, params))
    max_err = float(jnp.max(jnp.abs(out - ref)))
    assert max_err < 0.2, max_err

    print("KERNEL_OK")
</pallas_src>

<mosaic_0001>
module attributes {stable_mosaic.version = 11 : i64} {
  func.func @kernel(%arg0: i32, %arg1: memref<16x128xbf16, #tpu.memory_space<vmem>>, %arg2: memref<128x256xbf16, #tpu.memory_space<vmem>>, %arg3: memref<1x256xf32, #tpu.memory_space<vmem>>, %arg4: memref<1x256xf32, #tpu.memory_space<vmem>>, %arg5: memref<1x256xf32, #tpu.memory_space<vmem>>, %arg6: memref<256x512xbf16, #tpu.memory_space<vmem>>, %arg7: memref<1x512xf32, #tpu.memory_space<vmem>>, %arg8: memref<1x512xf32, #tpu.memory_space<vmem>>, %arg9: memref<1x512xf32, #tpu.memory_space<vmem>>, %arg10: memref<512x1024xbf16, #tpu.memory_space<vmem>>, %arg11: memref<1x1024xf32, #tpu.memory_space<vmem>>, %arg12: memref<1x1024xf32, #tpu.memory_space<vmem>>, %arg13: memref<1x1024xf32, #tpu.memory_space<vmem>>, %arg14: memref<1024x784xbf16, #tpu.memory_space<vmem>>, %arg15: memref<1x784xf32, #tpu.memory_space<vmem>>, %arg16: memref<16x784xf32, #tpu.memory_space<vmem>>) attributes {dimension_semantics = [#tpu.dimension_semantics<parallel>], iteration_bounds = array<i64: 1>, scalar_prefetch = 0 : i64, scratch_operands = 0 : i64, tpu.core_type = #tpu.core_type<tc>, window_params = [{transform_indices = @transform_0, window_bounds = array<i64: 16, 128>}, {pipeline_mode = #tpu.pipeline_mode<synchronous>, transform_indices = @transform_1, window_bounds = array<i64: 128, 256>}, {pipeline_mode = #tpu.pipeline_mode<synchronous>, transform_indices = @transform_2, window_bounds = array<i64: 1, 256>}, {pipeline_mode = #tpu.pipeline_mode<synchronous>, transform_indices = @transform_3, window_bounds = array<i64: 1, 256>}, {pipeline_mode = #tpu.pipeline_mode<synchronous>, transform_indices = @transform_4, window_bounds = array<i64: 1, 256>}, {pipeline_mode = #tpu.pipeline_mode<synchronous>, transform_indices = @transform_5, window_bounds = array<i64: 256, 512>}, {pipeline_mode = #tpu.pipeline_mode<synchronous>, transform_indices = @transform_6, window_bounds = array<i64: 1, 512>}, {pipeline_mode = #tpu.pipeline_mode<synchronous>, transform_indices = @transform_7, window_bounds = array<i64: 1, 512>}, {pipeline_mode = #tpu.pipeline_mode<synchronous>, transform_indices = @transform_8, window_bounds = array<i64: 1, 512>}, {pipeline_mode = #tpu.pipeline_mode<synchronous>, transform_indices = @transform_9, window_bounds = array<i64: 512, 1024>}, {pipeline_mode = #tpu.pipeline_mode<synchronous>, transform_indices = @transform_10, window_bounds = array<i64: 1, 1024>}, {pipeline_mode = #tpu.pipeline_mode<synchronous>, transform_indices = @transform_11, window_bounds = array<i64: 1, 1024>}, {pipeline_mode = #tpu.pipeline_mode<synchronous>, transform_indices = @transform_12, window_bounds = array<i64: 1, 1024>}, {pipeline_mode = #tpu.pipeline_mode<synchronous>, transform_indices = @transform_13, window_bounds = array<i64: 1024, 784>}, {pipeline_mode = #tpu.pipeline_mode<synchronous>, transform_indices = @transform_14, window_bounds = array<i64: 1, 784>}, {transform_indices = @transform_15, window_bounds = array<i64: 16, 784>}]} {
    %c0_i32 = arith.constant 0 : i32
    %0 = arith.cmpi eq, %arg0, %c0_i32 : i32
    %cst = arith.constant 1.250000e-01 : f32
    %cst_0 = arith.constant 6.250000e-02 : f32
    %1 = arith.select %0, %cst, %cst_0 : f32
    %2 = tpu.iota {dimensions = array<i32: 0>} : vector<16x1xi32>
    %c8_i32 = arith.constant 8 : i32
    %3 = vector.broadcast %c8_i32 : i32 to vector<16x1xi32>
    %4 = arith.cmpi slt, %2, %3 : vector<16x1xi32>
    %5 = arith.extui %4 : vector<16x1xi1> to vector<16x1xi32>
    %6 = arith.sitofp %5 : vector<16x1xi32> to vector<16x1xf32>
    %c0 = arith.constant 0 : index
    %c0_1 = arith.constant 0 : index
    %7 = vector.load %arg1[%c0, %c0_1] : memref<16x128xbf16, #tpu.memory_space<vmem>>, vector<16x128xbf16>
    %c0_2 = arith.constant 0 : index
    %c0_3 = arith.constant 0 : index
    %8 = vector.load %arg2[%c0_2, %c0_3] : memref<128x256xbf16, #tpu.memory_space<vmem>>, vector<128x256xbf16>
    %cst_4 = arith.constant dense<0.000000e+00> : vector<16x256xf32>
    %9 = tpu.matmul %7, %8, %cst_4 {dimension_numbers = #tpu.dot_dimension_numbers<[1], [0], [0], [1], [0, 0, 1, 1], [], []>} : vector<16x128xbf16>, vector<128x256xbf16>, vector<16x256xf32> -> vector<16x256xf32>
    %c0_5 = arith.constant 0 : index
    %c0_6 = arith.constant 0 : index
    %10 = vector.load %arg3[%c0_5, %c0_6] : memref<1x256xf32, #tpu.memory_space<vmem>>, vector<1x256xf32>
    %11 = vector.broadcast %10 : vector<1x256xf32> to vector<16x256xf32>
    %12 = arith.addf %9, %11 : vector<16x256xf32>
    %cst_7 = arith.constant 2.000000e-01 : f32
    %13 = vector.broadcast %cst_7 : f32 to vector<16x256xf32>
    %14 = arith.mulf %13, %12 : vector<16x256xf32>
    %15 = arith.maximumf %12, %14 : vector<16x256xf32>
    %16 = arith.extui %0 : i1 to i32
    %c0_i32_8 = arith.constant 0 : i32
    %17 = arith.cmpi ne, %16, %c0_i32_8 : i32
    %18:2 = scf.if %17 -> (vector<1x256xf32>, vector<1x256xf32>) {
      %111 = vector.broadcast %6 : vector<16x1xf32> to vector<16x256xf32>
      %112 = arith.mulf %15, %111 : vector<16x256xf32>
      %cst_48 = arith.constant dense<0.000000e+00> : vector<256xf32>
      %113 = vector.multi_reduction <add>, %112, %cst_48 [0] : vector<16x256xf32> to vector<256xf32>
      %114 = vector.shape_cast %113 : vector<256xf32> to vector<1x256xf32>
      %115 = arith.mulf %112, %15 : vector<16x256xf32>
      %cst_49 = arith.constant dense<0.000000e+00> : vector<256xf32>
      %116 = vector.multi_reduction <add>, %115, %cst_49 [0] : vector<16x256xf32> to vector<256xf32>
      %117 = vector.shape_cast %116 : vector<256xf32> to vector<1x256xf32>
      scf.yield %114, %117 : vector<1x256xf32>, vector<1x256xf32>
    } else {
      %cst_48 = arith.constant dense<0.000000e+00> : vector<256xf32>
      %111 = vector.multi_reduction <add>, %15, %cst_48 [0] : vector<16x256xf32> to vector<256xf32>
      %112 = vector.shape_cast %111 : vector<256xf32> to vector<1x256xf32>
      %113 = arith.mulf %15, %15 : vector<16x256xf32>
      %cst_49 = arith.constant dense<0.000000e+00> : vector<256xf32>
      %114 = vector.multi_reduction <add>, %113, %cst_49 [0] : vector<16x256xf32> to vector<256xf32>
      %115 = vector.shape_cast %114 : vector<256xf32> to vector<1x256xf32>
      scf.yield %112, %115 : vector<1x256xf32>, vector<1x256xf32>
    }
    %19 = vector.broadcast %1 : f32 to vector<1x256xf32>
    %20 = arith.mulf %18#0, %19 : vector<1x256xf32>
    %21 = vector.broadcast %1 : f32 to vector<1x256xf32>
    %22 = arith.mulf %18#1, %21 : vector<1x256xf32>
    %23 = arith.mulf %20, %20 : vector<1x256xf32>
    %24 = arith.subf %22, %23 : vector<1x256xf32>
    %cst_9 = arith.constant 0.000000e+00 : f32
    %25 = vector.broadcast %cst_9 : f32 to vector<1x256xf32>
    %26 = arith.maximumf %24, %25 : vector<1x256xf32>
    %c0_10 = arith.constant 0 : index
    %c0_11 = arith.constant 0 : index
    %27 = vector.load %arg4[%c0_10, %c0_11] : memref<1x256xf32, #tpu.memory_space<vmem>>, vector<1x256xf32>
    %cst_12 = arith.constant 9.99999974E-6 : f32
    %28 = vector.broadcast %cst_12 : f32 to vector<1x256xf32>
    %29 = arith.addf %26, %28 : vector<1x256xf32>
    %30 = math.rsqrt %29 : vector<1x256xf32>
    %31 = arith.mulf %27, %30 : vector<1x256xf32>
    %c0_13 = arith.constant 0 : index
    %c0_14 = arith.constant 0 : index
    %32 = vector.load %arg5[%c0_13, %c0_14] : memref<1x256xf32, #tpu.memory_space<vmem>>, vector<1x256xf32>
    %33 = arith.mulf %20, %31 : vector<1x256xf32>
    %34 = arith.subf %32, %33 : vector<1x256xf32>
    %35 = vector.broadcast %31 : vector<1x256xf32> to vector<16x256xf32>
    %36 = arith.mulf %15, %35 : vector<16x256xf32>
    %37 = vector.broadcast %34 : vector<1x256xf32> to vector<16x256xf32>
    %38 = arith.addf %36, %37 : vector<16x256xf32>
    %39 = arith.truncf %38 : vector<16x256xf32> to vector<16x256xbf16>
    %c0_15 = arith.constant 0 : index
    %c0_16 = arith.constant 0 : index
    %40 = vector.load %arg6[%c0_15, %c0_16] : memref<256x512xbf16, #tpu.memory_space<vmem>>, vector<256x512xbf16>
    %cst_17 = arith.constant dense<0.000000e+00> : vector<16x512xf32>
    %41 = tpu.matmul %39, %40, %cst_17 {dimension_numbers = #tpu.dot_dimension_numbers<[1], [0], [0], [1], [0, 0, 1, 1], [], []>} : vector<16x256xbf16>, vector<256x512xbf16>, vector<16x512xf32> -> vector<16x512xf32>
    %c0_18 = arith.constant 0 : index
    %c0_19 = arith.constant 0 : index
    %42 = vector.load %arg7[%c0_18, %c0_19] : memref<1x512xf32, #tpu.memory_space<vmem>>, vector<1x512xf32>
    %43 = vector.broadcast %42 : vector<1x512xf32> to vector<16x512xf32>
    %44 = arith.addf %41, %43 : vector<16x512xf32>
    %cst_20 = arith.constant 2.000000e-01 : f32
    %45 = vector.broadcast %cst_20 : f32 to vector<16x512xf32>
    %46 = arith.mulf %45, %44 : vector<16x512xf32>
    %47 = arith.maximumf %44, %46 : vector<16x512xf32>
    %48 = arith.extui %0 : i1 to i32
    %c0_i32_21 = arith.constant 0 : i32
    %49 = arith.cmpi ne, %48, %c0_i32_21 : i32
    %50:2 = scf.if %49 -> (vector<1x512xf32>, vector<1x512xf32>) {
      %111 = vector.broadcast %6 : vector<16x1xf32> to vector<16x512xf32>
      %112 = arith.mulf %47, %111 : vector<16x512xf32>
      %cst_48 = arith.constant dense<0.000000e+00> : vector<512xf32>
      %113 = vector.multi_reduction <add>, %112, %cst_48 [0] : vector<16x512xf32> to vector<512xf32>
      %114 = vector.shape_cast %113 : vector<512xf32> to vector<1x512xf32>
      %115 = arith.mulf %112, %47 : vector<16x512xf32>
      %cst_49 = arith.constant dense<0.000000e+00> : vector<512xf32>
      %116 = vector.multi_reduction <add>, %115, %cst_49 [0] : vector<16x512xf32> to vector<512xf32>
      %117 = vector.shape_cast %116 : vector<512xf32> to vector<1x512xf32>
      scf.yield %114, %117 : vector<1x512xf32>, vector<1x512xf32>
    } else {
      %cst_48 = arith.constant dense<0.000000e+00> : vector<512xf32>
      %111 = vector.multi_reduction <add>, %47, %cst_48 [0] : vector<16x512xf32> to vector<512xf32>
      %112 = vector.shape_cast %111 : vector<512xf32> to vector<1x512xf32>
      %113 = arith.mulf %47, %47 : vector<16x512xf32>
      %cst_49 = arith.constant dense<0.000000e+00> : vector<512xf32>
      %114 = vector.multi_reduction <add>, %113, %cst_49 [0] : vector<16x512xf32> to vector<512xf32>
      %115 = vector.shape_cast %114 : vector<512xf32> to vector<1x512xf32>
      scf.yield %112, %115 : vector<1x512xf32>, vector<1x512xf32>
    }
    %51 = vector.broadcast %1 : f32 to vector<1x512xf32>
    %52 = arith.mulf %50#0, %51 : vector<1x512xf32>
    %53 = vector.broadcast %1 : f32 to vector<1x512xf32>
    %54 = arith.mulf %50#1, %53 : vector<1x512xf32>
    %55 = arith.mulf %52, %52 : vector<1x512xf32>
    %56 = arith.subf %54, %55 : vector<1x512xf32>
    %cst_22 = arith.constant 0.000000e+00 : f32
    %57 = vector.broadcast %cst_22 : f32 to vector<1x512xf32>
    %58 = arith.maximumf %56, %57 : vector<1x512xf32>
    %c0_23 = arith.constant 0 : index
    %c0_24 = arith.constant 0 : index
    %59 = vector.load %arg8[%c0_23, %c0_24] : memref<1x512xf32, #tpu.memory_space<vmem>>, vector<1x512xf32>
    %cst_25 = arith.constant 9.99999974E-6 : f32
    %60 = vector.broadcast %cst_25 : f32 to vector<1x512xf32>
    %61 = arith.addf %58, %60 : vector<1x512xf32>
    %62 = math.rsqrt %61 : vector<1x512xf32>
    %63 = arith.mulf %59, %62 : vector<1x512xf32>
    %c0_26 = arith.constant 0 : index
    %c0_27 = arith.constant 0 : index
    %64 = vector.load %arg9[%c0_26, %c0_27] : memref<1x512xf32, #tpu.memory_space<vmem>>, vector<1x512xf32>
    %65 = arith.mulf %52, %63 : vector<1x512xf32>
    %66 = arith.subf %64, %65 : vector<1x512xf32>
    %67 = vector.broadcast %63 : vector<1x512xf32> to vector<16x512xf32>
    %68 = arith.mulf %47, %67 : vector<16x512xf32>
    %69 = vector.broadcast %66 : vector<1x512xf32> to vector<16x512xf32>
    %70 = arith.addf %68, %69 : vector<16x512xf32>
    %71 = arith.truncf %70 : vector<16x512xf32> to vector<16x512xbf16>
    %c0_28 = arith.constant 0 : index
    %c0_29 = arith.constant 0 : index
    %72 = vector.load %arg10[%c0_28, %c0_29] : memref<512x1024xbf16, #tpu.memory_space<vmem>>, vector<512x1024xbf16>
    %cst_30 = arith.constant dense<0.000000e+00> : vector<16x1024xf32>
    %73 = tpu.matmul %71, %72, %cst_30 {dimension_numbers = #tpu.dot_dimension_numbers<[1], [0], [0], [1], [0, 0, 1, 1], [], []>} : vector<16x512xbf16>, vector<512x1024xbf16>, vector<16x1024xf32> -> vector<16x1024xf32>
    %c0_31 = arith.constant 0 : index
    %c0_32 = arith.constant 0 : index
    %74 = vector.load %arg11[%c0_31, %c0_32] : memref<1x1024xf32, #tpu.memory_space<vmem>>, vector<1x1024xf32>
    %75 = vector.broadcast %74 : vector<1x1024xf32> to vector<16x1024xf32>
    %76 = arith.addf %73, %75 : vector<16x1024xf32>
    %cst_33 = arith.constant 2.000000e-01 : f32
    %77 = vector.broadcast %cst_33 : f32 to vector<16x1024xf32>
    %78 = arith.mulf %77, %76 : vector<16x1024xf32>
    %79 = arith.maximumf %76, %78 : vector<16x1024xf32>
    %80 = arith.extui %0 : i1 to i32
    %c0_i32_34 = arith.constant 0 : i32
    %81 = arith.cmpi ne, %80, %c0_i32_34 : i32
    %82:2 = scf.if %81 -> (vector<1x1024xf32>, vector<1x1024xf32>) {
      %111 = vector.broadcast %6 : vector<16x1xf32> to vector<16x1024xf32>
      %112 = arith.mulf %79, %111 : vector<16x1024xf32>
      %cst_48 = arith.constant dense<0.000000e+00> : vector<1024xf32>
      %113 = vector.multi_reduction <add>, %112, %cst_48 [0] : vector<16x1024xf32> to vector<1024xf32>
      %114 = vector.shape_cast %113 : vector<1024xf32> to vector<1x1024xf32>
      %115 = arith.mulf %112, %79 : vector<16x1024xf32>
      %cst_49 = arith.constant dense<0.000000e+00> : vector<1024xf32>
      %116 = vector.multi_reduction <add>, %115, %cst_49 [0] : vector<16x1024xf32> to vector<1024xf32>
      %117 = vector.shape_cast %116 : vector<1024xf32> to vector<1x1024xf32>
      scf.yield %114, %117 : vector<1x1024xf32>, vector<1x1024xf32>
    } else {
      %cst_48 = arith.constant dense<0.000000e+00> : vector<1024xf32>
      %111 = vector.multi_reduction <add>, %79, %cst_48 [0] : vector<16x1024xf32> to vector<1024xf32>
      %112 = vector.shape_cast %111 : vector<1024xf32> to vector<1x1024xf32>
      %113 = arith.mulf %79, %79 : vector<16x1024xf32>
      %cst_49 = arith.constant dense<0.000000e+00> : vector<1024xf32>
      %114 = vector.multi_reduction <add>, %113, %cst_49 [0] : vector<16x1024xf32> to vector<1024xf32>
      %115 = vector.shape_cast %114 : vector<1024xf32> to vector<1x1024xf32>
      scf.yield %112, %115 : vector<1x1024xf32>, vector<1x1024xf32>
    }
    %83 = vector.broadcast %1 : f32 to vector<1x1024xf32>
    %84 = arith.mulf %82#0, %83 : vector<1x1024xf32>
    %85 = vector.broadcast %1 : f32 to vector<1x1024xf32>
    %86 = arith.mulf %82#1, %85 : vector<1x1024xf32>
    %87 = arith.mulf %84, %84 : vector<1x1024xf32>
    %88 = arith.subf %86, %87 : vector<1x1024xf32>
    %cst_35 = arith.constant 0.000000e+00 : f32
    %89 = vector.broadcast %cst_35 : f32 to vector<1x1024xf32>
    %90 = arith.maximumf %88, %89 : vector<1x1024xf32>
    %c0_36 = arith.constant 0 : index
    %c0_37 = arith.constant 0 : index
    %91 = vector.load %arg12[%c0_36, %c0_37] : memref<1x1024xf32, #tpu.memory_space<vmem>>, vector<1x1024xf32>
    %cst_38 = arith.constant 9.99999974E-6 : f32
    %92 = vector.broadcast %cst_38 : f32 to vector<1x1024xf32>
    %93 = arith.addf %90, %92 : vector<1x1024xf32>
    %94 = math.rsqrt %93 : vector<1x1024xf32>
    %95 = arith.mulf %91, %94 : vector<1x1024xf32>
    %c0_39 = arith.constant 0 : index
    %c0_40 = arith.constant 0 : index
    %96 = vector.load %arg13[%c0_39, %c0_40] : memref<1x1024xf32, #tpu.memory_space<vmem>>, vector<1x1024xf32>
    %97 = arith.mulf %84, %95 : vector<1x1024xf32>
    %98 = arith.subf %96, %97 : vector<1x1024xf32>
    %99 = vector.broadcast %95 : vector<1x1024xf32> to vector<16x1024xf32>
    %100 = arith.mulf %79, %99 : vector<16x1024xf32>
    %101 = vector.broadcast %98 : vector<1x1024xf32> to vector<16x1024xf32>
    %102 = arith.addf %100, %101 : vector<16x1024xf32>
    %103 = arith.truncf %102 : vector<16x1024xf32> to vector<16x1024xbf16>
    %c0_41 = arith.constant 0 : index
    %c0_42 = arith.constant 0 : index
    %104 = vector.load %arg14[%c0_41, %c0_42] : memref<1024x784xbf16, #tpu.memory_space<vmem>>, vector<1024x784xbf16>
    %cst_43 = arith.constant dense<0.000000e+00> : vector<16x784xf32>
    %105 = tpu.matmul %103, %104, %cst_43 {dimension_numbers = #tpu.dot_dimension_numbers<[1], [0], [0], [1], [0, 0, 1, 1], [], []>} : vector<16x1024xbf16>, vector<1024x784xbf16>, vector<16x784xf32> -> vector<16x784xf32>
    %c0_44 = arith.constant 0 : index
    %c0_45 = arith.constant 0 : index
    %106 = vector.load %arg15[%c0_44, %c0_45] : memref<1x784xf32, #tpu.memory_space<vmem>>, vector<1x784xf32>
    %107 = vector.broadcast %106 : vector<1x784xf32> to vector<16x784xf32>
    %108 = arith.addf %105, %107 : vector<16x784xf32>
    %109 = math.tanh %108 : vector<16x784xf32>
    %c0_46 = arith.constant 0 : index
    %c0_47 = arith.constant 0 : index
    %110 = vector.load %arg16[%c0_46, %c0_47] : memref<16x784xf32, #tpu.memory_space<vmem>>, vector<16x784xf32>
    tpu.vector_store %arg16[%c0_46, %c0_47], %109 {strides = array<i32>} : memref<16x784xf32, #tpu.memory_space<vmem>>, vector<16x784xf32>,
    return
  }
  func.func @transform_0(%arg0: i32) -> (i32, i32) {
    %c0_i32 = arith.constant 0 : i32
    %c0_i32_0 = arith.constant 0 : i32
    return %arg0, %c0_i32 : i32, i32
  }
  func.func @transform_1(%arg0: i32) -> (i32, i32) {
    %c0_i32 = arith.constant 0 : i32
    %c0_i32_0 = arith.constant 0 : i32
    %c0_i32_1 = arith.constant 0 : i32
    return %c0_i32, %c0_i32_0 : i32, i32
  }
  func.func @transform_2(%arg0: i32) -> (i32, i32) {
    %c0_i32 = arith.constant 0 : i32
    %c0_i32_0 = arith.constant 0 : i32
    %c0_i32_1 = arith.constant 0 : i32
    return %c0_i32, %c0_i32_0 : i32, i32
  }
  func.func @transform_3(%arg0: i32) -> (i32, i32) {
    %c0_i32 = arith.constant 0 : i32
    %c0_i32_0 = arith.constant 0 : i32
    %c0_i32_1 = arith.constant 0 : i32
    return %c0_i32, %c0_i32_0 : i32, i32
  }
  func.func @transform_4(%arg0: i32) -> (i32, i32) {
    %c0_i32 = arith.constant 0 : i32
    %c0_i32_0 = arith.constant 0 : i32
    %c0_i32_1 = arith.constant 0 : i32
    return %c0_i32, %c0_i32_0 : i32, i32
  }
  func.func @transform_5(%arg0: i32) -> (i32, i32) {
    %c0_i32 = arith.constant 0 : i32
    %c0_i32_0 = arith.constant 0 : i32
    %c0_i32_1 = arith.constant 0 : i32
    return %c0_i32, %c0_i32_0 : i32, i32
  }
  func.func @transform_6(%arg0: i32) -> (i32, i32) {
    %c0_i32 = arith.constant 0 : i32
    %c0_i32_0 = arith.constant 0 : i32
    %c0_i32_1 = arith.constant 0 : i32
    return %c0_i32, %c0_i32_0 : i32, i32
  }
  func.func @transform_7(%arg0: i32) -> (i32, i32) {
    %c0_i32 = arith.constant 0 : i32
    %c0_i32_0 = arith.constant 0 : i32
    %c0_i32_1 = arith.constant 0 : i32
    return %c0_i32, %c0_i32_0 : i32, i32
  }
  func.func @transform_8(%arg0: i32) -> (i32, i32) {
    %c0_i32 = arith.constant 0 : i32
    %c0_i32_0 = arith.constant 0 : i32
    %c0_i32_1 = arith.constant 0 : i32
    return %c0_i32, %c0_i32_0 : i32, i32
  }
  func.func @transform_9(%arg0: i32) -> (i32, i32) {
    %c0_i32 = arith.constant 0 : i32
    %c0_i32_0 = arith.constant 0 : i32
    %c0_i32_1 = arith.constant 0 : i32
    return %c0_i32, %c0_i32_0 : i32, i32
  }
  func.func @transform_10(%arg0: i32) -> (i32, i32) {
    %c0_i32 = arith.constant 0 : i32
    %c0_i32_0 = arith.constant 0 : i32
    %c0_i32_1 = arith.constant 0 : i32
    return %c0_i32, %c0_i32_0 : i32, i32
  }
  func.func @transform_11(%arg0: i32) -> (i32, i32) {
    %c0_i32 = arith.constant 0 : i32
    %c0_i32_0 = arith.constant 0 : i32
    %c0_i32_1 = arith.constant 0 : i32
    return %c0_i32, %c0_i32_0 : i32, i32
  }
  func.func @transform_12(%arg0: i32) -> (i32, i32) {
    %c0_i32 = arith.constant 0 : i32
    %c0_i32_0 = arith.constant 0 : i32
    %c0_i32_1 = arith.constant 0 : i32
    return %c0_i32, %c0_i32_0 : i32, i32
  }
  func.func @transform_13(%arg0: i32) -> (i32, i32) {
    %c0_i32 = arith.constant 0 : i32
    %c0_i32_0 = arith.constant 0 : i32
    %c0_i32_1 = arith.constant 0 : i32
    return %c0_i32, %c0_i32_0 : i32, i32
  }
  func.func @transform_14(%arg0: i32) -> (i32, i32) {
    %c0_i32 = arith.constant 0 : i32
    %c0_i32_0 = arith.constant 0 : i32
    %c0_i32_1 = arith.constant 0 : i32
    return %c0_i32, %c0_i32_0 : i32, i32
  }
  func.func @transform_15(%arg0: i32) -> (i32, i32) {
    %c0_i32 = arith.constant 0 : i32
    %c0_i32_0 = arith.constant 0 : i32
    return %arg0, %c0_i32 : i32, i32
  }
}

module attributes {stable_mosaic.version = 11 : i64} {
  func.func @kernel(%arg0: i32, %arg1: memref<16x128xbf16, #tpu.memory_space<vmem>>, %arg2: memref<128x256xbf16, #tpu.memory_space<vmem>>, %arg3: memref<1x256xf32, #tpu.memory_space<vmem>>, %arg4: memref<1x256xf32, #tpu.memory_space<vmem>>, %arg5: memref<1x256xf32, #tpu.memory_space<vmem>>, %arg6: memref<256x512xbf16, #tpu.memory_space<vmem>>, %arg7: memref<1x512xf32, #tpu.memory_space<vmem>>, %arg8: memref<1x512xf32, #tpu.memory_space<vmem>>, %arg9: memref<1x512xf32, #tpu.memory_space<vmem>>, %arg10: memref<512x1024xbf16, #tpu.memory_space<vmem>>, %arg11: memref<1x1024xf32, #tpu.memory_space<vmem>>, %arg12: memref<1x1024xf32, #tpu.memory_space<vmem>>, %arg13: memref<1x1024xf32, #tpu.memory_space<vmem>>, %arg14: memref<1024x784xbf16, #tpu.memory_space<vmem>>, %arg15: memref<1x784xf32, #tpu.memory_space<vmem>>, %arg16: memref<16x784xf32, #tpu.memory_space<vmem>>) attributes {dimension_semantics = [#tpu.dimension_semantics<parallel>], iteration_bounds = array<i64: 1>, scalar_prefetch = 0 : i64, scratch_operands = 0 : i64, tpu.core_type = #tpu.core_type<tc>, window_params = [{transform_indices = @transform_0, window_bounds = array<i64: 16, 128>}, {pipeline_mode = #tpu.pipeline_mode<synchronous>, transform_indices = @transform_1, window_bounds = array<i64: 128, 256>}, {pipeline_mode = #tpu.pipeline_mode<synchronous>, transform_indices = @transform_2, window_bounds = array<i64: 1, 256>}, {pipeline_mode = #tpu.pipeline_mode<synchronous>, transform_indices = @transform_3, window_bounds = array<i64: 1, 256>}, {pipeline_mode = #tpu.pipeline_mode<synchronous>, transform_indices = @transform_4, window_bounds = array<i64: 1, 256>}, {pipeline_mode = #tpu.pipeline_mode<synchronous>, transform_indices = @transform_5, window_bounds = array<i64: 256, 512>}, {pipeline_mode = #tpu.pipeline_mode<synchronous>, transform_indices = @transform_6, window_bounds = array<i64: 1, 512>}, {pipeline_mode = #tpu.pipeline_mode<synchronous>, transform_indices = @transform_7, window_bounds = array<i64: 1, 512>}, {pipeline_mode = #tpu.pipeline_mode<synchronous>, transform_indices = @transform_8, window_bounds = array<i64: 1, 512>}, {pipeline_mode = #tpu.pipeline_mode<synchronous>, transform_indices = @transform_9, window_bounds = array<i64: 512, 1024>}, {pipeline_mode = #tpu.pipeline_mode<synchronous>, transform_indices = @transform_10, window_bounds = array<i64: 1, 1024>}, {pipeline_mode = #tpu.pipeline_mode<synchronous>, transform_indices = @transform_11, window_bounds = array<i64: 1, 1024>}, {pipeline_mode = #tpu.pipeline_mode<synchronous>, transform_indices = @transform_12, window_bounds = array<i64: 1, 1024>}, {pipeline_mode = #tpu.pipeline_mode<synchronous>, transform_indices = @transform_13, window_bounds = array<i64: 1024, 784>}, {pipeline_mode = #tpu.pipeline_mode<synchronous>, transform_indices = @transform_14, window_bounds = array<i64: 1, 784>}, {transform_indices = @transform_15, window_bounds = array<i64: 16, 784>}]} {
    %c0_i32 = arith.constant 0 : i32
    %0 = arith.cmpi eq, %arg0, %c0_i32 : i32
    %cst = arith.constant 1.250000e-01 : f32
    %cst_0 = arith.constant 6.250000e-02 : f32
    %1 = arith.select %0, %cst, %cst_0 : f32
    %2 = tpu.iota {dimensions = array<i32: 0>} : vector<16x1xi32>
    %c8_i32 = arith.constant 8 : i32
    %3 = vector.broadcast %c8_i32 : i32 to vector<16x1xi32>
    %4 = arith.cmpi slt, %2, %3 : vector<16x1xi32>
    %5 = arith.extui %4 : vector<16x1xi1> to vector<16x1xi32>
    %6 = arith.sitofp %5 : vector<16x1xi32> to vector<16x1xf32>
    %c0 = arith.constant 0 : index
    %c0_1 = arith.constant 0 : index
    %7 = vector.load %arg1[%c0, %c0_1] : memref<16x128xbf16, #tpu.memory_space<vmem>>, vector<16x128xbf16>
    %c0_2 = arith.constant 0 : index
    %c0_3 = arith.constant 0 : index
    %8 = vector.load %arg2[%c0_2, %c0_3] : memref<128x256xbf16, #tpu.memory_space<vmem>>, vector<128x256xbf16>
    %cst_4 = arith.constant dense<0.000000e+00> : vector<16x256xf32>
    %9 = tpu.matmul %7, %8, %cst_4 {dimension_numbers = #tpu.dot_dimension_numbers<[1], [0], [0], [1], [0, 0, 1, 1], [], []>} : vector<16x128xbf16>, vector<128x256xbf16>, vector<16x256xf32> -> vector<16x256xf32>
    %c0_5 = arith.constant 0 : index
    %c0_6 = arith.constant 0 : index
    %10 = vector.load %arg3[%c0_5, %c0_6] : memref<1x256xf32, #tpu.memory_space<vmem>>, vector<1x256xf32>
    %11 = vector.broadcast %10 : vector<1x256xf32> to vector<16x256xf32>
    %12 = arith.addf %9, %11 : vector<16x256xf32>
    %cst_7 = arith.constant 2.000000e-01 : f32
    %13 = vector.broadcast %cst_7 : f32 to vector<16x256xf32>
    %14 = arith.mulf %13, %12 : vector<16x256xf32>
    %15 = arith.maximumf %12, %14 : vector<16x256xf32>
    %16 = arith.extui %0 : i1 to i32
    %c0_i32_8 = arith.constant 0 : i32
    %17 = arith.cmpi ne, %16, %c0_i32_8 : i32
    %18:2 = scf.if %17 -> (vector<1x256xf32>, vector<1x256xf32>) {
      %111 = vector.broadcast %6 : vector<16x1xf32> to vector<16x256xf32>
      %112 = arith.mulf %15, %111 : vector<16x256xf32>
      %cst_48 = arith.constant dense<0.000000e+00> : vector<256xf32>
      %113 = vector.multi_reduction <add>, %112, %cst_48 [0] : vector<16x256xf32> to vector<256xf32>
      %114 = vector.shape_cast %113 : vector<256xf32> to vector<1x256xf32>
      %115 = arith.mulf %112, %15 : vector<16x256xf32>
      %cst_49 = arith.constant dense<0.000000e+00> : vector<256xf32>
      %116 = vector.multi_reduction <add>, %115, %cst_49 [0] : vector<16x256xf32> to vector<256xf32>
      %117 = vector.shape_cast %116 : vector<256xf32> to vector<1x256xf32>
      scf.yield %114, %117 : vector<1x256xf32>, vector<1x256xf32>
    } else {
      %cst_48 = arith.constant dense<0.000000e+00> : vector<256xf32>
      %111 = vector.multi_reduction <add>, %15, %cst_48 [0] : vector<16x256xf32> to vector<256xf32>
      %112 = vector.shape_cast %111 : vector<256xf32> to vector<1x256xf32>
      %113 = arith.mulf %15, %15 : vector<16x256xf32>
      %cst_49 = arith.constant dense<0.000000e+00> : vector<256xf32>
      %114 = vector.multi_reduction <add>, %113, %cst_49 [0] : vector<16x256xf32> to vector<256xf32>
      %115 = vector.shape_cast %114 : vector<256xf32> to vector<1x256xf32>
      scf.yield %112, %115 : vector<1x256xf32>, vector<1x256xf32>
    }
    %19 = vector.broadcast %1 : f32 to vector<1x256xf32>
    %20 = arith.mulf %18#0, %19 : vector<1x256xf32>
    %21 = vector.broadcast %1 : f32 to vector<1x256xf32>
    %22 = arith.mulf %18#1, %21 : vector<1x256xf32>
    %23 = arith.mulf %20, %20 : vector<1x256xf32>
    %24 = arith.subf %22, %23 : vector<1x256xf32>
    %cst_9 = arith.constant 0.000000e+00 : f32
    %25 = vector.broadcast %cst_9 : f32 to vector<1x256xf32>
    %26 = arith.maximumf %24, %25 : vector<1x256xf32>
    %c0_10 = arith.constant 0 : index
    %c0_11 = arith.constant 0 : index
    %27 = vector.load %arg4[%c0_10, %c0_11] : memref<1x256xf32, #tpu.memory_space<vmem>>, vector<1x256xf32>
    %cst_12 = arith.constant 9.99999974E-6 : f32
    %28 = vector.broadcast %cst_12 : f32 to vector<1x256xf32>
    %29 = arith.addf %26, %28 : vector<1x256xf32>
    %30 = math.rsqrt %29 : vector<1x256xf32>
    %31 = arith.mulf %27, %30 : vector<1x256xf32>
    %c0_13 = arith.constant 0 : index
    %c0_14 = arith.constant 0 : index
    %32 = vector.load %arg5[%c0_13, %c0_14] : memref<1x256xf32, #tpu.memory_space<vmem>>, vector<1x256xf32>
    %33 = arith.mulf %20, %31 : vector<1x256xf32>
    %34 = arith.subf %32, %33 : vector<1x256xf32>
    %35 = vector.broadcast %31 : vector<1x256xf32> to vector<16x256xf32>
    %36 = arith.mulf %15, %35 : vector<16x256xf32>
    %37 = vector.broadcast %34 : vector<1x256xf32> to vector<16x256xf32>
    %38 = arith.addf %36, %37 : vector<16x256xf32>
    %39 = arith.truncf %38 : vector<16x256xf32> to vector<16x256xbf16>
    %c0_15 = arith.constant 0 : index
    %c0_16 = arith.constant 0 : index
    %40 = vector.load %arg6[%c0_15, %c0_16] : memref<256x512xbf16, #tpu.memory_space<vmem>>, vector<256x512xbf16>
    %cst_17 = arith.constant dense<0.000000e+00> : vector<16x512xf32>
    %41 = tpu.matmul %39, %40, %cst_17 {dimension_numbers = #tpu.dot_dimension_numbers<[1], [0], [0], [1], [0, 0, 1, 1], [], []>} : vector<16x256xbf16>, vector<256x512xbf16>, vector<16x512xf32> -> vector<16x512xf32>
    %c0_18 = arith.constant 0 : index
    %c0_19 = arith.constant 0 : index
    %42 = vector.load %arg7[%c0_18, %c0_19] : memref<1x512xf32, #tpu.memory_space<vmem>>, vector<1x512xf32>
    %43 = vector.broadcast %42 : vector<1x512xf32> to vector<16x512xf32>
    %44 = arith.addf %41, %43 : vector<16x512xf32>
    %cst_20 = arith.constant 2.000000e-01 : f32
    %45 = vector.broadcast %cst_20 : f32 to vector<16x512xf32>
    %46 = arith.mulf %45, %44 : vector<16x512xf32>
    %47 = arith.maximumf %44, %46 : vector<16x512xf32>
    %48 = arith.extui %0 : i1 to i32
    %c0_i32_21 = arith.constant 0 : i32
    %49 = arith.cmpi ne, %48, %c0_i32_21 : i32
    %50:2 = scf.if %49 -> (vector<1x512xf32>, vector<1x512xf32>) {
      %111 = vector.broadcast %6 : vector<16x1xf32> to vector<16x512xf32>
      %112 = arith.mulf %47, %111 : vector<16x512xf32>
      %cst_48 = arith.constant dense<0.000000e+00> : vector<512xf32>
      %113 = vector.multi_reduction <add>, %112, %cst_48 [0] : vector<16x512xf32> to vector<512xf32>
      %114 = vector.shape_cast %113 : vector<512xf32> to vector<1x512xf32>
      %115 = arith.mulf %112, %47 : vector<16x512xf32>
      %cst_49 = arith.constant dense<0.000000e+00> : vector<512xf32>
      %116 = vector.multi_reduction <add>, %115, %cst_49 [0] : vector<16x512xf32> to vector<512xf32>
      %117 = vector.shape_cast %116 : vector<512xf32> to vector<1x512xf32>
      scf.yield %114, %117 : vector<1x512xf32>, vector<1x512xf32>
    } else {
      %cst_48 = arith.constant dense<0.000000e+00> : vector<512xf32>
      %111 = vector.multi_reduction <add>, %47, %cst_48 [0] : vector<16x512xf32> to vector<512xf32>
      %112 = vector.shape_cast %111 : vector<512xf32> to vector<1x512xf32>
      %113 = arith.mulf %47, %47 : vector<16x512xf32>
      %cst_49 = arith.constant dense<0.000000e+00> : vector<512xf32>
      %114 = vector.multi_reduction <add>, %113, %cst_49 [0] : vector<16x512xf32> to vector<512xf32>
      %115 = vector.shape_cast %114 : vector<512xf32> to vector<1x512xf32>
      scf.yield %112, %115 : vector<1x512xf32>, vector<1x512xf32>
    }
    %51 = vector.broadcast %1 : f32 to vector<1x512xf32>
    %52 = arith.mulf %50#0, %51 : vector<1x512xf32>
    %53 = vector.broadcast %1 : f32 to vector<1x512xf32>
    %54 = arith.mulf %50#1, %53 : vector<1x512xf32>
    %55 = arith.mulf %52, %52 : vector<1x512xf32>
    %56 = arith.subf %54, %55 : vector<1x512xf32>
    %cst_22 = arith.constant 0.000000e+00 : f32
    %57 = vector.broadcast %cst_22 : f32 to vector<1x512xf32>
    %58 = arith.maximumf %56, %57 : vector<1x512xf32>
    %c0_23 = arith.constant 0 : index
    %c0_24 = arith.constant 0 : index
    %59 = vector.load %arg8[%c0_23, %c0_24] : memref<1x512xf32, #tpu.memory_space<vmem>>, vector<1x512xf32>
    %cst_25 = arith.constant 9.99999974E-6 : f32
    %60 = vector.broadcast %cst_25 : f32 to vector<1x512xf32>
    %61 = arith.addf %58, %60 : vector<1x512xf32>
    %62 = math.rsqrt %61 : vector<1x512xf32>
    %63 = arith.mulf %59, %62 : vector<1x512xf32>
    %c0_26 = arith.constant 0 : index
    %c0_27 = arith.constant 0 : index
    %64 = vector.load %arg9[%c0_26, %c0_27] : memref<1x512xf32, #tpu.memory_space<vmem>>, vector<1x512xf32>
    %65 = arith.mulf %52, %63 : vector<1x512xf32>
    %66 = arith.subf %64, %65 : vector<1x512xf32>
    %67 = vector.broadcast %63 : vector<1x512xf32> to vector<16x512xf32>
    %68 = arith.mulf %47, %67 : vector<16x512xf32>
    %69 = vector.broadcast %66 : vector<1x512xf32> to vector<16x512xf32>
    %70 = arith.addf %68, %69 : vector<16x512xf32>
    %71 = arith.truncf %70 : vector<16x512xf32> to vector<16x512xbf16>
    %c0_28 = arith.constant 0 : index
    %c0_29 = arith.constant 0 : index
    %72 = vector.load %arg10[%c0_28, %c0_29] : memref<512x1024xbf16, #tpu.memory_space<vmem>>, vector<512x1024xbf16>
    %cst_30 = arith.constant dense<0.000000e+00> : vector<16x1024xf32>
    %73 = tpu.matmul %71, %72, %cst_30 {dimension_numbers = #tpu.dot_dimension_numbers<[1], [0], [0], [1], [0, 0, 1, 1], [], []>} : vector<16x512xbf16>, vector<512x1024xbf16>, vector<16x1024xf32> -> vector<16x1024xf32>
    %c0_31 = arith.constant 0 : index
    %c0_32 = arith.constant 0 : index
    %74 = vector.load %arg11[%c0_31, %c0_32] : memref<1x1024xf32, #tpu.memory_space<vmem>>, vector<1x1024xf32>
    %75 = vector.broadcast %74 : vector<1x1024xf32> to vector<16x1024xf32>
    %76 = arith.addf %73, %75 : vector<16x1024xf32>
    %cst_33 = arith.constant 2.000000e-01 : f32
    %77 = vector.broadcast %cst_33 : f32 to vector<16x1024xf32>
    %78 = arith.mulf %77, %76 : vector<16x1024xf32>
    %79 = arith.maximumf %76, %78 : vector<16x1024xf32>
    %80 = arith.extui %0 : i1 to i32
    %c0_i32_34 = arith.constant 0 : i32
    %81 = arith.cmpi ne, %80, %c0_i32_34 : i32
    %82:2 = scf.if %81 -> (vector<1x1024xf32>, vector<1x1024xf32>) {
      %111 = vector.broadcast %6 : vector<16x1xf32> to vector<16x1024xf32>
      %112 = arith.mulf %79, %111 : vector<16x1024xf32>
      %cst_48 = arith.constant dense<0.000000e+00> : vector<1024xf32>
      %113 = vector.multi_reduction <add>, %112, %cst_48 [0] : vector<16x1024xf32> to vector<1024xf32>
      %114 = vector.shape_cast %113 : vector<1024xf32> to vector<1x1024xf32>
      %115 = arith.mulf %112, %79 : vector<16x1024xf32>
      %cst_49 = arith.constant dense<0.000000e+00> : vector<1024xf32>
      %116 = vector.multi_reduction <add>, %115, %cst_49 [0] : vector<16x1024xf32> to vector<1024xf32>
      %117 = vector.shape_cast %116 : vector<1024xf32> to vector<1x1024xf32>
      scf.yield %114, %117 : vector<1x1024xf32>, vector<1x1024xf32>
    } else {
      %cst_48 = arith.constant dense<0.000000e+00> : vector<1024xf32>
      %111 = vector.multi_reduction <add>, %79, %cst_48 [0] : vector<16x1024xf32> to vector<1024xf32>
      %112 = vector.shape_cast %111 : vector<1024xf32> to vector<1x1024xf32>
      %113 = arith.mulf %79, %79 : vector<16x1024xf32>
      %cst_49 = arith.constant dense<0.000000e+00> : vector<1024xf32>
      %114 = vector.multi_reduction <add>, %113, %cst_49 [0] : vector<16x1024xf32> to vector<1024xf32>
      %115 = vector.shape_cast %114 : vector<1024xf32> to vector<1x1024xf32>
      scf.yield %112, %115 : vector<1x1024xf32>, vector<1x1024xf32>
    }
    %83 = vector.broadcast %1 : f32 to vector<1x1024xf32>
    %84 = arith.mulf %82#0, %83 : vector<1x1024xf32>
    %85 = vector.broadcast %1 : f32 to vector<1x1024xf32>
    %86 = arith.mulf %82#1, %85 : vector<1x1024xf32>
    %87 = arith.mulf %84, %84 : vector<1x1024xf32>
    %88 = arith.subf %86, %87 : vector<1x1024xf32>
    %cst_35 = arith.constant 0.000000e+00 : f32
    %89 = vector.broadcast %cst_35 : f32 to vector<1x1024xf32>
    %90 = arith.maximumf %88, %89 : vector<1x1024xf32>
    %c0_36 = arith.constant 0 : index
    %c0_37 = arith.constant 0 : index
    %91 = vector.load %arg12[%c0_36, %c0_37] : memref<1x1024xf32, #tpu.memory_space<vmem>>, vector<1x1024xf32>
    %cst_38 = arith.constant 9.99999974E-6 : f32
    %92 = vector.broadcast %cst_38 : f32 to vector<1x1024xf32>
    %93 = arith.addf %90, %92 : vector<1x1024xf32>
    %94 = math.rsqrt %93 : vector<1x1024xf32>
    %95 = arith.mulf %91, %94 : vector<1x1024xf32>
    %c0_39 = arith.constant 0 : index
    %c0_40 = arith.constant 0 : index
    %96 = vector.load %arg13[%c0_39, %c0_40] : memref<1x1024xf32, #tpu.memory_space<vmem>>, vector<1x1024xf32>
    %97 = arith.mulf %84, %95 : vector<1x1024xf32>
    %98 = arith.subf %96, %97 : vector<1x1024xf32>
    %99 = vector.broadcast %95 : vector<1x1024xf32> to vector<16x1024xf32>
    %100 = arith.mulf %79, %99 : vector<16x1024xf32>
    %101 = vector.broadcast %98 : vector<1x1024xf32> to vector<16x1024xf32>
    %102 = arith.addf %100, %101 : vector<16x1024xf32>
    %103 = arith.truncf %102 : vector<16x1024xf32> to vector<16x1024xbf16>
    %c0_41 = arith.constant 0 : index
    %c0_42 = arith.constant 0 : index
    %104 = vector.load %arg14[%c0_41, %c0_42] : memref<1024x784xbf16, #tpu.memory_space<vmem>>, vector<1024x784xbf16>
    %cst_43 = arith.constant dense<0.000000e+00> : vector<16x784xf32>
    %105 = tpu.matmul %103, %104, %cst_43 {dimension_numbers = #tpu.dot_dimension_numbers<[1], [0], [0], [1], [0, 0, 1, 1], [], []>} : vector<16x1024xbf16>, vector<1024x784xbf16>, vector<16x784xf32> -> vector<16x784xf32>
    %c0_44 = arith.constant 0 : index
    %c0_45 = arith.constant 0 : index
    %106 = vector.load %arg15[%c0_44, %c0_45] : memref<1x784xf32, #tpu.memory_space<vmem>>, vector<1x784xf32>
    %107 = vector.broadcast %106 : vector<1x784xf32> to vector<16x784xf32>
    %108 = arith.addf %105, %107 : vector<16x784xf32>
    %109 = math.tanh %108 : vector<16x784xf32>
    %c0_46 = arith.constant 0 : index
    %c0_47 = arith.constant 0 : index
    %110 = vector.load %arg16[%c0_46, %c0_47] : memref<16x784xf32, #tpu.memory_space<vmem>>, vector<16x784xf32>
    tpu.vector_store %arg16[%c0_46, %c0_47], %109 {strides = array<i32>} : memref<16x784xf32, #tpu.memory_space<vmem>>, vector<16x784xf32>,
    return
  }
  func.func @transform_0(%arg0: i32) -> (i32, i32) {
    %c0_i32 = arith.constant 0 : i32
    %c0_i32_0 = arith.constant 0 : i32
    return %arg0, %c0_i32 : i32, i32
  }
  func.func @transform_1(%arg0: i32) -> (i32, i32) {
    %c0_i32 = arith.constant 0 : i32
    %c0_i32_0 = arith.constant 0 : i32
    %c0_i32_1 = arith.constant 0 : i32
    return %c0_i32, %c0_i32_0 : i32, i32
  }
  func.func @transform_2(%arg0: i32) -> (i32, i32) {
    %c0_i32 = arith.constant 0 : i32
    %c0_i32_0 = arith.constant 0 : i32
    %c0_i32_1 = arith.constant 0 : i32
    return %c0_i32, %c0_i32_0 : i32, i32
  }
  func.func @transform_3(%arg0: i32) -> (i32, i32) {
    %c0_i32 = arith.constant 0 : i32
    %c0_i32_0 = arith.constant 0 : i32
    %c0_i32_1 = arith.constant 0 : i32
    return %c0_i32, %c0_i32_0 : i32, i32
  }
  func.func @transform_4(%arg0: i32) -> (i32, i32) {
    %c0_i32 = arith.constant 0 : i32
    %c0_i32_0 = arith.constant 0 : i32
    %c0_i32_1 = arith.constant 0 : i32
    return %c0_i32, %c0_i32_0 : i32, i32
  }
  func.func @transform_5(%arg0: i32) -> (i32, i32) {
    %c0_i32 = arith.constant 0 : i32
    %c0_i32_0 = arith.constant 0 : i32
    %c0_i32_1 = arith.constant 0 : i32
    return %c0_i32, %c0_i32_0 : i32, i32
  }
  func.func @transform_6(%arg0: i32) -> (i32, i32) {
    %c0_i32 = arith.constant 0 : i32
    %c0_i32_0 = arith.constant 0 : i32
    %c0_i32_1 = arith.constant 0 : i32
    return %c0_i32, %c0_i32_0 : i32, i32
  }
  func.func @transform_7(%arg0: i32) -> (i32, i32) {
    %c0_i32 = arith.constant 0 : i32
    %c0_i32_0 = arith.constant 0 : i32
    %c0_i32_1 = arith.constant 0 : i32
    return %c0_i32, %c0_i32_0 : i32, i32
  }
  func.func @transform_8(%arg0: i32) -> (i32, i32) {
    %c0_i32 = arith.constant 0 : i32
    %c0_i32_0 = arith.constant 0 : i32
    %c0_i32_1 = arith.constant 0 : i32
    return %c0_i32, %c0_i32_0 : i32, i32
  }
  func.func @transform_9(%arg0: i32) -> (i32, i32) {
    %c0_i32 = arith.constant 0 : i32
    %c0_i32_0 = arith.constant 0 : i32
    %c0_i32_1 = arith.constant 0 : i32
    return %c0_i32, %c0_i32_0 : i32, i32
  }
  func.func @transform_10(%arg0: i32) -> (i32, i32) {
    %c0_i32 = arith.constant 0 : i32
    %c0_i32_0 = arith.constant 0 : i32
    %c0_i32_1 = arith.constant 0 : i32
    return %c0_i32, %c0_i32_0 : i32, i32
  }
  func.func @transform_11(%arg0: i32) -> (i32, i32) {
    %c0_i32 = arith.constant 0 : i32
    %c0_i32_0 = arith.constant 0 : i32
    %c0_i32_1 = arith.constant 0 : i32
    return %c0_i32, %c0_i32_0 : i32, i32
  }
  func.func @transform_12(%arg0: i32) -> (i32, i32) {
    %c0_i32 = arith.constant 0 : i32
    %c0_i32_0 = arith.constant 0 : i32
    %c0_i32_1 = arith.constant 0 : i32
    return %c0_i32, %c0_i32_0 : i32, i32
  }
  func.func @transform_13(%arg0: i32) -> (i32, i32) {
    %c0_i32 = arith.constant 0 : i32
    %c0_i32_0 = arith.constant 0 : i32
    %c0_i32_1 = arith.constant 0 : i32
    return %c0_i32, %c0_i32_0 : i32, i32
  }
  func.func @transform_14(%arg0: i32) -> (i32, i32) {
    %c0_i32 = arith.constant 0 : i32
    %c0_i32_0 = arith.constant 0 : i32
    %c0_i32_1 = arith.constant 0 : i32
    return %c0_i32, %c0_i32_0 : i32, i32
  }
  func.func @transform_15(%arg0: i32) -> (i32, i32) {
    %c0_i32 = arith.constant 0 : i32
    %c0_i32_0 = arith.constant 0 : i32
    return %arg0, %c0_i32 : i32, i32
  }
}

</mosaic_0001>

<bundles_post_ra>
// kernel: tpu_custom_call.1
= control target key start
LH: loop header
LB: loop body
LE: loop exit
PB: predicated region body
PF: predicated region fallthrough
CT: control target
= control target key end

     0   :  { %v9170_v2 = vmov 0   ;;  %s12105_s0 = inlined_call_operand.vmem [shape: bf16[16,128], index: 0, kind: input, shape index: {}]   ;;  %s12106_s1 = inlined_call_operand.vmem [shape: bf16[128,256], index: 1, kind: input, shape index: {}]   ;;  %s12107_s2 = inlined_call_operand.vmem [shape: f32[1,256], index: 2, kind: input, shape index: {}]   ;;  %s12108_s3 = inlined_call_operand.vmem [shape: f32[1,256], index: 3, kind: input, shape index: {}]   ;;  %s12109_s4 = inlined_call_operand.vmem [shape: f32[1,256], index: 4, kind: input, shape index: {}]   ;;  %s12110_s5 = inlined_call_operand.vmem [shape: bf16[256,512], index: 5, kind: input, shape index: {}]   ;;  %s12111_s6 = inlined_call_operand.vmem [shape: f32[1,512], index: 6, kind: input, shape index: {}]   ;;  %s12112_s7 = inlined_call_operand.vmem [shape: f32[1,512], index: 7, kind: input, shape index: {}]   ;;  %s12113_s8 = inlined_call_operand.vmem [shape: f32[1,512], index: 8, kind: input, shape index: {}]   ;;  %s12114_s9 = inlined_call_operand.vmem [shape: bf16[512,1024], index: 9, kind: input, shape index: {}]   ;;  %s12115_s10 = inlined_call_operand.vmem [shape: f32[1,1024], index: 10, kind: input, shape index: {}]   ;;  %s12116_s11 = inlined_call_operand.vmem [shape: f32[1,1024], index: 11, kind: input, shape index: {}]   ;;  %s12117_s12 = inlined_call_operand.vmem [shape: f32[1,1024], index: 12, kind: input, shape index: {}]   ;;  %s12118_s13 = inlined_call_operand.vmem [shape: bf16[1024,784], index: 13, kind: input, shape index: {}]   ;;  %s12119_s14 = inlined_call_operand.vmem [shape: f32[1,784], index: 14, kind: input, shape index: {}]   ;;  %s12120_s15 = inlined_call_operand.hbm [shape: f32[16,784], index: 15, kind: output, shape index: {}]  }
   0x1   :  { %v8329_v0 = vld [vmem:[%s12106_s1 + $0x4] ss:$8 sps:$4 sm:$0xff]   ;;  %v8331_v1 = vld [vmem:[%s12106_s1] ss:$8 sps:$4 sm:$0xff]   ;;  %211 = vmatprep.mubr.bf16.mxu0 %v9170_v2  ;;  %v8332_v3 = vld [vmem:[%s12106_s1 + $0x14] ss:$8 sps:$4 sm:$0xff]  }
   0x2   :  { %179 = vmatprep.subr.bf16.mxu0 %v8329_v0  ;;  %v8334_v4 = vld [vmem:[%s12106_s1 + $0x10] ss:$8 sps:$4 sm:$0xff]   ;;  %v8335_v5 = vld [vmem:[%s12106_s1 + $0x24] ss:$8 sps:$4 sm:$0xff]   ;;  %v8337_v6 = vld [vmem:[%s12106_s1 + $0x20] ss:$8 sps:$4 sm:$0xff]  }
   0x3   :  { %180 = vmatpush1.bf16.msra.mxu0 %v8331_v1  ;;  %v8338_v7 = vld [vmem:[%s12106_s1 + $0x34] ss:$8 sps:$4 sm:$0xff]   ;;  %v8340_v8 = vld [vmem:[%s12106_s1 + $0x30] ss:$8 sps:$4 sm:$0xff]   ;;  %v8341_v9 = vld [vmem:[%s12106_s1 + $0x44] ss:$8 sps:$4 sm:$0xff]  }
   0x4   :  { %181 = vmatprep.subr.bf16.mxu0 %v8332_v3  ;;  %v8343_v10 = vld [vmem:[%s12106_s1 + $0x40] ss:$8 sps:$4 sm:$0xff]   ;;  %v8344_v11 = vld [vmem:[%s12106_s1 + $0x54] ss:$8 sps:$4 sm:$0xff]   ;;  %v8346_v12 = vld [vmem:[%s12106_s1 + $0x50] ss:$8 sps:$4 sm:$0xff]  }
   0x5   :  { %v8347_v13 = vld [vmem:[%s12106_s1 + $0x64] ss:$8 sps:$4 sm:$0xff]   ;;  %v8349_v14 = vld [vmem:[%s12106_s1 + $0x60] ss:$8 sps:$4 sm:$0xff]   ;;  %v8350_v15 = vld [vmem:[%s12106_s1 + $0x74] ss:$8 sps:$4 sm:$0xff]  }
   0x6   :  { %v8352_v16 = vld [vmem:[%s12106_s1 + $0x70] ss:$8 sps:$4 sm:$0xff]   ;;  %v8353_v17 = vld [vmem:[%s12105_s0] sm:$0xff]   ;;  %v8404_v50 = vld [vmem:[%s12110_s5 + $0xc] ss:$16 sps:$4 sm:$0xff]  }
   0x7   :  { %182 = vmatpush1.bf16.msra.mxu0 %v8334_v4  ;;  %v8356_v18 = vld [vmem:[%s12110_s5 + $0x4] ss:$16 sps:$4 sm:$0xff]   ;;  %v8354_v19 = vld [vmem:[%s12110_s5] ss:$16 sps:$4 sm:$0xff]  }
   0x8   :  { %183 = vmatprep.subr.bf16.mxu0 %v8335_v5  ;;  %v8359_v20 = vld [vmem:[%s12110_s5 + $0x24] ss:$16 sps:$4 sm:$0xff]   ;;  %v8357_v21 = vld [vmem:[%s12110_s5 + $0x20] ss:$16 sps:$4 sm:$0xff]  }
   0x9   :  { %v8362_v22 = vld [vmem:[%s12110_s5 + $0x44] ss:$16 sps:$4 sm:$0xff]   ;;  %v8360_v23 = vld [vmem:[%s12110_s5 + $0x40] ss:$16 sps:$4 sm:$0xff]  }
   0xa   :  { %v8365_v24 = vld [vmem:[%s12110_s5 + $0x64] ss:$16 sps:$4 sm:$0xff]   ;;  %v8363_v25 = vld [vmem:[%s12110_s5 + $0x60] ss:$16 sps:$4 sm:$0xff]  }
   0xb   :  { %184 = vmatpush1.bf16.msra.mxu0 %v8337_v6  ;;  %v8368_v26 = vld [vmem:[%s12110_s5 + $0x84] ss:$16 sps:$4 sm:$0xff]   ;;  %v8366_v27 = vld [vmem:[%s12110_s5 + $0x80] ss:$16 sps:$4 sm:$0xff]  }
   0xc   :  { %185 = vmatprep.subr.bf16.mxu0 %v8338_v7  ;;  %v8371_v28 = vld [vmem:[%s12110_s5 + $0xa4] ss:$16 sps:$4 sm:$0xff]   ;;  %v8369_v29 = vld [vmem:[%s12110_s5 + $0xa0] ss:$16 sps:$4 sm:$0xff]  }
   0xd   :  { %v8374_v30 = vld [vmem:[%s12110_s5 + $0xc4] ss:$16 sps:$4 sm:$0xff]   ;;  %v8372_v31 = vld [vmem:[%s12110_s5 + $0xc0] ss:$16 sps:$4 sm:$0xff]  }
   0xe   :  { %v8377_v32 = vld [vmem:[%s12110_s5 + $0xe4] ss:$16 sps:$4 sm:$0xff]   ;;  %v8375_v33 = vld [vmem:[%s12110_s5 + $0xe0] ss:$16 sps:$4 sm:$0xff]  }
   0xf   :  { %186 = vmatpush1.bf16.msra.mxu0 %v8340_v8  ;;  %v8380_v34 = vld [vmem:[%s12110_s5 + $0x104] ss:$16 sps:$4 sm:$0xff]   ;;  %v8378_v35 = vld [vmem:[%s12110_s5 + $0x100] ss:$16 sps:$4 sm:$0xff]  }
  0x10   :  { %187 = vmatprep.subr.bf16.mxu0 %v8341_v9  ;;  %v8383_v36 = vld [vmem:[%s12110_s5 + $0x124] ss:$16 sps:$4 sm:$0xff]   ;;  %v8381_v37 = vld [vmem:[%s12110_s5 + $0x120] ss:$16 sps:$4 sm:$0xff]  }
  0x11   :  { %v8386_v38 = vld [vmem:[%s12110_s5 + $0x144] ss:$16 sps:$4 sm:$0xff]   ;;  %v8384_v39 = vld [vmem:[%s12110_s5 + $0x140] ss:$16 sps:$4 sm:$0xff]  }
  0x12   :  { %v8389_v40 = vld [vmem:[%s12110_s5 + $0x164] ss:$16 sps:$4 sm:$0xff]   ;;  %v8387_v41 = vld [vmem:[%s12110_s5 + $0x160] ss:$16 sps:$4 sm:$0xff]  }
  0x13   :  { %188 = vmatpush1.bf16.msra.mxu0 %v8343_v10  ;;  %v8392_v42 = vld [vmem:[%s12110_s5 + $0x184] ss:$16 sps:$4 sm:$0xff]   ;;  %v8390_v43 = vld [vmem:[%s12110_s5 + $0x180] ss:$16 sps:$4 sm:$0xff]  }
  0x14   :  { %189 = vmatprep.subr.bf16.mxu0 %v8344_v11  ;;  %v8395_v44 = vld [vmem:[%s12110_s5 + $0x1a4] ss:$16 sps:$4 sm:$0xff]   ;;  %v8393_v45 = vld [vmem:[%s12110_s5 + $0x1a0] ss:$16 sps:$4 sm:$0xff]  }
  0x15   :  { %v8398_v46 = vld [vmem:[%s12110_s5 + $0x1c4] ss:$16 sps:$4 sm:$0xff]   ;;  %v8396_v47 = vld [vmem:[%s12110_s5 + $0x1c0] ss:$16 sps:$4 sm:$0xff]  }
  0x16   :  { %v8401_v48 = vld [vmem:[%s12110_s5 + $0x1e4] ss:$16 sps:$4 sm:$0xff]   ;;  %v8399_v49 = vld [vmem:[%s12110_s5 + $0x1e0] ss:$16 sps:$4 sm:$0xff]  }
  0x17   :  { %190 = vmatpush1.bf16.msra.mxu0 %v8346_v12 }
  0x18   :  { %191 = vmatprep.subr.bf16.mxu0 %v8347_v13 }
  0x1b   :  { %192 = vmatpush1.bf16.msra.mxu0 %v8349_v14 }
  0x1c   :  { %193 = vmatprep.subr.bf16.mxu0 %v8350_v15 }
  0x1f   :  { %194 = vmatpush1.bf16.msra.mxu0 %v8352_v16 }
  0x20   :  { %807 = vmatprep.subr.bf16.mxu0 %v8356_v18 }
  0x22   :  { %212 = vmatmul.mubr.bf16.vlgmr.msra.gmra.mrb[0].mxu0 %v8353_v17 }
  0x23   :  { %808 = vmatpush1.bf16.msra.mxu0 %v8354_v19 }
  0x24   :  { %809 = vmatprep.subr.bf16.mxu0 %v8359_v20 }
  0x27   :  { %810 = vmatpush1.bf16.msra.mxu0 %v8357_v21 }
  0x28   :  { %811 = vmatprep.subr.bf16.mxu0 %v8362_v22 }
  0x2b   :  { %812 = vmatpush1.bf16.msra.mxu0 %v8360_v23 }
  0x2c   :  { %813 = vmatprep.subr.bf16.mxu0 %v8365_v24 }
  0x2f   :  { %814 = vmatpush1.bf16.msra.mxu0 %v8363_v25 }
  0x30   :  { %815 = vmatprep.subr.bf16.mxu0 %v8368_v26 }
  0x33   :  { %816 = vmatpush1.bf16.msra.mxu0 %v8366_v27 }
  0x34   :  { %817 = vmatprep.subr.bf16.mxu0 %v8371_v28 }
  0x37   :  { %818 = vmatpush1.bf16.msra.mxu0 %v8369_v29 }
  0x38   :  { %819 = vmatprep.subr.bf16.mxu0 %v8374_v30 }
  0x3b   :  { %820 = vmatpush1.bf16.msra.mxu0 %v8372_v31 }
  0x3c   :  { %821 = vmatprep.subr.bf16.mxu0 %v8377_v32 }
  0x3f   :  { %822 = vmatpush1.bf16.msra.mxu0 %v8375_v33 }
  0x40   :  { %823 = vmatprep.subr.bf16.mxu0 %v8380_v34 }
  0x43   :  { %824 = vmatpush1.bf16.msra.mxu0 %v8378_v35 }
  0x44   :  { %825 = vmatprep.subr.bf16.mxu0 %v8383_v36 }
  0x47   :  { %826 = vmatpush1.bf16.msra.mxu0 %v8381_v37 }
  0x48   :  { %827 = vmatprep.subr.bf16.mxu0 %v8386_v38 }
  0x4b   :  { %828 = vmatpush1.bf16.msra.mxu0 %v8384_v39 }
  0x4c   :  { %829 = vmatprep.subr.bf16.mxu0 %v8389_v40 }
  0x4f   :  { %830 = vmatpush1.bf16.msra.mxu0 %v8387_v41 }
  0x50   :  { %831 = vmatprep.subr.bf16.mxu0 %v8392_v42 }
  0x53   :  { %832 = vmatpush1.bf16.msra.mxu0 %v8390_v43 }
  0x54   :  { %833 = vmatprep.subr.bf16.mxu0 %v8395_v44 }
  0x57   :  { %834 = vmatpush1.bf16.msra.mxu0 %v8393_v45 }
  0x58   :  { %835 = vmatprep.subr.bf16.mxu0 %v8398_v46 }
  0x5b   :  { %836 = vmatpush1.bf16.msra.mxu0 %v8396_v47 }
  0x5c   :  { %837 = vmatprep.subr.bf16.mxu0 %v8401_v48 }
  0x5f   :  { %838 = vmatpush1.bf16.msra.mxu0 %v8399_v49 }
  0x60   :  { %850 = vmatprep.subr.bf16.mxu0 %v8404_v50 }
  0x61   :  { %20 = vsyncpa [#allocation3], 0  ;;  %v83_v51 = vlaneseq  ;;  %v81_v54 = vld [vmem:[%s12107_s2] sm:$0x3]  ;;  %vm7346_vm0 = vcmask 130048  }
  0x63   :  { %v9405_v52 = vshrl.u32 %v83_v51, 7 }
  0x65   :  { %v9408_v53 = vsub.s32 0, %v9405_v52  ;;  %v9414_v55 = vsub.s32 1, %v9405_v52 }
  0x67   :  { %v86_v56 = vrot.slane %v81_v54, %v9408_v53  ;;  %v90_v57 = vrot.slane %v81_v54, %v9414_v55 }
  0xf5   :  { %v213_v58 = vpop.f32.mrb[0].mxu0 }
  0xf6   :  { %v214_v59 = vadd.f32 %v213_v58, %v86_v56  ;;  %v215_v60 = vpop.f32.mrb[1].mxu0 }
  0xf7   :  { %v216_v61 = vadd.f32 %v215_v60, %v90_v57  ;;  %v217_v62 = vpop.f32.mrb[2].mxu0 }
  0xf8   :  { %v222_v63 = vmul.f32 0.2, %v214_v59  ;;  %v218_v0 = vadd.f32 %v217_v62, %v86_v56  ;;  %v219_v1 = vpop.f32.mrb[3].mxu0 }
  0xf9   :  { %v223_v2 = vmul.f32 0.2, %v216_v61  ;;  %v220_v3 = vadd.f32 %v219_v1, %v90_v57 }
  0xfa   :  { %v224_v4 = vmul.f32 0.2, %v218_v0  ;;  %v9418_v6 = vmax.f32 %v214_v59, %v222_v63  ;;  %v9171_v59 = vmov 1966171168  }
  0xfb   :  { %v225_v5 = vmul.f32 0.2, %v220_v3  ;;  %v9422_v8 = vmax.f32 %v216_v61, %v223_v2  ;;  %v332_v60 = vunpack.c.l.s4 %v9171_v59  ;;  %v8449_v59 = vld [vmem:[%s12110_s5 + $0x1ec] ss:$16 sps:$4 sm:$0xff]  }
  0xfc   :  { %v9420_v7 = vmax.f32 %v218_v0, %v224_v4  ;;  %v251_v12 = vmul.f32 %v9418_v6, %v9418_v6 }
  0xfd   :  { %v9424_v9 = vmax.f32 %v220_v3, %v225_v5  ;;  %v252_v15 = vmul.f32 %v9422_v8, %v9422_v8  ;;  %v333_v61 = vunpack.c.0.s8 %v332_v60  ;;  %v323_v3 = vld [vmem:[%s12108_s3] sm:$0x3]  ;;  %v8447_v60 = vld [vmem:[%s12110_s5 + $0x1e8] ss:$16 sps:$4 sm:$0xff]  }
  0xfe   :  { %v235_v10 = vmul.f32 0.0, %v9420_v7 }
  0xff   :  { %v236_v11 = vmul.f32 0.0, %v9424_v9  ;;  %v9437_v63 = vsub.s32 %v333_v61, %v9405_v52  ;;  %v1223_v61 = vld [vmem:[%s12114_s9] sm:$0xff] }
 0x100   :  { %v237_v13 = vadd.f32 %v235_v10, %v9418_v6  ;;  %v253_v14 = vmul.f32 %v235_v10, %v9420_v7 }
 0x101   :  { %v244_v16 = vadd.f32 %v236_v11, %v9422_v8  ;;  %v254_v17 = vmul.f32 %v236_v11, %v9424_v9 }
 0x102   :  { %v238_v18 = vrot.slane %v237_v13, 4  ;;  %v255_v19 = vadd.f32 %v253_v14, %v251_v12 }
 0x103   :  { %v245_v20 = vrot.slane %v244_v16, 4  ;;  %v262_v21 = vadd.f32 %v254_v17, %v252_v15 }
 0x104   :  { %v239_v22 = vadd.f32 %v238_v18, %v237_v13  ;;  %v256_v23 = vrot.slane %v255_v19, 4 }
 0x105   :  { %v246_v24 = vadd.f32 %v245_v20, %v244_v16  ;;  %v263_v25 = vrot.slane %v262_v21, 4  ;;  %v347_v20 = vld [vmem:[%s12109_s4] sm:$0x3] }
 0x106   :  { %v240_v26 = vrot.slane %v239_v22, 2  ;;  %v257_v27 = vadd.f32 %v256_v23, %v255_v19 }
 0x107   :  { %v247_v28 = vrot.slane %v246_v24, 2  ;;  %v264_v29 = vadd.f32 %v263_v25, %v262_v21 }
 0x108   :  { %v241_v30 = vadd.f32 %v240_v26, %v239_v22  ;;  %v258_v31 = vrot.slane %v257_v27, 2 }
 0x109   :  { %v248_v32 = vadd.f32 %v247_v28, %v246_v24  ;;  %v265_v33 = vrot.slane %v264_v29, 2  ;;  %v8407_v28 = vld [vmem:[%s12110_s5 + $0x2c] ss:$16 sps:$4 sm:$0xff]  }
 0x10a   :  { %v242_v34 = vrot.slane %v241_v30, 1  ;;  %v259_v35 = vadd.f32 %v258_v31, %v257_v27  ;;  %v8408_v31 = vld [vmem:[%s12110_s5 + $0x48] ss:$16 sps:$4 sm:$0xff]  }
 0x10b   :  { %v249_v36 = vrot.slane %v248_v32, 1  ;;  %v266_v37 = vadd.f32 %v265_v33, %v264_v29  ;;  %v8405_v29 = vld [vmem:[%s12110_s5 + $0x28] ss:$16 sps:$4 sm:$0xff]  }
 0x10c   :  { %v243_v38 = vadd.f32 %v242_v34, %v241_v30  ;;  %v260_v39 = vrot.slane %v259_v35, 1  ;;  %v8410_v30 = vld [vmem:[%s12110_s5 + $0x4c] ss:$16 sps:$4 sm:$0xff]   ;;  %v8411_v33 = vld [vmem:[%s12110_s5 + $0x68] ss:$16 sps:$4 sm:$0xff]  }
 0x10d   :  { %v250_v40 = vadd.f32 %v249_v36, %v248_v32  ;;  %v267_v41 = vrot.slane %v266_v37, 1  ;;  %v8413_v32 = vld [vmem:[%s12110_s5 + $0x6c] ss:$16 sps:$4 sm:$0xff]  }
 0x10e   :  { %v261_v42 = vadd.f32 %v260_v39, %v259_v35  ;;  %v313_v43 = vmul.f32 0.125, %v243_v38  ;;  %v8416_v34 = vld [vmem:[%s12110_s5 + $0x8c] ss:$16 sps:$4 sm:$0xff]   ;;  %v8414_v35 = vld [vmem:[%s12110_s5 + $0x88] ss:$16 sps:$4 sm:$0xff]  }
 0x10f   :  { %v268_v44 = vadd.f32 %v267_v41, %v266_v37  ;;  %v314_v45 = vmul.f32 0.125, %v250_v40  ;;  %v8419_v36 = vld [vmem:[%s12110_s5 + $0xac] ss:$16 sps:$4 sm:$0xff]   ;;  %v8417_v37 = vld [vmem:[%s12110_s5 + $0xa8] ss:$16 sps:$4 sm:$0xff]  }
 0x110   :  { %v315_v46 = vmul.f32 0.125, %v261_v42  ;;  %v317_v47 = vmul.f32 %v313_v43, %v313_v43  ;;  %v8422_v38 = vld [vmem:[%s12110_s5 + $0xcc] ss:$16 sps:$4 sm:$0xff]   ;;  %v8420_v39 = vld [vmem:[%s12110_s5 + $0xc8] ss:$16 sps:$4 sm:$0xff]  }
 0x111   :  { %v316_v48 = vmul.f32 0.125, %v268_v44  ;;  %v318_v49 = vmul.f32 %v314_v45, %v314_v45  ;;  %v8425_v40 = vld [vmem:[%s12110_s5 + $0xec] ss:$16 sps:$4 sm:$0xff]   ;;  %v8423_v41 = vld [vmem:[%s12110_s5 + $0xe8] ss:$16 sps:$4 sm:$0xff]  }
 0x112   :  { %v319_v50 = vsub.f32 %v315_v46, %v317_v47  ;;  %v8428_v42 = vld [vmem:[%s12110_s5 + $0x10c] ss:$16 sps:$4 sm:$0xff]   ;;  %v8432_v47 = vld [vmem:[%s12110_s5 + $0x148] ss:$16 sps:$4 sm:$0xff]  }
 0x113   :  { %v320_v51 = vsub.f32 %v316_v48, %v318_v49  ;;  %v8431_v44 = vld [vmem:[%s12110_s5 + $0x12c] ss:$16 sps:$4 sm:$0xff]   ;;  %v8435_v49 = vld [vmem:[%s12110_s5 + $0x168] ss:$16 sps:$4 sm:$0xff]  }
 0x114   :  { %v321_v54 = vmax.f32 %v319_v50, 0.0  ;;  %v8434_v46 = vld [vmem:[%s12110_s5 + $0x14c] ss:$16 sps:$4 sm:$0xff]  }
 0x115   :  { %v322_v56 = vmax.f32 %v320_v51, 0.0  ;;  %v8437_v48 = vld [vmem:[%s12110_s5 + $0x16c] ss:$16 sps:$4 sm:$0xff]   ;;  %v8438_v51 = vld [vmem:[%s12110_s5 + $0x188] ss:$16 sps:$4 sm:$0xff]  }
 0x116   :  { %v324_v57 = vadd.f32 1e-05, %v321_v54  ;;  %v8440_v50 = vld [vmem:[%s12110_s5 + $0x18c] ss:$16 sps:$4 sm:$0xff]  }
 0x117   :  { %v325_v58 = vadd.f32 1e-05, %v322_v56  ;;  %v8443_v54 = vld [vmem:[%s12110_s5 + $0x1ac] ss:$16 sps:$4 sm:$0xff]   ;;  %v8441_v56 = vld [vmem:[%s12110_s5 + $0x1a8] ss:$16 sps:$4 sm:$0xff]  }
 0x118   :  { %9090 = vrsqrt.f32 %v324_v57  ;;  %v8446_v57 = vld [vmem:[%s12110_s5 + $0x1cc] ss:$16 sps:$4 sm:$0xff]  }
 0x119   :  { %9092 = vrsqrt.f32 %v325_v58  ;;  %v8444_v58 = vld [vmem:[%s12110_s5 + $0x1c8] ss:$16 sps:$4 sm:$0xff]  }
 0x122   :  { %v9091_v62 = vpop.eup %9090 }
 0x123   :  { %v9093_v0 = vpop.eup %9092 }
 0x124   :  { %v330_v1 = vcombine.low %v9091_v62, %v9093_v0  ;;  %v1227_v62 = vld [vmem:[%s12114_s9 + $0x20] sm:$0xff]  ;;  %v1224_v0 = vld [vmem:[%s12114_s9 + $0x8] sm:$0xff] }
 0x126   :  { %v337_v2 = vrot.slane %v330_v1, %v9437_v63  ;;  %v7453_v1 = vcombine.high %v1223_v61, %v1227_v62 }
 0x128   :  { %v344_v4 = vrot.slane %v337_v2, %v9437_v63  ;;  %v1228_v2 = vld [vmem:[%s12114_s9 + $0x28] sm:$0xff]  ;;  %2801 = vmatprep.subr.bf16.mxu1 %v7453_v1 }
 0x12a   :  { %v346_v5 = vmul.f32 %v344_v4, %v323_v3  ;;  %v7454_v3 = vcombine.low %v1224_v0, %v1228_v2  ;;  %v7455_v4 = vcombine.high %v1224_v0, %v1228_v2  ;;  %v1287_v2 = vld [vmem:[%s12114_s9 + $0x200] sm:$0xff] }
 0x12c   :  { %v352_v10 = vrot.slane %v346_v5, %v9408_v53  ;;  %v356_v11 = vrot.slane %v346_v5, %v9414_v55  ;;  %v7452_v5 = vcombine.low %v1223_v61, %v1227_v62  ;;  %v1284_v61 = vld [vmem:[%s12114_s9 + $0x1e8] sm:$0xff] }
 0x12e   :  { %v360_v12 = vmul.f32 %v356_v11, %v314_v45  ;;  %v383_v13 = vmul.f32 %v356_v11, %v9424_v9  ;;  %v359_v14 = vmul.f32 %v352_v10, %v313_v43  ;;  %v381_v15 = vmul.f32 %v356_v11, %v9422_v8  ;;  %v8426_v43 = vld [vmem:[%s12110_s5 + $0x108] ss:$16 sps:$4 sm:$0xff]   ;;  %2802 = vmatpush1.bf16.msra.mxu1 %v7452_v5  ;;  %v1235_v11 = vld [vmem:[%s12114_s9 + $0x60] sm:$0xff] }
 0x12f   :  { %v380_v16 = vmul.f32 %v352_v10, %v9418_v6  ;;  %v382_v17 = vmul.f32 %v352_v10, %v9420_v7  ;;  %v8402_v7 = vld [vmem:[%s12110_s5 + $0x8] ss:$16 sps:$4 sm:$0xff]   ;;  %v1231_v10 = vld [vmem:[%s12114_s9 + $0x40] sm:$0xff] }
 0x130   :  { %v363_v18 = vcombine.low %v359_v14, %v360_v12  ;;  %v8429_v45 = vld [vmem:[%s12110_s5 + $0x128] ss:$16 sps:$4 sm:$0xff]  }
 0x131   :  { %v1232_v12 = vld [vmem:[%s12114_s9 + $0x48] sm:$0xff] }
 0x132   :  { %v370_v19 = vrot.slane %v363_v18, %v9437_v63  ;;  %v1236_v14 = vld [vmem:[%s12114_s9 + $0x68] sm:$0xff]  ;;  %v1239_v18 = vld [vmem:[%s12114_s9 + $0x80] sm:$0xff] }
 0x134   :  { %v377_v21 = vrot.slane %v370_v19, %v9437_v63  ;;  %v1243_v19 = vld [vmem:[%s12114_s9 + $0xa0] sm:$0xff] }
 0x136   :  { %v379_v22 = vsub.f32 %v347_v20, %v377_v21  ;;  %v1240_v20 = vld [vmem:[%s12114_s9 + $0x88] sm:$0xff]  ;;  %v7469_v21 = vcombine.high %v1239_v18, %v1243_v19 }
 0x138   :  { %v392_v23 = vrot.slane %v379_v22, %v9414_v55  ;;  %v388_v9 = vrot.slane %v379_v22, %v9408_v53  ;;  %v1244_v22 = vld [vmem:[%s12114_s9 + $0xa8] sm:$0xff] }
 0x13a   :  { %v396_v24 = vadd.f32 %v392_v23, %v381_v15  ;;  %v398_v8 = vadd.f32 %v392_v23, %v383_v13  ;;  %v395_v25 = vadd.f32 %v388_v9, %v380_v16  ;;  %v397_v6 = vadd.f32 %v388_v9, %v382_v17 }
 0x13b   :  { %v7461_v13 = vcombine.high %v1231_v10, %v1235_v11  ;;  %v7462_v15 = vcombine.low %v1232_v12, %v1236_v14  ;;  %v7463_v16 = vcombine.high %v1232_v12, %v1236_v14  ;;  %v7460_v17 = vcombine.low %v1231_v10, %v1235_v11  ;;  %v1292_v10 = vld [vmem:[%s12114_s9 + $0x228] sm:$0xff]  ;;  %v1295_v14 = vld [vmem:[%s12114_s9 + $0x240] sm:$0xff] }
 0x13c   :  { %v400_v26 = vpack.c.bf16 %v398_v8, %v396_v24  ;;  %v9460_v27 = vpack.c.bf16 %v397_v6, %v395_v25  ;;  %v7470_v23 = vcombine.low %v1240_v20, %v1244_v22  ;;  %v7471_v9 = vcombine.high %v1240_v20, %v1244_v22  ;;  %v1247_v8 = vld [vmem:[%s12114_s9 + $0xc0] sm:$0xff]  ;;  %v1248_v6 = vld [vmem:[%s12114_s9 + $0xc8] sm:$0xff] }
 0x13d   :  { %2803 = vmatprep.subr.bf16.mxu1 %v7461_v13  ;;  %v7468_v24 = vcombine.low %v1239_v18, %v1243_v19  ;;  %v1251_v25 = vld [vmem:[%s12114_s9 + $0xe0] sm:$0xff]  ;;  %v1300_v18 = vld [vmem:[%s12114_s9 + $0x268] sm:$0xff] }
 0x13e   :  { %839 = vmatprep.mubr.bf16.mxu0 %v400_v26  ;;  %2804 = vmatpush1.bf16.msra.mxu1 %v7460_v17  ;;  %v1303_v22 = vld [vmem:[%s12114_s9 + $0x280] sm:$0xff] }
 0x13f   :  { %840 = vmatmul.mubr.bf16.vlgmr.msra.gmra.mrb[4].mxu0 %v9460_v27  ;;  %2805 = vmatprep.subr.bf16.mxu1 %v7469_v21 }
 0x140   :  { %851 = vmatpush1.bf16.msra.mxu0 %v8402_v7  ;;  %882 = vmatprep.mubr.bf16.mxu0 %v400_v26  ;;  %v7477_v26 = vcombine.high %v1247_v8, %v1251_v25  ;;  %v1252_v7 = vld [vmem:[%s12114_s9 + $0xe8] sm:$0xff] }
 0x141   :  { %852 = vmatprep.subr.bf16.mxu0 %v8407_v28  ;;  %v7479_v28 = vcombine.high %v1248_v6, %v1252_v7 }
 0x142   :  { %2806 = vmatpush1.bf16.msra.mxu1 %v7468_v24 }
 0x143   :  { %2807 = vmatprep.subr.bf16.mxu1 %v7477_v26 }
 0x144   :  { %853 = vmatpush1.bf16.msra.mxu0 %v8405_v29  ;;  %v7476_v29 = vcombine.low %v1247_v8, %v1251_v25  ;;  %v1308_v8 = vld [vmem:[%s12114_s9 + $0x2a8] sm:$0xff] }
 0x145   :  { %854 = vmatprep.subr.bf16.mxu0 %v8410_v30  ;;  %v1255_v30 = vld [vmem:[%s12114_s9 + $0x100] sm:$0xff] }
 0x146   :  { %2808 = vmatpush1.bf16.msra.mxu1 %v7476_v29  ;;  %v1312_v29 = vld [vmem:[%s12114_s9 + $0x2c8] sm:$0xff] }
 0x148   :  { %855 = vmatpush1.bf16.msra.mxu0 %v8408_v31  ;;  %v1259_v31 = vld [vmem:[%s12114_s9 + $0x120] sm:$0xff] }
 0x149   :  { %856 = vmatprep.subr.bf16.mxu0 %v8413_v32  ;;  %v1256_v32 = vld [vmem:[%s12114_s9 + $0x108] sm:$0xff] }
 0x14c   :  { %857 = vmatpush1.bf16.msra.mxu0 %v8411_v33  ;;  %v7485_v33 = vcombine.high %v1255_v30, %v1259_v31 }
 0x14d   :  { %858 = vmatprep.subr.bf16.mxu0 %v8416_v34  ;;  %v1260_v34 = vld [vmem:[%s12114_s9 + $0x128] sm:$0xff] }
 0x14e   :  { %2809 = vmatprep.subr.bf16.mxu1 %v7485_v33 }
 0x150   :  { %859 = vmatpush1.bf16.msra.mxu0 %v8414_v35  ;;  %v7486_v35 = vcombine.low %v1256_v32, %v1260_v34 }
 0x151   :  { %860 = vmatprep.subr.bf16.mxu0 %v8419_v36  ;;  %v7487_v36 = vcombine.high %v1256_v32, %v1260_v34  ;;  %v9701_v34 = vld [vmem:[%s12111_s6] sm:$0xf] }
 0x154   :  { %861 = vmatpush1.bf16.msra.mxu0 %v8417_v37  ;;  %v7484_v37 = vcombine.low %v1255_v30, %v1259_v31  ;;  %v1316_v30 = vld [vmem:[%s12114_s9 + $0x2e8] sm:$0xff] }
 0x155   :  { %862 = vmatprep.subr.bf16.mxu0 %v8422_v38  ;;  %v1263_v38 = vld [vmem:[%s12114_s9 + $0x140] sm:$0xff]  ;;  %v7542_v31 = vcombine.low %v1312_v29, %v1316_v30  ;;  %v7543_v32 = vcombine.high %v1312_v29, %v1316_v30 }
 0x156   :  { %2810 = vmatpush1.bf16.msra.mxu1 %v7484_v37  ;;  %v1320_v37 = vld [vmem:[%s12114_s9 + $0x308] sm:$0xff] }
 0x158   :  { %863 = vmatpush1.bf16.msra.mxu0 %v8420_v39  ;;  %v1267_v39 = vld [vmem:[%s12114_s9 + $0x160] sm:$0xff] }
 0x159   :  { %864 = vmatprep.subr.bf16.mxu0 %v8425_v40  ;;  %v1264_v40 = vld [vmem:[%s12114_s9 + $0x148] sm:$0xff] }
 0x15c   :  { %865 = vmatpush1.bf16.msra.mxu0 %v8423_v41  ;;  %v7493_v41 = vcombine.high %v1263_v38, %v1267_v39 }
 0x15d   :  { %866 = vmatprep.subr.bf16.mxu0 %v8428_v42  ;;  %v1268_v42 = vld [vmem:[%s12114_s9 + $0x168] sm:$0xff] }
 0x15e   :  { %2811 = vmatprep.subr.bf16.mxu1 %v7493_v41 }
 0x160   :  { %867 = vmatpush1.bf16.msra.mxu0 %v8426_v43  ;;  %v7494_v43 = vcombine.low %v1264_v40, %v1268_v42 }
 0x161   :  { %868 = vmatprep.subr.bf16.mxu0 %v8431_v44  ;;  %v7495_v44 = vcombine.high %v1264_v40, %v1268_v42  ;;  %v470_v40 = vrot.slane %v9701_v34, %v9408_v53 }
 0x164   :  { %869 = vmatpush1.bf16.msra.mxu0 %v8429_v45  ;;  %v7492_v45 = vcombine.low %v1263_v38, %v1267_v39  ;;  %v1324_v39 = vld [vmem:[%s12114_s9 + $0x328] sm:$0xff] }
 0x165   :  { %870 = vmatprep.subr.bf16.mxu0 %v8434_v46  ;;  %v1271_v46 = vld [vmem:[%s12114_s9 + $0x180] sm:$0xff]  ;;  %v7550_v41 = vcombine.low %v1320_v37, %v1324_v39  ;;  %v7551_v42 = vcombine.high %v1320_v37, %v1324_v39 }
 0x166   :  { %2812 = vmatpush1.bf16.msra.mxu1 %v7492_v45  ;;  %v1327_v45 = vld [vmem:[%s12114_s9 + $0x340] sm:$0xff] }
 0x168   :  { %871 = vmatpush1.bf16.msra.mxu0 %v8432_v47  ;;  %v1275_v47 = vld [vmem:[%s12114_s9 + $0x1a0] sm:$0xff] }
 0x169   :  { %872 = vmatprep.subr.bf16.mxu0 %v8437_v48  ;;  %v7501_v48 = vcombine.high %v1271_v46, %v1275_v47 }
 0x16b   :  { %2813 = vmatprep.subr.bf16.mxu1 %v7501_v48 }
 0x16c   :  { %873 = vmatpush1.bf16.msra.mxu0 %v8435_v49  ;;  %v1272_v49 = vld [vmem:[%s12114_s9 + $0x188] sm:$0xff] }
 0x16d   :  { %874 = vmatprep.subr.bf16.mxu0 %v8440_v50  ;;  %v1276_v50 = vld [vmem:[%s12114_s9 + $0x1a8] sm:$0xff] }
 0x170   :  { %875 = vmatpush1.bf16.msra.mxu0 %v8438_v51  ;;  %v7502_v51 = vcombine.low %v1272_v49, %v1276_v50 }
 0x171   :  { %876 = vmatprep.subr.bf16.mxu0 %v8443_v54  ;;  %v7503_v54 = vcombine.high %v1272_v49, %v1276_v50  ;;  %v1332_v50 = vld [vmem:[%s12114_s9 + $0x368] sm:$0xff] }
 0x174   :  { %877 = vmatpush1.bf16.msra.mxu0 %v8441_v56  ;;  %v7500_v56 = vcombine.low %v1271_v46, %v1275_v47  ;;  %v1331_v46 = vld [vmem:[%s12114_s9 + $0x360] sm:$0xff]  ;;  %v1328_v47 = vld [vmem:[%s12114_s9 + $0x348] sm:$0xff] }
 0x175   :  { %878 = vmatprep.subr.bf16.mxu0 %v8446_v57  ;;  %v1279_v57 = vld [vmem:[%s12114_s9 + $0x1c0] sm:$0xff]  ;;  %v7557_v49 = vcombine.high %v1327_v45, %v1331_v46 }
 0x176   :  { %2814 = vmatpush1.bf16.msra.mxu1 %v7500_v56  ;;  %v7558_v56 = vcombine.low %v1328_v47, %v1332_v50 }
 0x178   :  { %879 = vmatpush1.bf16.msra.mxu0 %v8444_v58  ;;  %v1283_v58 = vld [vmem:[%s12114_s9 + $0x1e0] sm:$0xff] }
 0x179   :  { %880 = vmatprep.subr.bf16.mxu0 %v8449_v59  ;;  %v1280_v59 = vld [vmem:[%s12114_s9 + $0x1c8] sm:$0xff]  ;;  %v7508_v1 = vcombine.low %v1279_v57, %v1283_v58 }
 0x17a   :  { %v7510_v62 = vcombine.low %v1280_v59, %v1284_v61  ;;  %v7511_v0 = vcombine.high %v1280_v59, %v1284_v61 }
 0x17c   :  { %881 = vmatpush1.bf16.msra.mxu0 %v8447_v60  ;;  %v7509_v60 = vcombine.high %v1279_v57, %v1283_v58  ;;  %v7559_v57 = vcombine.high %v1328_v47, %v1332_v50  ;;  %v7556_v58 = vcombine.low %v1327_v45, %v1331_v46 }
 0x17d   :  { %2887 = vmatprep.subr.bf16.mxu0 %v7455_v4  ;;  %v1288_v4 = vld [vmem:[%s12114_s9 + $0x208] sm:$0xff] }
 0x17e   :  { %2815 = vmatprep.subr.bf16.mxu1 %v7509_v60  ;;  %v7518_v11 = vcombine.low %v1288_v4, %v1292_v10  ;;  %v7519_v12 = vcombine.high %v1288_v4, %v1292_v10 }
 0x17f   :  { %883 = vmatmul.mubr.bf16.vlgmr.msra.gmra.mrb[8].mxu0 %v9460_v27  ;;  %v7478_v27 = vcombine.low %v1248_v6, %v1252_v7  ;;  %2816 = vmatpush1.bf16.msra.mxu1 %v7508_v1  ;;  %v1311_v7 = vld [vmem:[%s12114_s9 + $0x2c0] sm:$0xff] }
 0x180   :  { %2888 = vmatpush1.bf16.msra.mxu0 %v7454_v3  ;;  %v1291_v3 = vld [vmem:[%s12114_s9 + $0x220] sm:$0xff] }
 0x181   :  { %2889 = vmatprep.subr.bf16.mxu0 %v7463_v16  ;;  %v7517_v5 = vcombine.high %v1287_v2, %v1291_v3  ;;  %v7516_v13 = vcombine.low %v1287_v2, %v1291_v3  ;;  %v1296_v16 = vld [vmem:[%s12114_s9 + $0x248] sm:$0xff]  ;;  %v1335_v1 = vld [vmem:[%s12114_s9 + $0x380] sm:$0xff] }
 0x182   :  { %v7526_v19 = vcombine.low %v1296_v16, %v1300_v18  ;;  %v7527_v20 = vcombine.high %v1296_v16, %v1300_v18  ;;  %v1339_v2 = vld [vmem:[%s12114_s9 + $0x3a0] sm:$0xff]  ;;  %v1336_v3 = vld [vmem:[%s12114_s9 + $0x388] sm:$0xff] }
 0x183   :  { %2817 = vmatprep.subr.bf16.mxu1 %v7517_v5  ;;  %v7565_v10 = vcombine.high %v1335_v1, %v1339_v2  ;;  %v7564_v16 = vcombine.low %v1335_v1, %v1339_v2 }
 0x184   :  { %2890 = vmatpush1.bf16.msra.mxu0 %v7462_v15  ;;  %2818 = vmatpush1.bf16.msra.mxu1 %v7516_v13  ;;  %v1299_v15 = vld [vmem:[%s12114_s9 + $0x260] sm:$0xff] }
 0x185   :  { %2891 = vmatprep.subr.bf16.mxu0 %v7471_v9  ;;  %v7525_v17 = vcombine.high %v1295_v14, %v1299_v15  ;;  %v7524_v21 = vcombine.low %v1295_v14, %v1299_v15  ;;  %v1304_v9 = vld [vmem:[%s12114_s9 + $0x288] sm:$0xff] }
 0x186   :  { %v7534_v25 = vcombine.low %v1304_v9, %v1308_v8  ;;  %v7535_v6 = vcombine.high %v1304_v9, %v1308_v8 }
 0x187   :  { %2819 = vmatprep.subr.bf16.mxu1 %v7525_v17 }
 0x188   :  { %2892 = vmatpush1.bf16.msra.mxu0 %v7470_v23  ;;  %2820 = vmatpush1.bf16.msra.mxu1 %v7524_v21  ;;  %v1307_v23 = vld [vmem:[%s12114_s9 + $0x2a0] sm:$0xff] }
 0x189   :  { %2893 = vmatprep.subr.bf16.mxu0 %v7479_v28  ;;  %v7533_v24 = vcombine.high %v1303_v22, %v1307_v23  ;;  %v7532_v26 = vcombine.low %v1303_v22, %v1307_v23  ;;  %v1347_v21 = vld [vmem:[%s12114_s9 + $0x3e0] sm:$0xff]  ;;  %v1344_v22 = vld [vmem:[%s12114_s9 + $0x3c8] sm:$0xff] }
 0x18b   :  { %2821 = vmatprep.subr.bf16.mxu1 %v7533_v24  ;;  %v1348_v24 = vld [vmem:[%s12114_s9 + $0x3e8] sm:$0xff] }
 0x18c   :  { %2894 = vmatpush1.bf16.msra.mxu0 %v7478_v27  ;;  %2822 = vmatpush1.bf16.msra.mxu1 %v7532_v26  ;;  %v1315_v27 = vld [vmem:[%s12114_s9 + $0x2e0] sm:$0xff] }
 0x18d   :  { %2895 = vmatprep.subr.bf16.mxu0 %v7487_v36  ;;  %v7541_v28 = vcombine.high %v1311_v7, %v1315_v27  ;;  %v7540_v33 = vcombine.low %v1311_v7, %v1315_v27  ;;  %v1323_v36 = vld [vmem:[%s12114_s9 + $0x320] sm:$0xff] }
 0x18f   :  { %2823 = vmatprep.subr.bf16.mxu1 %v7541_v28 }
 0x190   :  { %2896 = vmatpush1.bf16.msra.mxu0 %v7486_v35  ;;  %2824 = vmatpush1.bf16.msra.mxu1 %v7540_v33  ;;  %v1319_v35 = vld [vmem:[%s12114_s9 + $0x300] sm:$0xff]  ;;  %v9784_v33 = vld [vmem:[%s12114_s9 + $0x408] sm:$0xff] }
 0x191   :  { %2897 = vmatprep.subr.bf16.mxu0 %v7495_v44  ;;  %v7549_v38 = vcombine.high %v1319_v35, %v1323_v36  ;;  %v474_v44 = vrot.slane %v9701_v34, %v9414_v55 }
 0x193   :  { %2825 = vmatprep.subr.bf16.mxu1 %v7549_v38  ;;  %v9793_v38 = vld [vmem:[%s12114_s9 + $0x428] sm:$0xff] }
 0x194   :  { %2898 = vmatpush1.bf16.msra.mxu0 %v7494_v43  ;;  %v7548_v43 = vcombine.low %v1319_v35, %v1323_v36  ;;  %v7583_v45 = vcombine.high %v9784_v33, %v9793_v38 }
 0x195   :  { %2899 = vmatprep.subr.bf16.mxu0 %v7503_v54 }
 0x196   :  { %2826 = vmatpush1.bf16.msra.mxu1 %v7548_v43 }
 0x197   :  { %2827 = vmatprep.subr.bf16.mxu1 %v7557_v49 }
 0x198   :  { %2900 = vmatpush1.bf16.msra.mxu0 %v7502_v51 }
 0x199   :  { %2901 = vmatprep.subr.bf16.mxu0 %v7511_v0 }
 0x19a   :  { %2828 = vmatpush1.bf16.msra.mxu1 %v7556_v58 }
 0x19b   :  { %2829 = vmatprep.subr.bf16.mxu1 %v7565_v10 }
 0x19c   :  { %2902 = vmatpush1.bf16.msra.mxu0 %v7510_v62 }
 0x19d   :  { %2903 = vmatprep.subr.bf16.mxu0 %v7519_v12 }
 0x19e   :  { %2830 = vmatpush1.bf16.msra.mxu1 %v7564_v16 }
 0x1a0   :  { %2904 = vmatpush1.bf16.msra.mxu0 %v7518_v11  ;;  %v1340_v11 = vld [vmem:[%s12114_s9 + $0x3a8] sm:$0xff] }
 0x1a1   :  { %2905 = vmatprep.subr.bf16.mxu0 %v7527_v20  ;;  %v7566_v13 = vcombine.low %v1336_v3, %v1340_v11  ;;  %v7567_v14 = vcombine.high %v1336_v3, %v1340_v11  ;;  %v1343_v20 = vld [vmem:[%s12114_s9 + $0x3c0] sm:$0xff] }
 0x1a2   :  { %v7573_v9 = vcombine.high %v1343_v20, %v1347_v21  ;;  %v7572_v26 = vcombine.low %v1343_v20, %v1347_v21 }
 0x1a4   :  { %2906 = vmatpush1.bf16.msra.mxu0 %v7526_v19  ;;  %2831 = vmatprep.subr.bf16.mxu1 %v7573_v9 }
 0x1a5   :  { %2907 = vmatprep.subr.bf16.mxu0 %v7535_v6  ;;  %v7575_v6 = vcombine.high %v1344_v22, %v1348_v24  ;;  %2832 = vmatpush1.bf16.msra.mxu1 %v7572_v26 }
 0x1a8   :  { %2908 = vmatpush1.bf16.msra.mxu0 %v7534_v25  ;;  %v7574_v25 = vcombine.low %v1344_v22, %v1348_v24 }
 0x1a9   :  { %2909 = vmatprep.subr.bf16.mxu0 %v7543_v32  ;;  %v9779_v32 = vld [vmem:[%s12114_s9 + $0x420] sm:$0xff] }
 0x1ac   :  { %2910 = vmatpush1.bf16.msra.mxu0 %v7542_v31  ;;  %v9774_v31 = vld [vmem:[%s12114_s9 + $0x400] sm:$0xff] }
 0x1ad   :  { %2911 = vmatprep.subr.bf16.mxu0 %v7551_v42  ;;  %v7581_v37 = vcombine.high %v9774_v31, %v9779_v32  ;;  %v7582_v42 = vcombine.low %v9784_v33, %v9793_v38  ;;  %v1380_v33 = vld [vmem:[%s12114_s9 + $0x4e8] sm:$0xff] }
 0x1af   :  { %2844 = vmatprep.subr.bf16.mxu1 %v7581_v37 }
 0x1b0   :  { %2912 = vmatpush1.bf16.msra.mxu0 %v7550_v41  ;;  %v7580_v41 = vcombine.low %v9774_v31, %v9779_v32  ;;  %v1379_v31 = vld [vmem:[%s12114_s9 + $0x4e0] sm:$0xff]  ;;  %v1376_v32 = vld [vmem:[%s12114_s9 + $0x4c8] sm:$0xff] }
 0x1b1   :  { %2913 = vmatprep.subr.bf16.mxu0 %v7559_v57 }
 0x1b4   :  { %2914 = vmatpush1.bf16.msra.mxu0 %v7558_v56 }
 0x1b5   :  { %2915 = vmatprep.subr.bf16.mxu0 %v7567_v14 }
 0x1b8   :  { %2916 = vmatpush1.bf16.msra.mxu0 %v7566_v13 }
 0x1b9   :  { %2917 = vmatprep.subr.bf16.mxu0 %v7575_v6 }
 0x1bc   :  { %2918 = vmatpush1.bf16.msra.mxu0 %v7574_v25 }
 0x1bd   :  { %2930 = vmatprep.subr.bf16.mxu0 %v7583_v45 }
 0x212   :  { %v841_v48 = vpop.f32.mrb[4].mxu0 }
 0x213   :  { %v842_v51 = vadd.f32 %v841_v48, %v470_v40  ;;  %v843_v54 = vpop.f32.mrb[5].mxu0 }
 0x214   :  { %v844_v59 = vadd.f32 %v843_v54, %v474_v44  ;;  %v845_v60 = vpop.f32.mrb[6].mxu0 }
 0x215   :  { %v893_v61 = vmul.f32 0.2, %v842_v51  ;;  %v846_v62 = vadd.f32 %v845_v60, %v470_v40  ;;  %v847_v0 = vpop.f32.mrb[7].mxu0 }
 0x216   :  { %v894_v4 = vmul.f32 0.2, %v844_v59  ;;  %v848_v5 = vadd.f32 %v847_v0, %v474_v44 }
 0x217   :  { %v897_v12 = vmul.f32 0.2, %v846_v62  ;;  %v9743_v17 = vmax.f32 %v842_v51, %v893_v61 }
 0x218   :  { %v898_v15 = vmul.f32 0.2, %v848_v5  ;;  %v9745_v18 = vmax.f32 %v844_v59, %v894_v4 }
 0x219   :  { %v9747_v19 = vmax.f32 %v846_v62, %v897_v12  ;;  %v948_v27 = vmul.f32 %v9743_v17, %v9743_v17 }
 0x21a   :  { %v9758_v23 = vmax.f32 %v848_v5, %v898_v15  ;;  %v949_v28 = vmul.f32 %v9745_v18, %v9745_v18 }
 0x21b   :  { %v916_v8 = vmul.f32 0.0, %v9747_v19 }
 0x21c   :  { %v917_v7 = vmul.f32 0.0, %v9758_v23 }
 0x21d   :  { %v920_v29 = vadd.f32 %v916_v8, %v9743_v17  ;;  %v952_v30 = vmul.f32 %v916_v8, %v9747_v19 }
 0x21e   :  { %v927_v35 = vadd.f32 %v917_v7, %v9745_v18  ;;  %v953_v36 = vmul.f32 %v917_v7, %v9758_v23 }
 0x21f   :  { %v921_v39 = vrot.slane %v920_v29, 4  ;;  %v956_v40 = vadd.f32 %v952_v30, %v948_v27  ;;  %v9816_v27 = vsub.s32 2, %v9405_v52 }
 0x220   :  { %v928_v43 = vrot.slane %v927_v35, 4  ;;  %v963_v44 = vadd.f32 %v953_v36, %v949_v28  ;;  %v9819_v28 = vsub.s32 3, %v9405_v52 }
 0x221   :  { %v922_v46 = vadd.f32 %v921_v39, %v920_v29  ;;  %v957_v47 = vrot.slane %v956_v40, 4  ;;  %v478_v29 = vrot.slane %v9701_v34, %v9816_v27 }
 0x222   :  { %v929_v48 = vadd.f32 %v928_v43, %v927_v35  ;;  %v964_v49 = vrot.slane %v963_v44, 4  ;;  %v482_v30 = vrot.slane %v9701_v34, %v9819_v28 }
 0x223   :  { %v923_v50 = vrot.slane %v922_v46, 2  ;;  %v958_v51 = vadd.f32 %v957_v47, %v956_v40 }
 0x224   :  { %v930_v54 = vrot.slane %v929_v48, 2  ;;  %v965_v56 = vadd.f32 %v964_v49, %v963_v44 }
 0x225   :  { %v924_v57 = vadd.f32 %v923_v50, %v922_v46  ;;  %v959_v58 = vrot.slane %v958_v51, 2 }
 0x226   :  { %v931_v59 = vadd.f32 %v930_v54, %v929_v48  ;;  %v966_v60 = vrot.slane %v965_v56, 2 }
 0x227   :  { %v925_v61 = vrot.slane %v924_v57, 1  ;;  %v960_v62 = vadd.f32 %v959_v58, %v958_v51 }
 0x228   :  { %v932_v0 = vrot.slane %v931_v59, 1  ;;  %v967_v1 = vadd.f32 %v966_v60, %v965_v56 }
 0x229   :  { %v926_v2 = vadd.f32 %v925_v61, %v924_v57  ;;  %v961_v3 = vrot.slane %v960_v62, 1 }
 0x22a   :  { %v933_v4 = vadd.f32 %v932_v0, %v931_v59  ;;  %v968_v5 = vrot.slane %v967_v1, 1 }
 0x22b   :  { %v962_v10 = vadd.f32 %v961_v3, %v960_v62  ;;  %v9801_v11 = vmul.f32 0.125, %v926_v2 }
 0x22c   :  { %v969_v12 = vadd.f32 %v968_v5, %v967_v1  ;;  %v9803_v13 = vmul.f32 0.125, %v933_v4 }
 0x22d   :  { %v1071_v14 = vmul.f32 0.125, %v962_v10  ;;  %v1075_v15 = vmul.f32 %v9801_v11, %v9801_v11 }
 0x22e   :  { %v1072_v16 = vmul.f32 0.125, %v969_v12  ;;  %v1076_v20 = vmul.f32 %v9803_v13, %v9803_v13 }
 0x22f   :  { %v1079_v21 = vsub.f32 %v1071_v14, %v1075_v15 }
 0x230   :  { %v1080_v22 = vsub.f32 %v1072_v16, %v1076_v20 }
 0x231   :  { %v1083_v9 = vmax.f32 %v1079_v21, 0.0 }
 0x232   :  { %v1084_v24 = vmax.f32 %v1080_v22, 0.0 }
 0x233   :  { %v1088_v8 = vadd.f32 1e-05, %v1083_v9 }
 0x234   :  { %v1089_v25 = vadd.f32 1e-05, %v1084_v24 }
 0x235   :  { %9094 = vrsqrt.f32 %v1088_v8 }
 0x236   :  { %9096 = vrsqrt.f32 %v1089_v25 }
 0x23f   :  { %v9809_v6 = vpop.eup %9094 }
 0x240   :  { %v9811_v26 = vpop.eup %9096 }
 0x241   :  { %v1100_v7 = vcombine.low %v9809_v6, %v9811_v26 }
 0x252   :  { %v884_v35 = vpop.f32.mrb[8].mxu0 }
 0x253   :  { %v885_v36 = vadd.f32 %v884_v35, %v478_v29  ;;  %v886_v37 = vpop.f32.mrb[9].mxu0 }
 0x254   :  { %v887_v39 = vadd.f32 %v886_v37, %v482_v30  ;;  %v888_v40 = vpop.f32.mrb[10].mxu0 }
 0x255   :  { %v895_v43 = vmul.f32 0.2, %v885_v36  ;;  %v889_v44 = vadd.f32 %v888_v40, %v478_v29  ;;  %v890_v45 = vpop.f32.mrb[11].mxu0 }
 0x256   :  { %v896_v46 = vmul.f32 0.2, %v887_v39  ;;  %v891_v47 = vadd.f32 %v890_v45, %v482_v30 }
 0x257   :  { %v899_v48 = vmul.f32 0.2, %v889_v44  ;;  %v9825_v50 = vmax.f32 %v885_v36, %v895_v43 }
 0x258   :  { %v900_v49 = vmul.f32 0.2, %v891_v47  ;;  %v9829_v54 = vmax.f32 %v887_v39, %v896_v46 }
 0x259   :  { %v9827_v51 = vmax.f32 %v889_v44, %v899_v48  ;;  %v950_v58 = vmul.f32 %v9825_v50, %v9825_v50 }
 0x25a   :  { %v9831_v56 = vmax.f32 %v891_v47, %v900_v49  ;;  %v951_v61 = vmul.f32 %v9829_v54, %v9829_v54 }
 0x25b   :  { %v918_v34 = vmul.f32 0.0, %v9827_v51 }
 0x25c   :  { %v919_v57 = vmul.f32 0.0, %v9831_v56 }
 0x25d   :  { %v934_v59 = vadd.f32 %v918_v34, %v9825_v50  ;;  %v954_v60 = vmul.f32 %v918_v34, %v9827_v51 }
 0x25e   :  { %v941_v62 = vadd.f32 %v919_v57, %v9829_v54  ;;  %v955_v0 = vmul.f32 %v919_v57, %v9831_v56 }
 0x25f   :  { %v935_v1 = vrot.slane %v934_v59, 4  ;;  %v970_v2 = vadd.f32 %v954_v60, %v950_v58 }
 0x260   :  { %v942_v3 = vrot.slane %v941_v62, 4  ;;  %v977_v4 = vadd.f32 %v955_v0, %v951_v61 }
 0x261   :  { %v936_v5 = vadd.f32 %v935_v1, %v934_v59  ;;  %v971_v10 = vrot.slane %v970_v2, 4 }
 0x262   :  { %v943_v12 = vadd.f32 %v942_v3, %v941_v62  ;;  %v978_v14 = vrot.slane %v977_v4, 4  ;;  %v1108_v3 = vrot.slane %v1100_v7, %v9437_v63 }
 0x263   :  { %v937_v15 = vrot.slane %v936_v5, 2  ;;  %v972_v16 = vadd.f32 %v971_v10, %v970_v2  ;;  %v1087_v10 = vld [vmem:[%s12112_s7] sm:$0xf] }
 0x264   :  { %v944_v20 = vrot.slane %v943_v12, 2  ;;  %v979_v21 = vadd.f32 %v978_v14, %v977_v4 }
 0x265   :  { %v938_v22 = vadd.f32 %v937_v15, %v936_v5  ;;  %v973_v9 = vrot.slane %v972_v16, 2 }
 0x266   :  { %v945_v24 = vadd.f32 %v944_v20, %v943_v12  ;;  %v980_v8 = vrot.slane %v979_v21, 2 }
 0x267   :  { %v939_v25 = vrot.slane %v938_v22, 1  ;;  %v974_v29 = vadd.f32 %v973_v9, %v972_v16 }
 0x268   :  { %v946_v30 = vrot.slane %v945_v24, 1  ;;  %v981_v35 = vadd.f32 %v980_v8, %v979_v21 }
 0x269   :  { %v940_v36 = vadd.f32 %v939_v25, %v938_v22  ;;  %v975_v37 = vrot.slane %v974_v29, 1 }
 0x26a   :  { %v947_v39 = vadd.f32 %v946_v30, %v945_v24  ;;  %v982_v40 = vrot.slane %v981_v35, 1 }
 0x26b   :  { %v976_v43 = vadd.f32 %v975_v37, %v974_v29  ;;  %v1069_v44 = vmul.f32 0.125, %v940_v36 }
 0x26c   :  { %v983_v45 = vadd.f32 %v982_v40, %v981_v35  ;;  %v1070_v46 = vmul.f32 0.125, %v947_v39 }
 0x26d   :  { %v1073_v47 = vmul.f32 0.125, %v976_v43  ;;  %v1077_v48 = vmul.f32 %v1069_v44, %v1069_v44 }
 0x26e   :  { %v1074_v49 = vmul.f32 0.125, %v983_v45  ;;  %v1078_v34 = vmul.f32 %v1070_v46, %v1070_v46 }
 0x26f   :  { %v1081_v57 = vsub.f32 %v1073_v47, %v1077_v48 }
 0x270   :  { %v1082_v58 = vsub.f32 %v1074_v49, %v1078_v34  ;;  %v1363_v49 = vld [vmem:[%s12114_s9 + $0x460] sm:$0xff]  ;;  %v1360_v34 = vld [vmem:[%s12114_s9 + $0x448] sm:$0xff] }
 0x271   :  { %v1085_v59 = vmax.f32 %v1081_v57, 0.0  ;;  %v1364_v57 = vld [vmem:[%s12114_s9 + $0x468] sm:$0xff] }
 0x272   :  { %v1086_v60 = vmax.f32 %v1082_v58, 0.0 }
 0x273   :  { %v1090_v61 = vadd.f32 1e-05, %v1085_v59 }
 0x274   :  { %v1091_v62 = vadd.f32 1e-05, %v1086_v60 }
 0x275   :  { %9098 = vrsqrt.f32 %v1090_v61 }
 0x276   :  { %9100 = vrsqrt.f32 %v1091_v62 }
 0x27f   :  { %v9099_v0 = vpop.eup %9098 }
 0x280   :  { %v9101_v1 = vpop.eup %9100 }
 0x281   :  { %v1101_v2 = vcombine.low %v9099_v0, %v9101_v1  ;;  %v1367_v0 = vld [vmem:[%s12114_s9 + $0x480] sm:$0xff] }
 0x283   :  { %v1115_v4 = vrot.slane %v1101_v2, %v9437_v63 }
 0x285   :  { %v1116_v5 = vcombine.low %v1108_v3, %v1115_v4  ;;  %v7591_v3 = vcombine.high %v1360_v34, %v1364_v57  ;;  %v1371_v4 = vld [vmem:[%s12114_s9 + $0x4a0] sm:$0xff] }
 0x286   :  { %v7596_v38 = vcombine.low %v1367_v0, %v1371_v4 }
 0x287   :  { %v1123_v12 = vrot.slane %v1116_v5, %v9437_v63  ;;  %v1368_v5 = vld [vmem:[%s12114_s9 + $0x488] sm:$0xff] }
 0x289   :  { %v1125_v14 = vmul.f32 %v1123_v12, %v1087_v10  ;;  %v1372_v10 = vld [vmem:[%s12114_s9 + $0x4a8] sm:$0xff] }
 0x28b   :  { %v1131_v15 = vrot.slane %v1125_v14, %v9408_v53  ;;  %v1135_v16 = vrot.slane %v1125_v14, %v9414_v55  ;;  %v1139_v20 = vrot.slane %v1125_v14, %v9816_v27  ;;  %v1143_v21 = vrot.slane %v1125_v14, %v9819_v28 }
 0x28c   :  { %v7590_v14 = vcombine.low %v1360_v34, %v1364_v57  ;;  %v1415_v34 = vld [vmem:[%s12114_s9 + $0x600] sm:$0xff] }
 0x28d   :  { %v1148_v6 = vmul.f32 %v1131_v15, %v9801_v11  ;;  %v1149_v26 = vmul.f32 %v1135_v16, %v9803_v13  ;;  %v1150_v7 = vmul.f32 %v1139_v20, %v1069_v44  ;;  %v1151_v22 = vmul.f32 %v1143_v21, %v1070_v46  ;;  %v1359_v46 = vld [vmem:[%s12114_s9 + $0x440] sm:$0xff] }
 0x28e   :  { %v1189_v9 = vmul.f32 %v1143_v21, %v9831_v56  ;;  %v1183_v24 = vmul.f32 %v1135_v16, %v9745_v18  ;;  %v1187_v8 = vmul.f32 %v1135_v16, %v9758_v23  ;;  %v1182_v25 = vmul.f32 %v1131_v15, %v9743_v17  ;;  %v1126_v18 = vld [vmem:[%s12113_s8] sm:$0xf] }
 0x28f   :  { %v1156_v29 = vcombine.low %v1148_v6, %v1149_v26  ;;  %v1157_v30 = vcombine.low %v1150_v7, %v1151_v22  ;;  %v1186_v35 = vmul.f32 %v1131_v15, %v9747_v19  ;;  %v1185_v36 = vmul.f32 %v1143_v21, %v9829_v54  ;;  %v1383_v6 = vld [vmem:[%s12114_s9 + $0x500] sm:$0xff]  ;;  %v1384_v7 = vld [vmem:[%s12114_s9 + $0x508] sm:$0xff] }
 0x290   :  { %v1184_v11 = vmul.f32 %v1139_v20, %v9825_v50  ;;  %v1188_v13 = vmul.f32 %v1139_v20, %v9827_v51  ;;  %v7589_v2 = vcombine.high %v1359_v46, %v1363_v49  ;;  %v7588_v12 = vcombine.low %v1359_v46, %v1363_v49  ;;  %v1375_v20 = vld [vmem:[%s12114_s9 + $0x4c0] sm:$0xff]  ;;  %v1388_v22 = vld [vmem:[%s12114_s9 + $0x528] sm:$0xff] }
 0x291   :  { %v1164_v37 = vrot.slane %v1156_v29, %v9437_v63  ;;  %v1171_v56 = vrot.slane %v1157_v30, %v9437_v63  ;;  %v7597_v15 = vcombine.high %v1367_v0, %v1371_v4  ;;  %v7599_v16 = vcombine.high %v1368_v5, %v1372_v10  ;;  %v1387_v26 = vld [vmem:[%s12114_s9 + $0x520] sm:$0xff] }
 0x292   :  { %v7607_v21 = vcombine.high %v1376_v32, %v1380_v33  ;;  %v1391_v29 = vld [vmem:[%s12114_s9 + $0x540] sm:$0xff] }
 0x293   :  { %v1172_v39 = vcombine.low %v1164_v37, %v1171_v56  ;;  %v1395_v30 = vld [vmem:[%s12114_s9 + $0x560] sm:$0xff] }
 0x294   :  { %v7621_v37 = vcombine.high %v1391_v29, %v1395_v30  ;;  %v1419_v57 = vld [vmem:[%s12114_s9 + $0x620] sm:$0xff] }
 0x295   :  { %v1179_v17 = vrot.slane %v1172_v39, %v9437_v63  ;;  %v1399_v39 = vld [vmem:[%s12114_s9 + $0x580] sm:$0xff] }
 0x297   :  { %v1181_v23 = vsub.f32 %v1126_v18, %v1179_v17  ;;  %v1403_v18 = vld [vmem:[%s12114_s9 + $0x5a0] sm:$0xff]  ;;  %v1400_v17 = vld [vmem:[%s12114_s9 + $0x588] sm:$0xff] }
 0x298   :  { %v7628_v46 = vcombine.low %v1399_v39, %v1403_v18 }
 0x299   :  { %v1206_v19 = vrot.slane %v1181_v23, %v9819_v28  ;;  %v1198_v54 = vrot.slane %v1181_v23, %v9414_v55  ;;  %v1194_v50 = vrot.slane %v1181_v23, %v9408_v53  ;;  %v1202_v51 = vrot.slane %v1181_v23, %v9816_v27  ;;  %v1404_v23 = vld [vmem:[%s12114_s9 + $0x5a8] sm:$0xff] }
 0x29b   :  { %v1218_v40 = vadd.f32 %v1206_v19, %v1189_v9  ;;  %v1212_v43 = vadd.f32 %v1198_v54, %v1183_v24  ;;  %v1216_v44 = vadd.f32 %v1198_v54, %v1187_v8  ;;  %v1211_v45 = vadd.f32 %v1194_v50, %v1182_v25 }
 0x29c   :  { %v1215_v47 = vadd.f32 %v1194_v50, %v1186_v35  ;;  %v1214_v48 = vadd.f32 %v1206_v19, %v1185_v36  ;;  %v1213_v58 = vadd.f32 %v1202_v51, %v1184_v11  ;;  %v1217_v59 = vadd.f32 %v1202_v51, %v1188_v13  ;;  %v1392_v35 = vld [vmem:[%s12114_s9 + $0x548] sm:$0xff] }
 0x29d   :  { %v9888_v60 = vpack.c.bf16 %v1216_v44, %v1212_v43  ;;  %v7604_v9 = vcombine.low %v1375_v20, %v1379_v31  ;;  %v7606_v24 = vcombine.low %v1376_v32, %v1380_v33  ;;  %v7613_v8 = vcombine.high %v1383_v6, %v1387_v26  ;;  %v1396_v36 = vld [vmem:[%s12114_s9 + $0x568] sm:$0xff]  ;;  %v1411_v43 = vld [vmem:[%s12114_s9 + $0x5e0] sm:$0xff] }
 0x29e   :  { %v9890_v61 = vpack.c.bf16 %v1215_v47, %v1211_v45  ;;  %v9892_v62 = vpack.c.bf16 %v1218_v40, %v1214_v48  ;;  %v9897_v1 = vpack.c.bf16 %v1217_v59, %v1213_v58  ;;  %v7615_v25 = vcombine.high %v1384_v7, %v1388_v22  ;;  %v1407_v40 = vld [vmem:[%s12114_s9 + $0x5c0] sm:$0xff]  ;;  %v1408_v44 = vld [vmem:[%s12114_s9 + $0x5c8] sm:$0xff] }
 0x29f   :  { %2833 = vmatprep.mubr.bf16.mxu1 %v9888_v60  ;;  %2919 = vmatprep.mubr.bf16.mxu0 %v9888_v60  ;;  %v7612_v11 = vcombine.low %v1383_v6, %v1387_v26  ;;  %v7614_v13 = vcombine.low %v1384_v7, %v1388_v22  ;;  %v7623_v56 = vcombine.high %v1392_v35, %v1396_v36  ;;  %v1412_v45 = vld [vmem:[%s12114_s9 + $0x5e8] sm:$0xff]  ;;  %v1431_v32 = vld [vmem:[%s12114_s9 + $0x680] sm:$0xff] }
 0x2a0   :  { %2834 = vmatmul.mubr.bf16.vlgmr.msra.gmra.mrb[0].mxu1 %v9890_v61  ;;  %2920 = vmatmul.mubr.bf16.vlgmr.msra.gmra.mrb[12].mxu0 %v9890_v61  ;;  %v7620_v19 = vcombine.low %v1391_v29, %v1395_v30  ;;  %v7622_v54 = vcombine.low %v1392_v35, %v1396_v36  ;;  %v7629_v50 = vcombine.high %v1399_v39, %v1403_v18  ;;  %v1416_v58 = vld [vmem:[%s12114_s9 + $0x608] sm:$0xff]  ;;  %v1435_v33 = vld [vmem:[%s12114_s9 + $0x6a0] sm:$0xff] }
 0x2a1   :  { %2845 = vmatpush1.bf16.msra.mxu1 %v7580_v41  ;;  %2931 = vmatpush1.bf16.msra.mxu0 %v7582_v42  ;;  %v7598_v41 = vcombine.low %v1368_v5, %v1372_v10  ;;  %v7605_v42 = vcombine.high %v1375_v20, %v1379_v31  ;;  %v7631_v51 = vcombine.high %v1400_v17, %v1404_v23  ;;  %v1420_v59 = vld [vmem:[%s12114_s9 + $0x628] sm:$0xff]  ;;  %v1423_v5 = vld [vmem:[%s12114_s9 + $0x640] sm:$0xff] }
 0x2a2   :  { %2876 = vmatprep.mubr.bf16.mxu1 %v9892_v62  ;;  %2962 = vmatprep.mubr.bf16.mxu0 %v9892_v62  ;;  %v7630_v47 = vcombine.low %v1400_v17, %v1404_v23  ;;  %v7637_v48 = vcombine.high %v1407_v40, %v1411_v43  ;;  %v7639_v49 = vcombine.high %v1408_v44, %v1412_v45  ;;  %v1427_v10 = vld [vmem:[%s12114_s9 + $0x660] sm:$0xff] }
 0x2a3   :  { %2846 = vmatprep.subr.bf16.mxu1 %v7589_v2  ;;  %2932 = vmatprep.subr.bf16.mxu0 %v7591_v3  ;;  %v7636_v0 = vcombine.low %v1407_v40, %v1411_v43  ;;  %v7638_v2 = vcombine.low %v1408_v44, %v1412_v45  ;;  %v7645_v3 = vcombine.high %v1415_v34, %v1419_v57  ;;  %v1439_v7 = vld [vmem:[%s12114_s9 + $0x6c0] sm:$0xff] }
 0x2a4   :  { %v7647_v4 = vcombine.high %v1416_v58, %v1420_v59  ;;  %v7653_v20 = vcombine.high %v1423_v5, %v1427_v10  ;;  %v7661_v6 = vcombine.high %v1431_v32, %v1435_v33  ;;  %v1443_v22 = vld [vmem:[%s12114_s9 + $0x6e0] sm:$0xff] }
 0x2a5   :  { %2847 = vmatpush1.bf16.msra.mxu1 %v7588_v12  ;;  %2933 = vmatpush1.bf16.msra.mxu0 %v7590_v14  ;;  %v1424_v12 = vld [vmem:[%s12114_s9 + $0x648] sm:$0xff]  ;;  %v7669_v29 = vcombine.high %v1439_v7, %v1443_v22  ;;  %v1447_v35 = vld [vmem:[%s12114_s9 + $0x700] sm:$0xff] }
 0x2a6   :  { %2848 = vmatprep.subr.bf16.mxu1 %v7597_v15  ;;  %2934 = vmatprep.subr.bf16.mxu0 %v7599_v16  ;;  %v1428_v14 = vld [vmem:[%s12114_s9 + $0x668] sm:$0xff]  ;;  %v7644_v15 = vcombine.low %v1415_v34, %v1419_v57  ;;  %v7646_v16 = vcombine.low %v1416_v58, %v1420_v59  ;;  %v1451_v36 = vld [vmem:[%s12114_s9 + $0x720] sm:$0xff] }
 0x2a7   :  { %v7655_v31 = vcombine.high %v1424_v12, %v1428_v14  ;;  %v7677_v39 = vcombine.high %v1447_v35, %v1451_v36  ;;  %v1455_v17 = vld [vmem:[%s12114_s9 + $0x740] sm:$0xff] }
 0x2a8   :  { %v1459_v23 = vld [vmem:[%s12114_s9 + $0x760] sm:$0xff] }
 0x2a9   :  { %2849 = vmatpush1.bf16.msra.mxu1 %v7596_v38  ;;  %2935 = vmatpush1.bf16.msra.mxu0 %v7598_v41  ;;  %v1432_v38 = vld [vmem:[%s12114_s9 + $0x688] sm:$0xff]  ;;  %v7685_v40 = vcombine.high %v1455_v17, %v1459_v23  ;;  %v1463_v44 = vld [vmem:[%s12114_s9 + $0x780] sm:$0xff] }
 0x2aa   :  { %2850 = vmatprep.subr.bf16.mxu1 %v7605_v42  ;;  %2936 = vmatprep.subr.bf16.mxu0 %v7607_v21  ;;  %v1436_v41 = vld [vmem:[%s12114_s9 + $0x6a8] sm:$0xff]  ;;  %v7652_v42 = vcombine.low %v1423_v5, %v1427_v10  ;;  %v7654_v21 = vcombine.low %v1424_v12, %v1428_v14  ;;  %v1467_v45 = vld [vmem:[%s12114_s9 + $0x7a0] sm:$0xff]  ;;  %v1225_v12 = vld [vmem:[%s12114_s9 + $0x10] sm:$0xff] }
 0x2ab   :  { %v7663_v26 = vcombine.high %v1432_v38, %v1436_v41  ;;  %v7693_v34 = vcombine.high %v1463_v44, %v1467_v45  ;;  %v1471_v58 = vld [vmem:[%s12114_s9 + $0x7c0] sm:$0xff]  ;;  %v1229_v14 = vld [vmem:[%s12114_s9 + $0x30] sm:$0xff] }
 0x2ac   :  { %v1475_v59 = vld [vmem:[%s12114_s9 + $0x7e0] sm:$0xff] }
 0x2ad   :  { %2851 = vmatpush1.bf16.msra.mxu1 %v7604_v9  ;;  %2937 = vmatpush1.bf16.msra.mxu0 %v7606_v24  ;;  %v1440_v9 = vld [vmem:[%s12114_s9 + $0x6c8] sm:$0xff]  ;;  %v7701_v5 = vcombine.high %v1471_v58, %v1475_v59 }
 0x2ae   :  { %2852 = vmatprep.subr.bf16.mxu1 %v7613_v8  ;;  %2938 = vmatprep.subr.bf16.mxu0 %v7615_v25  ;;  %v1444_v24 = vld [vmem:[%s12114_s9 + $0x6e8] sm:$0xff]  ;;  %v7660_v8 = vcombine.low %v1431_v32, %v1435_v33  ;;  %v7662_v25 = vcombine.low %v1432_v38, %v1436_v41  ;;  %v7457_v32 = vcombine.high %v1225_v12, %v1229_v14  ;;  %v1233_v38 = vld [vmem:[%s12114_s9 + $0x50] sm:$0xff] }
 0x2af   :  { %v7671_v30 = vcombine.high %v1440_v9, %v1444_v24  ;;  %v1237_v41 = vld [vmem:[%s12114_s9 + $0x70] sm:$0xff] }
 0x2b1   :  { %2853 = vmatpush1.bf16.msra.mxu1 %v7612_v11  ;;  %2939 = vmatpush1.bf16.msra.mxu0 %v7614_v13  ;;  %v1448_v11 = vld [vmem:[%s12114_s9 + $0x708] sm:$0xff] }
 0x2b2   :  { %2854 = vmatprep.subr.bf16.mxu1 %v7621_v37  ;;  %2940 = vmatprep.subr.bf16.mxu0 %v7623_v56  ;;  %v1452_v13 = vld [vmem:[%s12114_s9 + $0x728] sm:$0xff]  ;;  %v7668_v37 = vcombine.low %v1439_v7, %v1443_v22  ;;  %v7670_v56 = vcombine.low %v1440_v9, %v1444_v24  ;;  %v7465_v7 = vcombine.high %v1233_v38, %v1237_v41  ;;  %v1241_v9 = vld [vmem:[%s12114_s9 + $0x90] sm:$0xff] }
 0x2b3   :  { %v7679_v18 = vcombine.high %v1448_v11, %v1452_v13  ;;  %v1245_v24 = vld [vmem:[%s12114_s9 + $0xb0] sm:$0xff] }
 0x2b5   :  { %2855 = vmatpush1.bf16.msra.mxu1 %v7620_v19  ;;  %2941 = vmatpush1.bf16.msra.mxu0 %v7622_v54  ;;  %v1456_v19 = vld [vmem:[%s12114_s9 + $0x748] sm:$0xff] }
 0x2b6   :  { %2856 = vmatprep.subr.bf16.mxu1 %v7629_v50  ;;  %2942 = vmatprep.subr.bf16.mxu0 %v7631_v51  ;;  %v1460_v54 = vld [vmem:[%s12114_s9 + $0x768] sm:$0xff]  ;;  %v7676_v50 = vcombine.low %v1447_v35, %v1451_v36  ;;  %v7678_v51 = vcombine.low %v1448_v11, %v1452_v13  ;;  %v7473_v35 = vcombine.high %v1241_v9, %v1245_v24  ;;  %v1249_v11 = vld [vmem:[%s12114_s9 + $0xd0] sm:$0xff] }
 0x2b7   :  { %v7687_v43 = vcombine.high %v1456_v19, %v1460_v54  ;;  %v1253_v13 = vld [vmem:[%s12114_s9 + $0xf0] sm:$0xff] }
 0x2b9   :  { %2857 = vmatpush1.bf16.msra.mxu1 %v7628_v46  ;;  %2943 = vmatpush1.bf16.msra.mxu0 %v7630_v47  ;;  %v1464_v46 = vld [vmem:[%s12114_s9 + $0x788] sm:$0xff] }
 0x2ba   :  { %2858 = vmatprep.subr.bf16.mxu1 %v7637_v48  ;;  %2944 = vmatprep.subr.bf16.mxu0 %v7639_v49  ;;  %v1468_v47 = vld [vmem:[%s12114_s9 + $0x7a8] sm:$0xff]  ;;  %v7684_v48 = vcombine.low %v1455_v17, %v1459_v23  ;;  %v7686_v49 = vcombine.low %v1456_v19, %v1460_v54  ;;  %v1257_v23 = vld [vmem:[%s12114_s9 + $0x110] sm:$0xff]  ;;  %v1258_v54 = vld [vmem:[%s12114_s9 + $0x118] sm:$0xff] }
 0x2bb   :  { %v7695_v57 = vcombine.high %v1464_v46, %v1468_v47  ;;  %v1261_v19 = vld [vmem:[%s12114_s9 + $0x130] sm:$0xff] }
 0x2bd   :  { %2859 = vmatpush1.bf16.msra.mxu1 %v7636_v0  ;;  %2945 = vmatpush1.bf16.msra.mxu0 %v7638_v2  ;;  %v1472_v0 = vld [vmem:[%s12114_s9 + $0x7c8] sm:$0xff] }
 0x2be   :  { %2860 = vmatprep.subr.bf16.mxu1 %v7645_v3  ;;  %2946 = vmatprep.subr.bf16.mxu0 %v7647_v4  ;;  %v1476_v2 = vld [vmem:[%s12114_s9 + $0x7e8] sm:$0xff]  ;;  %v7692_v3 = vcombine.low %v1463_v44, %v1467_v45  ;;  %v7694_v4 = vcombine.low %v1464_v46, %v1468_v47  ;;  %v1265_v45 = vld [vmem:[%s12114_s9 + $0x150] sm:$0xff]  ;;  %v1266_v47 = vld [vmem:[%s12114_s9 + $0x158] sm:$0xff] }
 0x2bf   :  { %v7703_v10 = vcombine.high %v1472_v0, %v1476_v2  ;;  %v1269_v46 = vld [vmem:[%s12114_s9 + $0x170] sm:$0xff] }
 0x2c1   :  { %2861 = vmatpush1.bf16.msra.mxu1 %v7644_v15  ;;  %2947 = vmatpush1.bf16.msra.mxu0 %v7646_v16  ;;  %v1226_v15 = vld [vmem:[%s12114_s9 + $0x18] sm:$0xff] }
 0x2c2   :  { %2862 = vmatprep.subr.bf16.mxu1 %v7653_v20  ;;  %2948 = vmatprep.subr.bf16.mxu0 %v7655_v31  ;;  %v1230_v16 = vld [vmem:[%s12114_s9 + $0x38] sm:$0xff]  ;;  %v7700_v20 = vcombine.low %v1471_v58, %v1475_v59  ;;  %v7702_v31 = vcombine.low %v1472_v0, %v1476_v2  ;;  %v1273_v59 = vld [vmem:[%s12114_s9 + $0x190] sm:$0xff] }
 0x2c3   :  { %v7459_v33 = vcombine.high %v1226_v15, %v1230_v16  ;;  %v1277_v0 = vld [vmem:[%s12114_s9 + $0x1b0] sm:$0xff]  ;;  %v1274_v2 = vld [vmem:[%s12114_s9 + $0x198] sm:$0xff] }
 0x2c5   :  { %2863 = vmatpush1.bf16.msra.mxu1 %v7652_v42  ;;  %2949 = vmatpush1.bf16.msra.mxu0 %v7654_v21  ;;  %v1234_v42 = vld [vmem:[%s12114_s9 + $0x58] sm:$0xff] }
 0x2c6   :  { %2864 = vmatprep.subr.bf16.mxu1 %v7661_v6  ;;  %2950 = vmatprep.subr.bf16.mxu0 %v7663_v26  ;;  %v1238_v21 = vld [vmem:[%s12114_s9 + $0x78] sm:$0xff]  ;;  %v7456_v6 = vcombine.low %v1225_v12, %v1229_v14  ;;  %v7458_v26 = vcombine.low %v1226_v15, %v1230_v16  ;;  %v1281_v14 = vld [vmem:[%s12114_s9 + $0x1d0] sm:$0xff] }
 0x2c7   :  { %v7467_v22 = vcombine.high %v1234_v42, %v1238_v21  ;;  %v1285_v15 = vld [vmem:[%s12114_s9 + $0x1f0] sm:$0xff]  ;;  %v1282_v16 = vld [vmem:[%s12114_s9 + $0x1d8] sm:$0xff] }
 0x2c9   :  { %2865 = vmatpush1.bf16.msra.mxu1 %v7660_v8  ;;  %2951 = vmatpush1.bf16.msra.mxu0 %v7662_v25  ;;  %v1242_v8 = vld [vmem:[%s12114_s9 + $0x98] sm:$0xff] }
 0x2ca   :  { %2866 = vmatprep.subr.bf16.mxu1 %v7669_v29  ;;  %2952 = vmatprep.subr.bf16.mxu0 %v7671_v30  ;;  %v1246_v25 = vld [vmem:[%s12114_s9 + $0xb8] sm:$0xff]  ;;  %v7464_v29 = vcombine.low %v1233_v38, %v1237_v41  ;;  %v7466_v30 = vcombine.low %v1234_v42, %v1238_v21  ;;  %v1289_v41 = vld [vmem:[%s12114_s9 + $0x210] sm:$0xff] }
 0x2cb   :  { %v7475_v36 = vcombine.high %v1242_v8, %v1246_v25  ;;  %v1293_v42 = vld [vmem:[%s12114_s9 + $0x230] sm:$0xff]  ;;  %v1290_v21 = vld [vmem:[%s12114_s9 + $0x218] sm:$0xff] }
 0x2cd   :  { %2867 = vmatpush1.bf16.msra.mxu1 %v7668_v37  ;;  %2953 = vmatpush1.bf16.msra.mxu0 %v7670_v56  ;;  %v1250_v37 = vld [vmem:[%s12114_s9 + $0xd8] sm:$0xff]  ;;  %v7472_v56 = vcombine.low %v1241_v9, %v1245_v24  ;;  %v1297_v24 = vld [vmem:[%s12114_s9 + $0x250] sm:$0xff] }
 0x2ce   :  { %2868 = vmatprep.subr.bf16.mxu1 %v7677_v39  ;;  %2954 = vmatprep.subr.bf16.mxu0 %v7679_v18  ;;  %v7474_v39 = vcombine.low %v1242_v8, %v1246_v25  ;;  %v7481_v18 = vcombine.high %v1249_v11, %v1253_v13  ;;  %v1301_v8 = vld [vmem:[%s12114_s9 + $0x270] sm:$0xff]  ;;  %v1298_v25 = vld [vmem:[%s12114_s9 + $0x258] sm:$0xff] }
 0x2d1   :  { %2869 = vmatpush1.bf16.msra.mxu1 %v7676_v50  ;;  %2955 = vmatpush1.bf16.msra.mxu0 %v7678_v51  ;;  %v1262_v50 = vld [vmem:[%s12114_s9 + $0x138] sm:$0xff]  ;;  %v7480_v51 = vcombine.low %v1249_v11, %v1253_v13  ;;  %v1305_v13 = vld [vmem:[%s12114_s9 + $0x290] sm:$0xff] }
 0x2d2   :  { %2870 = vmatprep.subr.bf16.mxu1 %v7685_v40  ;;  %2956 = vmatprep.subr.bf16.mxu0 %v7687_v43  ;;  %v7489_v43 = vcombine.high %v1257_v23, %v1261_v19  ;;  %v7491_v44 = vcombine.high %v1258_v54, %v1262_v50 }
 0x2d5   :  { %2871 = vmatpush1.bf16.msra.mxu1 %v7684_v48  ;;  %2957 = vmatpush1.bf16.msra.mxu0 %v7686_v49  ;;  %v1270_v48 = vld [vmem:[%s12114_s9 + $0x178] sm:$0xff]  ;;  %v7488_v49 = vcombine.low %v1257_v23, %v1261_v19  ;;  %v1313_v19 = vld [vmem:[%s12114_s9 + $0x2d0] sm:$0xff] }
 0x2d6   :  { %2872 = vmatprep.subr.bf16.mxu1 %v7693_v34  ;;  %2958 = vmatprep.subr.bf16.mxu0 %v7695_v57  ;;  %v7490_v34 = vcombine.low %v1258_v54, %v1262_v50  ;;  %v7497_v57 = vcombine.high %v1265_v45, %v1269_v46  ;;  %v7499_v58 = vcombine.high %v1266_v47, %v1270_v48  ;;  %v1317_v54 = vld [vmem:[%s12114_s9 + $0x2f0] sm:$0xff]  ;;  %v1314_v50 = vld [vmem:[%s12114_s9 + $0x2d8] sm:$0xff] }
 0x2d9   :  { %2873 = vmatpush1.bf16.msra.mxu1 %v7692_v3  ;;  %2959 = vmatpush1.bf16.msra.mxu0 %v7694_v4  ;;  %v1278_v3 = vld [vmem:[%s12114_s9 + $0x1b8] sm:$0xff]  ;;  %v7496_v4 = vcombine.low %v1265_v45, %v1269_v46  ;;  %v1321_v46 = vld [vmem:[%s12114_s9 + $0x310] sm:$0xff] }
 0x2da   :  { %2874 = vmatprep.subr.bf16.mxu1 %v7701_v5  ;;  %2960 = vmatprep.subr.bf16.mxu0 %v7703_v10  ;;  %v7498_v5 = vcombine.low %v1266_v47, %v1270_v48  ;;  %v7505_v10 = vcombine.high %v1273_v59, %v1277_v0  ;;  %v7507_v12 = vcombine.high %v1274_v2, %v1278_v3  ;;  %v1325_v47 = vld [vmem:[%s12114_s9 + $0x330] sm:$0xff]  ;;  %v1322_v48 = vld [vmem:[%s12114_s9 + $0x318] sm:$0xff] }
 0x2dd   :  { %2875 = vmatpush1.bf16.msra.mxu1 %v7700_v20  ;;  %2961 = vmatpush1.bf16.msra.mxu0 %v7702_v31  ;;  %v1286_v20 = vld [vmem:[%s12114_s9 + $0x1f8] sm:$0xff]  ;;  %v7504_v31 = vcombine.low %v1273_v59, %v1277_v0  ;;  %v1329_v0 = vld [vmem:[%s12114_s9 + $0x350] sm:$0xff] }
 0x2de   :  { %2973 = vmatprep.subr.bf16.mxu1 %v7457_v32  ;;  %3059 = vmatprep.subr.bf16.mxu0 %v7459_v33  ;;  %v7506_v32 = vcombine.low %v1274_v2, %v1278_v3  ;;  %v7513_v33 = vcombine.high %v1281_v14, %v1285_v15  ;;  %v7515_v38 = vcombine.high %v1282_v16, %v1286_v20  ;;  %v1333_v2 = vld [vmem:[%s12114_s9 + $0x370] sm:$0xff]  ;;  %v1330_v3 = vld [vmem:[%s12114_s9 + $0x358] sm:$0xff] }
 0x2e0   :  { %2877 = vmatmul.mubr.bf16.vlgmr.msra.gmra.mrb[0].mxu1 %v9897_v1  ;;  %2963 = vmatmul.mubr.bf16.vlgmr.msra.gmra.mrb[12].mxu0 %v9897_v1 }
 0x2e1   :  { %2974 = vmatpush1.bf16.msra.mxu1 %v7456_v6  ;;  %3005 = vmatprep.mubr.bf16.mxu1 %v9888_v60  ;;  %v1294_v6 = vld [vmem:[%s12114_s9 + $0x238] sm:$0xff] }
 0x2e2   :  { %3060 = vmatpush1.bf16.msra.mxu0 %v7458_v26  ;;  %3091 = vmatprep.mubr.bf16.mxu0 %v9888_v60  ;;  %v1254_v60 = vld [vmem:[%s12114_s9 + $0xf8] sm:$0xff]  ;;  %v7512_v26 = vcombine.low %v1281_v14, %v1285_v15  ;;  %v7523_v9 = vcombine.high %v1290_v21, %v1294_v6  ;;  %v1337_v15 = vld [vmem:[%s12114_s9 + $0x390] sm:$0xff] }
 0x2e3   :  { %2975 = vmatprep.subr.bf16.mxu1 %v7465_v7  ;;  %3061 = vmatprep.subr.bf16.mxu0 %v7467_v22  ;;  %v7483_v17 = vcombine.high %v1250_v37, %v1254_v60  ;;  %v7482_v40 = vcombine.low %v1250_v37, %v1254_v60  ;;  %v7514_v7 = vcombine.low %v1282_v16, %v1286_v20  ;;  %v1309_v37 = vld [vmem:[%s12114_s9 + $0x2b0] sm:$0xff]  ;;  %v1306_v60 = vld [vmem:[%s12114_s9 + $0x298] sm:$0xff] }
 0x2e4   :  { %v7521_v22 = vcombine.high %v1289_v41, %v1293_v42  ;;  %v1341_v16 = vld [vmem:[%s12114_s9 + $0x3b0] sm:$0xff]  ;;  %v1338_v20 = vld [vmem:[%s12114_s9 + $0x398] sm:$0xff] }
 0x2e5   :  { %2976 = vmatpush1.bf16.msra.mxu1 %v7464_v29  ;;  %v1302_v29 = vld [vmem:[%s12114_s9 + $0x278] sm:$0xff] }
 0x2e6   :  { %3062 = vmatpush1.bf16.msra.mxu0 %v7466_v30  ;;  %2977 = vmatprep.subr.bf16.mxu1 %v7473_v35  ;;  %v7520_v30 = vcombine.low %v1289_v41, %v1293_v42  ;;  %v7522_v35 = vcombine.low %v1290_v21, %v1294_v6  ;;  %v7531_v11 = vcombine.high %v1298_v25, %v1302_v29  ;;  %v1345_v42 = vld [vmem:[%s12114_s9 + $0x3d0] sm:$0xff]  ;;  %v1346_v6 = vld [vmem:[%s12114_s9 + $0x3d8] sm:$0xff] }
 0x2e7   :  { %3063 = vmatprep.subr.bf16.mxu0 %v7475_v36  ;;  %v7529_v36 = vcombine.high %v1297_v24, %v1301_v8  ;;  %v1349_v21 = vld [vmem:[%s12114_s9 + $0x3f0] sm:$0xff] }
 0x2e9   :  { %2978 = vmatpush1.bf16.msra.mxu1 %v7472_v56  ;;  %v1310_v56 = vld [vmem:[%s12114_s9 + $0x2b8] sm:$0xff] }
 0x2ea   :  { %3064 = vmatpush1.bf16.msra.mxu0 %v7474_v39  ;;  %2979 = vmatprep.subr.bf16.mxu1 %v7481_v18  ;;  %v7528_v39 = vcombine.low %v1297_v24, %v1301_v8  ;;  %v7530_v18 = vcombine.low %v1298_v25, %v1302_v29  ;;  %v7539_v23 = vcombine.high %v1306_v60, %v1310_v56  ;;  %v1353_v8 = vld [vmem:[%s12114_s9 + $0x410] sm:$0xff]  ;;  %v1354_v29 = vld [vmem:[%s12114_s9 + $0x418] sm:$0xff] }
 0x2eb   :  { %3065 = vmatprep.subr.bf16.mxu0 %v7483_v17  ;;  %v7537_v17 = vcombine.high %v1305_v13, %v1309_v37  ;;  %v1357_v25 = vld [vmem:[%s12114_s9 + $0x430] sm:$0xff] }
 0x2ed   :  { %2980 = vmatpush1.bf16.msra.mxu1 %v7480_v51  ;;  %v1318_v51 = vld [vmem:[%s12114_s9 + $0x2f8] sm:$0xff] }
 0x2ee   :  { %3066 = vmatpush1.bf16.msra.mxu0 %v7482_v40  ;;  %2981 = vmatprep.subr.bf16.mxu1 %v7489_v43  ;;  %v7536_v40 = vcombine.low %v1305_v13, %v1309_v37  ;;  %v7538_v43 = vcombine.low %v1306_v60, %v1310_v56  ;;  %v7547_v45 = vcombine.high %v1314_v50, %v1318_v51  ;;  %v1361_v37 = vld [vmem:[%s12114_s9 + $0x450] sm:$0xff] }
 0x2ef   :  { %3067 = vmatprep.subr.bf16.mxu0 %v7491_v44  ;;  %v7545_v44 = vcombine.high %v1313_v19, %v1317_v54  ;;  %v1365_v60 = vld [vmem:[%s12114_s9 + $0x470] sm:$0xff]  ;;  %v7584_v56 = vcombine.low %v1353_v8, %v1357_v25 }
 0x2f1   :  { %2982 = vmatpush1.bf16.msra.mxu1 %v7488_v49  ;;  %v1326_v49 = vld [vmem:[%s12114_s9 + $0x338] sm:$0xff] }
 0x2f2   :  { %3068 = vmatpush1.bf16.msra.mxu0 %v7490_v34  ;;  %2983 = vmatprep.subr.bf16.mxu1 %v7497_v57  ;;  %v7544_v34 = vcombine.low %v1313_v19, %v1317_v54  ;;  %v7546_v57 = vcombine.low %v1314_v50, %v1318_v51  ;;  %v7555_v59 = vcombine.high %v1322_v48, %v1326_v49  ;;  %v1369_v19 = vld [vmem:[%s12114_s9 + $0x490] sm:$0xff]  ;;  %v1370_v51 = vld [vmem:[%s12114_s9 + $0x498] sm:$0xff] }
 0x2f3   :  { %3069 = vmatprep.subr.bf16.mxu0 %v7499_v58  ;;  %v7553_v58 = vcombine.high %v1321_v46, %v1325_v47  ;;  %v1373_v54 = vld [vmem:[%s12114_s9 + $0x4b0] sm:$0xff] }
 0x2f5   :  { %2984 = vmatpush1.bf16.msra.mxu1 %v7496_v4  ;;  %v1334_v4 = vld [vmem:[%s12114_s9 + $0x378] sm:$0xff] }
 0x2f6   :  { %3070 = vmatpush1.bf16.msra.mxu0 %v7498_v5  ;;  %2985 = vmatprep.subr.bf16.mxu1 %v7505_v10  ;;  %v7552_v5 = vcombine.low %v1321_v46, %v1325_v47  ;;  %v7554_v10 = vcombine.low %v1322_v48, %v1326_v49  ;;  %v7563_v14 = vcombine.high %v1330_v3, %v1334_v4  ;;  %v1377_v47 = vld [vmem:[%s12114_s9 + $0x4d0] sm:$0xff]  ;;  %v1382_v49 = vld [vmem:[%s12114_s9 + $0x4f8] sm:$0xff] }
 0x2f7   :  { %3071 = vmatprep.subr.bf16.mxu0 %v7507_v12  ;;  %v7561_v12 = vcombine.high %v1329_v0, %v1333_v2  ;;  %v1381_v48 = vld [vmem:[%s12114_s9 + $0x4f0] sm:$0xff] }
 0x2f9   :  { %2986 = vmatpush1.bf16.msra.mxu1 %v7504_v31  ;;  %v1342_v31 = vld [vmem:[%s12114_s9 + $0x3b8] sm:$0xff] }
 0x2fa   :  { %3072 = vmatpush1.bf16.msra.mxu0 %v7506_v32  ;;  %2987 = vmatprep.subr.bf16.mxu1 %v7513_v33  ;;  %v7560_v32 = vcombine.low %v1329_v0, %v1333_v2  ;;  %v7562_v33 = vcombine.low %v1330_v3, %v1334_v4  ;;  %v7571_v41 = vcombine.high %v1338_v20, %v1342_v31  ;;  %v1389_v0 = vld [vmem:[%s12114_s9 + $0x530] sm:$0xff]  ;;  %v1386_v2 = vld [vmem:[%s12114_s9 + $0x518] sm:$0xff] }
 0x2fb   :  { %3073 = vmatprep.subr.bf16.mxu0 %v7515_v38  ;;  %v7569_v38 = vcombine.high %v1337_v15, %v1341_v16  ;;  %v1390_v3 = vld [vmem:[%s12114_s9 + $0x538] sm:$0xff]  ;;  %v7608_v4 = vcombine.low %v1377_v47, %v1381_v48 }
 0x2fd   :  { %2988 = vmatpush1.bf16.msra.mxu1 %v7512_v26  ;;  %v1350_v26 = vld [vmem:[%s12114_s9 + $0x3f8] sm:$0xff] }
 0x2fe   :  { %3074 = vmatpush1.bf16.msra.mxu0 %v7514_v7  ;;  %2989 = vmatprep.subr.bf16.mxu1 %v7521_v22  ;;  %v7568_v7 = vcombine.low %v1337_v15, %v1341_v16  ;;  %v7570_v22 = vcombine.low %v1338_v20, %v1342_v31  ;;  %v7579_v24 = vcombine.high %v1346_v6, %v1350_v26  ;;  %v1397_v15 = vld [vmem:[%s12114_s9 + $0x570] sm:$0xff]  ;;  %v1394_v16 = vld [vmem:[%s12114_s9 + $0x558] sm:$0xff] }
 0x2ff   :  { %3075 = vmatprep.subr.bf16.mxu0 %v7523_v9  ;;  %v7577_v9 = vcombine.high %v1345_v42, %v1349_v21  ;;  %v1398_v20 = vld [vmem:[%s12114_s9 + $0x578] sm:$0xff] }
 0x301   :  { %2990 = vmatpush1.bf16.msra.mxu1 %v7520_v30  ;;  %v1358_v30 = vld [vmem:[%s12114_s9 + $0x438] sm:$0xff] }
 0x302   :  { %3076 = vmatpush1.bf16.msra.mxu0 %v7522_v35  ;;  %2991 = vmatprep.subr.bf16.mxu1 %v7529_v36  ;;  %v7576_v35 = vcombine.low %v1345_v42, %v1349_v21  ;;  %v7578_v36 = vcombine.low %v1346_v6, %v1350_v26  ;;  %v7587_v13 = vcombine.high %v1354_v29, %v1358_v30  ;;  %v1405_v42 = vld [vmem:[%s12114_s9 + $0x5b0] sm:$0xff]  ;;  %v1402_v21 = vld [vmem:[%s12114_s9 + $0x598] sm:$0xff] }
 0x303   :  { %3077 = vmatprep.subr.bf16.mxu0 %v7531_v11  ;;  %v7585_v11 = vcombine.high %v1353_v8, %v1357_v25  ;;  %v1406_v6 = vld [vmem:[%s12114_s9 + $0x5b8] sm:$0xff]  ;;  %v1413_v8 = vld [vmem:[%s12114_s9 + $0x5f0] sm:$0xff] }
 0x304   :  { %v1410_v25 = vld [vmem:[%s12114_s9 + $0x5d8] sm:$0xff] }
 0x305   :  { %2992 = vmatpush1.bf16.msra.mxu1 %v7528_v39  ;;  %v1362_v39 = vld [vmem:[%s12114_s9 + $0x458] sm:$0xff] }
 0x306   :  { %3078 = vmatpush1.bf16.msra.mxu0 %v7530_v18  ;;  %2993 = vmatprep.subr.bf16.mxu1 %v7537_v17  ;;  %v1366_v18 = vld [vmem:[%s12114_s9 + $0x478] sm:$0xff]  ;;  %v7586_v17 = vcombine.low %v1354_v29, %v1358_v30 }
 0x307   :  { %3079 = vmatprep.subr.bf16.mxu0 %v7539_v23  ;;  %v7593_v23 = vcombine.high %v1361_v37, %v1365_v60  ;;  %v7595_v50 = vcombine.high %v1362_v39, %v1366_v18  ;;  %v1414_v29 = vld [vmem:[%s12114_s9 + $0x5f8] sm:$0xff] }
 0x309   :  { %2994 = vmatpush1.bf16.msra.mxu1 %v7536_v40  ;;  %v1374_v40 = vld [vmem:[%s12114_s9 + $0x4b8] sm:$0xff] }
 0x30a   :  { %3080 = vmatpush1.bf16.msra.mxu0 %v7538_v43  ;;  %2995 = vmatprep.subr.bf16.mxu1 %v7545_v44  ;;  %v7592_v43 = vcombine.low %v1361_v37, %v1365_v60  ;;  %v7594_v44 = vcombine.low %v1362_v39, %v1366_v18  ;;  %v7603_v46 = vcombine.high %v1370_v51, %v1374_v40  ;;  %v1421_v37 = vld [vmem:[%s12114_s9 + $0x630] sm:$0xff]  ;;  %v1418_v60 = vld [vmem:[%s12114_s9 + $0x618] sm:$0xff] }
 0x30b   :  { %3081 = vmatprep.subr.bf16.mxu0 %v7547_v45  ;;  %v7601_v45 = vcombine.high %v1369_v19, %v1373_v54  ;;  %v7642_v18 = vcombine.low %v1410_v25, %v1414_v29 }
 0x30d   :  { %2996 = vmatpush1.bf16.msra.mxu1 %v7544_v34  ;;  %v7602_v34 = vcombine.low %v1370_v51, %v1374_v40  ;;  %v1430_v51 = vld [vmem:[%s12114_s9 + $0x678] sm:$0xff] }
 0x30e   :  { %3082 = vmatpush1.bf16.msra.mxu0 %v7546_v57  ;;  %2997 = vmatprep.subr.bf16.mxu1 %v7553_v58  ;;  %v7609_v57 = vcombine.high %v1377_v47, %v1381_v48  ;;  %v1437_v47 = vld [vmem:[%s12114_s9 + $0x6b0] sm:$0xff]  ;;  %v1434_v48 = vld [vmem:[%s12114_s9 + $0x698] sm:$0xff] }
 0x30f   :  { %3083 = vmatprep.subr.bf16.mxu0 %v7555_v59  ;;  %v1385_v59 = vld [vmem:[%s12114_s9 + $0x510] sm:$0xff] }
 0x310   :  { %v7616_v31 = vcombine.low %v1385_v59, %v1389_v0 }
 0x311   :  { %2998 = vmatpush1.bf16.msra.mxu1 %v7552_v5 }
 0x312   :  { %3084 = vmatpush1.bf16.msra.mxu0 %v7554_v10  ;;  %2999 = vmatprep.subr.bf16.mxu1 %v7561_v12  ;;  %v7617_v10 = vcombine.high %v1385_v59, %v1389_v0  ;;  %v7619_v12 = vcombine.high %v1386_v2, %v1390_v3  ;;  %v1445_v59 = vld [vmem:[%s12114_s9 + $0x6f0] sm:$0xff]  ;;  %v1442_v0 = vld [vmem:[%s12114_s9 + $0x6d8] sm:$0xff] }
 0x313   :  { %3085 = vmatprep.subr.bf16.mxu0 %v7563_v14  ;;  %v1393_v14 = vld [vmem:[%s12114_s9 + $0x550] sm:$0xff] }
 0x314   :  { %v7624_v26 = vcombine.low %v1393_v14, %v1397_v15 }
 0x315   :  { %3000 = vmatpush1.bf16.msra.mxu1 %v7560_v32  ;;  %v7618_v32 = vcombine.low %v1386_v2, %v1390_v3  ;;  %v1446_v2 = vld [vmem:[%s12114_s9 + $0x6f8] sm:$0xff] }
 0x316   :  { %3086 = vmatpush1.bf16.msra.mxu0 %v7562_v33  ;;  %3001 = vmatprep.subr.bf16.mxu1 %v7569_v38  ;;  %v7625_v33 = vcombine.high %v1393_v14, %v1397_v15  ;;  %v7627_v38 = vcombine.high %v1394_v16, %v1398_v20  ;;  %v1453_v14 = vld [vmem:[%s12114_s9 + $0x730] sm:$0xff]  ;;  %v1450_v15 = vld [vmem:[%s12114_s9 + $0x718] sm:$0xff] }
 0x317   :  { %3087 = vmatprep.subr.bf16.mxu0 %v7571_v41  ;;  %v1401_v41 = vld [vmem:[%s12114_s9 + $0x590] sm:$0xff] }
 0x318   :  { %v7632_v30 = vcombine.low %v1401_v41, %v1405_v42 }
 0x319   :  { %3002 = vmatpush1.bf16.msra.mxu1 %v7568_v7  ;;  %v7626_v7 = vcombine.low %v1394_v16, %v1398_v20  ;;  %v1454_v16 = vld [vmem:[%s12114_s9 + $0x738] sm:$0xff] }
 0x31a   :  { %3088 = vmatpush1.bf16.msra.mxu0 %v7570_v22  ;;  %3003 = vmatprep.subr.bf16.mxu1 %v7577_v9  ;;  %v7633_v22 = vcombine.high %v1401_v41, %v1405_v42  ;;  %v7635_v9 = vcombine.high %v1402_v21, %v1406_v6  ;;  %v1461_v41 = vld [vmem:[%s12114_s9 + $0x770] sm:$0xff]  ;;  %v1458_v42 = vld [vmem:[%s12114_s9 + $0x758] sm:$0xff] }
 0x31b   :  { %3089 = vmatprep.subr.bf16.mxu0 %v7579_v24  ;;  %v1409_v24 = vld [vmem:[%s12114_s9 + $0x5d0] sm:$0xff] }
 0x31c   :  { %v7640_v39 = vcombine.low %v1409_v24, %v1413_v8 }
 0x31d   :  { %3004 = vmatpush1.bf16.msra.mxu1 %v7576_v35  ;;  %v7634_v35 = vcombine.low %v1402_v21, %v1406_v6  ;;  %v1462_v21 = vld [vmem:[%s12114_s9 + $0x778] sm:$0xff] }
 0x31e   :  { %3090 = vmatpush1.bf16.msra.mxu0 %v7578_v36  ;;  %3016 = vmatprep.subr.bf16.mxu1 %v7585_v11  ;;  %v7641_v36 = vcombine.high %v1409_v24, %v1413_v8  ;;  %v7643_v11 = vcombine.high %v1410_v25, %v1414_v29  ;;  %v1469_v24 = vld [vmem:[%s12114_s9 + $0x7b0] sm:$0xff]  ;;  %v1466_v8 = vld [vmem:[%s12114_s9 + $0x798] sm:$0xff] }
 0x31f   :  { %3102 = vmatprep.subr.bf16.mxu0 %v7587_v13  ;;  %v1417_v13 = vld [vmem:[%s12114_s9 + $0x610] sm:$0xff]  ;;  %v1470_v25 = vld [vmem:[%s12114_s9 + $0x7b8] sm:$0xff] }
 0x320   :  { %3006 = vmatmul.mubr.bf16.vlgmr.msra.gmra.mrb[4].mxu1 %v9890_v61  ;;  %v7648_v40 = vcombine.low %v1417_v13, %v1421_v37 }
 0x321   :  { %3092 = vmatmul.mubr.bf16.vlgmr.msra.gmra.mrb[16].mxu0 %v9890_v61  ;;  %3017 = vmatpush1.bf16.msra.mxu1 %v7584_v56  ;;  %v1378_v61 = vld [vmem:[%s12114_s9 + $0x4d8] sm:$0xff] }
 0x322   :  { %3048 = vmatprep.mubr.bf16.mxu1 %v9892_v62  ;;  %3103 = vmatpush1.bf16.msra.mxu0 %v7586_v17  ;;  %v7611_v58 = vcombine.high %v1378_v61, %v1382_v49  ;;  %v7610_v5 = vcombine.low %v1378_v61, %v1382_v49  ;;  %v1422_v56 = vld [vmem:[%s12114_s9 + $0x638] sm:$0xff]  ;;  %v7649_v17 = vcombine.high %v1417_v13, %v1421_v37  ;;  %v1477_v13 = vld [vmem:[%s12114_s9 + $0x7f0] sm:$0xff] }
 0x323   :  { %3134 = vmatprep.mubr.bf16.mxu0 %v9892_v62  ;;  %3018 = vmatprep.subr.bf16.mxu1 %v7593_v23  ;;  %v7600_v62 = vcombine.low %v1369_v19, %v1373_v54  ;;  %v7651_v23 = vcombine.high %v1418_v60, %v1422_v56  ;;  %v1425_v19 = vld [vmem:[%s12114_s9 + $0x650] sm:$0xff]  ;;  %v1438_v61 = vld [vmem:[%s12114_s9 + $0x6b8] sm:$0xff] }
 0x324   :  { %3104 = vmatprep.subr.bf16.mxu0 %v7595_v50  ;;  %v1429_v54 = vld [vmem:[%s12114_s9 + $0x670] sm:$0xff]  ;;  %v1426_v50 = vld [vmem:[%s12114_s9 + $0x658] sm:$0xff] }
 0x325   :  { %3019 = vmatpush1.bf16.msra.mxu1 %v7592_v43  ;;  %v7650_v43 = vcombine.low %v1418_v60, %v1422_v56  ;;  %v7656_v49 = vcombine.low %v1425_v19, %v1429_v54  ;;  %v1474_v37 = vld [vmem:[%s12114_s9 + $0x7d8] sm:$0xff] }
 0x326   :  { %3105 = vmatpush1.bf16.msra.mxu0 %v7594_v44  ;;  %3020 = vmatprep.subr.bf16.mxu1 %v7601_v45  ;;  %v7657_v44 = vcombine.high %v1425_v19, %v1429_v54  ;;  %v7659_v45 = vcombine.high %v1426_v50, %v1430_v51  ;;  %v1478_v60 = vld [vmem:[%s12114_s9 + $0x7f8] sm:$0xff]  ;;  %v10473_v54 = vld [vmem:[%s12115_s10] sm:$0xff] }
 0x327   :  { %3106 = vmatprep.subr.bf16.mxu0 %v7603_v46  ;;  %v1433_v46 = vld [vmem:[%s12114_s9 + $0x690] sm:$0xff]  ;;  %v7706_v19 = vcombine.low %v1474_v37, %v1478_v60 }
 0x328   :  { %v7664_v3 = vcombine.low %v1433_v46, %v1437_v47 }
 0x329   :  { %3021 = vmatpush1.bf16.msra.mxu1 %v7600_v62  ;;  %v7658_v62 = vcombine.low %v1426_v50, %v1430_v51  ;;  %v1484_v50 = vrot.slane %v10473_v54, %v9408_v53  ;;  %v1488_v51 = vrot.slane %v10473_v54, %v9414_v55 }
 0x32a   :  { %3107 = vmatpush1.bf16.msra.mxu0 %v7602_v34  ;;  %3022 = vmatprep.subr.bf16.mxu1 %v7609_v57  ;;  %v7665_v34 = vcombine.high %v1433_v46, %v1437_v47  ;;  %v7667_v57 = vcombine.high %v1434_v48, %v1438_v61 }
 0x32b   :  { %3108 = vmatprep.subr.bf16.mxu0 %v7611_v58  ;;  %v1441_v58 = vld [vmem:[%s12114_s9 + $0x6d0] sm:$0xff] }
 0x32c   :  { %v7672_v20 = vcombine.low %v1441_v58, %v1445_v59 }
 0x32d   :  { %3023 = vmatpush1.bf16.msra.mxu1 %v7608_v4  ;;  %v7666_v4 = vcombine.low %v1434_v48, %v1438_v61 }
 0x32e   :  { %3109 = vmatpush1.bf16.msra.mxu0 %v7610_v5  ;;  %3024 = vmatprep.subr.bf16.mxu1 %v7617_v10  ;;  %v7673_v5 = vcombine.high %v1441_v58, %v1445_v59  ;;  %v7675_v10 = vcombine.high %v1442_v0, %v1446_v2 }
 0x32f   :  { %3110 = vmatprep.subr.bf16.mxu0 %v7619_v12  ;;  %v1449_v12 = vld [vmem:[%s12114_s9 + $0x710] sm:$0xff] }
 0x330   :  { %v7680_v6 = vcombine.low %v1449_v12, %v1453_v14 }
 0x331   :  { %3025 = vmatpush1.bf16.msra.mxu1 %v7616_v31  ;;  %v7674_v31 = vcombine.low %v1442_v0, %v1446_v2 }
 0x332   :  { %3111 = vmatpush1.bf16.msra.mxu0 %v7618_v32  ;;  %3026 = vmatprep.subr.bf16.mxu1 %v7625_v33  ;;  %v7681_v32 = vcombine.high %v1449_v12, %v1453_v14  ;;  %v7683_v33 = vcombine.high %v1450_v15, %v1454_v16 }
 0x333   :  { %3112 = vmatprep.subr.bf16.mxu0 %v7627_v38  ;;  %v1457_v38 = vld [vmem:[%s12114_s9 + $0x750] sm:$0xff] }
 0x334   :  { %v7688_v29 = vcombine.low %v1457_v38, %v1461_v41 }
 0x335   :  { %3027 = vmatpush1.bf16.msra.mxu1 %v7624_v26  ;;  %v7682_v26 = vcombine.low %v1450_v15, %v1454_v16 }
 0x336   :  { %3113 = vmatpush1.bf16.msra.mxu0 %v7626_v7  ;;  %3028 = vmatprep.subr.bf16.mxu1 %v7633_v22  ;;  %v7689_v7 = vcombine.high %v1457_v38, %v1461_v41  ;;  %v7691_v22 = vcombine.high %v1458_v42, %v1462_v21 }
 0x337   :  { %3114 = vmatprep.subr.bf16.mxu0 %v7635_v9  ;;  %v1465_v9 = vld [vmem:[%s12114_s9 + $0x790] sm:$0xff] }
 0x338   :  { %v7696_v56 = vcombine.low %v1465_v9, %v1469_v24 }
 0x339   :  { %3029 = vmatpush1.bf16.msra.mxu1 %v7632_v30  ;;  %v7690_v30 = vcombine.low %v1458_v42, %v1462_v21 }
 0x33a   :  { %3115 = vmatpush1.bf16.msra.mxu0 %v7634_v35  ;;  %3030 = vmatprep.subr.bf16.mxu1 %v7641_v36  ;;  %v7697_v35 = vcombine.high %v1465_v9, %v1469_v24  ;;  %v7699_v36 = vcombine.high %v1466_v8, %v1470_v25 }
 0x33b   :  { %3116 = vmatprep.subr.bf16.mxu0 %v7643_v11  ;;  %v1473_v11 = vld [vmem:[%s12114_s9 + $0x7d0] sm:$0xff] }
 0x33d   :  { %3031 = vmatpush1.bf16.msra.mxu1 %v7640_v39  ;;  %v7698_v39 = vcombine.low %v1466_v8, %v1470_v25 }
 0x33e   :  { %3117 = vmatpush1.bf16.msra.mxu0 %v7642_v18  ;;  %3032 = vmatprep.subr.bf16.mxu1 %v7649_v17  ;;  %v7705_v18 = vcombine.high %v1473_v11, %v1477_v13  ;;  %v7707_v17 = vcombine.high %v1474_v37, %v1478_v60  ;;  %v8453_v37 = vld [vmem:[%s12118_s13 + $0x8] ss:$28 sps:$4 sm:$0xff]  }
 0x33f   :  { %3118 = vmatprep.subr.bf16.mxu0 %v7651_v23  ;;  %v7704_v23 = vcombine.low %v1473_v11, %v1477_v13  ;;  %v8450_v13 = vld [vmem:[%s12118_s13] ss:$28 sps:$4 sm:$0xff]  }
 0x341   :  { %3033 = vmatpush1.bf16.msra.mxu1 %v7648_v40 }
 0x342   :  { %3119 = vmatpush1.bf16.msra.mxu0 %v7650_v43  ;;  %3034 = vmatprep.subr.bf16.mxu1 %v7657_v44 }
 0x343   :  { %3120 = vmatprep.subr.bf16.mxu0 %v7659_v45 }
 0x345   :  { %3035 = vmatpush1.bf16.msra.mxu1 %v7656_v49 }
 0x346   :  { %3121 = vmatpush1.bf16.msra.mxu0 %v7658_v62  ;;  %3036 = vmatprep.subr.bf16.mxu1 %v7665_v34 }
 0x347   :  { %3122 = vmatprep.subr.bf16.mxu0 %v7667_v57 }
 0x349   :  { %3037 = vmatpush1.bf16.msra.mxu1 %v7664_v3 }
 0x34a   :  { %3123 = vmatpush1.bf16.msra.mxu0 %v7666_v4  ;;  %3038 = vmatprep.subr.bf16.mxu1 %v7673_v5 }
 0x34b   :  { %3124 = vmatprep.subr.bf16.mxu0 %v7675_v10 }
 0x34d   :  { %3039 = vmatpush1.bf16.msra.mxu1 %v7672_v20 }
 0x34e   :  { %3125 = vmatpush1.bf16.msra.mxu0 %v7674_v31  ;;  %3040 = vmatprep.subr.bf16.mxu1 %v7681_v32 }
 0x34f   :  { %3126 = vmatprep.subr.bf16.mxu0 %v7683_v33 }
 0x351   :  { %3041 = vmatpush1.bf16.msra.mxu1 %v7680_v6 }
 0x352   :  { %3127 = vmatpush1.bf16.msra.mxu0 %v7682_v26  ;;  %3042 = vmatprep.subr.bf16.mxu1 %v7689_v7 }
 0x353   :  { %3128 = vmatprep.subr.bf16.mxu0 %v7691_v22 }
 0x355   :  { %3043 = vmatpush1.bf16.msra.mxu1 %v7688_v29 }
 0x356   :  { %3129 = vmatpush1.bf16.msra.mxu0 %v7690_v30  ;;  %3044 = vmatprep.subr.bf16.mxu1 %v7697_v35  ;;  %v8452_v30 = vld [vmem:[%s12118_s13 + $0x4] ss:$28 sps:$4 sm:$0xff]   ;;  %v8455_v35 = vld [vmem:[%s12118_s13 + $0xc] ss:$28 sps:$4 sm:$0xff]  }
 0x357   :  { %3130 = vmatprep.subr.bf16.mxu0 %v7699_v36 }
 0x359   :  { %3045 = vmatpush1.bf16.msra.mxu1 %v7696_v56 }
 0x35a   :  { %3131 = vmatpush1.bf16.msra.mxu0 %v7698_v39  ;;  %3046 = vmatprep.subr.bf16.mxu1 %v7705_v18 }
 0x35b   :  { %3132 = vmatprep.subr.bf16.mxu0 %v7707_v17 }
 0x35d   :  { %3047 = vmatpush1.bf16.msra.mxu1 %v7704_v23 }
 0x35e   :  { %3133 = vmatpush1.bf16.msra.mxu0 %v7706_v19  ;;  %6646 = vmatprep.subr.bf16.mxu1 %v8452_v30  ;;  %v8458_v19 = vld [vmem:[%s12118_s13 + $0x3c] ss:$28 sps:$4 sm:$0xff]  }
 0x35f   :  { %6818 = vmatprep.subr.bf16.mxu0 %v8455_v35  ;;  %v8491_v30 = vld [vmem:[%s12118_s13 + $0x15c] ss:$28 sps:$4 sm:$0xff]   ;;  %v8486_v35 = vld [vmem:[%s12118_s13 + $0x150] ss:$28 sps:$4 sm:$0xff]  }
 0x360   :  { %3049 = vmatmul.mubr.bf16.vlgmr.msra.gmra.mrb[4].mxu1 %v9897_v1 }
 0x361   :  { %3135 = vmatmul.mubr.bf16.vlgmr.msra.gmra.mrb[16].mxu0 %v9897_v1  ;;  %6647 = vmatpush1.bf16.msra.mxu1 %v8450_v13 }
 0x362   :  { %6819 = vmatpush1.bf16.msra.mxu0 %v8453_v37  ;;  %6648 = vmatprep.subr.bf16.mxu1 %v8458_v19  ;;  %v8494_v37 = vld [vmem:[%s12118_s13 + $0x18c] ss:$28 sps:$4 sm:$0xff]   ;;  %v8498_v19 = vld [vmem:[%s12118_s13 + $0x1c0] ss:$28 sps:$4 sm:$0xff]  }
 0x3b3   :  { %v2878_v40 = vpop.f32.mrb[0].mxu1  ;;  %v10479_v43 = vpop.f32.mrb[12].mxu0 }
 0x3b4   :  { %v8244_v44 = vadd.f32 %v2878_v40, %v1484_v50  ;;  %v2880_v45 = vpop.f32.mrb[1].mxu1  ;;  %v10481_v46 = vpop.f32.mrb[13].mxu0 }
 0x3b5   :  { %v8245_v47 = vadd.f32 %v2880_v45, %v1488_v51  ;;  %v2882_v1 = vpop.f32.mrb[2].mxu1  ;;  %v10483_v48 = vpop.f32.mrb[14].mxu0  ;;  %v8459_v45 = vld [vmem:[%s12118_s13 + $0x40] ss:$28 sps:$4 sm:$0xff]  }
 0x3b6   :  { %v3145_v61 = vmul.f32 0.2, %v8244_v44  ;;  %v8246_v49 = vadd.f32 %v2882_v1, %v1484_v50  ;;  %v2884_v62 = vpop.f32.mrb[3].mxu1  ;;  %v10485_v34 = vpop.f32.mrb[15].mxu0  ;;  %v8461_v50 = vld [vmem:[%s12118_s13 + $0x44] ss:$28 sps:$4 sm:$0xff]  }
 0x3b7   :  { %v3146_v57 = vmul.f32 0.2, %v8245_v47  ;;  %v8247_v58 = vadd.f32 %v2884_v62, %v1488_v51  ;;  %6820 = vmatprep.subr.bf16.mxu0 %v8461_v50  ;;  %v8501_v50 = vld [vmem:[%s12118_s13 + $0x1c8] ss:$28 sps:$4 sm:$0xff]  }
 0x3b8   :  { %v3153_v59 = vmul.f32 0.2, %v8246_v49  ;;  %v10487_v2 = vmax.f32 %v8244_v44, %v3145_v61  ;;  %v8456_v44 = vld [vmem:[%s12118_s13 + $0x38] ss:$28 sps:$4 sm:$0xff]   ;;  %6821 = vmatpush1.bf16.msra.mxu0 %v8459_v45  ;;  %v8507_v45 = vld [vmem:[%s12118_s13 + $0x200] ss:$28 sps:$4 sm:$0xff]  }
 0x3b9   :  { %v3154_v0 = vmul.f32 0.2, %v8247_v58  ;;  %v10491_v4 = vmax.f32 %v8245_v47, %v3146_v57  ;;  %6649 = vmatpush1.bf16.msra.mxu1 %v8456_v44  ;;  %v8504_v44 = vld [vmem:[%s12118_s13 + $0x1f8] ss:$28 sps:$4 sm:$0xff]  }
 0x3ba   :  { %v10489_v3 = vmax.f32 %v8246_v49, %v3153_v59  ;;  %v3252_v14 = vmul.f32 %v10487_v2, %v10487_v2  ;;  %v8467_v59 = vld [vmem:[%s12118_s13 + $0x7c] ss:$28 sps:$4 sm:$0xff]  }
 0x3bb   :  { %v10493_v5 = vmax.f32 %v8247_v58, %v3154_v0  ;;  %v3253_v20 = vmul.f32 %v10491_v4, %v10491_v4  ;;  %v8464_v58 = vld [vmem:[%s12118_s13 + $0x74] ss:$28 sps:$4 sm:$0xff]   ;;  %6822 = vmatprep.subr.bf16.mxu0 %v8467_v59 }
 0x3bc   :  { %v3188_v10 = vmul.f32 0.0, %v10489_v3  ;;  %6650 = vmatprep.subr.bf16.mxu1 %v8464_v58  ;;  %v8518_v58 = vld [vmem:[%s12118_s13 + $0x26c] ss:$28 sps:$4 sm:$0xff]   ;;  %v8521_v59 = vld [vmem:[%s12118_s13 + $0x274] ss:$28 sps:$4 sm:$0xff]  }
 0x3bd   :  { %v3189_v12 = vmul.f32 0.0, %v10493_v5 }
 0x3be   :  { %v3196_v15 = vadd.f32 %v3188_v10, %v10487_v2  ;;  %v3260_v16 = vmul.f32 %v3188_v10, %v10489_v3 }
 0x3bf   :  { %v3203_v31 = vadd.f32 %v3189_v12, %v10491_v4  ;;  %v3261_v32 = vmul.f32 %v3189_v12, %v10493_v5  ;;  %v8462_v12 = vld [vmem:[%s12118_s13 + $0x70] ss:$28 sps:$4 sm:$0xff]  }
 0x3c0   :  { %v3197_v33 = vrot.slane %v3196_v15, 4  ;;  %v3268_v38 = vadd.f32 %v3260_v16, %v3252_v14  ;;  %v8465_v14 = vld [vmem:[%s12118_s13 + $0x78] ss:$28 sps:$4 sm:$0xff]   ;;  %6651 = vmatpush1.bf16.msra.mxu1 %v8462_v12  ;;  %v8524_v12 = vld [vmem:[%s12118_s13 + $0x2a4] ss:$28 sps:$4 sm:$0xff]  }
 0x3c1   :  { %v3204_v41 = vrot.slane %v3203_v31, 4  ;;  %v3275_v42 = vadd.f32 %v3261_v32, %v3253_v20  ;;  %6823 = vmatpush1.bf16.msra.mxu0 %v8465_v14  ;;  %v8473_v32 = vld [vmem:[%s12118_s13 + $0xb4] ss:$28 sps:$4 sm:$0xff]   ;;  %v8527_v14 = vld [vmem:[%s12118_s13 + $0x2ac] ss:$28 sps:$4 sm:$0xff]  }
 0x3c2   :  { %v3198_v21 = vadd.f32 %v3197_v33, %v3196_v15  ;;  %v3269_v6 = vrot.slane %v3268_v38, 4  ;;  %6824 = vmatprep.subr.bf16.mxu0 %v8473_v32  ;;  %v1492_v32 = vrot.slane %v10473_v54, %v9816_v27 }
 0x3c3   :  { %v3205_v26 = vadd.f32 %v3204_v41, %v3203_v31  ;;  %v3276_v7 = vrot.slane %v3275_v42, 4  ;;  %v8470_v31 = vld [vmem:[%s12118_s13 + $0xac] ss:$28 sps:$4 sm:$0xff]  }
 0x3c4   :  { %v3199_v22 = vrot.slane %v3198_v21, 2  ;;  %v3270_v9 = vadd.f32 %v3269_v6, %v3268_v38  ;;  %v8468_v38 = vld [vmem:[%s12118_s13 + $0xa8] ss:$28 sps:$4 sm:$0xff]   ;;  %v8471_v41 = vld [vmem:[%s12118_s13 + $0xb0] ss:$28 sps:$4 sm:$0xff]   ;;  %6652 = vmatprep.subr.bf16.mxu1 %v8470_v31 }
 0x3c5   :  { %v3206_v24 = vrot.slane %v3205_v26, 2  ;;  %v3277_v8 = vadd.f32 %v3276_v7, %v3275_v42  ;;  %6653 = vmatpush1.bf16.msra.mxu1 %v8468_v38  ;;  %6825 = vmatpush1.bf16.msra.mxu0 %v8471_v41  ;;  %v8476_v6 = vld [vmem:[%s12118_s13 + $0xe4] ss:$28 sps:$4 sm:$0xff]   ;;  %v1496_v41 = vrot.slane %v10473_v54, %v9819_v28 }
 0x3c6   :  { %v3200_v25 = vadd.f32 %v3199_v22, %v3198_v21  ;;  %v3271_v29 = vrot.slane %v3270_v9, 2  ;;  %v8474_v7 = vld [vmem:[%s12118_s13 + $0xe0] ss:$28 sps:$4 sm:$0xff]   ;;  %v8477_v22 = vld [vmem:[%s12118_s13 + $0xe8] ss:$28 sps:$4 sm:$0xff]   ;;  %6654 = vmatprep.subr.bf16.mxu1 %v8476_v6 }
 0x3c7   :  { %v3207_v36 = vadd.f32 %v3206_v24, %v3205_v26  ;;  %v3278_v11 = vrot.slane %v3277_v8, 2  ;;  %v8479_v26 = vld [vmem:[%s12118_s13 + $0xec] ss:$28 sps:$4 sm:$0xff]   ;;  %v8485_v24 = vld [vmem:[%s12118_s13 + $0x124] ss:$28 sps:$4 sm:$0xff]  }
 0x3c8   :  { %v3201_v60 = vrot.slane %v3200_v25, 1  ;;  %v3272_v56 = vadd.f32 %v3271_v29, %v3270_v9  ;;  %6826 = vmatprep.subr.bf16.mxu0 %v8479_v26  ;;  %v8482_v9 = vld [vmem:[%s12118_s13 + $0x11c] ss:$28 sps:$4 sm:$0xff]   ;;  %v8488_v29 = vld [vmem:[%s12118_s13 + $0x154] ss:$28 sps:$4 sm:$0xff]  }
 0x3c9   :  { %v3208_v39 = vrot.slane %v3207_v36, 1  ;;  %v3279_v18 = vadd.f32 %v3278_v11, %v3277_v8  ;;  %6655 = vmatpush1.bf16.msra.mxu1 %v8474_v7  ;;  %6827 = vmatpush1.bf16.msra.mxu0 %v8477_v22  ;;  %v8480_v8 = vld [vmem:[%s12118_s13 + $0x118] ss:$28 sps:$4 sm:$0xff]   ;;  %v8533_v31 = vld [vmem:[%s12118_s13 + $0x2e4] ss:$28 sps:$4 sm:$0xff]  }
 0x3ca   :  { %v3202_v17 = vadd.f32 %v3201_v60, %v3200_v25  ;;  %v3273_v23 = vrot.slane %v3272_v56, 1  ;;  %v8483_v25 = vld [vmem:[%s12118_s13 + $0x120] ss:$28 sps:$4 sm:$0xff]   ;;  %6656 = vmatprep.subr.bf16.mxu1 %v8482_v9  ;;  %6828 = vmatprep.subr.bf16.mxu0 %v8485_v24  ;;  %v8497_v60 = vld [vmem:[%s12118_s13 + $0x194] ss:$28 sps:$4 sm:$0xff]  }
 0x3cb   :  { %v3209_v51 = vadd.f32 %v3208_v39, %v3207_v36  ;;  %v3280_v40 = vrot.slane %v3279_v18, 1  ;;  %v8489_v36 = vld [vmem:[%s12118_s13 + $0x158] ss:$28 sps:$4 sm:$0xff]   ;;  %v8492_v39 = vld [vmem:[%s12118_s13 + $0x188] ss:$28 sps:$4 sm:$0xff]  }
 0x3cc   :  { %v3274_v47 = vadd.f32 %v3273_v23, %v3272_v56  ;;  %v10529_v1 = vmul.f32 0.125, %v3202_v17  ;;  %v8500_v17 = vld [vmem:[%s12118_s13 + $0x1c4] ss:$28 sps:$4 sm:$0xff]   ;;  %v8503_v23 = vld [vmem:[%s12118_s13 + $0x1cc] ss:$28 sps:$4 sm:$0xff]  }
 0x3cd   :  { %v3281_v61 = vadd.f32 %v3280_v40, %v3279_v18  ;;  %v10531_v49 = vmul.f32 0.125, %v3209_v51  ;;  %6657 = vmatpush1.bf16.msra.mxu1 %v8480_v8  ;;  %6829 = vmatpush1.bf16.msra.mxu0 %v8483_v25  ;;  %v8495_v18 = vld [vmem:[%s12118_s13 + $0x190] ss:$28 sps:$4 sm:$0xff]   ;;  %v8506_v51 = vld [vmem:[%s12118_s13 + $0x1fc] ss:$28 sps:$4 sm:$0xff]   ;;  %v8248_v8 = vadd.f32 %v10479_v43, %v1492_v32 }
 0x3ce   :  { %v3495_v62 = vmul.f32 0.125, %v3274_v47  ;;  %v3503_v57 = vmul.f32 %v10529_v1, %v10529_v1  ;;  %6658 = vmatprep.subr.bf16.mxu1 %v8488_v29  ;;  %6830 = vmatprep.subr.bf16.mxu0 %v8491_v30  ;;  %v8509_v40 = vld [vmem:[%s12118_s13 + $0x204] ss:$28 sps:$4 sm:$0xff]   ;;  %v8512_v47 = vld [vmem:[%s12118_s13 + $0x234] ss:$28 sps:$4 sm:$0xff]   ;;  %v8249_v30 = vadd.f32 %v10481_v46, %v1496_v41 }
 0x3cf   :  { %v3496_v0 = vmul.f32 0.125, %v3281_v61  ;;  %v3504_v10 = vmul.f32 %v10531_v49, %v10531_v49  ;;  %v8515_v61 = vld [vmem:[%s12118_s13 + $0x23c] ss:$28 sps:$4 sm:$0xff]   ;;  %v8536_v6 = vld [vmem:[%s12118_s13 + $0x314] ss:$28 sps:$4 sm:$0xff]  }
 0x3d0   :  { %v3511_v15 = vsub.f32 %v3495_v62, %v3503_v57  ;;  %v8510_v62 = vld [vmem:[%s12118_s13 + $0x230] ss:$28 sps:$4 sm:$0xff]   ;;  %v8513_v57 = vld [vmem:[%s12118_s13 + $0x238] ss:$28 sps:$4 sm:$0xff]   ;;  %v8531_v38 = vld [vmem:[%s12118_s13 + $0x2e0] ss:$28 sps:$4 sm:$0xff]  }
 0x3d1   :  { %v3512_v16 = vsub.f32 %v3496_v0, %v3504_v10  ;;  %6659 = vmatpush1.bf16.msra.mxu1 %v8486_v35  ;;  %6831 = vmatpush1.bf16.msra.mxu0 %v8489_v36  ;;  %v8516_v0 = vld [vmem:[%s12118_s13 + $0x268] ss:$28 sps:$4 sm:$0xff]   ;;  %v8519_v10 = vld [vmem:[%s12118_s13 + $0x270] ss:$28 sps:$4 sm:$0xff]   ;;  %v8539_v26 = vld [vmem:[%s12118_s13 + $0x31c] ss:$28 sps:$4 sm:$0xff]  }
 0x3d2   :  { %v3519_v20 = vmax.f32 %v3511_v15, 0.0  ;;  %6660 = vmatprep.subr.bf16.mxu1 %v8494_v37  ;;  %6832 = vmatprep.subr.bf16.mxu0 %v8497_v60  ;;  %v8522_v15 = vld [vmem:[%s12118_s13 + $0x2a0] ss:$28 sps:$4 sm:$0xff]   ;;  %v8534_v7 = vld [vmem:[%s12118_s13 + $0x310] ss:$28 sps:$4 sm:$0xff]  }
 0x3d3   :  { %v3520_v33 = vmax.f32 %v3512_v16, 0.0  ;;  %v8525_v16 = vld [vmem:[%s12118_s13 + $0x2a8] ss:$28 sps:$4 sm:$0xff]   ;;  %v8545_v24 = vld [vmem:[%s12118_s13 + $0x354] ss:$28 sps:$4 sm:$0xff]  }
 0x3d4   :  { %v3528_v42 = vadd.f32 1e-05, %v3519_v20  ;;  %v8530_v20 = vld [vmem:[%s12118_s13 + $0x2dc] ss:$28 sps:$4 sm:$0xff]   ;;  %v8542_v9 = vld [vmem:[%s12118_s13 + $0x34c] ss:$28 sps:$4 sm:$0xff]  }
 0x3d5   :  { %v3529_v21 = vadd.f32 1e-05, %v3520_v33  ;;  %6661 = vmatpush1.bf16.msra.mxu1 %v8492_v39  ;;  %6833 = vmatpush1.bf16.msra.mxu0 %v8495_v18  ;;  %v8528_v33 = vld [vmem:[%s12118_s13 + $0x2d8] ss:$28 sps:$4 sm:$0xff]   ;;  %v8540_v25 = vld [vmem:[%s12118_s13 + $0x348] ss:$28 sps:$4 sm:$0xff]  }
 0x3d6   :  { %9102 = vrsqrt.f32 %v3528_v42  ;;  %6662 = vmatprep.subr.bf16.mxu1 %v8500_v17  ;;  %6834 = vmatprep.subr.bf16.mxu0 %v8503_v23  ;;  %v8250_v42 = vadd.f32 %v10483_v48, %v1492_v32  ;;  %v8537_v48 = vld [vmem:[%s12118_s13 + $0x318] ss:$28 sps:$4 sm:$0xff]   ;;  %v8543_v29 = vld [vmem:[%s12118_s13 + $0x350] ss:$28 sps:$4 sm:$0xff]   ;;  %v3147_v37 = vmul.f32 0.2, %v8248_v8 }
 0x3d7   :  { %9104 = vrsqrt.f32 %v3529_v21  ;;  %v8251_v21 = vadd.f32 %v10485_v34, %v1496_v41  ;;  %v8548_v43 = vld [vmem:[%s12118_s13 + $0x384] ss:$28 sps:$4 sm:$0xff]   ;;  %v3148_v60 = vmul.f32 0.2, %v8249_v30  ;;  %v8551_v39 = vld [vmem:[%s12118_s13 + $0x38c] ss:$28 sps:$4 sm:$0xff]  }
 0x3d8   :  { %v3155_v22 = vmul.f32 0.2, %v8250_v42  ;;  %v10731_v17 = vmax.f32 %v8248_v8, %v3147_v37  ;;  %v10748_v8 = vsub.s32 4, %v9405_v52  ;;  %v10756_v37 = vsub.s32 5, %v9405_v52 }
 0x3d9   :  { %6663 = vmatpush1.bf16.msra.mxu1 %v8498_v19  ;;  %6835 = vmatpush1.bf16.msra.mxu0 %v8501_v50  ;;  %v3156_v34 = vmul.f32 0.2, %v8251_v21  ;;  %v10733_v23 = vmax.f32 %v8249_v30, %v3148_v60  ;;  %v10753_v30 = vsub.s32 6, %v9405_v52 }
 0x3da   :  { %6664 = vmatprep.subr.bf16.mxu1 %v8506_v51  ;;  %6836 = vmatprep.subr.bf16.mxu0 %v8509_v40  ;;  %v10719_v35 = vmax.f32 %v8250_v42, %v3155_v22  ;;  %12124 = vst [vmem:[#allocation6_spill] sm:$0xff] %v10731_v17 }
 0x3db   :  { %v10721_v36 = vmax.f32 %v8251_v21, %v3156_v34 }
 0x3dc   :  { %12123 = vst [vmem:[#allocation5_spill] sm:$0xff] %v10719_v35  ;;  %v3190_v46 = vmul.f32 0.0, %v10719_v35 }
 0x3dd   :  { %6665 = vmatpush1.bf16.msra.mxu1 %v8504_v44  ;;  %6837 = vmatpush1.bf16.msra.mxu0 %v8507_v45  ;;  %v3191_v18 = vmul.f32 0.0, %v10721_v36  ;;  %v3254_v44 = vmul.f32 %v10731_v17, %v10731_v17  ;;  %v3255_v45 = vmul.f32 %v10733_v23, %v10733_v23 }
 0x3de   :  { %6666 = vmatprep.subr.bf16.mxu1 %v8512_v47  ;;  %6838 = vmatprep.subr.bf16.mxu0 %v8515_v61  ;;  %v3210_v19 = vadd.f32 %v3190_v46, %v10731_v17  ;;  %v3262_v50 = vmul.f32 %v3190_v46, %v10719_v35  ;;  %v1500_v46 = vrot.slane %v10473_v54, %v10748_v8 }
 0x3df   :  { %v3217_v51 = vadd.f32 %v3191_v18, %v10733_v23  ;;  %v3263_v40 = vmul.f32 %v3191_v18, %v10721_v36 }
 0x3e0   :  { %v10597_v11 = vpop.eup %9102  ;;  %v3211_v47 = vrot.slane %v3210_v19, 4  ;;  %v3282_v61 = vadd.f32 %v3262_v50, %v3254_v44  ;;  %v1504_v50 = vrot.slane %v10473_v54, %v10756_v37 }
 0x3e1   :  { %v10599_v13 = vpop.eup %9104  ;;  %6667 = vmatpush1.bf16.msra.mxu1 %v8510_v62  ;;  %6839 = vmatpush1.bf16.msra.mxu0 %v8513_v57  ;;  %v3218_v62 = vrot.slane %v3217_v51, 4  ;;  %v3289_v57 = vadd.f32 %v3263_v40, %v3255_v45 }
 0x3e2   :  { %6668 = vmatprep.subr.bf16.mxu1 %v8518_v58  ;;  %6840 = vmatprep.subr.bf16.mxu0 %v8521_v59  ;;  %v3212_v58 = vadd.f32 %v3211_v47, %v3210_v19  ;;  %v3283_v59 = vrot.slane %v3282_v61, 4  ;;  %v1508_v19 = vrot.slane %v10473_v54, %v10753_v30 }
 0x3e5   :  { %6669 = vmatpush1.bf16.msra.mxu1 %v8516_v0  ;;  %6841 = vmatpush1.bf16.msra.mxu0 %v8519_v10  ;;  %v3219_v0 = vadd.f32 %v3218_v62, %v3217_v51  ;;  %v3290_v10 = vrot.slane %v3289_v57, 4 }
 0x3e6   :  { %6670 = vmatprep.subr.bf16.mxu1 %v8524_v12  ;;  %6842 = vmatprep.subr.bf16.mxu0 %v8527_v14  ;;  %v3213_v12 = vrot.slane %v3212_v58, 2  ;;  %v3284_v14 = vadd.f32 %v3283_v59, %v3282_v61 }
 0x3e9   :  { %6671 = vmatpush1.bf16.msra.mxu1 %v8522_v15  ;;  %6843 = vmatpush1.bf16.msra.mxu0 %v8525_v16  ;;  %v3220_v15 = vrot.slane %v3219_v0, 2  ;;  %v3291_v16 = vadd.f32 %v3290_v10, %v3289_v57 }
 0x3ea   :  { %6672 = vmatprep.subr.bf16.mxu1 %v8530_v20  ;;  %6844 = vmatprep.subr.bf16.mxu0 %v8533_v31  ;;  %v3214_v20 = vadd.f32 %v3213_v12, %v3212_v58  ;;  %v3285_v31 = vrot.slane %v3284_v14, 2 }
 0x3eb   :  { %v3221_v32 = vadd.f32 %v3220_v15, %v3219_v0 }
 0x3ec   :  { %v3286_v41 = vadd.f32 %v3285_v31, %v3284_v14 }
 0x3ed   :  { %6673 = vmatpush1.bf16.msra.mxu1 %v8528_v33  ;;  %6845 = vmatpush1.bf16.msra.mxu0 %v8531_v38  ;;  %v3292_v33 = vrot.slane %v3291_v16, 2  ;;  %v3215_v38 = vrot.slane %v3214_v20, 1  ;;  %v3222_v42 = vrot.slane %v3221_v32, 1 }
 0x3ee   :  { %6674 = vmatprep.subr.bf16.mxu1 %v8536_v6  ;;  %6846 = vmatprep.subr.bf16.mxu0 %v8539_v26  ;;  %v3287_v26 = vrot.slane %v3286_v41, 1 }
 0x3ef   :  { %v3293_v21 = vadd.f32 %v3292_v33, %v3291_v16  ;;  %v3216_v6 = vadd.f32 %v3215_v38, %v3214_v20 }
 0x3f0   :  { %v3288_v22 = vadd.f32 %v3287_v26, %v3286_v41 }
 0x3f1   :  { %6675 = vmatpush1.bf16.msra.mxu1 %v8534_v7  ;;  %6847 = vmatpush1.bf16.msra.mxu0 %v8537_v48  ;;  %v3223_v7 = vadd.f32 %v3222_v42, %v3221_v32  ;;  %v3294_v48 = vrot.slane %v3293_v21, 1  ;;  %v10743_v34 = vmul.f32 0.125, %v3216_v6 }
 0x3f2   :  { %6676 = vmatprep.subr.bf16.mxu1 %v8542_v9  ;;  %6848 = vmatprep.subr.bf16.mxu0 %v8545_v24 }
 0x3f3   :  { %v3295_v9 = vadd.f32 %v3294_v48, %v3293_v21  ;;  %v10745_v24 = vmul.f32 0.125, %v3223_v7 }
 0x3f5   :  { %6677 = vmatpush1.bf16.msra.mxu1 %v8540_v25  ;;  %6849 = vmatpush1.bf16.msra.mxu0 %v8543_v29  ;;  %v3497_v25 = vmul.f32 0.125, %v3288_v22  ;;  %v3505_v29 = vmul.f32 %v10743_v34, %v10743_v34  ;;  %v3506_v60 = vmul.f32 %v10745_v24, %v10745_v24 }
 0x3f6   :  { %6689 = vmatprep.subr.bf16.mxu1 %v8548_v43  ;;  %6861 = vmatprep.subr.bf16.mxu0 %v8551_v39  ;;  %v3498_v43 = vmul.f32 0.125, %v3295_v9  ;;  %v10761_v39 = vsub.s32 7, %v9405_v52 }
 0x3f7   :  { %v3513_v18 = vsub.f32 %v3497_v25, %v3505_v29 }
 0x3f8   :  { %v3514_v51 = vsub.f32 %v3498_v43, %v3506_v60  ;;  %v1512_v40 = vrot.slane %v10473_v54, %v10761_v39 }
 0x3f9   :  { %v3521_v52 = vmax.f32 %v3513_v18, 0.0 }
 0x3fa   :  { %v3522_v0 = vmax.f32 %v3514_v51, 0.0 }
 0x3fb   :  { %v10781_v29 = vadd.f32 1e-05, %v3521_v52 }
 0x3fd   :  { %9106 = vrsqrt.f32 %v10781_v29 }
 0x407   :  { %v9107_v29 = vpop.eup %9106 }
 0x433   :  { %v3050_v44 = vpop.f32.mrb[4].mxu1 }
 0x434   :  { %v8252_v45 = vadd.f32 %v3050_v44, %v1500_v46  ;;  %v3136_v47 = vpop.f32.mrb[16].mxu0  ;;  %v3052_v61 = vpop.f32.mrb[5].mxu1 }
 0x435   :  { %v8256_v62 = vadd.f32 %v3136_v47, %v1508_v19  ;;  %v8253_v57 = vadd.f32 %v3052_v61, %v1504_v50  ;;  %v3138_v58 = vpop.f32.mrb[17].mxu0  ;;  %v3054_v59 = vpop.f32.mrb[6].mxu1 }
 0x436   :  { %v3149_v10 = vmul.f32 0.2, %v8252_v45  ;;  %v8257_v12 = vadd.f32 %v3138_v58, %v1512_v40  ;;  %v8254_v14 = vadd.f32 %v3054_v59, %v1500_v46  ;;  %v3140_v15 = vpop.f32.mrb[18].mxu0  ;;  %v3056_v16 = vpop.f32.mrb[7].mxu1  ;;  %v10787_v46 = vadd.f32 1e-05, %v3522_v0 }
 0x437   :  { %v3151_v20 = vmul.f32 0.2, %v8256_v62  ;;  %v3150_v31 = vmul.f32 0.2, %v8253_v57  ;;  %v8258_v32 = vadd.f32 %v3140_v15, %v1508_v19  ;;  %v8255_v33 = vadd.f32 %v3056_v16, %v1504_v50  ;;  %v3142_v54 = vpop.f32.mrb[19].mxu0 }
 0x438   :  { %v10771_v38 = vmax.f32 %v8252_v45, %v3149_v10  ;;  %v3152_v41 = vmul.f32 0.2, %v8257_v12  ;;  %v3157_v42 = vmul.f32 0.2, %v8254_v14  ;;  %v8259_v21 = vadd.f32 %v3142_v54, %v1512_v40 }
 0x439   :  { %v10773_v6 = vmax.f32 %v8256_v62, %v3151_v20  ;;  %v10775_v26 = vmax.f32 %v8253_v57, %v3150_v31  ;;  %v3159_v7 = vmul.f32 0.2, %v8258_v32  ;;  %v3158_v48 = vmul.f32 0.2, %v8255_v33 }
 0x43a   :  { %v10777_v22 = vmax.f32 %v8257_v12, %v3152_v41  ;;  %v10779_v9 = vmax.f32 %v8254_v14, %v3157_v42  ;;  %v3160_v25 = vmul.f32 0.2, %v8259_v21  ;;  %v3256_v18 = vmul.f32 %v10771_v38, %v10771_v38 }
 0x43b   :  { %v10783_v43 = vmax.f32 %v8258_v32, %v3159_v7  ;;  %v10785_v60 = vmax.f32 %v8255_v33, %v3158_v48  ;;  %v3258_v51 = vmul.f32 %v10773_v6, %v10773_v6  ;;  %v3257_v40 = vmul.f32 %v10775_v26, %v10775_v26 }
 0x43c   :  { %v3192_v19 = vmul.f32 0.0, %v10779_v9  ;;  %v10792_v50 = vmax.f32 %v8259_v21, %v3160_v25  ;;  %v3259_v47 = vmul.f32 %v10777_v22, %v10777_v22  ;;  %9108 = vrsqrt.f32 %v10787_v46 }
 0x43d   :  { %v3194_v44 = vmul.f32 0.0, %v10783_v43  ;;  %v3193_v45 = vmul.f32 0.0, %v10785_v60 }
 0x43e   :  { %v3224_v61 = vadd.f32 %v3192_v19, %v10771_v38  ;;  %v3264_v52 = vmul.f32 %v3192_v19, %v10779_v9  ;;  %v3195_v62 = vmul.f32 0.0, %v10792_v50 }
 0x43f   :  { %v3238_v57 = vadd.f32 %v3194_v44, %v10773_v6  ;;  %v3266_v58 = vmul.f32 %v3194_v44, %v10783_v43  ;;  %v3231_v59 = vadd.f32 %v3193_v45, %v10775_v26  ;;  %v3265_v0 = vmul.f32 %v3193_v45, %v10785_v60 }
 0x440   :  { %v3225_v10 = vrot.slane %v3224_v61, 4  ;;  %v3296_v12 = vadd.f32 %v3264_v52, %v3256_v18  ;;  %v3245_v14 = vadd.f32 %v3195_v62, %v10777_v22  ;;  %v3267_v15 = vmul.f32 %v3195_v62, %v10792_v50 }
 0x441   :  { %v3239_v16 = vrot.slane %v3238_v57, 4  ;;  %v3310_v20 = vadd.f32 %v3266_v58, %v3258_v51  ;;  %v3232_v31 = vrot.slane %v3231_v59, 4  ;;  %v3303_v32 = vadd.f32 %v3265_v0, %v3257_v40 }
 0x442   :  { %v3226_v33 = vadd.f32 %v3225_v10, %v3224_v61  ;;  %v3297_v54 = vrot.slane %v3296_v12, 4  ;;  %v3246_v41 = vrot.slane %v3245_v14, 4  ;;  %v3317_v42 = vadd.f32 %v3267_v15, %v3259_v47 }
 0x443   :  { %v3240_v21 = vadd.f32 %v3239_v16, %v3238_v57  ;;  %v3311_v7 = vrot.slane %v3310_v20, 4  ;;  %v3233_v48 = vadd.f32 %v3232_v31, %v3231_v59  ;;  %v3304_v25 = vrot.slane %v3303_v32, 4 }
 0x444   :  { %v3227_v19 = vrot.slane %v3226_v33, 2  ;;  %v3298_v44 = vadd.f32 %v3297_v54, %v3296_v12  ;;  %v3247_v45 = vadd.f32 %v3246_v41, %v3245_v14  ;;  %v3318_v18 = vrot.slane %v3317_v42, 4 }
 0x445   :  { %v3241_v52 = vrot.slane %v3240_v21, 2  ;;  %v3312_v56 = vadd.f32 %v3311_v7, %v3310_v20  ;;  %v3234_v35 = vrot.slane %v3233_v48, 2  ;;  %v3305_v62 = vadd.f32 %v3304_v25, %v3303_v32 }
 0x446   :  { %v3228_v17 = vadd.f32 %v3227_v19, %v3226_v33  ;;  %v3299_v51 = vrot.slane %v3298_v44, 2  ;;  %v3248_v58 = vrot.slane %v3247_v45, 2  ;;  %v3319_v40 = vadd.f32 %v3318_v18, %v3317_v42 }
 0x447   :  { %v3242_v61 = vadd.f32 %v3241_v52, %v3240_v21  ;;  %v3313_v0 = vrot.slane %v3312_v56, 2  ;;  %v3235_v10 = vadd.f32 %v3234_v35, %v3233_v48  ;;  %v3306_v47 = vrot.slane %v3305_v62, 2 }
 0x448   :  { %v3229_v57 = vrot.slane %v3228_v17, 1  ;;  %v3300_v15 = vadd.f32 %v3299_v51, %v3298_v44  ;;  %v3249_v59 = vadd.f32 %v3248_v58, %v3247_v45  ;;  %v3320_v16 = vrot.slane %v3319_v40, 2 }
 0x449   :  { %v3243_v31 = vrot.slane %v3242_v61, 1  ;;  %v3314_v12 = vadd.f32 %v3313_v0, %v3312_v56  ;;  %v3236_v14 = vrot.slane %v3235_v10, 1  ;;  %v3307_v54 = vadd.f32 %v3306_v47, %v3305_v62 }
 0x44a   :  { %v3230_v41 = vadd.f32 %v3229_v57, %v3228_v17  ;;  %v3301_v20 = vrot.slane %v3300_v15, 1  ;;  %v3250_v7 = vrot.slane %v3249_v59, 1  ;;  %v3321_v32 = vadd.f32 %v3320_v16, %v3319_v40 }
 0x44b   :  { %v3244_v33 = vadd.f32 %v3243_v31, %v3242_v61  ;;  %v3315_v25 = vrot.slane %v3314_v12, 1  ;;  %v3237_v19 = vadd.f32 %v3236_v14, %v3235_v10  ;;  %v3308_v42 = vrot.slane %v3307_v54, 1 }
 0x44c   :  { %v3302_v21 = vadd.f32 %v3301_v20, %v3300_v15  ;;  %v10811_v18 = vmul.f32 0.125, %v3230_v41  ;;  %v3251_v35 = vadd.f32 %v3250_v7, %v3249_v59  ;;  %v3322_v48 = vrot.slane %v3321_v32, 1 }
 0x44d   :  { %v3316_v44 = vadd.f32 %v3315_v25, %v3314_v12  ;;  %v10813_v45 = vmul.f32 0.125, %v3244_v33  ;;  %v3309_v52 = vadd.f32 %v3308_v42, %v3307_v54  ;;  %v3492_v56 = vmul.f32 0.125, %v3237_v19  ;;  %v9109_v25 = vpop.eup %9108 }
 0x44e   :  { %v3499_v51 = vmul.f32 0.125, %v3302_v21  ;;  %v3507_v17 = vmul.f32 %v10811_v18, %v10811_v18  ;;  %v3323_v62 = vadd.f32 %v3322_v48, %v3321_v32  ;;  %v3494_v58 = vmul.f32 0.125, %v3251_v35 }
 0x44f   :  { %v3501_v40 = vmul.f32 0.125, %v3316_v44  ;;  %v3509_v61 = vmul.f32 %v10813_v45, %v10813_v45  ;;  %v3500_v0 = vmul.f32 0.125, %v3309_v52  ;;  %v3508_v10 = vmul.f32 %v3492_v56, %v3492_v56 }
 0x450   :  { %v3515_v47 = vsub.f32 %v3499_v51, %v3507_v17  ;;  %v3502_v57 = vmul.f32 0.125, %v3323_v62  ;;  %v3510_v15 = vmul.f32 %v3494_v58, %v3494_v58  ;;  %v3553_v19 = vcombine.low %v9107_v29, %v9109_v25 }
 0x451   :  { %v3517_v59 = vsub.f32 %v3501_v40, %v3509_v61  ;;  %v3516_v16 = vsub.f32 %v3500_v0, %v3508_v10  ;;  %v12125_v35 = vcombine.low %v10597_v11, %v10599_v13  ;;  %v3527_v11 = vld [vmem:[%s12116_s11] sm:$0xff] }
 0x452   :  { %v3523_v31 = vmax.f32 %v3515_v47, 0.0  ;;  %v3518_v12 = vsub.f32 %v3502_v57, %v3510_v15  ;;  %v3569_v44 = vrot.slane %v3553_v19, %v9437_v63 }
 0x453   :  { %v3525_v14 = vmax.f32 %v3517_v59, 0.0  ;;  %v3524_v54 = vmax.f32 %v3516_v16, 0.0  ;;  %v3562_v48 = vrot.slane %v12125_v35, %v9437_v63 }
 0x454   :  { %v3532_v41 = vadd.f32 1e-05, %v3523_v31  ;;  %v3526_v20 = vmax.f32 %v3518_v12, 0.0 }
 0x455   :  { %v3534_v7 = vadd.f32 1e-05, %v3525_v14  ;;  %v3533_v32 = vadd.f32 1e-05, %v3524_v54  ;;  %v3584_v40 = vcombine.low %v3562_v48, %v3569_v44 }
 0x456   :  { %9110 = vrsqrt.f32 %v3532_v41  ;;  %v3535_v33 = vadd.f32 1e-05, %v3526_v20 }
 0x457   :  { %9112 = vrsqrt.f32 %v3534_v7  ;;  %v3592_v10 = vrot.slane %v3584_v40, %v9437_v63 }
 0x458   :  { %9114 = vrsqrt.f32 %v3533_v32 }
 0x459   :  { %9116 = vrsqrt.f32 %v3535_v33 }
 0x460   :  { %v9111_v42 = vpop.eup %9110 }
 0x461   :  { %v9113_v46 = vpop.eup %9112 }
 0x462   :  { %v9115_v21 = vpop.eup %9114 }
 0x463   :  { %v9117_v52 = vpop.eup %9116  ;;  %v3554_v51 = vcombine.low %v9111_v42, %v9115_v21 }
 0x464   :  { %v3555_v17 = vcombine.low %v9113_v46, %v9117_v52 }
 0x465   :  { %v3576_v62 = vrot.slane %v3554_v51, %v9437_v63 }
 0x466   :  { %v3583_v61 = vrot.slane %v3555_v17, %v9437_v63 }
 0x468   :  { %v3585_v0 = vcombine.low %v3576_v62, %v3583_v61 }
 0x46a   :  { %v3599_v47 = vrot.slane %v3585_v0, %v9437_v63 }
 0x46c   :  { %v3600_v13 = vcombine.low %v3592_v10, %v3599_v47  ;;  %v12126_v47 = vld [vmem:[#allocation6_spill] sm:$0xff] }
 0x46e   :  { %v3602_v57 = vmul.f32 %v3600_v13, %v3527_v11  ;;  %v12127_v11 = vld [vmem:[#allocation5_spill] sm:$0xff] }
 0x470   :  { %v3608_v15 = vrot.slane %v3602_v57, %v9408_v53  ;;  %v3612_v59 = vrot.slane %v3602_v57, %v9414_v55  ;;  %v3616_v16 = vrot.slane %v3602_v57, %v9816_v27  ;;  %v3620_v31 = vrot.slane %v3602_v57, %v9819_v28 }
 0x471   :  { %v3624_v12 = vrot.slane %v3602_v57, %v10748_v8  ;;  %v3628_v14 = vrot.slane %v3602_v57, %v10756_v37  ;;  %v3632_v54 = vrot.slane %v3602_v57, %v10753_v30  ;;  %v3636_v41 = vrot.slane %v3602_v57, %v10761_v39 }
 0x472   :  { %v3645_v20 = vmul.f32 %v3608_v15, %v10529_v1  ;;  %v3646_v7 = vmul.f32 %v3612_v59, %v10531_v49  ;;  %v3647_v32 = vmul.f32 %v3616_v16, %v10743_v34  ;;  %v3648_v33 = vmul.f32 %v3620_v31, %v10745_v24 }
 0x473   :  { %v3649_v29 = vmul.f32 %v3624_v12, %v10811_v18  ;;  %v3650_v25 = vmul.f32 %v3628_v14, %v3492_v56  ;;  %v3651_v19 = vmul.f32 %v3632_v54, %v10813_v45  ;;  %v3652_v42 = vmul.f32 %v3636_v41, %v3494_v58 }
 0x474   :  { %v3661_v46 = vcombine.low %v3645_v20, %v3646_v7  ;;  %v3662_v21 = vcombine.low %v3647_v32, %v3648_v33  ;;  %v3727_v35 = vmul.f32 %v3636_v41, %v10792_v50  ;;  %v3713_v48 = vmul.f32 %v3612_v59, %v10491_v4  ;;  %v8546_v7 = vld [vmem:[%s12118_s13 + $0x380] ss:$28 sps:$4 sm:$0xff]   ;;  %v8549_v32 = vld [vmem:[%s12118_s13 + $0x388] ss:$28 sps:$4 sm:$0xff]  }
 0x475   :  { %v3663_v44 = vcombine.low %v3649_v29, %v3650_v25  ;;  %v3664_v1 = vcombine.low %v3651_v19, %v3652_v42  ;;  %v3712_v49 = vmul.f32 %v3608_v15, %v10487_v2  ;;  %v3717_v58 = vmul.f32 %v3628_v14, %v10775_v26  ;;  %v3603_v26 = vld [vmem:[%s12117_s12] sm:$0xff] }
 0x476   :  { %v3671_v34 = vrot.slane %v3661_v46, %v9437_v63  ;;  %v3678_v24 = vrot.slane %v3662_v21, %v9437_v63  ;;  %v3725_v52 = vmul.f32 %v3628_v14, %v10785_v60  ;;  %v3716_v4 = vmul.f32 %v3624_v12, %v10771_v38 }
 0x477   :  { %v3685_v18 = vrot.slane %v3663_v44, %v9437_v63  ;;  %v3692_v56 = vrot.slane %v3664_v1, %v9437_v63  ;;  %v3724_v51 = vmul.f32 %v3624_v12, %v10779_v9  ;;  %v3719_v2 = vmul.f32 %v3636_v41, %v10777_v22 }
 0x478   :  { %v3693_v45 = vcombine.low %v3671_v34, %v3678_v24  ;;  %v3718_v62 = vmul.f32 %v3632_v54, %v10773_v6  ;;  %v3726_v40 = vmul.f32 %v3632_v54, %v10783_v43  ;;  %v3721_v38 = vmul.f32 %v3612_v59, %v10493_v5 }
 0x479   :  { %v3694_v50 = vcombine.low %v3685_v18, %v3692_v56  ;;  %v3720_v9 = vmul.f32 %v3608_v15, %v10489_v3  ;;  %v3715_v22 = vmul.f32 %v3620_v31, %v10733_v23  ;;  %v3723_v10 = vmul.f32 %v3620_v31, %v10721_v36  ;;  %v8552_v56 = vld [vmem:[%s12118_s13 + $0x3b8] ss:$28 sps:$4 sm:$0xff]  }
 0x47a   :  { %v3701_v17 = vrot.slane %v3693_v45, %v9437_v63  ;;  %v3714_v6 = vmul.f32 %v3616_v16, %v12126_v47  ;;  %v3722_v43 = vmul.f32 %v3616_v16, %v12127_v11  ;;  %v8555_v45 = vld [vmem:[%s12118_s13 + $0x3c0] ss:$28 sps:$4 sm:$0xff]  }
 0x47b   :  { %v3708_v61 = vrot.slane %v3694_v50, %v9437_v63  ;;  %v8563_v50 = vld [vmem:[%s12118_s13 + $0x3fc] ss:$28 sps:$4 sm:$0xff]  }
 0x47c   :  { %v8579_v47 = vld [vmem:[%s12118_s13 + $0x4a0] ss:$28 sps:$4 sm:$0xff]  }
 0x47d   :  { %v3709_v60 = vcombine.low %v3701_v17, %v3708_v61  ;;  %v8566_v17 = vld [vmem:[%s12118_s13 + $0x42c] ss:$28 sps:$4 sm:$0xff]   ;;  %v8587_v11 = vld [vmem:[%s12118_s13 + $0x4dc] ss:$28 sps:$4 sm:$0xff]  }
 0x47e   :  { %v8567_v61 = vld [vmem:[%s12118_s13 + $0x430] ss:$28 sps:$4 sm:$0xff]  }
 0x47f   :  { %v3711_v0 = vsub.f32 %v3603_v26, %v3709_v60  ;;  %v8572_v26 = vld [vmem:[%s12118_s13 + $0x464] ss:$28 sps:$4 sm:$0xff]   ;;  %v8575_v60 = vld [vmem:[%s12118_s13 + $0x46c] ss:$28 sps:$4 sm:$0xff]  }
 0x481   :  { %v3760_v63 = vrot.slane %v3711_v0, %v10761_v39  ;;  %v3736_v13 = vrot.slane %v3711_v0, %v9414_v55  ;;  %v3732_v57 = vrot.slane %v3711_v0, %v9408_v53  ;;  %v3744_v12 = vrot.slane %v3711_v0, %v9819_v28 }
 0x482   :  { %v3740_v5 = vrot.slane %v3711_v0, %v9816_v27  ;;  %v3752_v3 = vrot.slane %v3711_v0, %v10756_v37  ;;  %v3748_v23 = vrot.slane %v3711_v0, %v10748_v8  ;;  %v3756_v36 = vrot.slane %v3711_v0, %v10753_v30  ;;  %v8570_v0 = vld [vmem:[%s12118_s13 + $0x460] ss:$28 sps:$4 sm:$0xff]  }
 0x483   :  { %v3784_v15 = vadd.f32 %v3760_v63, %v3727_v35  ;;  %v3770_v59 = vadd.f32 %v3736_v13, %v3713_v48  ;;  %v3778_v31 = vadd.f32 %v3736_v13, %v3721_v38  ;;  %v3769_v16 = vadd.f32 %v3732_v57, %v3712_v49  ;;  %v8554_v35 = vld [vmem:[%s12118_s13 + $0x3bc] ss:$28 sps:$4 sm:$0xff]   ;;  %v8557_v48 = vld [vmem:[%s12118_s13 + $0x3c4] ss:$28 sps:$4 sm:$0xff]   ;;  %v8590_v13 = vld [vmem:[%s12118_s13 + $0x50c] ss:$28 sps:$4 sm:$0xff]  }
 0x484   :  { %v3777_v14 = vadd.f32 %v3732_v57, %v3720_v9  ;;  %v3772_v39 = vadd.f32 %v3744_v12, %v3715_v22  ;;  %v3780_v54 = vadd.f32 %v3744_v12, %v3723_v10  ;;  %v3771_v41 = vadd.f32 %v3740_v5, %v3714_v6  ;;  %v8573_v38 = vld [vmem:[%s12118_s13 + $0x468] ss:$28 sps:$4 sm:$0xff]   ;;  %v8578_v9 = vld [vmem:[%s12118_s13 + $0x49c] ss:$28 sps:$4 sm:$0xff]   ;;  %v8584_v6 = vld [vmem:[%s12118_s13 + $0x4d4] ss:$28 sps:$4 sm:$0xff]  }
 0x485   :  { %v10880_v20 = vpack.c.bf16 %v3778_v31, %v3770_v59  ;;  %v3779_v33 = vadd.f32 %v3740_v5, %v3722_v43  ;;  %v3774_v29 = vadd.f32 %v3752_v3, %v3717_v58  ;;  %v3782_v25 = vadd.f32 %v3752_v3, %v3725_v52  ;;  %v8560_v52 = vld [vmem:[%s12118_s13 + $0x3f4] ss:$28 sps:$4 sm:$0xff]   ;;  %v8581_v22 = vld [vmem:[%s12118_s13 + $0x4a4] ss:$28 sps:$4 sm:$0xff]   ;;  %v8602_v59 = vld [vmem:[%s12118_s13 + $0x57c] ss:$28 sps:$4 sm:$0xff]  }
 0x486   :  { %v10888_v19 = vpack.c.bf16 %v3777_v14, %v3769_v16  ;;  %v10890_v42 = vpack.c.bf16 %v3780_v54, %v3772_v39  ;;  %v3773_v46 = vadd.f32 %v3748_v23, %v3716_v4  ;;  %v3781_v21 = vadd.f32 %v3748_v23, %v3724_v51  ;;  %v8558_v51 = vld [vmem:[%s12118_s13 + $0x3f0] ss:$28 sps:$4 sm:$0xff]   ;;  %v8576_v10 = vld [vmem:[%s12118_s13 + $0x498] ss:$28 sps:$4 sm:$0xff]   ;;  %v8588_v12 = vld [vmem:[%s12118_s13 + $0x508] ss:$28 sps:$4 sm:$0xff]  }
 0x487   :  { %6678 = vmatprep.mubr.bf16.mxu1 %v10880_v20  ;;  %6850 = vmatprep.mubr.bf16.mxu0 %v10880_v20  ;;  %v10900_v44 = vpack.c.bf16 %v3779_v33, %v3771_v41  ;;  %v10902_v1 = vpack.c.bf16 %v3782_v25, %v3774_v29  ;;  %v3776_v49 = vadd.f32 %v3760_v63, %v3719_v2  ;;  %v8561_v2 = vld [vmem:[%s12118_s13 + $0x3f8] ss:$28 sps:$4 sm:$0xff]   ;;  %v8582_v43 = vld [vmem:[%s12118_s13 + $0x4d0] ss:$28 sps:$4 sm:$0xff]   ;;  %v8596_v3 = vld [vmem:[%s12118_s13 + $0x544] ss:$28 sps:$4 sm:$0xff]  }
 0x488   :  { %6679 = vmatmul.mubr.bf16.vlgmr.msra.gmra.mrb[8].mxu1 %v10888_v19  ;;  %6851 = vmatmul.mubr.bf16.vlgmr.msra.gmra.mrb[20].mxu0 %v10888_v19  ;;  %v10906_v34 = vpack.c.bf16 %v3781_v21, %v3773_v46  ;;  %v3775_v24 = vadd.f32 %v3756_v36, %v3718_v62  ;;  %v3783_v18 = vadd.f32 %v3756_v36, %v3726_v40  ;;  %v8569_v62 = vld [vmem:[%s12118_s13 + $0x434] ss:$28 sps:$4 sm:$0xff]   ;;  %v8564_v40 = vld [vmem:[%s12118_s13 + $0x428] ss:$28 sps:$4 sm:$0xff]   ;;  %v8594_v36 = vld [vmem:[%s12118_s13 + $0x540] ss:$28 sps:$4 sm:$0xff]  }
 0x489   :  { %6690 = vmatpush1.bf16.msra.mxu1 %v8546_v7  ;;  %6862 = vmatpush1.bf16.msra.mxu0 %v8549_v32  ;;  %v10914_v58 = vpack.c.bf16 %v3784_v15, %v3776_v49  ;;  %v8585_v63 = vld [vmem:[%s12118_s13 + $0x4d8] ss:$28 sps:$4 sm:$0xff]   ;;  %v8591_v5 = vld [vmem:[%s12118_s13 + $0x510] ss:$28 sps:$4 sm:$0xff]   ;;  %v8597_v15 = vld [vmem:[%s12118_s13 + $0x548] ss:$28 sps:$4 sm:$0xff]  }
 0x48a   :  { %6721 = vmatprep.mubr.bf16.mxu1 %v10890_v42  ;;  %6893 = vmatprep.mubr.bf16.mxu0 %v10890_v42  ;;  %v10924_v4 = vpack.c.bf16 %v3783_v18, %v3775_v24  ;;  %v8593_v57 = vld [vmem:[%s12118_s13 + $0x514] ss:$28 sps:$4 sm:$0xff]   ;;  %v8599_v23 = vld [vmem:[%s12118_s13 + $0x54c] ss:$28 sps:$4 sm:$0xff]   ;;  %v8605_v31 = vld [vmem:[%s12118_s13 + $0x584] ss:$28 sps:$4 sm:$0xff]  }
 0x48b   :  { %6691 = vmatprep.subr.bf16.mxu1 %v8554_v35  ;;  %6863 = vmatprep.subr.bf16.mxu0 %v8557_v48  ;;  %v8600_v16 = vld [vmem:[%s12118_s13 + $0x578] ss:$28 sps:$4 sm:$0xff]   ;;  %v8603_v14 = vld [vmem:[%s12118_s13 + $0x580] ss:$28 sps:$4 sm:$0xff]   ;;  %v8606_v41 = vld [vmem:[%s12118_s13 + $0x5b0] ss:$28 sps:$4 sm:$0xff]  }
 0x48c   :  { %v8608_v39 = vld [vmem:[%s12118_s13 + $0x5b4] ss:$28 sps:$4 sm:$0xff]   ;;  %v8611_v54 = vld [vmem:[%s12118_s13 + $0x5bc] ss:$28 sps:$4 sm:$0xff]   ;;  %v8614_v32 = vld [vmem:[%s12118_s13 + $0x5ec] ss:$28 sps:$4 sm:$0xff]  }
 0x48d   :  { %6692 = vmatpush1.bf16.msra.mxu1 %v8552_v56  ;;  %6864 = vmatpush1.bf16.msra.mxu0 %v8555_v45  ;;  %v8609_v7 = vld [vmem:[%s12118_s13 + $0x5b8] ss:$28 sps:$4 sm:$0xff]   ;;  %v8612_v29 = vld [vmem:[%s12118_s13 + $0x5e8] ss:$28 sps:$4 sm:$0xff]   ;;  %v8615_v25 = vld [vmem:[%s12118_s13 + $0x5f0] ss:$28 sps:$4 sm:$0xff]  }
 0x48e   :  { %6693 = vmatprep.subr.bf16.mxu1 %v8560_v52  ;;  %6865 = vmatprep.subr.bf16.mxu0 %v8563_v50  ;;  %v8617_v33 = vld [vmem:[%s12118_s13 + $0x5f4] ss:$28 sps:$4 sm:$0xff]   ;;  %v8620_v46 = vld [vmem:[%s12118_s13 + $0x624] ss:$28 sps:$4 sm:$0xff]   ;;  %v8623_v21 = vld [vmem:[%s12118_s13 + $0x62c] ss:$28 sps:$4 sm:$0xff]  }
 0x48f   :  { %v8618_v35 = vld [vmem:[%s12118_s13 + $0x620] ss:$28 sps:$4 sm:$0xff]   ;;  %v8621_v48 = vld [vmem:[%s12118_s13 + $0x628] ss:$28 sps:$4 sm:$0xff]   ;;  %v8624_v18 = vld [vmem:[%s12118_s13 + $0x658] ss:$28 sps:$4 sm:$0xff]  }
 0x490   :  { %v8626_v49 = vld [vmem:[%s12118_s13 + $0x65c] ss:$28 sps:$4 sm:$0xff]   ;;  %v8629_v24 = vld [vmem:[%s12118_s13 + $0x664] ss:$28 sps:$4 sm:$0xff]   ;;  %v8632_v45 = vld [vmem:[%s12118_s13 + $0x694] ss:$28 sps:$4 sm:$0xff]  }
 0x491   :  { %6694 = vmatpush1.bf16.msra.mxu1 %v8558_v51  ;;  %6866 = vmatpush1.bf16.msra.mxu0 %v8561_v2  ;;  %v8627_v56 = vld [vmem:[%s12118_s13 + $0x660] ss:$28 sps:$4 sm:$0xff]   ;;  %v8630_v50 = vld [vmem:[%s12118_s13 + $0x690] ss:$28 sps:$4 sm:$0xff]   ;;  %v8633_v51 = vld [vmem:[%s12118_s13 + $0x698] ss:$28 sps:$4 sm:$0xff]  }
 0x492   :  { %6695 = vmatprep.subr.bf16.mxu1 %v8566_v17  ;;  %6867 = vmatprep.subr.bf16.mxu0 %v8569_v62  ;;  %v8635_v52 = vld [vmem:[%s12118_s13 + $0x69c] ss:$28 sps:$4 sm:$0xff]   ;;  %v8638_v2 = vld [vmem:[%s12118_s13 + $0x6cc] ss:$28 sps:$4 sm:$0xff]   ;;  %v8641_v17 = vld [vmem:[%s12118_s13 + $0x6d4] ss:$28 sps:$4 sm:$0xff]  }
 0x493   :  { %v8636_v62 = vld [vmem:[%s12118_s13 + $0x6c8] ss:$28 sps:$4 sm:$0xff]  }
 0x495   :  { %6696 = vmatpush1.bf16.msra.mxu1 %v8564_v40  ;;  %6868 = vmatpush1.bf16.msra.mxu0 %v8567_v61  ;;  %v8639_v40 = vld [vmem:[%s12118_s13 + $0x6d0] ss:$28 sps:$4 sm:$0xff]   ;;  %v8644_v61 = vld [vmem:[%s12118_s13 + $0x704] ss:$28 sps:$4 sm:$0xff]  }
 0x496   :  { %6697 = vmatprep.subr.bf16.mxu1 %v8572_v26  ;;  %6869 = vmatprep.subr.bf16.mxu0 %v8575_v60  ;;  %v8647_v26 = vld [vmem:[%s12118_s13 + $0x70c] ss:$28 sps:$4 sm:$0xff]   ;;  %v8642_v60 = vld [vmem:[%s12118_s13 + $0x700] ss:$28 sps:$4 sm:$0xff]  }
 0x499   :  { %6698 = vmatpush1.bf16.msra.mxu1 %v8570_v0  ;;  %6870 = vmatpush1.bf16.msra.mxu0 %v8573_v38  ;;  %v8645_v0 = vld [vmem:[%s12118_s13 + $0x708] ss:$28 sps:$4 sm:$0xff]   ;;  %v8650_v38 = vld [vmem:[%s12118_s13 + $0x73c] ss:$28 sps:$4 sm:$0xff]  }
 0x49a   :  { %6699 = vmatprep.subr.bf16.mxu1 %v8578_v9  ;;  %6871 = vmatprep.subr.bf16.mxu0 %v8581_v22  ;;  %v8653_v9 = vld [vmem:[%s12118_s13 + $0x744] ss:$28 sps:$4 sm:$0xff]   ;;  %v8648_v22 = vld [vmem:[%s12118_s13 + $0x738] ss:$28 sps:$4 sm:$0xff]  }
 0x49d   :  { %6700 = vmatpush1.bf16.msra.mxu1 %v8576_v10  ;;  %6872 = vmatpush1.bf16.msra.mxu0 %v8579_v47  ;;  %v8651_v10 = vld [vmem:[%s12118_s13 + $0x740] ss:$28 sps:$4 sm:$0xff]   ;;  %v8656_v47 = vld [vmem:[%s12118_s13 + $0x774] ss:$28 sps:$4 sm:$0xff]  }
 0x49e   :  { %6701 = vmatprep.subr.bf16.mxu1 %v8584_v6  ;;  %6873 = vmatprep.subr.bf16.mxu0 %v8587_v11  ;;  %v8659_v6 = vld [vmem:[%s12118_s13 + $0x77c] ss:$28 sps:$4 sm:$0xff]   ;;  %v8654_v11 = vld [vmem:[%s12118_s13 + $0x770] ss:$28 sps:$4 sm:$0xff]  }
 0x4a1   :  { %6702 = vmatpush1.bf16.msra.mxu1 %v8582_v43  ;;  %6874 = vmatpush1.bf16.msra.mxu0 %v8585_v63  ;;  %v8657_v43 = vld [vmem:[%s12118_s13 + $0x778] ss:$28 sps:$4 sm:$0xff]   ;;  %v8662_v63 = vld [vmem:[%s12118_s13 + $0x7ac] ss:$28 sps:$4 sm:$0xff]  }
 0x4a2   :  { %6703 = vmatprep.subr.bf16.mxu1 %v8590_v13  ;;  %6875 = vmatprep.subr.bf16.mxu0 %v8593_v57  ;;  %v8665_v13 = vld [vmem:[%s12118_s13 + $0x7b4] ss:$28 sps:$4 sm:$0xff]   ;;  %v8660_v57 = vld [vmem:[%s12118_s13 + $0x7a8] ss:$28 sps:$4 sm:$0xff]  }
 0x4a5   :  { %6704 = vmatpush1.bf16.msra.mxu1 %v8588_v12  ;;  %6876 = vmatpush1.bf16.msra.mxu0 %v8591_v5  ;;  %v8663_v12 = vld [vmem:[%s12118_s13 + $0x7b0] ss:$28 sps:$4 sm:$0xff]   ;;  %v8668_v5 = vld [vmem:[%s12118_s13 + $0x7e4] ss:$28 sps:$4 sm:$0xff]  }
 0x4a6   :  { %6705 = vmatprep.subr.bf16.mxu1 %v8596_v3  ;;  %6877 = vmatprep.subr.bf16.mxu0 %v8599_v23  ;;  %v8671_v3 = vld [vmem:[%s12118_s13 + $0x7ec] ss:$28 sps:$4 sm:$0xff]   ;;  %v8666_v23 = vld [vmem:[%s12118_s13 + $0x7e0] ss:$28 sps:$4 sm:$0xff]  }
 0x4a9   :  { %6706 = vmatpush1.bf16.msra.mxu1 %v8594_v36  ;;  %6878 = vmatpush1.bf16.msra.mxu0 %v8597_v15  ;;  %v8669_v36 = vld [vmem:[%s12118_s13 + $0x7e8] ss:$28 sps:$4 sm:$0xff]   ;;  %v8674_v15 = vld [vmem:[%s12118_s13 + $0x81c] ss:$28 sps:$4 sm:$0xff]  }
 0x4aa   :  { %6707 = vmatprep.subr.bf16.mxu1 %v8602_v59  ;;  %6879 = vmatprep.subr.bf16.mxu0 %v8605_v31  ;;  %v8677_v59 = vld [vmem:[%s12118_s13 + $0x824] ss:$28 sps:$4 sm:$0xff]   ;;  %v8672_v31 = vld [vmem:[%s12118_s13 + $0x818] ss:$28 sps:$4 sm:$0xff]  }
 0x4ad   :  { %6708 = vmatpush1.bf16.msra.mxu1 %v8600_v16  ;;  %6880 = vmatpush1.bf16.msra.mxu0 %v8603_v14  ;;  %v8675_v16 = vld [vmem:[%s12118_s13 + $0x820] ss:$28 sps:$4 sm:$0xff]   ;;  %v8680_v14 = vld [vmem:[%s12118_s13 + $0x854] ss:$28 sps:$4 sm:$0xff]  }
 0x4ae   :  { %6709 = vmatprep.subr.bf16.mxu1 %v8608_v39  ;;  %6881 = vmatprep.subr.bf16.mxu0 %v8611_v54  ;;  %v8683_v39 = vld [vmem:[%s12118_s13 + $0x85c] ss:$28 sps:$4 sm:$0xff]   ;;  %v8678_v54 = vld [vmem:[%s12118_s13 + $0x850] ss:$28 sps:$4 sm:$0xff]  }
 0x4b1   :  { %6710 = vmatpush1.bf16.msra.mxu1 %v8606_v41  ;;  %6882 = vmatpush1.bf16.msra.mxu0 %v8609_v7  ;;  %v8681_v41 = vld [vmem:[%s12118_s13 + $0x858] ss:$28 sps:$4 sm:$0xff]   ;;  %v8686_v7 = vld [vmem:[%s12118_s13 + $0x88c] ss:$28 sps:$4 sm:$0xff]  }
 0x4b2   :  { %6711 = vmatprep.subr.bf16.mxu1 %v8614_v32  ;;  %6883 = vmatprep.subr.bf16.mxu0 %v8617_v33  ;;  %v8689_v32 = vld [vmem:[%s12118_s13 + $0x894] ss:$28 sps:$4 sm:$0xff]   ;;  %v8684_v33 = vld [vmem:[%s12118_s13 + $0x888] ss:$28 sps:$4 sm:$0xff]  }
 0x4b5   :  { %6712 = vmatpush1.bf16.msra.mxu1 %v8612_v29  ;;  %6884 = vmatpush1.bf16.msra.mxu0 %v8615_v25  ;;  %v8687_v29 = vld [vmem:[%s12118_s13 + $0x890] ss:$28 sps:$4 sm:$0xff]   ;;  %v8692_v25 = vld [vmem:[%s12118_s13 + $0x8c4] ss:$28 sps:$4 sm:$0xff]  }
 0x4b6   :  { %6713 = vmatprep.subr.bf16.mxu1 %v8620_v46  ;;  %6885 = vmatprep.subr.bf16.mxu0 %v8623_v21  ;;  %v8695_v46 = vld [vmem:[%s12118_s13 + $0x8cc] ss:$28 sps:$4 sm:$0xff]   ;;  %v8690_v21 = vld [vmem:[%s12118_s13 + $0x8c0] ss:$28 sps:$4 sm:$0xff]  }
 0x4b9   :  { %6714 = vmatpush1.bf16.msra.mxu1 %v8618_v35  ;;  %6886 = vmatpush1.bf16.msra.mxu0 %v8621_v48  ;;  %v8693_v35 = vld [vmem:[%s12118_s13 + $0x8c8] ss:$28 sps:$4 sm:$0xff]   ;;  %v8698_v48 = vld [vmem:[%s12118_s13 + $0x8fc] ss:$28 sps:$4 sm:$0xff]  }
 0x4ba   :  { %6715 = vmatprep.subr.bf16.mxu1 %v8626_v49  ;;  %6887 = vmatprep.subr.bf16.mxu0 %v8629_v24  ;;  %v8701_v49 = vld [vmem:[%s12118_s13 + $0x904] ss:$28 sps:$4 sm:$0xff]   ;;  %v8696_v24 = vld [vmem:[%s12118_s13 + $0x8f8] ss:$28 sps:$4 sm:$0xff]  }
 0x4bd   :  { %6716 = vmatpush1.bf16.msra.mxu1 %v8624_v18  ;;  %6888 = vmatpush1.bf16.msra.mxu0 %v8627_v56  ;;  %v8699_v18 = vld [vmem:[%s12118_s13 + $0x900] ss:$28 sps:$4 sm:$0xff]   ;;  %v8704_v56 = vld [vmem:[%s12118_s13 + $0x934] ss:$28 sps:$4 sm:$0xff]  }
 0x4be   :  { %6717 = vmatprep.subr.bf16.mxu1 %v8632_v45  ;;  %6889 = vmatprep.subr.bf16.mxu0 %v8635_v52  ;;  %v8707_v45 = vld [vmem:[%s12118_s13 + $0x93c] ss:$28 sps:$4 sm:$0xff]   ;;  %v8702_v52 = vld [vmem:[%s12118_s13 + $0x930] ss:$28 sps:$4 sm:$0xff]  }
 0x4c1   :  { %6718 = vmatpush1.bf16.msra.mxu1 %v8630_v50  ;;  %6890 = vmatpush1.bf16.msra.mxu0 %v8633_v51  ;;  %v8705_v50 = vld [vmem:[%s12118_s13 + $0x938] ss:$28 sps:$4 sm:$0xff]   ;;  %v8710_v51 = vld [vmem:[%s12118_s13 + $0x96c] ss:$28 sps:$4 sm:$0xff]  }
 0x4c2   :  { %6719 = vmatprep.subr.bf16.mxu1 %v8638_v2  ;;  %6891 = vmatprep.subr.bf16.mxu0 %v8641_v17  ;;  %v8713_v2 = vld [vmem:[%s12118_s13 + $0x974] ss:$28 sps:$4 sm:$0xff]   ;;  %v8708_v17 = vld [vmem:[%s12118_s13 + $0x968] ss:$28 sps:$4 sm:$0xff]  }
 0x4c5   :  { %6720 = vmatpush1.bf16.msra.mxu1 %v8636_v62  ;;  %6892 = vmatpush1.bf16.msra.mxu0 %v8639_v40  ;;  %v8711_v62 = vld [vmem:[%s12118_s13 + $0x970] ss:$28 sps:$4 sm:$0xff]   ;;  %v8716_v40 = vld [vmem:[%s12118_s13 + $0x9a4] ss:$28 sps:$4 sm:$0xff]  }
 0x4c6   :  { %6732 = vmatprep.subr.bf16.mxu1 %v8644_v61  ;;  %6904 = vmatprep.subr.bf16.mxu0 %v8647_v26  ;;  %v8719_v61 = vld [vmem:[%s12118_s13 + $0x9ac] ss:$28 sps:$4 sm:$0xff]   ;;  %v8714_v26 = vld [vmem:[%s12118_s13 + $0x9a0] ss:$28 sps:$4 sm:$0xff]  }
 0x4c8   :  { %6722 = vmatmul.mubr.bf16.vlgmr.msra.gmra.mrb[8].mxu1 %v10900_v44  ;;  %6894 = vmatmul.mubr.bf16.vlgmr.msra.gmra.mrb[20].mxu0 %v10900_v44 }
 0x4c9   :  { %6733 = vmatpush1.bf16.msra.mxu1 %v8642_v60  ;;  %6764 = vmatprep.mubr.bf16.mxu1 %v10902_v1  ;;  %v8717_v60 = vld [vmem:[%s12118_s13 + $0x9a8] ss:$28 sps:$4 sm:$0xff]  }
 0x4ca   :  { %6905 = vmatpush1.bf16.msra.mxu0 %v8645_v0  ;;  %6936 = vmatprep.mubr.bf16.mxu0 %v10902_v1  ;;  %v8722_v0 = vld [vmem:[%s12118_s13 + $0x9dc] ss:$28 sps:$4 sm:$0xff]  }
 0x4cb   :  { %6734 = vmatprep.subr.bf16.mxu1 %v8650_v38  ;;  %6906 = vmatprep.subr.bf16.mxu0 %v8653_v9  ;;  %v8725_v38 = vld [vmem:[%s12118_s13 + $0x9e4] ss:$28 sps:$4 sm:$0xff]   ;;  %v8720_v9 = vld [vmem:[%s12118_s13 + $0x9d8] ss:$28 sps:$4 sm:$0xff]  }
 0x4cd   :  { %6735 = vmatpush1.bf16.msra.mxu1 %v8648_v22  ;;  %v8723_v22 = vld [vmem:[%s12118_s13 + $0x9e0] ss:$28 sps:$4 sm:$0xff]  }
 0x4ce   :  { %6907 = vmatpush1.bf16.msra.mxu0 %v8651_v10  ;;  %6736 = vmatprep.subr.bf16.mxu1 %v8656_v47  ;;  %v8728_v10 = vld [vmem:[%s12118_s13 + $0xa14] ss:$28 sps:$4 sm:$0xff]   ;;  %v8731_v47 = vld [vmem:[%s12118_s13 + $0xa1c] ss:$28 sps:$4 sm:$0xff]  }
 0x4cf   :  { %6908 = vmatprep.subr.bf16.mxu0 %v8659_v6  ;;  %v8726_v6 = vld [vmem:[%s12118_s13 + $0xa10] ss:$28 sps:$4 sm:$0xff]  }
 0x4d1   :  { %6737 = vmatpush1.bf16.msra.mxu1 %v8654_v11  ;;  %v8729_v11 = vld [vmem:[%s12118_s13 + $0xa18] ss:$28 sps:$4 sm:$0xff]  }
 0x4d2   :  { %6909 = vmatpush1.bf16.msra.mxu0 %v8657_v43  ;;  %6738 = vmatprep.subr.bf16.mxu1 %v8662_v63  ;;  %v8734_v43 = vld [vmem:[%s12118_s13 + $0xa4c] ss:$28 sps:$4 sm:$0xff]   ;;  %v8737_v63 = vld [vmem:[%s12118_s13 + $0xa54] ss:$28 sps:$4 sm:$0xff]  }
 0x4d3   :  { %6910 = vmatprep.subr.bf16.mxu0 %v8665_v13  ;;  %v8732_v13 = vld [vmem:[%s12118_s13 + $0xa48] ss:$28 sps:$4 sm:$0xff]  }
 0x4d5   :  { %6739 = vmatpush1.bf16.msra.mxu1 %v8660_v57  ;;  %v8735_v57 = vld [vmem:[%s12118_s13 + $0xa50] ss:$28 sps:$4 sm:$0xff]  }
 0x4d6   :  { %6911 = vmatpush1.bf16.msra.mxu0 %v8663_v12  ;;  %6740 = vmatprep.subr.bf16.mxu1 %v8668_v5  ;;  %v8740_v12 = vld [vmem:[%s12118_s13 + $0xa84] ss:$28 sps:$4 sm:$0xff]   ;;  %v8743_v5 = vld [vmem:[%s12118_s13 + $0xa8c] ss:$28 sps:$4 sm:$0xff]  }
 0x4d7   :  { %6912 = vmatprep.subr.bf16.mxu0 %v8671_v3  ;;  %v8738_v3 = vld [vmem:[%s12118_s13 + $0xa80] ss:$28 sps:$4 sm:$0xff]  }
 0x4d9   :  { %6741 = vmatpush1.bf16.msra.mxu1 %v8666_v23  ;;  %v8741_v23 = vld [vmem:[%s12118_s13 + $0xa88] ss:$28 sps:$4 sm:$0xff]  }
 0x4da   :  { %6913 = vmatpush1.bf16.msra.mxu0 %v8669_v36  ;;  %6742 = vmatprep.subr.bf16.mxu1 %v8674_v15  ;;  %v8746_v36 = vld [vmem:[%s12118_s13 + $0xabc] ss:$28 sps:$4 sm:$0xff]   ;;  %v8749_v15 = vld [vmem:[%s12118_s13 + $0xac4] ss:$28 sps:$4 sm:$0xff]  }
 0x4db   :  { %6914 = vmatprep.subr.bf16.mxu0 %v8677_v59  ;;  %v8744_v59 = vld [vmem:[%s12118_s13 + $0xab8] ss:$28 sps:$4 sm:$0xff]  }
 0x4dd   :  { %6743 = vmatpush1.bf16.msra.mxu1 %v8672_v31  ;;  %v8747_v31 = vld [vmem:[%s12118_s13 + $0xac0] ss:$28 sps:$4 sm:$0xff]  }
 0x4de   :  { %6915 = vmatpush1.bf16.msra.mxu0 %v8675_v16  ;;  %6744 = vmatprep.subr.bf16.mxu1 %v8680_v14  ;;  %v8752_v16 = vld [vmem:[%s12118_s13 + $0xaf4] ss:$28 sps:$4 sm:$0xff]   ;;  %v8755_v14 = vld [vmem:[%s12118_s13 + $0xafc] ss:$28 sps:$4 sm:$0xff]  }
 0x4df   :  { %6916 = vmatprep.subr.bf16.mxu0 %v8683_v39  ;;  %v8750_v39 = vld [vmem:[%s12118_s13 + $0xaf0] ss:$28 sps:$4 sm:$0xff]  }
 0x4e1   :  { %6745 = vmatpush1.bf16.msra.mxu1 %v8678_v54  ;;  %v8753_v54 = vld [vmem:[%s12118_s13 + $0xaf8] ss:$28 sps:$4 sm:$0xff]  }
 0x4e2   :  { %6917 = vmatpush1.bf16.msra.mxu0 %v8681_v41  ;;  %6746 = vmatprep.subr.bf16.mxu1 %v8686_v7  ;;  %v8758_v41 = vld [vmem:[%s12118_s13 + $0xb2c] ss:$28 sps:$4 sm:$0xff]   ;;  %v8761_v7 = vld [vmem:[%s12118_s13 + $0xb34] ss:$28 sps:$4 sm:$0xff]  }
 0x4e3   :  { %6918 = vmatprep.subr.bf16.mxu0 %v8689_v32  ;;  %v8756_v32 = vld [vmem:[%s12118_s13 + $0xb28] ss:$28 sps:$4 sm:$0xff]  }
 0x4e5   :  { %6747 = vmatpush1.bf16.msra.mxu1 %v8684_v33  ;;  %v8759_v33 = vld [vmem:[%s12118_s13 + $0xb30] ss:$28 sps:$4 sm:$0xff]  }
 0x4e6   :  { %6919 = vmatpush1.bf16.msra.mxu0 %v8687_v29  ;;  %6748 = vmatprep.subr.bf16.mxu1 %v8692_v25  ;;  %v8764_v29 = vld [vmem:[%s12118_s13 + $0xb64] ss:$28 sps:$4 sm:$0xff]   ;;  %v8767_v25 = vld [vmem:[%s12118_s13 + $0xb6c] ss:$28 sps:$4 sm:$0xff]  }
 0x4e7   :  { %6920 = vmatprep.subr.bf16.mxu0 %v8695_v46  ;;  %v8762_v46 = vld [vmem:[%s12118_s13 + $0xb60] ss:$28 sps:$4 sm:$0xff]  }
 0x4e9   :  { %6749 = vmatpush1.bf16.msra.mxu1 %v8690_v21  ;;  %v8765_v21 = vld [vmem:[%s12118_s13 + $0xb68] ss:$28 sps:$4 sm:$0xff]  }
 0x4ea   :  { %6921 = vmatpush1.bf16.msra.mxu0 %v8693_v35  ;;  %6750 = vmatprep.subr.bf16.mxu1 %v8698_v48  ;;  %v8770_v35 = vld [vmem:[%s12118_s13 + $0xb9c] ss:$28 sps:$4 sm:$0xff]   ;;  %v8773_v48 = vld [vmem:[%s12118_s13 + $0xba4] ss:$28 sps:$4 sm:$0xff]  }
 0x4eb   :  { %6922 = vmatprep.subr.bf16.mxu0 %v8701_v49  ;;  %v8768_v49 = vld [vmem:[%s12118_s13 + $0xb98] ss:$28 sps:$4 sm:$0xff]  }
 0x4ed   :  { %6751 = vmatpush1.bf16.msra.mxu1 %v8696_v24  ;;  %v8771_v24 = vld [vmem:[%s12118_s13 + $0xba0] ss:$28 sps:$4 sm:$0xff]  }
 0x4ee   :  { %6923 = vmatpush1.bf16.msra.mxu0 %v8699_v18  ;;  %6752 = vmatprep.subr.bf16.mxu1 %v8704_v56  ;;  %v8776_v18 = vld [vmem:[%s12118_s13 + $0xbd4] ss:$28 sps:$4 sm:$0xff]   ;;  %v8779_v56 = vld [vmem:[%s12118_s13 + $0xbdc] ss:$28 sps:$4 sm:$0xff]  }
 0x4ef   :  { %6924 = vmatprep.subr.bf16.mxu0 %v8707_v45  ;;  %v8774_v45 = vld [vmem:[%s12118_s13 + $0xbd0] ss:$28 sps:$4 sm:$0xff]  }
 0x4f1   :  { %6753 = vmatpush1.bf16.msra.mxu1 %v8702_v52  ;;  %v8777_v52 = vld [vmem:[%s12118_s13 + $0xbd8] ss:$28 sps:$4 sm:$0xff]  }
 0x4f2   :  { %6925 = vmatpush1.bf16.msra.mxu0 %v8705_v50  ;;  %6754 = vmatprep.subr.bf16.mxu1 %v8710_v51  ;;  %v8782_v50 = vld [vmem:[%s12118_s13 + $0xc0c] ss:$28 sps:$4 sm:$0xff]   ;;  %v8785_v51 = vld [vmem:[%s12118_s13 + $0xc14] ss:$28 sps:$4 sm:$0xff]  }
 0x4f3   :  { %6926 = vmatprep.subr.bf16.mxu0 %v8713_v2  ;;  %v8780_v2 = vld [vmem:[%s12118_s13 + $0xc08] ss:$28 sps:$4 sm:$0xff]  }
 0x4f5   :  { %6755 = vmatpush1.bf16.msra.mxu1 %v8708_v17  ;;  %v8783_v17 = vld [vmem:[%s12118_s13 + $0xc10] ss:$28 sps:$4 sm:$0xff]  }
 0x4f6   :  { %6927 = vmatpush1.bf16.msra.mxu0 %v8711_v62  ;;  %6756 = vmatprep.subr.bf16.mxu1 %v8716_v40  ;;  %v8788_v62 = vld [vmem:[%s12118_s13 + $0xc44] ss:$28 sps:$4 sm:$0xff]   ;;  %v8791_v40 = vld [vmem:[%s12118_s13 + $0xc4c] ss:$28 sps:$4 sm:$0xff]  }
 0x4f7   :  { %6928 = vmatprep.subr.bf16.mxu0 %v8719_v61  ;;  %v8786_v61 = vld [vmem:[%s12118_s13 + $0xc40] ss:$28 sps:$4 sm:$0xff]  }
 0x4f9   :  { %6757 = vmatpush1.bf16.msra.mxu1 %v8714_v26  ;;  %v8789_v26 = vld [vmem:[%s12118_s13 + $0xc48] ss:$28 sps:$4 sm:$0xff]  }
 0x4fa   :  { %6929 = vmatpush1.bf16.msra.mxu0 %v8717_v60  ;;  %6758 = vmatprep.subr.bf16.mxu1 %v8722_v0  ;;  %v8794_v60 = vld [vmem:[%s12118_s13 + $0xc7c] ss:$28 sps:$4 sm:$0xff]   ;;  %v8797_v0 = vld [vmem:[%s12118_s13 + $0xc84] ss:$28 sps:$4 sm:$0xff]  }
 0x4fb   :  { %6930 = vmatprep.subr.bf16.mxu0 %v8725_v38  ;;  %v8792_v38 = vld [vmem:[%s12118_s13 + $0xc78] ss:$28 sps:$4 sm:$0xff]  }
 0x4fd   :  { %6759 = vmatpush1.bf16.msra.mxu1 %v8720_v9  ;;  %v8795_v9 = vld [vmem:[%s12118_s13 + $0xc80] ss:$28 sps:$4 sm:$0xff]  }
 0x4fe   :  { %6931 = vmatpush1.bf16.msra.mxu0 %v8723_v22  ;;  %6760 = vmatprep.subr.bf16.mxu1 %v8728_v10  ;;  %v8800_v22 = vld [vmem:[%s12118_s13 + $0xcb4] ss:$28 sps:$4 sm:$0xff]   ;;  %v8803_v10 = vld [vmem:[%s12118_s13 + $0xcbc] ss:$28 sps:$4 sm:$0xff]  }
 0x4ff   :  { %6932 = vmatprep.subr.bf16.mxu0 %v8731_v47  ;;  %v8798_v47 = vld [vmem:[%s12118_s13 + $0xcb0] ss:$28 sps:$4 sm:$0xff]  }
 0x501   :  { %6761 = vmatpush1.bf16.msra.mxu1 %v8726_v6  ;;  %v8801_v6 = vld [vmem:[%s12118_s13 + $0xcb8] ss:$28 sps:$4 sm:$0xff]  }
 0x502   :  { %6933 = vmatpush1.bf16.msra.mxu0 %v8729_v11  ;;  %6762 = vmatprep.subr.bf16.mxu1 %v8734_v43  ;;  %v8806_v11 = vld [vmem:[%s12118_s13 + $0xcec] ss:$28 sps:$4 sm:$0xff]   ;;  %v8809_v43 = vld [vmem:[%s12118_s13 + $0xcf4] ss:$28 sps:$4 sm:$0xff]  }
 0x503   :  { %6934 = vmatprep.subr.bf16.mxu0 %v8737_v63  ;;  %v8804_v63 = vld [vmem:[%s12118_s13 + $0xce8] ss:$28 sps:$4 sm:$0xff]  }
 0x505   :  { %6763 = vmatpush1.bf16.msra.mxu1 %v8732_v13  ;;  %v8807_v13 = vld [vmem:[%s12118_s13 + $0xcf0] ss:$28 sps:$4 sm:$0xff]  }
 0x506   :  { %6935 = vmatpush1.bf16.msra.mxu0 %v8735_v57  ;;  %6775 = vmatprep.subr.bf16.mxu1 %v8740_v12  ;;  %v8812_v57 = vld [vmem:[%s12118_s13 + $0xd24] ss:$28 sps:$4 sm:$0xff]   ;;  %v8815_v12 = vld [vmem:[%s12118_s13 + $0xd2c] ss:$28 sps:$4 sm:$0xff]  }
 0x507   :  { %6947 = vmatprep.subr.bf16.mxu0 %v8743_v5  ;;  %v8810_v5 = vld [vmem:[%s12118_s13 + $0xd20] ss:$28 sps:$4 sm:$0xff]  }
 0x508   :  { %6765 = vmatmul.mubr.bf16.vlgmr.msra.gmra.mrb[8].mxu1 %v10906_v34 }
 0x509   :  { %6937 = vmatmul.mubr.bf16.vlgmr.msra.gmra.mrb[20].mxu0 %v10906_v34  ;;  %6776 = vmatpush1.bf16.msra.mxu1 %v8738_v3  ;;  %v8813_v3 = vld [vmem:[%s12118_s13 + $0xd28] ss:$28 sps:$4 sm:$0xff]  }
 0x50a   :  { %6807 = vmatprep.mubr.bf16.mxu1 %v10914_v58  ;;  %6948 = vmatpush1.bf16.msra.mxu0 %v8741_v23  ;;  %v8818_v23 = vld [vmem:[%s12118_s13 + $0xd5c] ss:$28 sps:$4 sm:$0xff]  }
 0x50b   :  { %6979 = vmatprep.mubr.bf16.mxu0 %v10914_v58  ;;  %6777 = vmatprep.subr.bf16.mxu1 %v8746_v36  ;;  %v8821_v36 = vld [vmem:[%s12118_s13 + $0xd64] ss:$28 sps:$4 sm:$0xff]  }
 0x50c   :  { %6949 = vmatprep.subr.bf16.mxu0 %v8749_v15  ;;  %v8816_v15 = vld [vmem:[%s12118_s13 + $0xd58] ss:$28 sps:$4 sm:$0xff]  }
 0x50d   :  { %6778 = vmatpush1.bf16.msra.mxu1 %v8744_v59  ;;  %v8819_v59 = vld [vmem:[%s12118_s13 + $0xd60] ss:$28 sps:$4 sm:$0xff]  }
 0x50e   :  { %6950 = vmatpush1.bf16.msra.mxu0 %v8747_v31  ;;  %6779 = vmatprep.subr.bf16.mxu1 %v8752_v16  ;;  %v8824_v31 = vld [vmem:[%s12118_s13 + $0xd94] ss:$28 sps:$4 sm:$0xff]   ;;  %v8827_v16 = vld [vmem:[%s12118_s13 + $0xd9c] ss:$28 sps:$4 sm:$0xff]  }
 0x50f   :  { %6951 = vmatprep.subr.bf16.mxu0 %v8755_v14  ;;  %v8822_v14 = vld [vmem:[%s12118_s13 + $0xd90] ss:$28 sps:$4 sm:$0xff]  }
 0x511   :  { %6780 = vmatpush1.bf16.msra.mxu1 %v8750_v39  ;;  %v8825_v39 = vld [vmem:[%s12118_s13 + $0xd98] ss:$28 sps:$4 sm:$0xff]  }
 0x512   :  { %6952 = vmatpush1.bf16.msra.mxu0 %v8753_v54  ;;  %6781 = vmatprep.subr.bf16.mxu1 %v8758_v41  ;;  %v8830_v54 = vld [vmem:[%s12118_s13 + $0xdcc] ss:$28 sps:$4 sm:$0xff]   ;;  %v8833_v41 = vld [vmem:[%s12118_s13 + $0xdd4] ss:$28 sps:$4 sm:$0xff]  }
 0x513   :  { %6953 = vmatprep.subr.bf16.mxu0 %v8761_v7  ;;  %v8828_v7 = vld [vmem:[%s12118_s13 + $0xdc8] ss:$28 sps:$4 sm:$0xff]  }
 0x515   :  { %6782 = vmatpush1.bf16.msra.mxu1 %v8756_v32  ;;  %v8831_v32 = vld [vmem:[%s12118_s13 + $0xdd0] ss:$28 sps:$4 sm:$0xff]  }
 0x516   :  { %6954 = vmatpush1.bf16.msra.mxu0 %v8759_v33  ;;  %6783 = vmatprep.subr.bf16.mxu1 %v8764_v29  ;;  %v8836_v33 = vld [vmem:[%s12118_s13 + $0x14] ss:$28 sps:$4 sm:$0xff]  }
 0x517   :  { %6955 = vmatprep.subr.bf16.mxu0 %v8767_v25  ;;  %v8837_v29 = vld [vmem:[%s12118_s13 + $0x1d8] ss:$28 sps:$4 sm:$0xff]   ;;  %v8834_v25 = vld [vmem:[%s12118_s13 + $0x10] ss:$28 sps:$4 sm:$0xff]  }
 0x519   :  { %6784 = vmatpush1.bf16.msra.mxu1 %v8762_v46  ;;  %v8838_v46 = vld [vmem:[%s12118_s13 + $0x18] ss:$28 sps:$4 sm:$0xff]  }
 0x51a   :  { %6956 = vmatpush1.bf16.msra.mxu0 %v8765_v21  ;;  %6785 = vmatprep.subr.bf16.mxu1 %v8770_v35  ;;  %v8841_v21 = vld [vmem:[%s12118_s13 + $0x4c] ss:$28 sps:$4 sm:$0xff]  }
 0x51b   :  { %6957 = vmatprep.subr.bf16.mxu0 %v8773_v48  ;;  %v8842_v35 = vld [vmem:[%s12118_s13 + $0x210] ss:$28 sps:$4 sm:$0xff]   ;;  %v8839_v48 = vld [vmem:[%s12118_s13 + $0x48] ss:$28 sps:$4 sm:$0xff]  }
 0x51d   :  { %6786 = vmatpush1.bf16.msra.mxu1 %v8768_v49  ;;  %v8843_v49 = vld [vmem:[%s12118_s13 + $0x50] ss:$28 sps:$4 sm:$0xff]  }
 0x51e   :  { %6958 = vmatpush1.bf16.msra.mxu0 %v8771_v24  ;;  %6787 = vmatprep.subr.bf16.mxu1 %v8776_v18  ;;  %v8846_v24 = vld [vmem:[%s12118_s13 + $0x84] ss:$28 sps:$4 sm:$0xff]  }
 0x51f   :  { %6959 = vmatprep.subr.bf16.mxu0 %v8779_v56  ;;  %v8847_v18 = vld [vmem:[%s12118_s13 + $0x248] ss:$28 sps:$4 sm:$0xff]   ;;  %v8844_v56 = vld [vmem:[%s12118_s13 + $0x80] ss:$28 sps:$4 sm:$0xff]  }
 0x521   :  { %6788 = vmatpush1.bf16.msra.mxu1 %v8774_v45  ;;  %v8848_v45 = vld [vmem:[%s12118_s13 + $0x88] ss:$28 sps:$4 sm:$0xff]  }
 0x522   :  { %6960 = vmatpush1.bf16.msra.mxu0 %v8777_v52  ;;  %6789 = vmatprep.subr.bf16.mxu1 %v8782_v50  ;;  %v8852_v52 = vld [vmem:[%s12118_s13 + $0x280] ss:$28 sps:$4 sm:$0xff]   ;;  %v8849_v50 = vld [vmem:[%s12118_s13 + $0xb8] ss:$28 sps:$4 sm:$0xff]  }
 0x523   :  { %6961 = vmatprep.subr.bf16.mxu0 %v8785_v51  ;;  %v8853_v51 = vld [vmem:[%s12118_s13 + $0xc0] ss:$28 sps:$4 sm:$0xff]  }
 0x525   :  { %6790 = vmatpush1.bf16.msra.mxu1 %v8780_v2  ;;  %v8856_v2 = vld [vmem:[%s12118_s13 + $0xf4] ss:$28 sps:$4 sm:$0xff]  }
 0x526   :  { %6962 = vmatpush1.bf16.msra.mxu0 %v8783_v17  ;;  %6791 = vmatprep.subr.bf16.mxu1 %v8788_v62  ;;  %v8857_v17 = vld [vmem:[%s12118_s13 + $0x2b8] ss:$28 sps:$4 sm:$0xff]   ;;  %v8854_v62 = vld [vmem:[%s12118_s13 + $0xf0] ss:$28 sps:$4 sm:$0xff]  }
 0x527   :  { %6963 = vmatprep.subr.bf16.mxu0 %v8791_v40  ;;  %v8858_v40 = vld [vmem:[%s12118_s13 + $0xf8] ss:$28 sps:$4 sm:$0xff]  }
 0x529   :  { %6792 = vmatpush1.bf16.msra.mxu1 %v8786_v61  ;;  %v8861_v61 = vld [vmem:[%s12118_s13 + $0x12c] ss:$28 sps:$4 sm:$0xff]  }
 0x52a   :  { %6964 = vmatpush1.bf16.msra.mxu0 %v8789_v26  ;;  %6793 = vmatprep.subr.bf16.mxu1 %v8794_v60  ;;  %v8862_v26 = vld [vmem:[%s12118_s13 + $0x2f0] ss:$28 sps:$4 sm:$0xff]   ;;  %v8859_v60 = vld [vmem:[%s12118_s13 + $0x128] ss:$28 sps:$4 sm:$0xff]  }
 0x52b   :  { %6965 = vmatprep.subr.bf16.mxu0 %v8797_v0  ;;  %v8863_v0 = vld [vmem:[%s12118_s13 + $0x130] ss:$28 sps:$4 sm:$0xff]  }
 0x52d   :  { %6794 = vmatpush1.bf16.msra.mxu1 %v8792_v38  ;;  %v8866_v38 = vld [vmem:[%s12118_s13 + $0x164] ss:$28 sps:$4 sm:$0xff]  }
 0x52e   :  { %6966 = vmatpush1.bf16.msra.mxu0 %v8795_v9  ;;  %6795 = vmatprep.subr.bf16.mxu1 %v8800_v22  ;;  %v8867_v9 = vld [vmem:[%s12118_s13 + $0x328] ss:$28 sps:$4 sm:$0xff]   ;;  %v8864_v22 = vld [vmem:[%s12118_s13 + $0x160] ss:$28 sps:$4 sm:$0xff]  }
 0x52f   :  { %6967 = vmatprep.subr.bf16.mxu0 %v8803_v10  ;;  %v8868_v10 = vld [vmem:[%s12118_s13 + $0x168] ss:$28 sps:$4 sm:$0xff]  }
 0x531   :  { %6796 = vmatpush1.bf16.msra.mxu1 %v8798_v47  ;;  %v8871_v47 = vld [vmem:[%s12118_s13 + $0x19c] ss:$28 sps:$4 sm:$0xff]  }
 0x532   :  { %6968 = vmatpush1.bf16.msra.mxu0 %v8801_v6  ;;  %6797 = vmatprep.subr.bf16.mxu1 %v8806_v11  ;;  %v8872_v6 = vld [vmem:[%s12118_s13 + $0x360] ss:$28 sps:$4 sm:$0xff]   ;;  %v8869_v11 = vld [vmem:[%s12118_s13 + $0x198] ss:$28 sps:$4 sm:$0xff]  }
 0x533   :  { %6969 = vmatprep.subr.bf16.mxu0 %v8809_v43  ;;  %v8873_v43 = vld [vmem:[%s12118_s13 + $0x1a0] ss:$28 sps:$4 sm:$0xff]  }
 0x535   :  { %6798 = vmatpush1.bf16.msra.mxu1 %v8804_v63  ;;  %v8876_v63 = vld [vmem:[%s12118_s13 + $0x1d4] ss:$28 sps:$4 sm:$0xff]  }
 0x536   :  { %6970 = vmatpush1.bf16.msra.mxu0 %v8807_v13  ;;  %6799 = vmatprep.subr.bf16.mxu1 %v8812_v57  ;;  %v8877_v13 = vld [vmem:[%s12118_s13 + $0x558] ss:$28 sps:$4 sm:$0xff]   ;;  %v8874_v57 = vld [vmem:[%s12118_s13 + $0x1d0] ss:$28 sps:$4 sm:$0xff]  }
 0x537   :  { %6971 = vmatprep.subr.bf16.mxu0 %v8815_v12  ;;  %v8878_v12 = vld [vmem:[%s12118_s13 + $0x398] ss:$28 sps:$4 sm:$0xff]  }
 0x539   :  { %6800 = vmatpush1.bf16.msra.mxu1 %v8810_v5  ;;  %v8881_v5 = vld [vmem:[%s12118_s13 + $0x20c] ss:$28 sps:$4 sm:$0xff]  }
 0x53a   :  { %6972 = vmatpush1.bf16.msra.mxu0 %v8813_v3  ;;  %6801 = vmatprep.subr.bf16.mxu1 %v8818_v23  ;;  %v8882_v3 = vld [vmem:[%s12118_s13 + $0x590] ss:$28 sps:$4 sm:$0xff]   ;;  %v8879_v23 = vld [vmem:[%s12118_s13 + $0x208] ss:$28 sps:$4 sm:$0xff]  }
 0x53b   :  { %6973 = vmatprep.subr.bf16.mxu0 %v8821_v36  ;;  %v8883_v36 = vld [vmem:[%s12118_s13 + $0x3d0] ss:$28 sps:$4 sm:$0xff]  }
 0x53d   :  { %6802 = vmatpush1.bf16.msra.mxu1 %v8816_v15  ;;  %v8886_v15 = vld [vmem:[%s12118_s13 + $0x244] ss:$28 sps:$4 sm:$0xff]  }
 0x53e   :  { %6974 = vmatpush1.bf16.msra.mxu0 %v8819_v59  ;;  %6803 = vmatprep.subr.bf16.mxu1 %v8824_v31  ;;  %v8887_v59 = vld [vmem:[%s12118_s13 + $0x5c8] ss:$28 sps:$4 sm:$0xff]   ;;  %v8884_v31 = vld [vmem:[%s12118_s13 + $0x240] ss:$28 sps:$4 sm:$0xff]  }
 0x53f   :  { %6975 = vmatprep.subr.bf16.mxu0 %v8827_v16  ;;  %v8888_v16 = vld [vmem:[%s12118_s13 + $0x408] ss:$28 sps:$4 sm:$0xff]  }
 0x541   :  { %6804 = vmatpush1.bf16.msra.mxu1 %v8822_v14  ;;  %v8891_v14 = vld [vmem:[%s12118_s13 + $0x27c] ss:$28 sps:$4 sm:$0xff]  }
 0x542   :  { %6976 = vmatpush1.bf16.msra.mxu0 %v8825_v39  ;;  %6805 = vmatprep.subr.bf16.mxu1 %v8830_v54  ;;  %v8892_v39 = vld [vmem:[%s12118_s13 + $0x600] ss:$28 sps:$4 sm:$0xff]   ;;  %v8889_v54 = vld [vmem:[%s12118_s13 + $0x278] ss:$28 sps:$4 sm:$0xff]  }
 0x543   :  { %6977 = vmatprep.subr.bf16.mxu0 %v8833_v41  ;;  %v8893_v41 = vld [vmem:[%s12118_s13 + $0x440] ss:$28 sps:$4 sm:$0xff]  }
 0x545   :  { %6806 = vmatpush1.bf16.msra.mxu1 %v8828_v7  ;;  %v8896_v7 = vld [vmem:[%s12118_s13 + $0x2b4] ss:$28 sps:$4 sm:$0xff]  }
 0x546   :  { %6978 = vmatpush1.bf16.msra.mxu0 %v8831_v32  ;;  %6990 = vmatprep.subr.bf16.mxu1 %v8836_v33  ;;  %v8897_v32 = vld [vmem:[%s12118_s13 + $0x638] ss:$28 sps:$4 sm:$0xff]   ;;  %v8894_v33 = vld [vmem:[%s12118_s13 + $0x2b0] ss:$28 sps:$4 sm:$0xff]  }
 0x547   :  { %8156 = vmatprep.subr.bf16.mxu0 %v8837_v29  ;;  %v8898_v29 = vld [vmem:[%s12118_s13 + $0x478] ss:$28 sps:$4 sm:$0xff]  }
 0x548   :  { %6808 = vmatmul.mubr.bf16.vlgmr.msra.gmra.mrb[8].mxu1 %v10924_v4 }
 0x549   :  { %6980 = vmatmul.mubr.bf16.vlgmr.msra.gmra.mrb[20].mxu0 %v10924_v4  ;;  %6991 = vmatpush1.bf16.msra.mxu1 %v8834_v25  ;;  %v8901_v25 = vld [vmem:[%s12118_s13 + $0x2ec] ss:$28 sps:$4 sm:$0xff]  }
 0x54a   :  { %7022 = vmatprep.mubr.bf16.mxu1 %v10880_v20  ;;  %8157 = vmatpush3.bf16.msra.mxu0 %v8838_v46  ;;  %v8902_v46 = vld [vmem:[%s12118_s13 + $0x670] ss:$28 sps:$4 sm:$0xff]  }
 0x54b   :  { %7194 = vmatprep.mubr.bf16.mxu0 %v10880_v20  ;;  %6992 = vmatprep.subr.bf16.mxu1 %v8841_v21  ;;  %v8851_v20 = vld [vmem:[%s12118_s13 + $0xbc] ss:$28 sps:$4 sm:$0xff]   ;;  %v8899_v21 = vld [vmem:[%s12118_s13 + $0x2e8] ss:$28 sps:$4 sm:$0xff]  }
 0x54c   :  { %8158 = vmatprep.subr.bf16.mxu0 %v8842_v35  ;;  %v8903_v35 = vld [vmem:[%s12118_s13 + $0x4b0] ss:$28 sps:$4 sm:$0xff]  }
 0x54d   :  { %6993 = vmatpush1.bf16.msra.mxu1 %v8839_v48  ;;  %v8906_v48 = vld [vmem:[%s12118_s13 + $0x324] ss:$28 sps:$4 sm:$0xff]  }
 0x54e   :  { %8159 = vmatpush3.bf16.msra.mxu0 %v8843_v49  ;;  %6994 = vmatprep.subr.bf16.mxu1 %v8846_v24  ;;  %v8907_v49 = vld [vmem:[%s12118_s13 + $0x6a8] ss:$28 sps:$4 sm:$0xff]   ;;  %v8904_v24 = vld [vmem:[%s12118_s13 + $0x320] ss:$28 sps:$4 sm:$0xff]  }
 0x54f   :  { %8160 = vmatprep.subr.bf16.mxu0 %v8847_v18  ;;  %v8908_v18 = vld [vmem:[%s12118_s13 + $0x4e8] ss:$28 sps:$4 sm:$0xff]  }
 0x551   :  { %6995 = vmatpush1.bf16.msra.mxu1 %v8844_v56  ;;  %v8911_v56 = vld [vmem:[%s12118_s13 + $0x35c] ss:$28 sps:$4 sm:$0xff]  }
 0x552   :  { %8161 = vmatpush3.bf16.msra.mxu0 %v8848_v45  ;;  %6996 = vmatprep.subr.bf16.mxu1 %v8851_v20  ;;  %v8912_v45 = vld [vmem:[%s12118_s13 + $0x6e0] ss:$28 sps:$4 sm:$0xff]   ;;  %v8909_v20 = vld [vmem:[%s12118_s13 + $0x358] ss:$28 sps:$4 sm:$0xff]  }
 0x553   :  { %8162 = vmatprep.subr.bf16.mxu0 %v8852_v52  ;;  %v8913_v52 = vld [vmem:[%s12118_s13 + $0x520] ss:$28 sps:$4 sm:$0xff]  }
 0x555   :  { %6997 = vmatpush1.bf16.msra.mxu1 %v8849_v50  ;;  %v8916_v50 = vld [vmem:[%s12118_s13 + $0x394] ss:$28 sps:$4 sm:$0xff]  }
 0x556   :  { %8163 = vmatpush3.bf16.msra.mxu0 %v8853_v51  ;;  %6998 = vmatprep.subr.bf16.mxu1 %v8856_v2  ;;  %v8917_v51 = vld [vmem:[%s12118_s13 + $0x8d8] ss:$28 sps:$4 sm:$0xff]   ;;  %v8914_v2 = vld [vmem:[%s12118_s13 + $0x390] ss:$28 sps:$4 sm:$0xff]  }
 0x557   :  { %8164 = vmatprep.subr.bf16.mxu0 %v8857_v17  ;;  %v8918_v17 = vld [vmem:[%s12118_s13 + $0x718] ss:$28 sps:$4 sm:$0xff]  }
 0x559   :  { %6999 = vmatpush1.bf16.msra.mxu1 %v8854_v62  ;;  %v8921_v62 = vld [vmem:[%s12118_s13 + $0x3cc] ss:$28 sps:$4 sm:$0xff]  }
 0x55a   :  { %8165 = vmatpush3.bf16.msra.mxu0 %v8858_v40  ;;  %7000 = vmatprep.subr.bf16.mxu1 %v8861_v61  ;;  %v8922_v40 = vld [vmem:[%s12118_s13 + $0x910] ss:$28 sps:$4 sm:$0xff]   ;;  %v8919_v61 = vld [vmem:[%s12118_s13 + $0x3c8] ss:$28 sps:$4 sm:$0xff]  }
 0x55b   :  { %8166 = vmatprep.subr.bf16.mxu0 %v8862_v26  ;;  %v8923_v26 = vld [vmem:[%s12118_s13 + $0x750] ss:$28 sps:$4 sm:$0xff]  }
 0x55d   :  { %7001 = vmatpush1.bf16.msra.mxu1 %v8859_v60  ;;  %v8927_v60 = vld [vmem:[%s12118_s13 + $0x948] ss:$28 sps:$4 sm:$0xff]  }
 0x55e   :  { %8167 = vmatpush3.bf16.msra.mxu0 %v8863_v0  ;;  %7002 = vmatprep.subr.bf16.mxu1 %v8866_v38  ;;  %v8928_v0 = vld [vmem:[%s12118_s13 + $0x788] ss:$28 sps:$4 sm:$0xff]   ;;  %v8931_v38 = vld [vmem:[%s12118_s13 + $0x43c] ss:$28 sps:$4 sm:$0xff]  }
 0x55f   :  { %8168 = vmatprep.subr.bf16.mxu0 %v8867_v9  ;;  %v8932_v9 = vld [vmem:[%s12118_s13 + $0x980] ss:$28 sps:$4 sm:$0xff]  }
 0x561   :  { %7003 = vmatpush1.bf16.msra.mxu1 %v8864_v22  ;;  %v8929_v22 = vld [vmem:[%s12118_s13 + $0x438] ss:$28 sps:$4 sm:$0xff]  }
 0x562   :  { %8169 = vmatpush3.bf16.msra.mxu0 %v8868_v10  ;;  %7004 = vmatprep.subr.bf16.mxu1 %v8871_v47  ;;  %v8933_v10 = vld [vmem:[%s12118_s13 + $0x7c0] ss:$28 sps:$4 sm:$0xff]   ;;  %v8936_v47 = vld [vmem:[%s12118_s13 + $0x474] ss:$28 sps:$4 sm:$0xff]  }
 0x563   :  { %8170 = vmatprep.subr.bf16.mxu0 %v8872_v6  ;;  %v8937_v6 = vld [vmem:[%s12118_s13 + $0x9b8] ss:$28 sps:$4 sm:$0xff]  }
 0x565   :  { %7005 = vmatpush1.bf16.msra.mxu1 %v8869_v11  ;;  %v8934_v11 = vld [vmem:[%s12118_s13 + $0x470] ss:$28 sps:$4 sm:$0xff]  }
 0x566   :  { %8171 = vmatpush3.bf16.msra.mxu0 %v8873_v43  ;;  %7006 = vmatprep.subr.bf16.mxu1 %v8876_v63  ;;  %v8938_v43 = vld [vmem:[%s12118_s13 + $0x7f8] ss:$28 sps:$4 sm:$0xff]   ;;  %v8941_v63 = vld [vmem:[%s12118_s13 + $0x4ac] ss:$28 sps:$4 sm:$0xff]  }
 0x567   :  { %8178 = vmatprep.subr.bf16.mxu0 %v8877_v13  ;;  %v8942_v13 = vld [vmem:[%s12118_s13 + $0x9f0] ss:$28 sps:$4 sm:$0xff]  }
 0x569   :  { %7195 = vmatmul.mubr.bf16.vlgmr.msra.gmra.mrb[24].mxu0 %v10888_v19  ;;  %7007 = vmatpush1.bf16.msra.mxu1 %v8874_v57  ;;  %v8939_v57 = vld [vmem:[%s12118_s13 + $0x4a8] ss:$28 sps:$4 sm:$0xff]  }
 0x56a   :  { %8179 = vmatpush3.bf16.msra.mxu0 %v8878_v12  ;;  %7235 = vmatprep.mubr.bf16.mxu0 %v10890_v42  ;;  %v8943_v12 = vld [vmem:[%s12118_s13 + $0x830] ss:$28 sps:$4 sm:$0xff]  }
 0x56b   :  { %7008 = vmatprep.subr.bf16.mxu1 %v8881_v5  ;;  %8180 = vmatprep.subr.bf16.mxu0 %v8882_v3  ;;  %v8946_v5 = vld [vmem:[%s12118_s13 + $0x4e4] ss:$28 sps:$4 sm:$0xff]  }
 0x56c   :  { %v8947_v3 = vld [vmem:[%s12118_s13 + $0xa28] ss:$28 sps:$4 sm:$0xff]  }
 0x56d   :  { %7009 = vmatpush1.bf16.msra.mxu1 %v8879_v23  ;;  %v8944_v23 = vld [vmem:[%s12118_s13 + $0x4e0] ss:$28 sps:$4 sm:$0xff]  }
 0x56e   :  { %8181 = vmatpush3.bf16.msra.mxu0 %v8883_v36  ;;  %7010 = vmatprep.subr.bf16.mxu1 %v8886_v15  ;;  %v8948_v36 = vld [vmem:[%s12118_s13 + $0x868] ss:$28 sps:$4 sm:$0xff]   ;;  %v8951_v15 = vld [vmem:[%s12118_s13 + $0x51c] ss:$28 sps:$4 sm:$0xff]  }
 0x56f   :  { %8182 = vmatprep.subr.bf16.mxu0 %v8887_v59  ;;  %v8952_v59 = vld [vmem:[%s12118_s13 + $0xa60] ss:$28 sps:$4 sm:$0xff]  }
 0x571   :  { %7011 = vmatpush1.bf16.msra.mxu1 %v8884_v31  ;;  %v8949_v31 = vld [vmem:[%s12118_s13 + $0x518] ss:$28 sps:$4 sm:$0xff]  }
 0x572   :  { %8183 = vmatpush3.bf16.msra.mxu0 %v8888_v16  ;;  %7012 = vmatprep.subr.bf16.mxu1 %v8891_v14  ;;  %v8953_v16 = vld [vmem:[%s12118_s13 + $0x8a0] ss:$28 sps:$4 sm:$0xff]   ;;  %v8956_v14 = vld [vmem:[%s12118_s13 + $0x554] ss:$28 sps:$4 sm:$0xff]  }
 0x573   :  { %8184 = vmatprep.subr.bf16.mxu0 %v8892_v39  ;;  %v8957_v39 = vld [vmem:[%s12118_s13 + $0xc58] ss:$28 sps:$4 sm:$0xff]  }
 0x575   :  { %7013 = vmatpush1.bf16.msra.mxu1 %v8889_v54  ;;  %v8954_v54 = vld [vmem:[%s12118_s13 + $0x550] ss:$28 sps:$4 sm:$0xff]  }
 0x576   :  { %8185 = vmatpush3.bf16.msra.mxu0 %v8893_v41  ;;  %7014 = vmatprep.subr.bf16.mxu1 %v8896_v7  ;;  %v8958_v41 = vld [vmem:[%s12118_s13 + $0xa98] ss:$28 sps:$4 sm:$0xff]   ;;  %v8961_v7 = vld [vmem:[%s12118_s13 + $0x58c] ss:$28 sps:$4 sm:$0xff]  }
 0x577   :  { %8186 = vmatprep.subr.bf16.mxu0 %v8897_v32  ;;  %v8962_v32 = vld [vmem:[%s12118_s13 + $0xc90] ss:$28 sps:$4 sm:$0xff]  }
 0x579   :  { %7015 = vmatpush1.bf16.msra.mxu1 %v8894_v33  ;;  %v8959_v33 = vld [vmem:[%s12118_s13 + $0x588] ss:$28 sps:$4 sm:$0xff]  }
 0x57a   :  { %8187 = vmatpush3.bf16.msra.mxu0 %v8898_v29  ;;  %7016 = vmatprep.subr.bf16.mxu1 %v8901_v25  ;;  %v8963_v29 = vld [vmem:[%s12118_s13 + $0xad0] ss:$28 sps:$4 sm:$0xff]   ;;  %v8966_v25 = vld [vmem:[%s12118_s13 + $0x5c4] ss:$28 sps:$4 sm:$0xff]  }
 0x57b   :  { %8188 = vmatprep.subr.bf16.mxu0 %v8902_v46  ;;  %v8967_v46 = vld [vmem:[%s12118_s13 + $0xcc8] ss:$28 sps:$4 sm:$0xff]  }
 0x57d   :  { %7017 = vmatpush1.bf16.msra.mxu1 %v8899_v21  ;;  %v8964_v21 = vld [vmem:[%s12118_s13 + $0x5c0] ss:$28 sps:$4 sm:$0xff]  }
 0x57e   :  { %8189 = vmatpush3.bf16.msra.mxu0 %v8903_v35  ;;  %7018 = vmatprep.subr.bf16.mxu1 %v8906_v48  ;;  %v8968_v35 = vld [vmem:[%s12118_s13 + $0xb08] ss:$28 sps:$4 sm:$0xff]   ;;  %v8971_v48 = vld [vmem:[%s12118_s13 + $0x5fc] ss:$28 sps:$4 sm:$0xff]  }
 0x57f   :  { %8190 = vmatprep.subr.bf16.mxu0 %v8907_v49  ;;  %v8972_v49 = vld [vmem:[%s12118_s13 + $0xd00] ss:$28 sps:$4 sm:$0xff]  }
 0x581   :  { %7019 = vmatpush1.bf16.msra.mxu1 %v8904_v24  ;;  %v8969_v24 = vld [vmem:[%s12118_s13 + $0x5f8] ss:$28 sps:$4 sm:$0xff]  }
 0x582   :  { %8191 = vmatpush3.bf16.msra.mxu0 %v8908_v18  ;;  %7020 = vmatprep.subr.bf16.mxu1 %v8911_v56  ;;  %v8973_v18 = vld [vmem:[%s12118_s13 + $0xb40] ss:$28 sps:$4 sm:$0xff]   ;;  %v8976_v56 = vld [vmem:[%s12118_s13 + $0x634] ss:$28 sps:$4 sm:$0xff]  }
 0x583   :  { %8192 = vmatprep.subr.bf16.mxu0 %v8912_v45  ;;  %v8977_v45 = vld [vmem:[%s12118_s13 + $0xd38] ss:$28 sps:$4 sm:$0xff]  }
 0x585   :  { %7021 = vmatpush1.bf16.msra.mxu1 %v8909_v20  ;;  %v8974_v20 = vld [vmem:[%s12118_s13 + $0x630] ss:$28 sps:$4 sm:$0xff]  }
 0x586   :  { %8193 = vmatpush3.bf16.msra.mxu0 %v8913_v52  ;;  %7033 = vmatprep.subr.bf16.mxu1 %v8916_v50  ;;  %v8978_v52 = vld [vmem:[%s12118_s13 + $0xb78] ss:$28 sps:$4 sm:$0xff]   ;;  %v8981_v50 = vld [vmem:[%s12118_s13 + $0x66c] ss:$28 sps:$4 sm:$0xff]  }
 0x587   :  { %8200 = vmatprep.subr.bf16.mxu0 %v8917_v51  ;;  %v8982_v51 = vld [vmem:[%s12118_s13 + $0xd70] ss:$28 sps:$4 sm:$0xff]  }
 0x588   :  { %7023 = vmatmul.mubr.bf16.vlgmr.msra.gmra.mrb[12].mxu1 %v10888_v19  ;;  %v8926_v19 = vld [vmem:[%s12118_s13 + $0x404] ss:$28 sps:$4 sm:$0xff]  }
 0x589   :  { %7236 = vmatmul.mubr.bf16.vlgmr.msra.gmra.mrb[28].mxu0 %v10900_v44  ;;  %7034 = vmatpush1.bf16.msra.mxu1 %v8914_v2  ;;  %v8979_v2 = vld [vmem:[%s12118_s13 + $0x668] ss:$28 sps:$4 sm:$0xff]  }
 0x58a   :  { %7065 = vmatprep.mubr.bf16.mxu1 %v10890_v42  ;;  %8201 = vmatpush3.bf16.msra.mxu0 %v8918_v17  ;;  %v8924_v42 = vld [vmem:[%s12118_s13 + $0x400] ss:$28 sps:$4 sm:$0xff]   ;;  %v8983_v17 = vld [vmem:[%s12118_s13 + $0xbb0] ss:$28 sps:$4 sm:$0xff]  }
 0x58b   :  { %7276 = vmatprep.mubr.bf16.mxu0 %v10902_v1  ;;  %7035 = vmatprep.subr.bf16.mxu1 %v8921_v62  ;;  %v8986_v62 = vld [vmem:[%s12118_s13 + $0x6a4] ss:$28 sps:$4 sm:$0xff]  }
 0x58c   :  { %8202 = vmatprep.subr.bf16.mxu0 %v8922_v40  ;;  %v8987_v40 = vld [vmem:[%s12118_s13 + $0xda8] ss:$28 sps:$4 sm:$0xff]  }
 0x58d   :  { %7036 = vmatpush1.bf16.msra.mxu1 %v8919_v61  ;;  %v8984_v61 = vld [vmem:[%s12118_s13 + $0x6a0] ss:$28 sps:$4 sm:$0xff]  }
 0x58e   :  { %8203 = vmatpush3.bf16.msra.mxu0 %v8923_v26  ;;  %7037 = vmatprep.subr.bf16.mxu1 %v8926_v19  ;;  %v8988_v26 = vld [vmem:[%s12118_s13 + $0xbe8] ss:$28 sps:$4 sm:$0xff]   ;;  %v8991_v19 = vld [vmem:[%s12118_s13 + $0x6dc] ss:$28 sps:$4 sm:$0xff]  }
 0x58f   :  { %8204 = vmatprep.subr.bf16.mxu0 %v8927_v60  ;;  %v8992_v60 = vld [vmem:[%s12118_s13 + $0xde0] ss:$28 sps:$4 sm:$0xff]  }
 0x591   :  { %7038 = vmatpush1.bf16.msra.mxu1 %v8924_v42  ;;  %v8989_v42 = vld [vmem:[%s12118_s13 + $0x6d8] ss:$28 sps:$4 sm:$0xff]  }
 0x592   :  { %8205 = vmatpush3.bf16.msra.mxu0 %v8928_v0  ;;  %7039 = vmatprep.subr.bf16.mxu1 %v8931_v38  ;;  %v8993_v0 = vld [vmem:[%s12118_s13 + $0xc20] ss:$28 sps:$4 sm:$0xff]   ;;  %v8996_v38 = vld [vmem:[%s12118_s13 + $0x714] ss:$28 sps:$4 sm:$0xff]  }
 0x593   :  { %8206 = vmatprep.subr.bf16.mxu0 %v8932_v9  ;;  %v8994_v9 = vld [vmem:[%s12118_s13 + $0x710] ss:$28 sps:$4 sm:$0xff]  }
 0x595   :  { %7040 = vmatpush1.bf16.msra.mxu1 %v8929_v22  ;;  %v8999_v22 = vld [vmem:[%s12118_s13 + $0x74c] ss:$28 sps:$4 sm:$0xff]  }
 0x596   :  { %8207 = vmatpush3.bf16.msra.mxu0 %v8933_v10  ;;  %7041 = vmatprep.subr.bf16.mxu1 %v8936_v47  ;;  %v8997_v10 = vld [vmem:[%s12118_s13 + $0x748] ss:$28 sps:$4 sm:$0xff]  }
 0x597   :  { %8208 = vmatprep.subr.bf16.mxu0 %v8937_v6  ;;  %v9002_v47 = vld [vmem:[%s12118_s13 + $0x784] ss:$28 sps:$4 sm:$0xff]  }
 0x598   :  { %v9000_v6 = vld [vmem:[%s12118_s13 + $0x780] ss:$28 sps:$4 sm:$0xff]  }
 0x599   :  { %7042 = vmatpush1.bf16.msra.mxu1 %v8934_v11  ;;  %v9008_v11 = vld [vmem:[%s12118_s13 + $0x7f4] ss:$28 sps:$4 sm:$0xff]  }
 0x59a   :  { %8209 = vmatpush3.bf16.msra.mxu0 %v8938_v43  ;;  %7043 = vmatprep.subr.bf16.mxu1 %v8941_v63  ;;  %v9006_v43 = vld [vmem:[%s12118_s13 + $0x7f0] ss:$28 sps:$4 sm:$0xff]  }
 0x59b   :  { %8210 = vmatprep.subr.bf16.mxu0 %v8942_v13  ;;  %v9011_v63 = vld [vmem:[%s12118_s13 + $0x82c] ss:$28 sps:$4 sm:$0xff]  }
 0x59c   :  { %v9009_v13 = vld [vmem:[%s12118_s13 + $0x828] ss:$28 sps:$4 sm:$0xff]  }
 0x59d   :  { %7044 = vmatpush1.bf16.msra.mxu1 %v8939_v57  ;;  %v9014_v57 = vld [vmem:[%s12118_s13 + $0x864] ss:$28 sps:$4 sm:$0xff]  }
 0x59e   :  { %8211 = vmatpush3.bf16.msra.mxu0 %v8943_v12  ;;  %7045 = vmatprep.subr.bf16.mxu1 %v8946_v5  ;;  %v9012_v12 = vld [vmem:[%s12118_s13 + $0x860] ss:$28 sps:$4 sm:$0xff]  }
 0x59f   :  { %8212 = vmatprep.subr.bf16.mxu0 %v8947_v3  ;;  %v9017_v5 = vld [vmem:[%s12118_s13 + $0x89c] ss:$28 sps:$4 sm:$0xff]  }
 0x5a0   :  { %v9015_v3 = vld [vmem:[%s12118_s13 + $0x898] ss:$28 sps:$4 sm:$0xff]  }
 0x5a1   :  { %7046 = vmatpush1.bf16.msra.mxu1 %v8944_v23  ;;  %v9020_v23 = vld [vmem:[%s12118_s13 + $0x8d4] ss:$28 sps:$4 sm:$0xff]  }
 0x5a2   :  { %8213 = vmatpush3.bf16.msra.mxu0 %v8948_v36  ;;  %7047 = vmatprep.subr.bf16.mxu1 %v8951_v15  ;;  %v9018_v36 = vld [vmem:[%s12118_s13 + $0x8d0] ss:$28 sps:$4 sm:$0xff]  }
 0x5a3   :  { %8214 = vmatprep.subr.bf16.mxu0 %v8952_v59  ;;  %v9023_v15 = vld [vmem:[%s12118_s13 + $0x90c] ss:$28 sps:$4 sm:$0xff]  }
 0x5a4   :  { %v9021_v59 = vld [vmem:[%s12118_s13 + $0x908] ss:$28 sps:$4 sm:$0xff]  }
 0x5a5   :  { %7048 = vmatpush1.bf16.msra.mxu1 %v8949_v31  ;;  %v9026_v31 = vld [vmem:[%s12118_s13 + $0x944] ss:$28 sps:$4 sm:$0xff]  }
 0x5a6   :  { %8215 = vmatpush3.bf16.msra.mxu0 %v8953_v16  ;;  %7049 = vmatprep.subr.bf16.mxu1 %v8956_v14  ;;  %v9024_v16 = vld [vmem:[%s12118_s13 + $0x940] ss:$28 sps:$4 sm:$0xff]  }
 0x5a7   :  { %8222 = vmatprep.subr.bf16.mxu0 %v8957_v39  ;;  %v9029_v14 = vld [vmem:[%s12118_s13 + $0x97c] ss:$28 sps:$4 sm:$0xff]  }
 0x5a8   :  { %v9027_v39 = vld [vmem:[%s12118_s13 + $0x978] ss:$28 sps:$4 sm:$0xff]  }
 0x5a9   :  { %7277 = vmatmul.mubr.bf16.vlgmr.msra.gmra.mrb[32].mxu0 %v10906_v34  ;;  %7050 = vmatpush1.bf16.msra.mxu1 %v8954_v54  ;;  %v9032_v54 = vld [vmem:[%s12118_s13 + $0x9b4] ss:$28 sps:$4 sm:$0xff]  }
 0x5aa   :  { %8223 = vmatpush3.bf16.msra.mxu0 %v8958_v41  ;;  %7317 = vmatprep.mubr.bf16.mxu0 %v10914_v58  ;;  %v9030_v41 = vld [vmem:[%s12118_s13 + $0x9b0] ss:$28 sps:$4 sm:$0xff]  }
 0x5ab   :  { %7051 = vmatprep.subr.bf16.mxu1 %v8961_v7  ;;  %8224 = vmatprep.subr.bf16.mxu0 %v8962_v32  ;;  %v9035_v7 = vld [vmem:[%s12118_s13 + $0x9ec] ss:$28 sps:$4 sm:$0xff]  }
 0x5ac   :  { %v9033_v32 = vld [vmem:[%s12118_s13 + $0x9e8] ss:$28 sps:$4 sm:$0xff]  }
 0x5ad   :  { %7052 = vmatpush1.bf16.msra.mxu1 %v8959_v33  ;;  %v9038_v33 = vld [vmem:[%s12118_s13 + $0xa24] ss:$28 sps:$4 sm:$0xff]  }
 0x5ae   :  { %8225 = vmatpush3.bf16.msra.mxu0 %v8963_v29  ;;  %7053 = vmatprep.subr.bf16.mxu1 %v8966_v25  ;;  %v9036_v29 = vld [vmem:[%s12118_s13 + $0xa20] ss:$28 sps:$4 sm:$0xff]  }
 0x5af   :  { %8226 = vmatprep.subr.bf16.mxu0 %v8967_v46  ;;  %v9041_v25 = vld [vmem:[%s12118_s13 + $0xa5c] ss:$28 sps:$4 sm:$0xff]  }
 0x5b0   :  { %v9039_v46 = vld [vmem:[%s12118_s13 + $0xa58] ss:$28 sps:$4 sm:$0xff]  }
 0x5b1   :  { %7054 = vmatpush1.bf16.msra.mxu1 %v8964_v21  ;;  %v9044_v21 = vld [vmem:[%s12118_s13 + $0xa94] ss:$28 sps:$4 sm:$0xff]  }
 0x5b2   :  { %8227 = vmatpush3.bf16.msra.mxu0 %v8968_v35  ;;  %7055 = vmatprep.subr.bf16.mxu1 %v8971_v48  ;;  %v9042_v35 = vld [vmem:[%s12118_s13 + $0xa90] ss:$28 sps:$4 sm:$0xff]  }
 0x5b3   :  { %8228 = vmatprep.subr.bf16.mxu0 %v8972_v49  ;;  %v9047_v48 = vld [vmem:[%s12118_s13 + $0xacc] ss:$28 sps:$4 sm:$0xff]  }
 0x5b4   :  { %v9045_v49 = vld [vmem:[%s12118_s13 + $0xac8] ss:$28 sps:$4 sm:$0xff]  }
 0x5b5   :  { %7056 = vmatpush1.bf16.msra.mxu1 %v8969_v24  ;;  %v9050_v24 = vld [vmem:[%s12118_s13 + $0xb04] ss:$28 sps:$4 sm:$0xff]  }
 0x5b6   :  { %8229 = vmatpush3.bf16.msra.mxu0 %v8973_v18  ;;  %7057 = vmatprep.subr.bf16.mxu1 %v8976_v56  ;;  %v9048_v18 = vld [vmem:[%s12118_s13 + $0xb00] ss:$28 sps:$4 sm:$0xff]   ;;  %v9056_v56 = vld [vmem:[%s12118_s13 + $0xb74] ss:$28 sps:$4 sm:$0xff]  }
 0x5b7   :  { %8230 = vmatprep.subr.bf16.mxu0 %v8977_v45  ;;  %v9054_v45 = vld [vmem:[%s12118_s13 + $0xb70] ss:$28 sps:$4 sm:$0xff]  }
 0x5b9   :  { %7058 = vmatpush1.bf16.msra.mxu1 %v8974_v20  ;;  %v12010_v20 = vld [vmem:[%s12119_s14] sm:$0x7f] }
 0x5ba   :  { %8231 = vmatpush3.bf16.msra.mxu0 %v8978_v52  ;;  %7059 = vmatprep.subr.bf16.mxu1 %v8981_v50  ;;  %v9059_v52 = vld [vmem:[%s12118_s13 + $0xbac] ss:$28 sps:$4 sm:$0xff]   ;;  %v4310_v50 = vrot.slane %v12010_v20, %v9408_v53 }
 0x5bb   :  { %8232 = vmatprep.subr.bf16.mxu0 %v8982_v51  ;;  %v4318_v51 = vrot.slane %v12010_v20, %v9816_v27 }
 0x5bd   :  { %7060 = vmatpush1.bf16.msra.mxu1 %v8979_v2  ;;  %v4314_v2 = vrot.slane %v12010_v20, %v9414_v55 }
 0x5be   :  { %8233 = vmatpush3.bf16.msra.mxu0 %v8983_v17  ;;  %7061 = vmatprep.subr.bf16.mxu1 %v8986_v62  ;;  %v9057_v17 = vld [vmem:[%s12118_s13 + $0xba8] ss:$28 sps:$4 sm:$0xff]   ;;  %v4322_v62 = vrot.slane %v12010_v20, %v9819_v28 }
 0x5bf   :  { %8234 = vmatprep.subr.bf16.mxu0 %v8987_v40  ;;  %v9062_v40 = vld [vmem:[%s12118_s13 + $0xbe4] ss:$28 sps:$4 sm:$0xff]  }
 0x5c1   :  { %7062 = vmatpush1.bf16.msra.mxu1 %v8984_v61 }
 0x5c2   :  { %8235 = vmatpush3.bf16.msra.mxu0 %v8988_v26  ;;  %7063 = vmatprep.subr.bf16.mxu1 %v8991_v19 }
 0x5c3   :  { %8236 = vmatprep.subr.bf16.mxu0 %v8992_v60 }
 0x5c5   :  { %7064 = vmatpush1.bf16.msra.mxu1 %v8989_v42 }
 0x5c6   :  { %8237 = vmatpush3.bf16.msra.mxu0 %v8993_v0  ;;  %7076 = vmatprep.subr.bf16.mxu1 %v8996_v38  ;;  %v9060_v0 = vld [vmem:[%s12118_s13 + $0xbe0] ss:$28 sps:$4 sm:$0xff]  }
 0x5c8   :  { %7066 = vmatmul.mubr.bf16.vlgmr.msra.gmra.mrb[12].mxu1 %v10900_v44  ;;  %v9005_v44 = vld [vmem:[%s12118_s13 + $0x7bc] ss:$28 sps:$4 sm:$0xff]  }
 0x5c9   :  { %7318 = vmatmul.mubr.bf16.vlgmr.msra.gmra.mrb[36].mxu0 %v10924_v4  ;;  %7077 = vmatpush1.bf16.msra.mxu1 %v8994_v9 }
 0x5ca   :  { %7108 = vmatprep.mubr.bf16.mxu1 %v10902_v1  ;;  %7078 = vmatprep.subr.bf16.mxu1 %v8999_v22  ;;  %v9003_v1 = vld [vmem:[%s12118_s13 + $0x7b8] ss:$28 sps:$4 sm:$0xff]  }
 0x5cd   :  { %7079 = vmatpush1.bf16.msra.mxu1 %v8997_v10  ;;  %v9065_v10 = vld [vmem:[%s12118_s13 + $0xc1c] ss:$28 sps:$4 sm:$0xff]  }
 0x5ce   :  { %7080 = vmatprep.subr.bf16.mxu1 %v9002_v47 }
 0x5d1   :  { %7081 = vmatpush1.bf16.msra.mxu1 %v9000_v6 }
 0x5d2   :  { %7082 = vmatprep.subr.bf16.mxu1 %v9005_v44 }
 0x5d5   :  { %7083 = vmatpush1.bf16.msra.mxu1 %v9003_v1 }
 0x5d6   :  { %7084 = vmatprep.subr.bf16.mxu1 %v9008_v11  ;;  %v9063_v11 = vld [vmem:[%s12118_s13 + $0xc18] ss:$28 sps:$4 sm:$0xff]  }
 0x5d9   :  { %7085 = vmatpush1.bf16.msra.mxu1 %v9006_v43  ;;  %v9068_v43 = vld [vmem:[%s12118_s13 + $0xc54] ss:$28 sps:$4 sm:$0xff]  }
 0x5da   :  { %7086 = vmatprep.subr.bf16.mxu1 %v9011_v63  ;;  %v9066_v63 = vld [vmem:[%s12118_s13 + $0xc50] ss:$28 sps:$4 sm:$0xff]  }
 0x5dd   :  { %7087 = vmatpush1.bf16.msra.mxu1 %v9009_v13  ;;  %v9071_v13 = vld [vmem:[%s12118_s13 + $0xc8c] ss:$28 sps:$4 sm:$0xff]  }
 0x5de   :  { %7088 = vmatprep.subr.bf16.mxu1 %v9014_v57 }
 0x5e1   :  { %7089 = vmatpush1.bf16.msra.mxu1 %v9012_v12 }
 0x5e2   :  { %7090 = vmatprep.subr.bf16.mxu1 %v9017_v5  ;;  %v9069_v5 = vld [vmem:[%s12118_s13 + $0xc88] ss:$28 sps:$4 sm:$0xff]  }
 0x5e5   :  { %7091 = vmatpush1.bf16.msra.mxu1 %v9015_v3 }
 0x5e6   :  { %7092 = vmatprep.subr.bf16.mxu1 %v9020_v23  ;;  %v9074_v23 = vld [vmem:[%s12118_s13 + $0xcc4] ss:$28 sps:$4 sm:$0xff]  }
 0x5e9   :  { %7093 = vmatpush1.bf16.msra.mxu1 %v9018_v36 }
 0x5ea   :  { %7094 = vmatprep.subr.bf16.mxu1 %v9023_v15 }
 0x5ed   :  { %7095 = vmatpush1.bf16.msra.mxu1 %v9021_v59 }
 0x5ee   :  { %7096 = vmatprep.subr.bf16.mxu1 %v9026_v31  ;;  %v9072_v31 = vld [vmem:[%s12118_s13 + $0xcc0] ss:$28 sps:$4 sm:$0xff]  }
 0x5f1   :  { %7097 = vmatpush1.bf16.msra.mxu1 %v9024_v16 }
 0x5f2   :  { %7098 = vmatprep.subr.bf16.mxu1 %v9029_v14  ;;  %v9077_v14 = vld [vmem:[%s12118_s13 + $0xcfc] ss:$28 sps:$4 sm:$0xff]  }
 0x5f5   :  { %7099 = vmatpush1.bf16.msra.mxu1 %v9027_v39 }
 0x5f6   :  { %7100 = vmatprep.subr.bf16.mxu1 %v9032_v54  ;;  %v9075_v54 = vld [vmem:[%s12118_s13 + $0xcf8] ss:$28 sps:$4 sm:$0xff]  }
 0x5f9   :  { %7101 = vmatpush1.bf16.msra.mxu1 %v9030_v41  ;;  %v9080_v41 = vld [vmem:[%s12118_s13 + $0xd34] ss:$28 sps:$4 sm:$0xff]  }
 0x5fa   :  { %7102 = vmatprep.subr.bf16.mxu1 %v9035_v7  ;;  %v9078_v7 = vld [vmem:[%s12118_s13 + $0xd30] ss:$28 sps:$4 sm:$0xff]  }
 0x5fd   :  { %7103 = vmatpush1.bf16.msra.mxu1 %v9033_v32  ;;  %v9083_v32 = vld [vmem:[%s12118_s13 + $0xd6c] ss:$28 sps:$4 sm:$0xff]  }
 0x5fe   :  { %7104 = vmatprep.subr.bf16.mxu1 %v9038_v33  ;;  %v9081_v33 = vld [vmem:[%s12118_s13 + $0xd68] ss:$28 sps:$4 sm:$0xff]  }
 0x601   :  { %7105 = vmatpush1.bf16.msra.mxu1 %v9036_v29  ;;  %v9086_v29 = vld [vmem:[%s12118_s13 + $0xda4] ss:$28 sps:$4 sm:$0xff]  }
 0x602   :  { %7106 = vmatprep.subr.bf16.mxu1 %v9041_v25 }
 0x605   :  { %7107 = vmatpush1.bf16.msra.mxu1 %v9039_v46 }
 0x606   :  { %7119 = vmatprep.subr.bf16.mxu1 %v9044_v21  ;;  %v9084_v21 = vld [vmem:[%s12118_s13 + $0xda0] ss:$28 sps:$4 sm:$0xff]  }
 0x608   :  { %7109 = vmatmul.mubr.bf16.vlgmr.msra.gmra.mrb[12].mxu1 %v10906_v34  ;;  %v9053_v34 = vld [vmem:[%s12118_s13 + $0xb3c] ss:$28 sps:$4 sm:$0xff]  }
 0x609   :  { %7120 = vmatpush1.bf16.msra.mxu1 %v9042_v35  ;;  %7151 = vmatprep.mubr.bf16.mxu1 %v10914_v58  ;;  %v9051_v58 = vld [vmem:[%s12118_s13 + $0xb38] ss:$28 sps:$4 sm:$0xff]  }
 0x60a   :  { %7121 = vmatprep.subr.bf16.mxu1 %v9047_v48 }
 0x60d   :  { %7122 = vmatpush1.bf16.msra.mxu1 %v9045_v49  ;;  %v9089_v49 = vld [vmem:[%s12118_s13 + $0xddc] ss:$28 sps:$4 sm:$0xff]  }
 0x60e   :  { %7123 = vmatprep.subr.bf16.mxu1 %v9050_v24 }
 0x611   :  { %7124 = vmatpush1.bf16.msra.mxu1 %v9048_v18 }
 0x612   :  { %7125 = vmatprep.subr.bf16.mxu1 %v9053_v34  ;;  %v9087_v34 = vld [vmem:[%s12118_s13 + $0xdd8] ss:$28 sps:$4 sm:$0xff]   ;;  %s9172_s13 = smov [#allocation2]  }
 0x613   :  { %s7360_s22 = sshll.u32 %s9172_s13, 4  ;;  %s7361_s22 = int_to_ptr.vmem [resolvable:$true] %s7360_s22 }
 0x614   :  { %s9146_s3 = scalar_lea.vmem %s7361_s22, 1792  ;;  %p9151_p1 = scmp.lt.s32.totalorder %s7361_s22, %s7361_s22 }
 0x615   :  { %7126 = vmatpush1.bf16.msra.mxu1 %v9051_v58  ;;  %v4334_v58 = vrot.slane %v12010_v20, %v10753_v30  ;;  %p9147_p0 = scmp.ne.s32.totalorder %s7361_s22, %s9146_s3  ;;  %p9152_p2 = scmp.lt.s32.totalorder %s9146_s3, %s9146_s3 }
 0x616   :  { %7127 = vmatprep.subr.bf16.mxu1 %v9056_v56 }
 0x617   :  { %p9153_p3 = por %p9152_p2, %p9151_p1 }
 0x619   :  { %7128 = vmatpush1.bf16.msra.mxu1 %v9054_v45  ;;  %p9154_p4 = pnand %p9153_p3, %p9147_p0 }
 0x61a   :  { %7129 = vmatprep.subr.bf16.mxu1 %v9059_v52 }
 0x61b   :  { %v6809_v53 = vpop.f32.mrb[8].mxu1 }
 0x61c   :  { %v8260_v61 = vadd.f32 %v6809_v53, %v4310_v50  ;;  %v6981_v26 = vpop.f32.mrb[20].mxu0  ;;  %v6811_v19 = vpop.f32.mrb[9].mxu1 }
 0x61d   :  { %v8264_v27 = vadd.f32 %v6981_v26, %v4318_v51  ;;  %v8261_v60 = vadd.f32 %v6811_v19, %v4314_v2  ;;  %v6983_v42 = vpop.f32.mrb[21].mxu0  ;;  %v6813_v55 = vpop.f32.mrb[10].mxu1  ;;  %7130 = vmatpush1.bf16.msra.mxu1 %v9057_v17 }
 0x61e   :  { %9118 = vtanh.f32 %v8260_v61  ;;  %v8265_v28 = vadd.f32 %v6983_v42, %v4322_v62  ;;  %v8262_v38 = vadd.f32 %v6813_v55, %v4310_v50  ;;  %v6985_v9 = vpop.f32.mrb[22].mxu0  ;;  %v6815_v22 = vpop.f32.mrb[11].mxu1  ;;  %7131 = vmatprep.subr.bf16.mxu1 %v9062_v40 }
 0x61f   :  { %9120 = vtanh.f32 %v8264_v27  ;;  %v8266_v47 = vadd.f32 %v6985_v9, %v4318_v51  ;;  %v6987_v6 = vpop.f32.mrb[23].mxu0  ;;  %v8263_v44 = vadd.f32 %v6815_v22, %v4314_v2 }
 0x620   :  { %9122 = vtanh.f32 %v8261_v60  ;;  %v8267_v1 = vadd.f32 %v6987_v6, %v4322_v62 }
 0x621   :  { %9124 = vtanh.f32 %v8265_v28  ;;  %7132 = vmatpush1.bf16.msra.mxu1 %v9060_v0 }
 0x622   :  { %9126 = vtanh.f32 %v8262_v38  ;;  %7133 = vmatprep.subr.bf16.mxu1 %v9065_v10 }
 0x623   :  { %9128 = vtanh.f32 %v8266_v47 }
 0x624   :  { %9130 = vtanh.f32 %v8263_v44 }
 0x625   :  { %9132 = vtanh.f32 %v8267_v1  ;;  %7134 = vmatpush1.bf16.msra.mxu1 %v9063_v11  ;;  %v4326_v1 = vrot.slane %v12010_v20, %v10748_v8  ;;  %v4330_v11 = vrot.slane %v12010_v20, %v10756_v37 }
 0x626   :  { %7135 = vmatprep.subr.bf16.mxu1 %v9068_v43 }
 0x628   :  { %v9119_v57 = vpop.eup %9118 }
 0x629   :  { %v9121_v12 = vpop.eup %9120  ;;  %7340 = vst [vmem:[#allocation2] sm:$0xff] %v9119_v57  ;;  %7136 = vmatpush1.bf16.msra.mxu1 %v9066_v63 }
 0x62a   :  { %v9123_v3 = vpop.eup %9122  ;;  %7342 = vst [vmem:[#allocation2 + $0x10] sm:$0xff] %v9121_v12  ;;  %7137 = vmatprep.subr.bf16.mxu1 %v9071_v13 }
 0x62b   :  { %v9125_v36 = vpop.eup %9124  ;;  %7341 = vst [vmem:[#allocation2 + $0x8] sm:$0xff] %v9123_v3 }
 0x62c   :  { %v9127_v15 = vpop.eup %9126  ;;  %7343 = vst [vmem:[#allocation2 + $0x18] sm:$0xff] %v9125_v36 }
 0x62d   :  { %v9129_v59 = vpop.eup %9128  ;;  %7348 = vst [vmem:[#allocation2 + $0x38] sm:$0xff] %v9127_v15  ;;  %7138 = vmatpush1.bf16.msra.mxu1 %v9069_v5 }
 0x62e   :  { %v9131_v16 = vpop.eup %9130  ;;  %7350 = vst [vmem:[#allocation2 + $0x48] sm:$0xff] %v9129_v59  ;;  %7139 = vmatprep.subr.bf16.mxu1 %v9074_v23 }
 0x62f   :  { %v9133_v39 = vpop.eup %9132  ;;  %7349 = vst [vmem:[#allocation2 + $0x40] sm:$0xff] %v9131_v16 }
 0x630   :  { %7351 = vst [vmem:[#allocation2 + $0x50] sm:$0xff] %v9133_v39 }
 0x631   :  { %7140 = vmatpush1.bf16.msra.mxu1 %v9072_v31 }
 0x632   :  { %7141 = vmatprep.subr.bf16.mxu1 %v9077_v14 }
 0x635   :  { %7142 = vmatpush1.bf16.msra.mxu1 %v9075_v54 }
 0x636   :  { %7143 = vmatprep.subr.bf16.mxu1 %v9080_v41 }
 0x639   :  { %7144 = vmatpush1.bf16.msra.mxu1 %v9078_v7 }
 0x63a   :  { %7145 = vmatprep.subr.bf16.mxu1 %v9083_v32 }
 0x63c   :  { %v8172_v25 = vpop.f32.mrb[24].mxu0 }
 0x63d   :  { %v8173_v46 = vpop.f32.mrb[25].mxu0  ;;  %7146 = vmatpush1.bf16.msra.mxu1 %v9081_v33 }
 0x63e   :  { %v8174_v35 = vadd.f32 %v8173_v46, %v8172_v25  ;;  %v8175_v48 = vpop.f32.mrb[26].mxu0  ;;  %7147 = vmatprep.subr.bf16.mxu1 %v9086_v29 }
 0x63f   :  { %v8176_v24 = vpop.f32.mrb[27].mxu0 }
 0x640   :  { %v8177_v18 = vadd.f32 %v8176_v24, %v8175_v48  ;;  %v7197_v52 = vadd.f32 %v8174_v35, %v4334_v58 }
 0x641   :  { %7148 = vmatpush1.bf16.msra.mxu1 %v9084_v21 }
 0x642   :  { %7149 = vmatprep.subr.bf16.mxu1 %v9089_v49  ;;  %v7200_v17 = vadd.f32 %v8177_v18, %v4334_v58 }
 0x645   :  { %7150 = vmatpush1.bf16.msra.mxu1 %v9087_v34 }
 0x648   :  { %7152 = vmatmul.mubr.bf16.vlgmr.msra.gmra.mrb[12].mxu1 %v10924_v4 }
 0x65c   :  { %v8194_v56 = vpop.f32.mrb[28].mxu0 }
 0x65d   :  { %v8195_v45 = vpop.f32.mrb[29].mxu0 }
 0x65e   :  { %v8196_v50 = vadd.f32 %v8195_v45, %v8194_v56  ;;  %v8197_v51 = vpop.f32.mrb[30].mxu0 }
 0x65f   :  { %v8198_v2 = vpop.f32.mrb[31].mxu0 }
 0x660   :  { %v7238_v62 = vadd.f32 %v8196_v50, %v7197_v52  ;;  %v8199_v40 = vadd.f32 %v8198_v2, %v8197_v51 }
 0x662   :  { %v7241_v53 = vadd.f32 %v8199_v40, %v7200_v17 }
 0x67c   :  { %v8216_v61 = vpop.f32.mrb[32].mxu0 }
 0x67d   :  { %v8217_v26 = vpop.f32.mrb[33].mxu0 }
 0x67e   :  { %v8218_v19 = vadd.f32 %v8217_v26, %v8216_v61  ;;  %v8219_v27 = vpop.f32.mrb[34].mxu0 }
 0x67f   :  { %v8220_v60 = vpop.f32.mrb[35].mxu0 }
 0x680   :  { %v7279_v42 = vadd.f32 %v8218_v19, %v7238_v62  ;;  %v8221_v4 = vadd.f32 %v8220_v60, %v8219_v27 }
 0x682   :  { %v7282_v55 = vadd.f32 %v8221_v4, %v7241_v53 }
 0x69c   :  { %v8238_v0 = vpop.f32.mrb[36].mxu0 }
 0x69d   :  { %v8239_v30 = vpop.f32.mrb[37].mxu0 }
 0x69e   :  { %v8240_v28 = vadd.f32 %v8239_v30, %v8238_v0  ;;  %v8241_v38 = vpop.f32.mrb[38].mxu0 }
 0x69f   :  { %v8242_v9 = vpop.f32.mrb[39].mxu0 }
 0x6a0   :  { %v7320_v22 = vadd.f32 %v8240_v28, %v7279_v42  ;;  %v8243_v10 = vadd.f32 %v8242_v9, %v8241_v38 }
 0x6a2   :  { %9134 = vtanh.f32 %v7320_v22  ;;  %v7323_v47 = vadd.f32 %v8243_v10, %v7282_v55 }
 0x6a4   :  { %9136 = vtanh.f32 %v7323_v47 }
 0x6ac   :  { %v9135_v6 = vpop.eup %9134 }
 0x6ad   :  { %7347 = vst.msk [vmem:[#allocation2 + $0x30] sm:$0xff] %vm7346_vm0, %v9135_v6 }
 0x6ae   :  { %v9137_v44 = vpop.eup %9136 }
 0x6af   :  { %7354 = vst.msk [vmem:[#allocation2 + $0x68] sm:$0xff] %vm7346_vm0, %v9137_v44 }
 0x71b   :  { %v7153_v43 = vpop.f32.mrb[12].mxu1 }
 0x71c   :  { %v8268_v63 = vadd.f32 %v7153_v43, %v4326_v1  ;;  %v7155_v13 = vpop.f32.mrb[13].mxu1 }
 0x71d   :  { %v8269_v57 = vadd.f32 %v7155_v13, %v4330_v11  ;;  %v7157_v12 = vpop.f32.mrb[14].mxu1 }
 0x71e   :  { %9138 = vtanh.f32 %v8268_v63  ;;  %v8270_v5 = vadd.f32 %v7157_v12, %v4326_v1  ;;  %v7159_v3 = vpop.f32.mrb[15].mxu1 }
 0x71f   :  { %9140 = vtanh.f32 %v8269_v57  ;;  %v8271_v23 = vadd.f32 %v7159_v3, %v4330_v11 }
 0x720   :  { %9142 = vtanh.f32 %v8270_v5 }
 0x721   :  { %9144 = vtanh.f32 %v8271_v23 }
 0x728   :  { %v9139_v36 = vpop.eup %9138 }
 0x729   :  { %v9141_v15 = vpop.eup %9140  ;;  %7344 = vst [vmem:[#allocation2 + $0x20] sm:$0xff] %v9139_v36 }
 0x72a   :  { %v9143_v8 = vpop.eup %9142  ;;  %7345 = vst [vmem:[#allocation2 + $0x28] sm:$0xff] %v9141_v15 }
 0x72b   :  { %v9145_v37 = vpop.eup %9144  ;;  %7352 = vst [vmem:[#allocation2 + $0x58] sm:$0xff] %v9143_v8 }
 0x72c   :  { %7353 = vst [vmem:[#allocation2 + $0x60] sm:$0xff] %v9145_v37 }
 0x72d   :  { %9157 = shalt.err (!%p9154_p4)
}
 0x72e   :  { %s9158_s25 = scalar_lea.hbm %s12120_s15, 1792 }
 0x72f   :  { %p9159_p5 = scmp.ne.s32.totalorder %s12120_s15, %s9158_s25  ;;  %p9162_p6 = scmp.lt.u32.totalorder %s9158_s25, %s12120_s15 }
 0x731   :  { %p9164_p7 = pnand %p9162_p6, %p9159_p5 }
 0x733   :  { %9167 = shalt.err (!%p9164_p7)
}
 0x734   :  { %s9173_s27 = smov 896   ;;  %s9174_s28 = smov 56  }
 0x735   :  { %7366 = dma.vmem_to_hbm [thread:$0]  %s7361_s22, 1792, %s12120_s15, [#allocation3], %s9173_s27, %s9173_s27, %s9174_s28  }
 0x736   :  { %9168 = dma.done.wait [#allocation3], 1792  }
 0x737   :  { %9169 = vsyncadd [#allocation3], 4294965504 }
 0x738   :  { %7370 = vsyncpa [#allocation3], 1 }

// kernel: tpu_custom_call.1
= control target key start
LH: loop header
LB: loop body
LE: loop exit
PB: predicated region body
PF: predicated region fallthrough
CT: control target
= control target key end

     0   :  { %v9170_v2 = vmov 0   ;;  %s12105_s0 = inlined_call_operand.vmem [shape: bf16[16,128], index: 0, kind: input, shape index: {}]   ;;  %s12106_s1 = inlined_call_operand.vmem [shape: bf16[128,256], index: 1, kind: input, shape index: {}]   ;;  %s12107_s2 = inlined_call_operand.vmem [shape: f32[1,256], index: 2, kind: input, shape index: {}]   ;;  %s12108_s3 = inlined_call_operand.vmem [shape: f32[1,256], index: 3, kind: input, shape index: {}]   ;;  %s12109_s4 = inlined_call_operand.vmem [shape: f32[1,256], index: 4, kind: input, shape index: {}]   ;;  %s12110_s5 = inlined_call_operand.vmem [shape: bf16[256,512], index: 5, kind: input, shape index: {}]   ;;  %s12111_s6 = inlined_call_operand.vmem [shape: f32[1,512], index: 6, kind: input, shape index: {}]   ;;  %s12112_s7 = inlined_call_operand.vmem [shape: f32[1,512], index: 7, kind: input, shape index: {}]   ;;  %s12113_s8 = inlined_call_operand.vmem [shape: f32[1,512], index: 8, kind: input, shape index: {}]   ;;  %s12114_s9 = inlined_call_operand.vmem [shape: bf16[512,1024], index: 9, kind: input, shape index: {}]   ;;  %s12115_s10 = inlined_call_operand.vmem [shape: f32[1,1024], index: 10, kind: input, shape index: {}]   ;;  %s12116_s11 = inlined_call_operand.vmem [shape: f32[1,1024], index: 11, kind: input, shape index: {}]   ;;  %s12117_s12 = inlined_call_operand.vmem [shape: f32[1,1024], index: 12, kind: input, shape index: {}]   ;;  %s12118_s13 = inlined_call_operand.vmem [shape: bf16[1024,784], index: 13, kind: input, shape index: {}]   ;;  %s12119_s14 = inlined_call_operand.vmem [shape: f32[1,784], index: 14, kind: input, shape index: {}]   ;;  %s12120_s15 = inlined_call_operand.hbm [shape: f32[16,784], index: 15, kind: output, shape index: {}]  }
   0x1   :  { %v8329_v0 = vld [vmem:[%s12106_s1 + $0x4] ss:$8 sps:$4 sm:$0xff]   ;;  %v8331_v1 = vld [vmem:[%s12106_s1] ss:$8 sps:$4 sm:$0xff]   ;;  %211 = vmatprep.mubr.bf16.mxu0 %v9170_v2  ;;  %v8332_v3 = vld [vmem:[%s12106_s1 + $0x14] ss:$8 sps:$4 sm:$0xff]  }
   0x2   :  { %179 = vmatprep.subr.bf16.mxu0 %v8329_v0  ;;  %v8334_v4 = vld [vmem:[%s12106_s1 + $0x10] ss:$8 sps:$4 sm:$0xff]   ;;  %v8335_v5 = vld [vmem:[%s12106_s1 + $0x24] ss:$8 sps:$4 sm:$0xff]   ;;  %v8337_v6 = vld [vmem:[%s12106_s1 + $0x20] ss:$8 sps:$4 sm:$0xff]  }
   0x3   :  { %180 = vmatpush1.bf16.msra.mxu0 %v8331_v1  ;;  %v8338_v7 = vld [vmem:[%s12106_s1 + $0x34] ss:$8 sps:$4 sm:$0xff]   ;;  %v8340_v8 = vld [vmem:[%s12106_s1 + $0x30] ss:$8 sps:$4 sm:$0xff]   ;;  %v8341_v9 = vld [vmem:[%s12106_s1 + $0x44] ss:$8 sps:$4 sm:$0xff]  }
   0x4   :  { %181 = vmatprep.subr.bf16.mxu0 %v8332_v3  ;;  %v8343_v10 = vld [vmem:[%s12106_s1 + $0x40] ss:$8 sps:$4 sm:$0xff]   ;;  %v8344_v11 = vld [vmem:[%s12106_s1 + $0x54] ss:$8 sps:$4 sm:$0xff]   ;;  %v8346_v12 = vld [vmem:[%s12106_s1 + $0x50] ss:$8 sps:$4 sm:$0xff]  }
   0x5   :  { %v8347_v13 = vld [vmem:[%s12106_s1 + $0x64] ss:$8 sps:$4 sm:$0xff]   ;;  %v8349_v14 = vld [vmem:[%s12106_s1 + $0x60] ss:$8 sps:$4 sm:$0xff]   ;;  %v8350_v15 = vld [vmem:[%s12106_s1 + $0x74] ss:$8 sps:$4 sm:$0xff]  }
   0x6   :  { %v8352_v16 = vld [vmem:[%s12106_s1 + $0x70] ss:$8 sps:$4 sm:$0xff]   ;;  %v8353_v17 = vld [vmem:[%s12105_s0] sm:$0xff]   ;;  %v8404_v50 = vld [vmem:[%s12110_s5 + $0xc] ss:$16 sps:$4 sm:$0xff]  }
   0x7   :  { %182 = vmatpush1.bf16.msra.mxu0 %v8334_v4  ;;  %v8356_v18 = vld [vmem:[%s12110_s5 + $0x4] ss:$16 sps:$4 sm:$0xff]   ;;  %v8354_v19 = vld [vmem:[%s12110_s5] ss:$16 sps:$4 sm:$0xff]  }
   0x8   :  { %183 = vmatprep.subr.bf16.mxu0 %v8335_v5  ;;  %v8359_v20 = vld [vmem:[%s12110_s5 + $0x24] ss:$16 sps:$4 sm:$0xff]   ;;  %v8357_v21 = vld [vmem:[%s12110_s5 + $0x20] ss:$16 sps:$4 sm:$0xff]  }
   0x9   :  { %v8362_v22 = vld [vmem:[%s12110_s5 + $0x44] ss:$16 sps:$4 sm:$0xff]   ;;  %v8360_v23 = vld [vmem:[%s12110_s5 + $0x40] ss:$16 sps:$4 sm:$0xff]  }
   0xa   :  { %v8365_v24 = vld [vmem:[%s12110_s5 + $0x64] ss:$16 sps:$4 sm:$0xff]   ;;  %v8363_v25 = vld [vmem:[%s12110_s5 + $0x60] ss:$16 sps:$4 sm:$0xff]  }
   0xb   :  { %184 = vmatpush1.bf16.msra.mxu0 %v8337_v6  ;;  %v8368_v26 = vld [vmem:[%s12110_s5 + $0x84] ss:$16 sps:$4 sm:$0xff]   ;;  %v8366_v27 = vld [vmem:[%s12110_s5 + $0x80] ss:$16 sps:$4 sm:$0xff]  }
   0xc   :  { %185 = vmatprep.subr.bf16.mxu0 %v8338_v7  ;;  %v8371_v28 = vld [vmem:[%s12110_s5 + $0xa4] ss:$16 sps:$4 sm:$0xff]   ;;  %v8369_v29 = vld [vmem:[%s12110_s5 + $0xa0] ss:$16 sps:$4 sm:$0xff]  }
   0xd   :  { %v8374_v30 = vld [vmem:[%s12110_s5 + $0xc4] ss:$16 sps:$4 sm:$0xff]   ;;  %v8372_v31 = vld [vmem:[%s12110_s5 + $0xc0] ss:$16 sps:$4 sm:$0xff]  }
   0xe   :  { %v8377_v32 = vld [vmem:[%s12110_s5 + $0xe4] ss:$16 sps:$4 sm:$0xff]   ;;  %v8375_v33 = vld [vmem:[%s12110_s5 + $0xe0] ss:$16 sps:$4 sm:$0xff]  }
   0xf   :  { %186 = vmatpush1.bf16.msra.mxu0 %v8340_v8  ;;  %v8380_v34 = vld [vmem:[%s12110_s5 + $0x104] ss:$16 sps:$4 sm:$0xff]   ;;  %v8378_v35 = vld [vmem:[%s12110_s5 + $0x100] ss:$16 sps:$4 sm:$0xff]  }
  0x10   :  { %187 = vmatprep.subr.bf16.mxu0 %v8341_v9  ;;  %v8383_v36 = vld [vmem:[%s12110_s5 + $0x124] ss:$16 sps:$4 sm:$0xff]   ;;  %v8381_v37 = vld [vmem:[%s12110_s5 + $0x120] ss:$16 sps:$4 sm:$0xff]  }
  0x11   :  { %v8386_v38 = vld [vmem:[%s12110_s5 + $0x144] ss:$16 sps:$4 sm:$0xff]   ;;  %v8384_v39 = vld [vmem:[%s12110_s5 + $0x140] ss:$16 sps:$4 sm:$0xff]  }
  0x12   :  { %v8389_v40 = vld [vmem:[%s12110_s5 + $0x164] ss:$16 sps:$4 sm:$0xff]   ;;  %v8387_v41 = vld [vmem:[%s12110_s5 + $0x160] ss:$16 sps:$4 sm:$0xff]  }
  0x13   :  { %188 = vmatpush1.bf16.msra.mxu0 %v8343_v10  ;;  %v8392_v42 = vld [vmem:[%s12110_s5 + $0x184] ss:$16 sps:$4 sm:$0xff]   ;;  %v8390_v43 = vld [vmem:[%s12110_s5 + $0x180] ss:$16 sps:$4 sm:$0xff]  }
  0x14   :  { %189 = vmatprep.subr.bf16.mxu0 %v8344_v11  ;;  %v8395_v44 = vld [vmem:[%s12110_s5 + $0x1a4] ss:$16 sps:$4 sm:$0xff]   ;;  %v8393_v45 = vld [vmem:[%s12110_s5 + $0x1a0] ss:$16 sps:$4 sm:$0xff]  }
  0x15   :  { %v8398_v46 = vld [vmem:[%s12110_s5 + $0x1c4] ss:$16 sps:$4 sm:$0xff]   ;;  %v8396_v47 = vld [vmem:[%s12110_s5 + $0x1c0] ss:$16 sps:$4 sm:$0xff]  }
  0x16   :  { %v8401_v48 = vld [vmem:[%s12110_s5 + $0x1e4] ss:$16 sps:$4 sm:$0xff]   ;;  %v8399_v49 = vld [vmem:[%s12110_s5 + $0x1e0] ss:$16 sps:$4 sm:$0xff]  }
  0x17   :  { %190 = vmatpush1.bf16.msra.mxu0 %v8346_v12 }
  0x18   :  { %191 = vmatprep.subr.bf16.mxu0 %v8347_v13 }
  0x1b   :  { %192 = vmatpush1.bf16.msra.mxu0 %v8349_v14 }
  0x1c   :  { %193 = vmatprep.subr.bf16.mxu0 %v8350_v15 }
  0x1f   :  { %194 = vmatpush1.bf16.msra.mxu0 %v8352_v16 }
  0x20   :  { %807 = vmatprep.subr.bf16.mxu0 %v8356_v18 }
  0x22   :  { %212 = vmatmul.mubr.bf16.vlgmr.msra.gmra.mrb[0].mxu0 %v8353_v17 }
  0x23   :  { %808 = vmatpush1.bf16.msra.mxu0 %v8354_v19 }
  0x24   :  { %809 = vmatprep.subr.bf16.mxu0 %v8359_v20 }
  0x27   :  { %810 = vmatpush1.bf16.msra.mxu0 %v8357_v21 }
  0x28   :  { %811 = vmatprep.subr.bf16.mxu0 %v8362_v22 }
  0x2b   :  { %812 = vmatpush1.bf16.msra.mxu0 %v8360_v23 }
  0x2c   :  { %813 = vmatprep.subr.bf16.mxu0 %v8365_v24 }
  0x2f   :  { %814 = vmatpush1.bf16.msra.mxu0 %v8363_v25 }
  0x30   :  { %815 = vmatprep.subr.bf16.mxu0 %v8368_v26 }
  0x33   :  { %816 = vmatpush1.bf16.msra.mxu0 %v8366_v27 }
  0x34   :  { %817 = vmatprep.subr.bf16.mxu0 %v8371_v28 }
  0x37   :  { %818 = vmatpush1.bf16.msra.mxu0 %v8369_v29 }
  0x38   :  { %819 = vmatprep.subr.bf16.mxu0 %v8374_v30 }
  0x3b   :  { %820 = vmatpush1.bf16.msra.mxu0 %v8372_v31 }
  0x3c   :  { %821 = vmatprep.subr.bf16.mxu0 %v8377_v32 }
  0x3f   :  { %822 = vmatpush1.bf16.msra.mxu0 %v8375_v33 }
  0x40   :  { %823 = vmatprep.subr.bf16.mxu0 %v8380_v34 }
  0x43   :  { %824 = vmatpush1.bf16.msra.mxu0 %v8378_v35 }
  0x44   :  { %825 = vmatprep.subr.bf16.mxu0 %v8383_v36 }
  0x47   :  { %826 = vmatpush1.bf16.msra.mxu0 %v8381_v37 }
  0x48   :  { %827 = vmatprep.subr.bf16.mxu0 %v8386_v38 }
  0x4b   :  { %828 = vmatpush1.bf16.msra.mxu0 %v8384_v39 }
  0x4c   :  { %829 = vmatprep.subr.bf16.mxu0 %v8389_v40 }
  0x4f   :  { %830 = vmatpush1.bf16.msra.mxu0 %v8387_v41 }
  0x50   :  { %831 = vmatprep.subr.bf16.mxu0 %v8392_v42 }
  0x53   :  { %832 = vmatpush1.bf16.msra.mxu0 %v8390_v43 }
  0x54   :  { %833 = vmatprep.subr.bf16.mxu0 %v8395_v44 }
  0x57   :  { %834 = vmatpush1.bf16.msra.mxu0 %v8393_v45 }
  0x58   :  { %835 = vmatprep.subr.bf16.mxu0 %v8398_v46 }
  0x5b   :  { %836 = vmatpush1.bf16.msra.mxu0 %v8396_v47 }
  0x5c   :  { %837 = vmatprep.subr.bf16.mxu0 %v8401_v48 }
  0x5f   :  { %838 = vmatpush1.bf16.msra.mxu0 %v8399_v49 }
  0x60   :  { %850 = vmatprep.subr.bf16.mxu0 %v8404_v50 }
  0x61   :  { %20 = vsyncpa [#allocation3], 0  ;;  %v83_v51 = vlaneseq  ;;  %v81_v54 = vld [vmem:[%s12107_s2] sm:$0x3]  ;;  %vm7346_vm0 = vcmask 130048  }
  0x63   :  { %v9405_v52 = vshrl.u32 %v83_v51, 7 }
  0x65   :  { %v9408_v53 = vsub.s32 0, %v9405_v52  ;;  %v9414_v55 = vsub.s32 1, %v9405_v52 }
  0x67   :  { %v86_v56 = vrot.slane %v81_v54, %v9408_v53  ;;  %v90_v57 = vrot.slane %v81_v54, %v9414_v55 }
  0xf5   :  { %v213_v58 = vpop.f32.mrb[0].mxu0 }
  0xf6   :  { %v214_v59 = vadd.f32 %v213_v58, %v86_v56  ;;  %v215_v60 = vpop.f32.mrb[1].mxu0 }
  0xf7   :  { %v216_v61 = vadd.f32 %v215_v60, %v90_v57  ;;  %v217_v62 = vpop.f32.mrb[2].mxu0 }
  0xf8   :  { %v222_v63 = vmul.f32 0.2, %v214_v59  ;;  %v218_v0 = vadd.f32 %v217_v62, %v86_v56  ;;  %v219_v1 = vpop.f32.mrb[3].mxu0 }
  0xf9   :  { %v223_v2 = vmul.f32 0.2, %v216_v61  ;;  %v220_v3 = vadd.f32 %v219_v1, %v90_v57 }
  0xfa   :  { %v224_v4 = vmul.f32 0.2, %v218_v0  ;;  %v9418_v6 = vmax.f32 %v214_v59, %v222_v63  ;;  %v9171_v59 = vmov 1966171168  }
  0xfb   :  { %v225_v5 = vmul.f32 0.2, %v220_v3  ;;  %v9422_v8 = vmax.f32 %v216_v61, %v223_v2  ;;  %v332_v60 = vunpack.c.l.s4 %v9171_v59  ;;  %v8449_v59 = vld [vmem:[%s12110_s5 + $0x1ec] ss:$16 sps:$4 sm:$0xff]  }
  0xfc   :  { %v9420_v7 = vmax.f32 %v218_v0, %v224_v4  ;;  %v251_v12 = vmul.f32 %v9418_v6, %v9418_v6 }
  0xfd   :  { %v9424_v9 = vmax.f32 %v220_v3, %v225_v5  ;;  %v252_v15 = vmul.f32 %v9422_v8, %v9422_v8  ;;  %v333_v61 = vunpack.c.0.s8 %v332_v60  ;;  %v323_v3 = vld [vmem:[%s12108_s3] sm:$0x3]  ;;  %v8447_v60 = vld [vmem:[%s12110_s5 + $0x1e8] ss:$16 sps:$4 sm:$0xff]  }
  0xfe   :  { %v235_v10 = vmul.f32 0.0, %v9420_v7 }
  0xff   :  { %v236_v11 = vmul.f32 0.0, %v9424_v9  ;;  %v9437_v63 = vsub.s32 %v333_v61, %v9405_v52  ;;  %v1223_v61 = vld [vmem:[%s12114_s9] sm:$0xff] }
 0x100   :  { %v237_v13 = vadd.f32 %v235_v10, %v9418_v6  ;;  %v253_v14 = vmul.f32 %v235_v10, %v9420_v7 }
 0x101   :  { %v244_v16 = vadd.f32 %v236_v11, %v9422_v8  ;;  %v254_v17 = vmul.f32 %v236_v11, %v9424_v9 }
 0x102   :  { %v238_v18 = vrot.slane %v237_v13, 4  ;;  %v255_v19 = vadd.f32 %v253_v14, %v251_v12 }
 0x103   :  { %v245_v20 = vrot.slane %v244_v16, 4  ;;  %v262_v21 = vadd.f32 %v254_v17, %v252_v15 }
 0x104   :  { %v239_v22 = vadd.f32 %v238_v18, %v237_v13  ;;  %v256_v23 = vrot.slane %v255_v19, 4 }
 0x105   :  { %v246_v24 = vadd.f32 %v245_v20, %v244_v16  ;;  %v263_v25 = vrot.slane %v262_v21, 4  ;;  %v347_v20 = vld [vmem:[%s12109_s4] sm:$0x3] }
 0x106   :  { %v240_v26 = vrot.slane %v239_v22, 2  ;;  %v257_v27 = vadd.f32 %v256_v23, %v255_v19 }
 0x107   :  { %v247_v28 = vrot.slane %v246_v24, 2  ;;  %v264_v29 = vadd.f32 %v263_v25, %v262_v21 }
 0x108   :  { %v241_v30 = vadd.f32 %v240_v26, %v239_v22  ;;  %v258_v31 = vrot.slane %v257_v27, 2 }
 0x109   :  { %v248_v32 = vadd.f32 %v247_v28, %v246_v24  ;;  %v265_v33 = vrot.slane %v264_v29, 2  ;;  %v8407_v28 = vld [vmem:[%s12110_s5 + $0x2c] ss:$16 sps:$4 sm:$0xff]  }
 0x10a   :  { %v242_v34 = vrot.slane %v241_v30, 1  ;;  %v259_v35 = vadd.f32 %v258_v31, %v257_v27  ;;  %v8408_v31 = vld [vmem:[%s12110_s5 + $0x48] ss:$16 sps:$4 sm:$0xff]  }
 0x10b   :  { %v249_v36 = vrot.slane %v248_v32, 1  ;;  %v266_v37 = vadd.f32 %v265_v33, %v264_v29  ;;  %v8405_v29 = vld [vmem:[%s12110_s5 + $0x28] ss:$16 sps:$4 sm:$0xff]  }
 0x10c   :  { %v243_v38 = vadd.f32 %v242_v34, %v241_v30  ;;  %v260_v39 = vrot.slane %v259_v35, 1  ;;  %v8410_v30 = vld [vmem:[%s12110_s5 + $0x4c] ss:$16 sps:$4 sm:$0xff]   ;;  %v8411_v33 = vld [vmem:[%s12110_s5 + $0x68] ss:$16 sps:$4 sm:$0xff]  }
 0x10d   :  { %v250_v40 = vadd.f32 %v249_v36, %v248_v32  ;;  %v267_v41 = vrot.slane %v266_v37, 1  ;;  %v8413_v32 = vld [vmem:[%s12110_s5 + $0x6c] ss:$16 sps:$4 sm:$0xff]  }
 0x10e   :  { %v261_v42 = vadd.f32 %v260_v39, %v259_v35  ;;  %v313_v43 = vmul.f32 0.125, %v243_v38  ;;  %v8416_v34 = vld [vmem:[%s12110_s5 + $0x8c] ss:$16 sps:$4 sm:$0xff]   ;;  %v8414_v35 = vld [vmem:[%s12110_s5 + $0x88] ss:$16 sps:$4 sm:$0xff]  }
 0x10f   :  { %v268_v44 = vadd.f32 %v267_v41, %v266_v37  ;;  %v314_v45 = vmul.f32 0.125, %v250_v40  ;;  %v8419_v36 = vld [vmem:[%s12110_s5 + $0xac] ss:$16 sps:$4 sm:$0xff]   ;;  %v8417_v37 = vld [vmem:[%s12110_s5 + $0xa8] ss:$16 sps:$4 sm:$0xff]  }
 0x110   :  { %v315_v46 = vmul.f32 0.125, %v261_v42  ;;  %v317_v47 = vmul.f32 %v313_v43, %v313_v43  ;;  %v8422_v38 = vld [vmem:[%s12110_s5 + $0xcc] ss:$16 sps:$4 sm:$0xff]   ;;  %v8420_v39 = vld [vmem:[%s12110_s5 + $0xc8] ss:$16 sps:$4 sm:$0xff]  }
 0x111   :  { %v316_v48 = vmul.f32 0.125, %v268_v44  ;;  %v318_v49 = vmul.f32 %v314_v45, %v314_v45  ;;  %v8425_v40 = vld [vmem:[%s12110_s5 + $0xec] ss:$16 sps:$4 sm:$0xff]   ;;  %v8423_v41 = vld [vmem:[%s12110_s5 + $0xe8] ss:$16 sps:$4 sm:$0xff]  }
 0x112   :  { %v319_v50 = vsub.f32 %v315_v46, %v317_v47  ;;  %v8428_v42 = vld [vmem:[%s12110_s5 + $0x10c] ss:$16 sps:$4 sm:$0xff]   ;;  %v8432_v47 = vld [vmem:[%s12110_s5 + $0x148] ss:$16 sps:$4 sm:$0xff]  }
 0x113   :  { %v320_v51 = vsub.f32 %v316_v48, %v318_v49  ;;  %v8431_v44 = vld [vmem:[%s12110_s5 + $0x12c] ss:$16 sps:$4 sm:$0xff]   ;;  %v8435_v49 = vld [vmem:[%s12110_s5 + $0x168] ss:$16 sps:$4 sm:$0xff]  }
 0x114   :  { %v321_v54 = vmax.f32 %v319_v50, 0.0  ;;  %v8434_v46 = vld [vmem:[%s12110_s5 + $0x14c] ss:$16 sps:$4 sm:$0xff]  }
 0x115   :  { %v322_v56 = vmax.f32 %v320_v51, 0.0  ;;  %v8437_v48 = vld [vmem:[%s12110_s5 + $0x16c] ss:$16 sps:$4 sm:$0xff]   ;;  %v8438_v51 = vld [vmem:[%s12110_s5 + $0x188] ss:$16 sps:$4 sm:$0xff]  }
 0x116   :  { %v324_v57 = vadd.f32 1e-05, %v321_v54  ;;  %v8440_v50 = vld [vmem:[%s12110_s5 + $0x18c] ss:$16 sps:$4 sm:$0xff]  }
 0x117   :  { %v325_v58 = vadd.f32 1e-05, %v322_v56  ;;  %v8443_v54 = vld [vmem:[%s12110_s5 + $0x1ac] ss:$16 sps:$4 sm:$0xff]   ;;  %v8441_v56 = vld [vmem:[%s12110_s5 + $0x1a8] ss:$16 sps:$4 sm:$0xff]  }
 0x118   :  { %9090 = vrsqrt.f32 %v324_v57  ;;  %v8446_v57 = vld [vmem:[%s12110_s5 + $0x1cc] ss:$16 sps:$4 sm:$0xff]  }
 0x119   :  { %9092 = vrsqrt.f32 %v325_v58  ;;  %v8444_v58 = vld [vmem:[%s12110_s5 + $0x1c8] ss:$16 sps:$4 sm:$0xff]  }
 0x122   :  { %v9091_v62 = vpop.eup %9090 }
 0x123   :  { %v9093_v0 = vpop.eup %9092 }
 0x124   :  { %v330_v1 = vcombine.low %v9091_v62, %v9093_v0  ;;  %v1227_v62 = vld [vmem:[%s12114_s9 + $0x20] sm:$0xff]  ;;  %v1224_v0 = vld [vmem:[%s12114_s9 + $0x8] sm:$0xff] }
 0x126   :  { %v337_v2 = vrot.slane %v330_v1, %v9437_v63  ;;  %v7453_v1 = vcombine.high %v1223_v61, %v1227_v62 }
 0x128   :  { %v344_v4 = vrot.slane %v337_v2, %v9437_v63  ;;  %v1228_v2 = vld [vmem:[%s12114_s9 + $0x28] sm:$0xff]  ;;  %2801 = vmatprep.subr.bf16.mxu1 %v7453_v1 }
 0x12a   :  { %v346_v5 = vmul.f32 %v344_v4, %v323_v3  ;;  %v7454_v3 = vcombine.low %v1224_v0, %v1228_v2  ;;  %v7455_v4 = vcombine.high %v1224_v0, %v1228_v2  ;;  %v1287_v2 = vld [vmem:[%s12114_s9 + $0x200] sm:$0xff] }
 0x12c   :  { %v352_v10 = vrot.slane %v346_v5, %v9408_v53  ;;  %v356_v11 = vrot.slane %v346_v5, %v9414_v55  ;;  %v7452_v5 = vcombine.low %v1223_v61, %v1227_v62  ;;  %v1284_v61 = vld [vmem:[%s12114_s9 + $0x1e8] sm:$0xff] }
 0x12e   :  { %v360_v12 = vmul.f32 %v356_v11, %v314_v45  ;;  %v383_v13 = vmul.f32 %v356_v11, %v9424_v9  ;;  %v359_v14 = vmul.f32 %v352_v10, %v313_v43  ;;  %v381_v15 = vmul.f32 %v356_v11, %v9422_v8  ;;  %v8426_v43 = vld [vmem:[%s12110_s5 + $0x108] ss:$16 sps:$4 sm:$0xff]   ;;  %2802 = vmatpush1.bf16.msra.mxu1 %v7452_v5  ;;  %v1235_v11 = vld [vmem:[%s12114_s9 + $0x60] sm:$0xff] }
 0x12f   :  { %v380_v16 = vmul.f32 %v352_v10, %v9418_v6  ;;  %v382_v17 = vmul.f32 %v352_v10, %v9420_v7  ;;  %v8402_v7 = vld [vmem:[%s12110_s5 + $0x8] ss:$16 sps:$4 sm:$0xff]   ;;  %v1231_v10 = vld [vmem:[%s12114_s9 + $0x40] sm:$0xff] }
 0x130   :  { %v363_v18 = vcombine.low %v359_v14, %v360_v12  ;;  %v8429_v45 = vld [vmem:[%s12110_s5 + $0x128] ss:$16 sps:$4 sm:$0xff]  }
 0x131   :  { %v1232_v12 = vld [vmem:[%s12114_s9 + $0x48] sm:$0xff] }
 0x132   :  { %v370_v19 = vrot.slane %v363_v18, %v9437_v63  ;;  %v1236_v14 = vld [vmem:[%s12114_s9 + $0x68] sm:$0xff]  ;;  %v1239_v18 = vld [vmem:[%s12114_s9 + $0x80] sm:$0xff] }
 0x134   :  { %v377_v21 = vrot.slane %v370_v19, %v9437_v63  ;;  %v1243_v19 = vld [vmem:[%s12114_s9 + $0xa0] sm:$0xff] }
 0x136   :  { %v379_v22 = vsub.f32 %v347_v20, %v377_v21  ;;  %v1240_v20 = vld [vmem:[%s12114_s9 + $0x88] sm:$0xff]  ;;  %v7469_v21 = vcombine.high %v1239_v18, %v1243_v19 }
 0x138   :  { %v392_v23 = vrot.slane %v379_v22, %v9414_v55  ;;  %v388_v9 = vrot.slane %v379_v22, %v9408_v53  ;;  %v1244_v22 = vld [vmem:[%s12114_s9 + $0xa8] sm:$0xff] }
 0x13a   :  { %v396_v24 = vadd.f32 %v392_v23, %v381_v15  ;;  %v398_v8 = vadd.f32 %v392_v23, %v383_v13  ;;  %v395_v25 = vadd.f32 %v388_v9, %v380_v16  ;;  %v397_v6 = vadd.f32 %v388_v9, %v382_v17 }
 0x13b   :  { %v7461_v13 = vcombine.high %v1231_v10, %v1235_v11  ;;  %v7462_v15 = vcombine.low %v1232_v12, %v1236_v14  ;;  %v7463_v16 = vcombine.high %v1232_v12, %v1236_v14  ;;  %v7460_v17 = vcombine.low %v1231_v10, %v1235_v11  ;;  %v1292_v10 = vld [vmem:[%s12114_s9 + $0x228] sm:$0xff]  ;;  %v1295_v14 = vld [vmem:[%s12114_s9 + $0x240] sm:$0xff] }
 0x13c   :  { %v400_v26 = vpack.c.bf16 %v398_v8, %v396_v24  ;;  %v9460_v27 = vpack.c.bf16 %v397_v6, %v395_v25  ;;  %v7470_v23 = vcombine.low %v1240_v20, %v1244_v22  ;;  %v7471_v9 = vcombine.high %v1240_v20, %v1244_v22  ;;  %v1247_v8 = vld [vmem:[%s12114_s9 + $0xc0] sm:$0xff]  ;;  %v1248_v6 = vld [vmem:[%s12114_s9 + $0xc8] sm:$0xff] }
 0x13d   :  { %2803 = vmatprep.subr.bf16.mxu1 %v7461_v13  ;;  %v7468_v24 = vcombine.low %v1239_v18, %v1243_v19  ;;  %v1251_v25 = vld [vmem:[%s12114_s9 + $0xe0] sm:$0xff]  ;;  %v1300_v18 = vld [vmem:[%s12114_s9 + $0x268] sm:$0xff] }
 0x13e   :  { %839 = vmatprep.mubr.bf16.mxu0 %v400_v26  ;;  %2804 = vmatpush1.bf16.msra.mxu1 %v7460_v17  ;;  %v1303_v22 = vld [vmem:[%s12114_s9 + $0x280] sm:$0xff] }
 0x13f   :  { %840 = vmatmul.mubr.bf16.vlgmr.msra.gmra.mrb[4].mxu0 %v9460_v27  ;;  %2805 = vmatprep.subr.bf16.mxu1 %v7469_v21 }
 0x140   :  { %851 = vmatpush1.bf16.msra.mxu0 %v8402_v7  ;;  %882 = vmatprep.mubr.bf16.mxu0 %v400_v26  ;;  %v7477_v26 = vcombine.high %v1247_v8, %v1251_v25  ;;  %v1252_v7 = vld [vmem:[%s12114_s9 + $0xe8] sm:$0xff] }
 0x141   :  { %852 = vmatprep.subr.bf16.mxu0 %v8407_v28  ;;  %v7479_v28 = vcombine.high %v1248_v6, %v1252_v7 }
 0x142   :  { %2806 = vmatpush1.bf16.msra.mxu1 %v7468_v24 }
 0x143   :  { %2807 = vmatprep.subr.bf16.mxu1 %v7477_v26 }
 0x144   :  { %853 = vmatpush1.bf16.msra.mxu0 %v8405_v29  ;;  %v7476_v29 = vcombine.low %v1247_v8, %v1251_v25  ;;  %v1308_v8 = vld [vmem:[%s12114_s9 + $0x2a8] sm:$0xff] }
 0x145   :  { %854 = vmatprep.subr.bf16.mxu0 %v8410_v30  ;;  %v1255_v30 = vld [vmem:[%s12114_s9 + $0x100] sm:$0xff] }
 0x146   :  { %2808 = vmatpush1.bf16.msra.mxu1 %v7476_v29  ;;  %v1312_v29 = vld [vmem:[%s12114_s9 + $0x2c8] sm:$0xff] }
 0x148   :  { %855 = vmatpush1.bf16.msra.mxu0 %v8408_v31  ;;  %v1259_v31 = vld [vmem:[%s12114_s9 + $0x120] sm:$0xff] }
 0x149   :  { %856 = vmatprep.subr.bf16.mxu0 %v8413_v32  ;;  %v1256_v32 = vld [vmem:[%s12114_s9 + $0x108] sm:$0xff] }
 0x14c   :  { %857 = vmatpush1.bf16.msra.mxu0 %v8411_v33  ;;  %v7485_v33 = vcombine.high %v1255_v30, %v1259_v31 }
 0x14d   :  { %858 = vmatprep.subr.bf16.mxu0 %v8416_v34  ;;  %v1260_v34 = vld [vmem:[%s12114_s9 + $0x128] sm:$0xff] }
 0x14e   :  { %2809 = vmatprep.subr.bf16.mxu1 %v7485_v33 }
 0x150   :  { %859 = vmatpush1.bf16.msra.mxu0 %v8414_v35  ;;  %v7486_v35 = vcombine.low %v1256_v32, %v1260_v34 }
 0x151   :  { %860 = vmatprep.subr.bf16.mxu0 %v8419_v36  ;;  %v7487_v36 = vcombine.high %v1256_v32, %v1260_v34  ;;  %v9701_v34 = vld [vmem:[%s12111_s6] sm:$0xf] }
 0x154   :  { %861 = vmatpush1.bf16.msra.mxu0 %v8417_v37  ;;  %v7484_v37 = vcombine.low %v1255_v30, %v1259_v31  ;;  %v1316_v30 = vld [vmem:[%s12114_s9 + $0x2e8] sm:$0xff] }
 0x155   :  { %862 = vmatprep.subr.bf16.mxu0 %v8422_v38  ;;  %v1263_v38 = vld [vmem:[%s12114_s9 + $0x140] sm:$0xff]  ;;  %v7542_v31 = vcombine.low %v1312_v29, %v1316_v30  ;;  %v7543_v32 = vcombine.high %v1312_v29, %v1316_v30 }
 0x156   :  { %2810 = vmatpush1.bf16.msra.mxu1 %v7484_v37  ;;  %v1320_v37 = vld [vmem:[%s12114_s9 + $0x308] sm:$0xff] }
 0x158   :  { %863 = vmatpush1.bf16.msra.mxu0 %v8420_v39  ;;  %v1267_v39 = vld [vmem:[%s12114_s9 + $0x160] sm:$0xff] }
 0x159   :  { %864 = vmatprep.subr.bf16.mxu0 %v8425_v40  ;;  %v1264_v40 = vld [vmem:[%s12114_s9 + $0x148] sm:$0xff] }
 0x15c   :  { %865 = vmatpush1.bf16.msra.mxu0 %v8423_v41  ;;  %v7493_v41 = vcombine.high %v1263_v38, %v1267_v39 }
 0x15d   :  { %866 = vmatprep.subr.bf16.mxu0 %v8428_v42  ;;  %v1268_v42 = vld [vmem:[%s12114_s9 + $0x168] sm:$0xff] }
 0x15e   :  { %2811 = vmatprep.subr.bf16.mxu1 %v7493_v41 }
 0x160   :  { %867 = vmatpush1.bf16.msra.mxu0 %v8426_v43  ;;  %v7494_v43 = vcombine.low %v1264_v40, %v1268_v42 }
 0x161   :  { %868 = vmatprep.subr.bf16.mxu0 %v8431_v44  ;;  %v7495_v44 = vcombine.high %v1264_v40, %v1268_v42  ;;  %v470_v40 = vrot.slane %v9701_v34, %v9408_v53 }
 0x164   :  { %869 = vmatpush1.bf16.msra.mxu0 %v8429_v45  ;;  %v7492_v45 = vcombine.low %v1263_v38, %v1267_v39  ;;  %v1324_v39 = vld [vmem:[%s12114_s9 + $0x328] sm:$0xff] }
 0x165   :  { %870 = vmatprep.subr.bf16.mxu0 %v8434_v46  ;;  %v1271_v46 = vld [vmem:[%s12114_s9 + $0x180] sm:$0xff]  ;;  %v7550_v41 = vcombine.low %v1320_v37, %v1324_v39  ;;  %v7551_v42 = vcombine.high %v1320_v37, %v1324_v39 }
 0x166   :  { %2812 = vmatpush1.bf16.msra.mxu1 %v7492_v45  ;;  %v1327_v45 = vld [vmem:[%s12114_s9 + $0x340] sm:$0xff] }
 0x168   :  { %871 = vmatpush1.bf16.msra.mxu0 %v8432_v47  ;;  %v1275_v47 = vld [vmem:[%s12114_s9 + $0x1a0] sm:$0xff] }
 0x169   :  { %872 = vmatprep.subr.bf16.mxu0 %v8437_v48  ;;  %v7501_v48 = vcombine.high %v1271_v46, %v1275_v47 }
 0x16b   :  { %2813 = vmatprep.subr.bf16.mxu1 %v7501_v48 }
 0x16c   :  { %873 = vmatpush1.bf16.msra.mxu0 %v8435_v49  ;;  %v1272_v49 = vld [vmem:[%s12114_s9 + $0x188] sm:$0xff] }
 0x16d   :  { %874 = vmatprep.subr.bf16.mxu0 %v8440_v50  ;;  %v1276_v50 = vld [vmem:[%s12114_s9 + $0x1a8] sm:$0xff] }
 0x170   :  { %875 = vmatpush1.bf16.msra.mxu0 %v8438_v51  ;;  %v7502_v51 = vcombine.low %v1272_v49, %v1276_v50 }
 0x171   :  { %876 = vmatprep.subr.bf16.mxu0 %v8443_v54  ;;  %v7503_v54 = vcombine.high %v1272_v49, %v1276_v50  ;;  %v1332_v50 = vld [vmem:[%s12114_s9 + $0x368] sm:$0xff] }
 0x174   :  { %877 = vmatpush1.bf16.msra.mxu0 %v8441_v56  ;;  %v7500_v56 = vcombine.low %v1271_v46, %v1275_v47  ;;  %v1331_v46 = vld [vmem:[%s12114_s9 + $0x360] sm:$0xff]  ;;  %v1328_v47 = vld [vmem:[%s12114_s9 + $0x348] sm:$0xff] }
 0x175   :  { %878 = vmatprep.subr.bf16.mxu0 %v8446_v57  ;;  %v1279_v57 = vld [vmem:[%s12114_s9 + $0x1c0] sm:$0xff]  ;;  %v7557_v49 = vcombine.high %v1327_v45, %v1331_v46 }
 0x176   :  { %2814 = vmatpush1.bf16.msra.mxu1 %v7500_v56  ;;  %v7558_v56 = vcombine.low %v1328_v47, %v1332_v50 }
 0x178   :  { %879 = vmatpush1.bf16.msra.mxu0 %v8444_v58  ;;  %v1283_v58 = vld [vmem:[%s12114_s9 + $0x1e0] sm:$0xff] }
 0x179   :  { %880 = vmatprep.subr.bf16.mxu0 %v8449_v59  ;;  %v1280_v59 = vld [vmem:[%s12114_s9 + $0x1c8] sm:$0xff]  ;;  %v7508_v1 = vcombine.low %v1279_v57, %v1283_v58 }
 0x17a   :  { %v7510_v62 = vcombine.low %v1280_v59, %v1284_v61  ;;  %v7511_v0 = vcombine.high %v1280_v59, %v1284_v61 }
 0x17c   :  { %881 = vmatpush1.bf16.msra.mxu0 %v8447_v60  ;;  %v7509_v60 = vcombine.high %v1279_v57, %v1283_v58  ;;  %v7559_v57 = vcombine.high %v1328_v47, %v1332_v50  ;;  %v7556_v58 = vcombine.low %v1327_v45, %v1331_v46 }
 0x17d   :  { %2887 = vmatprep.subr.bf16.mxu0 %v7455_v4  ;;  %v1288_v4 = vld [vmem:[%s12114_s9 + $0x208] sm:$0xff] }
 0x17e   :  { %2815 = vmatprep.subr.bf16.mxu1 %v7509_v60  ;;  %v7518_v11 = vcombine.low %v1288_v4, %v1292_v10  ;;  %v7519_v12 = vcombine.high %v1288_v4, %v1292_v10 }
 0x17f   :  { %883 = vmatmul.mubr.bf16.vlgmr.msra.gmra.mrb[8].mxu0 %v9460_v27  ;;  %v7478_v27 = vcombine.low %v1248_v6, %v1252_v7  ;;  %2816 = vmatpush1.bf16.msra.mxu1 %v7508_v1  ;;  %v1311_v7 = vld [vmem:[%s12114_s9 + $0x2c0] sm:$0xff] }
 0x180   :  { %2888 = vmatpush1.bf16.msra.mxu0 %v7454_v3  ;;  %v1291_v3 = vld [vmem:[%s12114_s9 + $0x220] sm:$0xff] }
 0x181   :  { %2889 = vmatprep.subr.bf16.mxu0 %v7463_v16  ;;  %v7517_v5 = vcombine.high %v1287_v2, %v1291_v3  ;;  %v7516_v13 = vcombine.low %v1287_v2, %v1291_v3  ;;  %v1296_v16 = vld [vmem:[%s12114_s9 + $0x248] sm:$0xff]  ;;  %v1335_v1 = vld [vmem:[%s12114_s9 + $0x380] sm:$0xff] }
 0x182   :  { %v7526_v19 = vcombine.low %v1296_v16, %v1300_v18  ;;  %v7527_v20 = vcombine.high %v1296_v16, %v1300_v18  ;;  %v1339_v2 = vld [vmem:[%s12114_s9 + $0x3a0] sm:$0xff]  ;;  %v1336_v3 = vld [vmem:[%s12114_s9 + $0x388] sm:$0xff] }
 0x183   :  { %2817 = vmatprep.subr.bf16.mxu1 %v7517_v5  ;;  %v7565_v10 = vcombine.high %v1335_v1, %v1339_v2  ;;  %v7564_v16 = vcombine.low %v1335_v1, %v1339_v2 }
 0x184   :  { %2890 = vmatpush1.bf16.msra.mxu0 %v7462_v15  ;;  %2818 = vmatpush1.bf16.msra.mxu1 %v7516_v13  ;;  %v1299_v15 = vld [vmem:[%s12114_s9 + $0x260] sm:$0xff] }
 0x185   :  { %2891 = vmatprep.subr.bf16.mxu0 %v7471_v9  ;;  %v7525_v17 = vcombine.high %v1295_v14, %v1299_v15  ;;  %v7524_v21 = vcombine.low %v1295_v14, %v1299_v15  ;;  %v1304_v9 = vld [vmem:[%s12114_s9 + $0x288] sm:$0xff] }
 0x186   :  { %v7534_v25 = vcombine.low %v1304_v9, %v1308_v8  ;;  %v7535_v6 = vcombine.high %v1304_v9, %v1308_v8 }
 0x187   :  { %2819 = vmatprep.subr.bf16.mxu1 %v7525_v17 }
 0x188   :  { %2892 = vmatpush1.bf16.msra.mxu0 %v7470_v23  ;;  %2820 = vmatpush1.bf16.msra.mxu1 %v7524_v21  ;;  %v1307_v23 = vld [vmem:[%s12114_s9 + $0x2a0] sm:$0xff] }
 0x189   :  { %2893 = vmatprep.subr.bf16.mxu0 %v7479_v28  ;;  %v7533_v24 = vcombine.high %v1303_v22, %v1307_v23  ;;  %v7532_v26 = vcombine.low %v1303_v22, %v1307_v23  ;;  %v1347_v21 = vld [vmem:[%s12114_s9 + $0x3e0] sm:$0xff]  ;;  %v1344_v22 = vld [vmem:[%s12114_s9 + $0x3c8] sm:$0xff] }
 0x18b   :  { %2821 = vmatprep.subr.bf16.mxu1 %v7533_v24  ;;  %v1348_v24 = vld [vmem:[%s12114_s9 + $0x3e8] sm:$0xff] }
 0x18c   :  { %2894 = vmatpush1.bf16.msra.mxu0 %v7478_v27  ;;  %2822 = vmatpush1.bf16.msra.mxu1 %v7532_v26  ;;  %v1315_v27 = vld [vmem:[%s12114_s9 + $0x2e0] sm:$0xff] }
 0x18d   :  { %2895 = vmatprep.subr.bf16.mxu0 %v7487_v36  ;;  %v7541_v28 = vcombine.high %v1311_v7, %v1315_v27  ;;  %v7540_v33 = vcombine.low %v1311_v7, %v1315_v27  ;;  %v1323_v36 = vld [vmem:[%s12114_s9 + $0x320] sm:$0xff] }
 0x18f   :  { %2823 = vmatprep.subr.bf16.mxu1 %v7541_v28 }
 0x190   :  { %2896 = vmatpush1.bf16.msra.mxu0 %v7486_v35  ;;  %2824 = vmatpush1.bf16.msra.mxu1 %v7540_v33  ;;  %v1319_v35 = vld [vmem:[%s12114_s9 + $0x300] sm:$0xff]  ;;  %v9784_v33 = vld [vmem:[%s12114_s9 + $0x408] sm:$0xff] }
 0x191   :  { %2897 = vmatprep.subr.bf16.mxu0 %v7495_v44  ;;  %v7549_v38 = vcombine.high %v1319_v35, %v1323_v36  ;;  %v474_v44 = vrot.slane %v9701_v34, %v9414_v55 }
 0x193   :  { %2825 = vmatprep.subr.bf16.mxu1 %v7549_v38  ;;  %v9793_v38 = vld [vmem:[%s12114_s9 + $0x428] sm:$0xff] }
 0x194   :  { %2898 = vmatpush1.bf16.msra.mxu0 %v7494_v43  ;;  %v7548_v43 = vcombine.low %v1319_v35, %v1323_v36  ;;  %v7583_v45 = vcombine.high %v9784_v33, %v9793_v38 }
 0x195   :  { %2899 = vmatprep.subr.bf16.mxu0 %v7503_v54 }
 0x196   :  { %2826 = vmatpush1.bf16.msra.mxu1 %v7548_v43 }
 0x197   :  { %2827 = vmatprep.subr.bf16.mxu1 %v7557_v49 }
 0x198   :  { %2900 = vmatpush1.bf16.msra.mxu0 %v7502_v51 }
 0x199   :  { %2901 = vmatprep.subr.bf16.mxu0 %v7511_v0 }
 0x19a   :  { %2828 = vmatpush1.bf16.msra.mxu1 %v7556_v58 }
 0x19b   :  { %2829 = vmatprep.subr.bf16.mxu1 %v7565_v10 }
 0x19c   :  { %2902 = vmatpush1.bf16.msra.mxu0 %v7510_v62 }
 0x19d   :  { %2903 = vmatprep.subr.bf16.mxu0 %v7519_v12 }
 0x19e   :  { %2830 = vmatpush1.bf16.msra.mxu1 %v7564_v16 }
 0x1a0   :  { %2904 = vmatpush1.bf16.msra.mxu0 %v7518_v11  ;;  %v1340_v11 = vld [vmem:[%s12114_s9 + $0x3a8] sm:$0xff] }
 0x1a1   :  { %2905 = vmatprep.subr.bf16.mxu0 %v7527_v20  ;;  %v7566_v13 = vcombine.low %v1336_v3, %v1340_v11  ;;  %v7567_v14 = vcombine.high %v1336_v3, %v1340_v11  ;;  %v1343_v20 = vld [vmem:[%s12114_s9 + $0x3c0] sm:$0xff] }
 0x1a2   :  { %v7573_v9 = vcombine.high %v1343_v20, %v1347_v21  ;;  %v7572_v26 = vcombine.low %v1343_v20, %v1347_v21 }
 0x1a4   :  { %2906 = vmatpush1.bf16.msra.mxu0 %v7526_v19  ;;  %2831 = vmatprep.subr.bf16.mxu1 %v7573_v9 }
 0x1a5   :  { %2907 = vmatprep.subr.bf16.mxu0 %v7535_v6  ;;  %v7575_v6 = vcombine.high %v1344_v22, %v1348_v24  ;;  %2832 = vmatpush1.bf16.msra.mxu1 %v7572_v26 }
 0x1a8   :  { %2908 = vmatpush1.bf16.msra.mxu0 %v7534_v25  ;;  %v7574_v25 = vcombine.low %v1344_v22, %v1348_v24 }
 0x1a9   :  { %2909 = vmatprep.subr.bf16.mxu0 %v7543_v32  ;;  %v9779_v32 = vld [vmem:[%s12114_s9 + $0x420] sm:$0xff] }
 0x1ac   :  { %2910 = vmatpush1.bf16.msra.mxu0 %v7542_v31  ;;  %v9774_v31 = vld [vmem:[%s12114_s9 + $0x400] sm:$0xff] }
 0x1ad   :  { %2911 = vmatprep.subr.bf16.mxu0 %v7551_v42  ;;  %v7581_v37 = vcombine.high %v9774_v31, %v9779_v32  ;;  %v7582_v42 = vcombine.low %v9784_v33, %v9793_v38  ;;  %v1380_v33 = vld [vmem:[%s12114_s9 + $0x4e8] sm:$0xff] }
 0x1af   :  { %2844 = vmatprep.subr.bf16.mxu1 %v7581_v37 }
 0x1b0   :  { %2912 = vmatpush1.bf16.msra.mxu0 %v7550_v41  ;;  %v7580_v41 = vcombine.low %v9774_v31, %v9779_v32  ;;  %v1379_v31 = vld [vmem:[%s12114_s9 + $0x4e0] sm:$0xff]  ;;  %v1376_v32 = vld [vmem:[%s12114_s9 + $0x4c8] sm:$0xff] }
 0x1b1   :  { %2913 = vmatprep.subr.bf16.mxu0 %v7559_v57 }
 0x1b4   :  { %2914 = vmatpush1.bf16.msra.mxu0 %v7558_v56 }
 0x1b5   :  { %2915 = vmatprep.subr.bf16.mxu0 %v7567_v14 }
 0x1b8   :  { %2916 = vmatpush1.bf16.msra.mxu0 %v7566_v13 }
 0x1b9   :  { %2917 = vmatprep.subr.bf16.mxu0 %v7575_v6 }
 0x1bc   :  { %2918 = vmatpush1.bf16.msra.mxu0 %v7574_v25 }
 0x1bd   :  { %2930 = vmatprep.subr.bf16.mxu0 %v7583_v45 }
 0x212   :  { %v841_v48 = vpop.f32.mrb[4].mxu0 }
 0x213   :  { %v842_v51 = vadd.f32 %v841_v48, %v470_v40  ;;  %v843_v54 = vpop.f32.mrb[5].mxu0 }
 0x214   :  { %v844_v59 = vadd.f32 %v843_v54, %v474_v44  ;;  %v845_v60 = vpop.f32.mrb[6].mxu0 }
 0x215   :  { %v893_v61 = vmul.f32 0.2, %v842_v51  ;;  %v846_v62 = vadd.f32 %v845_v60, %v470_v40  ;;  %v847_v0 = vpop.f32.mrb[7].mxu0 }
 0x216   :  { %v894_v4 = vmul.f32 0.2, %v844_v59  ;;  %v848_v5 = vadd.f32 %v847_v0, %v474_v44 }
 0x217   :  { %v897_v12 = vmul.f32 0.2, %v846_v62  ;;  %v9743_v17 = vmax.f32 %v842_v51, %v893_v61 }
 0x218   :  { %v898_v15 = vmul.f32 0.2, %v848_v5  ;;  %v9745_v18 = vmax.f32 %v844_v59, %v894_v4 }
 0x219   :  { %v9747_v19 = vmax.f32 %v846_v62, %v897_v12  ;;  %v948_v27 = vmul.f32 %v9743_v17, %v9743_v17 }
 0x21a   :  { %v9758_v23 = vmax.f32 %v848_v5, %v898_v15  ;;  %v949_v28 = vmul.f32 %v9745_v18, %v9745_v18 }
 0x21b   :  { %v916_v8 = vmul.f32 0.0, %v9747_v19 }
 0x21c   :  { %v917_v7 = vmul.f32 0.0, %v9758_v23 }
 0x21d   :  { %v920_v29 = vadd.f32 %v916_v8, %v9743_v17  ;;  %v952_v30 = vmul.f32 %v916_v8, %v9747_v19 }
 0x21e   :  { %v927_v35 = vadd.f32 %v917_v7, %v9745_v18  ;;  %v953_v36 = vmul.f32 %v917_v7, %v9758_v23 }
 0x21f   :  { %v921_v39 = vrot.slane %v920_v29, 4  ;;  %v956_v40 = vadd.f32 %v952_v30, %v948_v27  ;;  %v9816_v27 = vsub.s32 2, %v9405_v52 }
 0x220   :  { %v928_v43 = vrot.slane %v927_v35, 4  ;;  %v963_v44 = vadd.f32 %v953_v36, %v949_v28  ;;  %v9819_v28 = vsub.s32 3, %v9405_v52 }
 0x221   :  { %v922_v46 = vadd.f32 %v921_v39, %v920_v29  ;;  %v957_v47 = vrot.slane %v956_v40, 4  ;;  %v478_v29 = vrot.slane %v9701_v34, %v9816_v27 }
 0x222   :  { %v929_v48 = vadd.f32 %v928_v43, %v927_v35  ;;  %v964_v49 = vrot.slane %v963_v44, 4  ;;  %v482_v30 = vrot.slane %v9701_v34, %v9819_v28 }
 0x223   :  { %v923_v50 = vrot.slane %v922_v46, 2  ;;  %v958_v51 = vadd.f32 %v957_v47, %v956_v40 }
 0x224   :  { %v930_v54 = vrot.slane %v929_v48, 2  ;;  %v965_v56 = vadd.f32 %v964_v49, %v963_v44 }
 0x225   :  { %v924_v57 = vadd.f32 %v923_v50, %v922_v46  ;;  %v959_v58 = vrot.slane %v958_v51, 2 }
 0x226   :  { %v931_v59 = vadd.f32 %v930_v54, %v929_v48  ;;  %v966_v60 = vrot.slane %v965_v56, 2 }
 0x227   :  { %v925_v61 = vrot.slane %v924_v57, 1  ;;  %v960_v62 = vadd.f32 %v959_v58, %v958_v51 }
 0x228   :  { %v932_v0 = vrot.slane %v931_v59, 1  ;;  %v967_v1 = vadd.f32 %v966_v60, %v965_v56 }
 0x229   :  { %v926_v2 = vadd.f32 %v925_v61, %v924_v57  ;;  %v961_v3 = vrot.slane %v960_v62, 1 }
 0x22a   :  { %v933_v4 = vadd.f32 %v932_v0, %v931_v59  ;;  %v968_v5 = vrot.slane %v967_v1, 1 }
 0x22b   :  { %v962_v10 = vadd.f32 %v961_v3, %v960_v62  ;;  %v9801_v11 = vmul.f32 0.125, %v926_v2 }
 0x22c   :  { %v969_v12 = vadd.f32 %v968_v5, %v967_v1  ;;  %v9803_v13 = vmul.f32 0.125, %v933_v4 }
 0x22d   :  { %v1071_v14 = vmul.f32 0.125, %v962_v10  ;;  %v1075_v15 = vmul.f32 %v9801_v11, %v9801_v11 }
 0x22e   :  { %v1072_v16 = vmul.f32 0.125, %v969_v12  ;;  %v1076_v20 = vmul.f32 %v9803_v13, %v9803_v13 }
 0x22f   :  { %v1079_v21 = vsub.f32 %v1071_v14, %v1075_v15 }
 0x230   :  { %v1080_v22 = vsub.f32 %v1072_v16, %v1076_v20 }
 0x231   :  { %v1083_v9 = vmax.f32 %v1079_v21, 0.0 }
 0x232   :  { %v1084_v24 = vmax.f32 %v1080_v22, 0.0 }
 0x233   :  { %v1088_v8 = vadd.f32 1e-05, %v1083_v9 }
 0x234   :  { %v1089_v25 = vadd.f32 1e-05, %v1084_v24 }
 0x235   :  { %9094 = vrsqrt.f32 %v1088_v8 }
 0x236   :  { %9096 = vrsqrt.f32 %v1089_v25 }
 0x23f   :  { %v9809_v6 = vpop.eup %9094 }
 0x240   :  { %v9811_v26 = vpop.eup %9096 }
 0x241   :  { %v1100_v7 = vcombine.low %v9809_v6, %v9811_v26 }
 0x252   :  { %v884_v35 = vpop.f32.mrb[8].mxu0 }
 0x253   :  { %v885_v36 = vadd.f32 %v884_v35, %v478_v29  ;;  %v886_v37 = vpop.f32.mrb[9].mxu0 }
 0x254   :  { %v887_v39 = vadd.f32 %v886_v37, %v482_v30  ;;  %v888_v40 = vpop.f32.mrb[10].mxu0 }
 0x255   :  { %v895_v43 = vmul.f32 0.2, %v885_v36  ;;  %v889_v44 = vadd.f32 %v888_v40, %v478_v29  ;;  %v890_v45 = vpop.f32.mrb[11].mxu0 }
 0x256   :  { %v896_v46 = vmul.f32 0.2, %v887_v39  ;;  %v891_v47 = vadd.f32 %v890_v45, %v482_v30 }
 0x257   :  { %v899_v48 = vmul.f32 0.2, %v889_v44  ;;  %v9825_v50 = vmax.f32 %v885_v36, %v895_v43 }
 0x258   :  { %v900_v49 = vmul.f32 0.2, %v891_v47  ;;  %v9829_v54 = vmax.f32 %v887_v39, %v896_v46 }
 0x259   :  { %v9827_v51 = vmax.f32 %v889_v44, %v899_v48  ;;  %v950_v58 = vmul.f32 %v9825_v50, %v9825_v50 }
 0x25a   :  { %v9831_v56 = vmax.f32 %v891_v47, %v900_v49  ;;  %v951_v61 = vmul.f32 %v9829_v54, %v9829_v54 }
 0x25b   :  { %v918_v34 = vmul.f32 0.0, %v9827_v51 }
 0x25c   :  { %v919_v57 = vmul.f32 0.0, %v9831_v56 }
 0x25d   :  { %v934_v59 = vadd.f32 %v918_v34, %v9825_v50  ;;  %v954_v60 = vmul.f32 %v918_v34, %v9827_v51 }
 0x25e   :  { %v941_v62 = vadd.f32 %v919_v57, %v9829_v54  ;;  %v955_v0 = vmul.f32 %v919_v57, %v9831_v56 }
 0x25f   :  { %v935_v1 = vrot.slane %v934_v59, 4  ;;  %v970_v2 = vadd.f32 %v954_v60, %v950_v58 }
 0x260   :  { %v942_v3 = vrot.slane %v941_v62, 4  ;;  %v977_v4 = vadd.f32 %v955_v0, %v951_v61 }
 0x261   :  { %v936_v5 = vadd.f32 %v935_v1, %v934_v59  ;;  %v971_v10 = vrot.slane %v970_v2, 4 }
 0x262   :  { %v943_v12 = vadd.f32 %v942_v3, %v941_v62  ;;  %v978_v14 = vrot.slane %v977_v4, 4  ;;  %v1108_v3 = vrot.slane %v1100_v7, %v9437_v63 }
 0x263   :  { %v937_v15 = vrot.slane %v936_v5, 2  ;;  %v972_v16 = vadd.f32 %v971_v10, %v970_v2  ;;  %v1087_v10 = vld [vmem:[%s12112_s7] sm:$0xf] }
 0x264   :  { %v944_v20 = vrot.slane %v943_v12, 2  ;;  %v979_v21 = vadd.f32 %v978_v14, %v977_v4 }
 0x265   :  { %v938_v22 = vadd.f32 %v937_v15, %v936_v5  ;;  %v973_v9 = vrot.slane %v972_v16, 2 }
 0x266   :  { %v945_v24 = vadd.f32 %v944_v20, %v943_v12  ;;  %v980_v8 = vrot.slane %v979_v21, 2 }
 0x267   :  { %v939_v25 = vrot.slane %v938_v22, 1  ;;  %v974_v29 = vadd.f32 %v973_v9, %v972_v16 }
 0x268   :  { %v946_v30 = vrot.slane %v945_v24, 1  ;;  %v981_v35 = vadd.f32 %v980_v8, %v979_v21 }
 0x269   :  { %v940_v36 = vadd.f32 %v939_v25, %v938_v22  ;;  %v975_v37 = vrot.slane %v974_v29, 1 }
 0x26a   :  { %v947_v39 = vadd.f32 %v946_v30, %v945_v24  ;;  %v982_v40 = vrot.slane %v981_v35, 1 }
 0x26b   :  { %v976_v43 = vadd.f32 %v975_v37, %v974_v29  ;;  %v1069_v44 = vmul.f32 0.125, %v940_v36 }
 0x26c   :  { %v983_v45 = vadd.f32 %v982_v40, %v981_v35  ;;  %v1070_v46 = vmul.f32 0.125, %v947_v39 }
 0x26d   :  { %v1073_v47 = vmul.f32 0.125, %v976_v43  ;;  %v1077_v48 = vmul.f32 %v1069_v44, %v1069_v44 }
 0x26e   :  { %v1074_v49 = vmul.f32 0.125, %v983_v45  ;;  %v1078_v34 = vmul.f32 %v1070_v46, %v1070_v46 }
 0x26f   :  { %v1081_v57 = vsub.f32 %v1073_v47, %v1077_v48 }
 0x270   :  { %v1082_v58 = vsub.f32 %v1074_v49, %v1078_v34  ;;  %v1363_v49 = vld [vmem:[%s12114_s9 + $0x460] sm:$0xff]  ;;  %v1360_v34 = vld [vmem:[%s12114_s9 + $0x448] sm:$0xff] }
 0x271   :  { %v1085_v59 = vmax.f32 %v1081_v57, 0.0  ;;  %v1364_v57 = vld [vmem:[%s12114_s9 + $0x468] sm:$0xff] }
 0x272   :  { %v1086_v60 = vmax.f32 %v1082_v58, 0.0 }
 0x273   :  { %v1090_v61 = vadd.f32 1e-05, %v1085_v59 }
 0x274   :  { %v1091_v62 = vadd.f32 1e-05, %v1086_v60 }
 0x275   :  { %9098 = vrsqrt.f32 %v1090_v61 }
 0x276   :  { %9100 = vrsqrt.f32 %v1091_v62 }
 0x27f   :  { %v9099_v0 = vpop.eup %9098 }
 0x280   :  { %v9101_v1 = vpop.eup %9100 }
 0x281   :  { %v1101_v2 = vcombine.low %v9099_v0, %v9101_v1  ;;  %v1367_v0 = vld [vmem:[%s12114_s9 + $0x480] sm:$0xff] }
 0x283   :  { %v1115_v4 = vrot.slane %v1101_v2, %v9437_v63 }
 0x285   :  { %v1116_v5 = vcombine.low %v1108_v3, %v1115_v4  ;;  %v7591_v3 = vcombine.high %v1360_v34, %v1364_v57  ;;  %v1371_v4 = vld [vmem:[%s12114_s9 + $0x4a0] sm:$0xff] }
 0x286   :  { %v7596_v38 = vcombine.low %v1367_v0, %v1371_v4 }
 0x287   :  { %v1123_v12 = vrot.slane %v1116_v5, %v9437_v63  ;;  %v1368_v5 = vld [vmem:[%s12114_s9 + $0x488] sm:$0xff] }
 0x289   :  { %v1125_v14 = vmul.f32 %v1123_v12, %v1087_v10  ;;  %v1372_v10 = vld [vmem:[%s12114_s9 + $0x4a8] sm:$0xff] }
 0x28b   :  { %v1131_v15 = vrot.slane %v1125_v14, %v9408_v53  ;;  %v1135_v16 = vrot.slane %v1125_v14, %v9414_v55  ;;  %v1139_v20 = vrot.slane %v1125_v14, %v9816_v27  ;;  %v1143_v21 = vrot.slane %v1125_v14, %v9819_v28 }
 0x28c   :  { %v7590_v14 = vcombine.low %v1360_v34, %v1364_v57  ;;  %v1415_v34 = vld [vmem:[%s12114_s9 + $0x600] sm:$0xff] }
 0x28d   :  { %v1148_v6 = vmul.f32 %v1131_v15, %v9801_v11  ;;  %v1149_v26 = vmul.f32 %v1135_v16, %v9803_v13  ;;  %v1150_v7 = vmul.f32 %v1139_v20, %v1069_v44  ;;  %v1151_v22 = vmul.f32 %v1143_v21, %v1070_v46  ;;  %v1359_v46 = vld [vmem:[%s12114_s9 + $0x440] sm:$0xff] }
 0x28e   :  { %v1189_v9 = vmul.f32 %v1143_v21, %v9831_v56  ;;  %v1183_v24 = vmul.f32 %v1135_v16, %v9745_v18  ;;  %v1187_v8 = vmul.f32 %v1135_v16, %v9758_v23  ;;  %v1182_v25 = vmul.f32 %v1131_v15, %v9743_v17  ;;  %v1126_v18 = vld [vmem:[%s12113_s8] sm:$0xf] }
 0x28f   :  { %v1156_v29 = vcombine.low %v1148_v6, %v1149_v26  ;;  %v1157_v30 = vcombine.low %v1150_v7, %v1151_v22  ;;  %v1186_v35 = vmul.f32 %v1131_v15, %v9747_v19  ;;  %v1185_v36 = vmul.f32 %v1143_v21, %v9829_v54  ;;  %v1383_v6 = vld [vmem:[%s12114_s9 + $0x500] sm:$0xff]  ;;  %v1384_v7 = vld [vmem:[%s12114_s9 + $0x508] sm:$0xff] }
 0x290   :  { %v1184_v11 = vmul.f32 %v1139_v20, %v9825_v50  ;;  %v1188_v13 = vmul.f32 %v1139_v20, %v9827_v51  ;;  %v7589_v2 = vcombine.high %v1359_v46, %v1363_v49  ;;  %v7588_v12 = vcombine.low %v1359_v46, %v1363_v49  ;;  %v1375_v20 = vld [vmem:[%s12114_s9 + $0x4c0] sm:$0xff]  ;;  %v1388_v22 = vld [vmem:[%s12114_s9 + $0x528] sm:$0xff] }
 0x291   :  { %v1164_v37 = vrot.slane %v1156_v29, %v9437_v63  ;;  %v1171_v56 = vrot.slane %v1157_v30, %v9437_v63  ;;  %v7597_v15 = vcombine.high %v1367_v0, %v1371_v4  ;;  %v7599_v16 = vcombine.high %v1368_v5, %v1372_v10  ;;  %v1387_v26 = vld [vmem:[%s12114_s9 + $0x520] sm:$0xff] }
 0x292   :  { %v7607_v21 = vcombine.high %v1376_v32, %v1380_v33  ;;  %v1391_v29 = vld [vmem:[%s12114_s9 + $0x540] sm:$0xff] }
 0x293   :  { %v1172_v39 = vcombine.low %v1164_v37, %v1171_v56  ;;  %v1395_v30 = vld [vmem:[%s12114_s9 + $0x560] sm:$0xff] }
 0x294   :  { %v7621_v37 = vcombine.high %v1391_v29, %v1395_v30  ;;  %v1419_v57 = vld [vmem:[%s12114_s9 + $0x620] sm:$0xff] }
 0x295   :  { %v1179_v17 = vrot.slane %v1172_v39, %v9437_v63  ;;  %v1399_v39 = vld [vmem:[%s12114_s9 + $0x580] sm:$0xff] }
 0x297   :  { %v1181_v23 = vsub.f32 %v1126_v18, %v1179_v17  ;;  %v1403_v18 = vld [vmem:[%s12114_s9 + $0x5a0] sm:$0xff]  ;;  %v1400_v17 = vld [vmem:[%s12114_s9 + $0x588] sm:$0xff] }
 0x298   :  { %v7628_v46 = vcombine.low %v1399_v39, %v1403_v18 }
 0x299   :  { %v1206_v19 = vrot.slane %v1181_v23, %v9819_v28  ;;  %v1198_v54 = vrot.slane %v1181_v23, %v9414_v55  ;;  %v1194_v50 = vrot.slane %v1181_v23, %v9408_v53  ;;  %v1202_v51 = vrot.slane %v1181_v23, %v9816_v27  ;;  %v1404_v23 = vld [vmem:[%s12114_s9 + $0x5a8] sm:$0xff] }
 0x29b   :  { %v1218_v40 = vadd.f32 %v1206_v19, %v1189_v9  ;;  %v1212_v43 = vadd.f32 %v1198_v54, %v1183_v24  ;;  %v1216_v44 = vadd.f32 %v1198_v54, %v1187_v8  ;;  %v1211_v45 = vadd.f32 %v1194_v50, %v1182_v25 }
 0x29c   :  { %v1215_v47 = vadd.f32 %v1194_v50, %v1186_v35  ;;  %v1214_v48 = vadd.f32 %v1206_v19, %v1185_v36  ;;  %v1213_v58 = vadd.f32 %v1202_v51, %v1184_v11  ;;  %v1217_v59 = vadd.f32 %v1202_v51, %v1188_v13  ;;  %v1392_v35 = vld [vmem:[%s12114_s9 + $0x548] sm:$0xff] }
 0x29d   :  { %v9888_v60 = vpack.c.bf16 %v1216_v44, %v1212_v43  ;;  %v7604_v9 = vcombine.low %v1375_v20, %v1379_v31  ;;  %v7606_v24 = vcombine.low %v1376_v32, %v1380_v33  ;;  %v7613_v8 = vcombine.high %v1383_v6, %v1387_v26  ;;  %v1396_v36 = vld [vmem:[%s12114_s9 + $0x568] sm:$0xff]  ;;  %v1411_v43 = vld [vmem:[%s12114_s9 + $0x5e0] sm:$0xff] }
 0x29e   :  { %v9890_v61 = vpack.c.bf16 %v1215_v47, %v1211_v45  ;;  %v9892_v62 = vpack.c.bf16 %v1218_v40, %v1214_v48  ;;  %v9897_v1 = vpack.c.bf16 %v1217_v59, %v1213_v58  ;;  %v7615_v25 = vcombine.high %v1384_v7, %v1388_v22  ;;  %v1407_v40 = vld [vmem:[%s12114_s9 + $0x5c0] sm:$0xff]  ;;  %v1408_v44 = vld [vmem:[%s12114_s9 + $0x5c8] sm:$0xff] }
 0x29f   :  { %2833 = vmatprep.mubr.bf16.mxu1 %v9888_v60  ;;  %2919 = vmatprep.mubr.bf16.mxu0 %v9888_v60  ;;  %v7612_v11 = vcombine.low %v1383_v6, %v1387_v26  ;;  %v7614_v13 = vcombine.low %v1384_v7, %v1388_v22  ;;  %v7623_v56 = vcombine.high %v1392_v35, %v1396_v36  ;;  %v1412_v45 = vld [vmem:[%s12114_s9 + $0x5e8] sm:$0xff]  ;;  %v1431_v32 = vld [vmem:[%s12114_s9 + $0x680] sm:$0xff] }
 0x2a0   :  { %2834 = vmatmul.mubr.bf16.vlgmr.msra.gmra.mrb[0].mxu1 %v9890_v61  ;;  %2920 = vmatmul.mubr.bf16.vlgmr.msra.gmra.mrb[12].mxu0 %v9890_v61  ;;  %v7620_v19 = vcombine.low %v1391_v29, %v1395_v30  ;;  %v7622_v54 = vcombine.low %v1392_v35, %v1396_v36  ;;  %v7629_v50 = vcombine.high %v1399_v39, %v1403_v18  ;;  %v1416_v58 = vld [vmem:[%s12114_s9 + $0x608] sm:$0xff]  ;;  %v1435_v33 = vld [vmem:[%s12114_s9 + $0x6a0] sm:$0xff] }
 0x2a1   :  { %2845 = vmatpush1.bf16.msra.mxu1 %v7580_v41  ;;  %2931 = vmatpush1.bf16.msra.mxu0 %v7582_v42  ;;  %v7598_v41 = vcombine.low %v1368_v5, %v1372_v10  ;;  %v7605_v42 = vcombine.high %v1375_v20, %v1379_v31  ;;  %v7631_v51 = vcombine.high %v1400_v17, %v1404_v23  ;;  %v1420_v59 = vld [vmem:[%s12114_s9 + $0x628] sm:$0xff]  ;;  %v1423_v5 = vld [vmem:[%s12114_s9 + $0x640] sm:$0xff] }
 0x2a2   :  { %2876 = vmatprep.mubr.bf16.mxu1 %v9892_v62  ;;  %2962 = vmatprep.mubr.bf16.mxu0 %v9892_v62  ;;  %v7630_v47 = vcombine.low %v1400_v17, %v1404_v23  ;;  %v7637_v48 = vcombine.high %v1407_v40, %v1411_v43  ;;  %v7639_v49 = vcombine.high %v1408_v44, %v1412_v45  ;;  %v1427_v10 = vld [vmem:[%s12114_s9 + $0x660] sm:$0xff] }
 0x2a3   :  { %2846 = vmatprep.subr.bf16.mxu1 %v7589_v2  ;;  %2932 = vmatprep.subr.bf16.mxu0 %v7591_v3  ;;  %v7636_v0 = vcombine.low %v1407_v40, %v1411_v43  ;;  %v7638_v2 = vcombine.low %v1408_v44, %v1412_v45  ;;  %v7645_v3 = vcombine.high %v1415_v34, %v1419_v57  ;;  %v1439_v7 = vld [vmem:[%s12114_s9 + $0x6c0] sm:$0xff] }
 0x2a4   :  { %v7647_v4 = vcombine.high %v1416_v58, %v1420_v59  ;;  %v7653_v20 = vcombine.high %v1423_v5, %v1427_v10  ;;  %v7661_v6 = vcombine.high %v1431_v32, %v1435_v33  ;;  %v1443_v22 = vld [vmem:[%s12114_s9 + $0x6e0] sm:$0xff] }
 0x2a5   :  { %2847 = vmatpush1.bf16.msra.mxu1 %v7588_v12  ;;  %2933 = vmatpush1.bf16.msra.mxu0 %v7590_v14  ;;  %v1424_v12 = vld [vmem:[%s12114_s9 + $0x648] sm:$0xff]  ;;  %v7669_v29 = vcombine.high %v1439_v7, %v1443_v22  ;;  %v1447_v35 = vld [vmem:[%s12114_s9 + $0x700] sm:$0xff] }
 0x2a6   :  { %2848 = vmatprep.subr.bf16.mxu1 %v7597_v15  ;;  %2934 = vmatprep.subr.bf16.mxu0 %v7599_v16  ;;  %v1428_v14 = vld [vmem:[%s12114_s9 + $0x668] sm:$0xff]  ;;  %v7644_v15 = vcombine.low %v1415_v34, %v1419_v57  ;;  %v7646_v16 = vcombine.low %v1416_v58, %v1420_v59  ;;  %v1451_v36 = vld [vmem:[%s12114_s9 + $0x720] sm:$0xff] }
 0x2a7   :  { %v7655_v31 = vcombine.high %v1424_v12, %v1428_v14  ;;  %v7677_v39 = vcombine.high %v1447_v35, %v1451_v36  ;;  %v1455_v17 = vld [vmem:[%s12114_s9 + $0x740] sm:$0xff] }
 0x2a8   :  { %v1459_v23 = vld [vmem:[%s12114_s9 + $0x760] sm:$0xff] }
 0x2a9   :  { %2849 = vmatpush1.bf16.msra.mxu1 %v7596_v38  ;;  %2935 = vmatpush1.bf16.msra.mxu0 %v7598_v41  ;;  %v1432_v38 = vld [vmem:[%s12114_s9 + $0x688] sm:$0xff]  ;;  %v7685_v40 = vcombine.high %v1455_v17, %v1459_v23  ;;  %v1463_v44 = vld [vmem:[%s12114_s9 + $0x780] sm:$0xff] }
 0x2aa   :  { %2850 = vmatprep.subr.bf16.mxu1 %v7605_v42  ;;  %2936 = vmatprep.subr.bf16.mxu0 %v7607_v21  ;;  %v1436_v41 = vld [vmem:[%s12114_s9 + $0x6a8] sm:$0xff]  ;;  %v7652_v42 = vcombine.low %v1423_v5, %v1427_v10  ;;  %v7654_v21 = vcombine.low %v1424_v12, %v1428_v14  ;;  %v1467_v45 = vld [vmem:[%s12114_s9 + $0x7a0] sm:$0xff]  ;;  %v1225_v12 = vld [vmem:[%s12114_s9 + $0x10] sm:$0xff] }
 0x2ab   :  { %v7663_v26 = vcombine.high %v1432_v38, %v1436_v41  ;;  %v7693_v34 = vcombine.high %v1463_v44, %v1467_v45  ;;  %v1471_v58 = vld [vmem:[%s12114_s9 + $0x7c0] sm:$0xff]  ;;  %v1229_v14 = vld [vmem:[%s12114_s9 + $0x30] sm:$0xff] }
 0x2ac   :  { %v1475_v59 = vld [vmem:[%s12114_s9 + $0x7e0] sm:$0xff] }
 0x2ad   :  { %2851 = vmatpush1.bf16.msra.mxu1 %v7604_v9  ;;  %2937 = vmatpush1.bf16.msra.mxu0 %v7606_v24  ;;  %v1440_v9 = vld [vmem:[%s12114_s9 + $0x6c8] sm:$0xff]  ;;  %v7701_v5 = vcombine.high %v1471_v58, %v1475_v59 }
 0x2ae   :  { %2852 = vmatprep.subr.bf16.mxu1 %v7613_v8  ;;  %2938 = vmatprep.subr.bf16.mxu0 %v7615_v25  ;;  %v1444_v24 = vld [vmem:[%s12114_s9 + $0x6e8] sm:$0xff]  ;;  %v7660_v8 = vcombine.low %v1431_v32, %v1435_v33  ;;  %v7662_v25 = vcombine.low %v1432_v38, %v1436_v41  ;;  %v7457_v32 = vcombine.high %v1225_v12, %v1229_v14  ;;  %v1233_v38 = vld [vmem:[%s12114_s9 + $0x50] sm:$0xff] }
 0x2af   :  { %v7671_v30 = vcombine.high %v1440_v9, %v1444_v24  ;;  %v1237_v41 = vld [vmem:[%s12114_s9 + $0x70] sm:$0xff] }
 0x2b1   :  { %2853 = vmatpush1.bf16.msra.mxu1 %v7612_v11  ;;  %2939 = vmatpush1.bf16.msra.mxu0 %v7614_v13  ;;  %v1448_v11 = vld [vmem:[%s12114_s9 + $0x708] sm:$0xff] }
 0x2b2   :  { %2854 = vmatprep.subr.bf16.mxu1 %v7621_v37  ;;  %2940 = vmatprep.subr.bf16.mxu0 %v7623_v56  ;;  %v1452_v13 = vld [vmem:[%s12114_s9 + $0x728] sm:$0xff]  ;;  %v7668_v37 = vcombine.low %v1439_v7, %v1443_v22  ;;  %v7670_v56 = vcombine.low %v1440_v9, %v1444_v24  ;;  %v7465_v7 = vcombine.high %v1233_v38, %v1237_v41  ;;  %v1241_v9 = vld [vmem:[%s12114_s9 + $0x90] sm:$0xff] }
 0x2b3   :  { %v7679_v18 = vcombine.high %v1448_v11, %v1452_v13  ;;  %v1245_v24 = vld [vmem:[%s12114_s9 + $0xb0] sm:$0xff] }
 0x2b5   :  { %2855 = vmatpush1.bf16.msra.mxu1 %v7620_v19  ;;  %2941 = vmatpush1.bf16.msra.mxu0 %v7622_v54  ;;  %v1456_v19 = vld [vmem:[%s12114_s9 + $0x748] sm:$0xff] }
 0x2b6   :  { %2856 = vmatprep.subr.bf16.mxu1 %v7629_v50  ;;  %2942 = vmatprep.subr.bf16.mxu0 %v7631_v51  ;;  %v1460_v54 = vld [vmem:[%s12114_s9 + $0x768] sm:$0xff]  ;;  %v7676_v50 = vcombine.low %v1447_v35, %v1451_v36  ;;  %v7678_v51 = vcombine.low %v1448_v11, %v1452_v13  ;;  %v7473_v35 = vcombine.high %v1241_v9, %v1245_v24  ;;  %v1249_v11 = vld [vmem:[%s12114_s9 + $0xd0] sm:$0xff] }
 0x2b7   :  { %v7687_v43 = vcombine.high %v1456_v19, %v1460_v54  ;;  %v1253_v13 = vld [vmem:[%s12114_s9 + $0xf0] sm:$0xff] }
 0x2b9   :  { %2857 = vmatpush1.bf16.msra.mxu1 %v7628_v46  ;;  %2943 = vmatpush1.bf16.msra.mxu0 %v7630_v47  ;;  %v1464_v46 = vld [vmem:[%s12114_s9 + $0x788] sm:$0xff] }
 0x2ba   :  { %2858 = vmatprep.subr.bf16.mxu1 %v7637_v48  ;;  %2944 = vmatprep.subr.bf16.mxu0 %v7639_v49  ;;  %v1468_v47 = vld [vmem:[%s12114_s9 + $0x7a8] sm:$0xff]  ;;  %v7684_v48 = vcombine.low %v1455_v17, %v1459_v23  ;;  %v7686_v49 = vcombine.low %v1456_v19, %v1460_v54  ;;  %v1257_v23 = vld [vmem:[%s12114_s9 + $0x110] sm:$0xff]  ;;  %v1258_v54 = vld [vmem:[%s12114_s9 + $0x118] sm:$0xff] }
 0x2bb   :  { %v7695_v57 = vcombine.high %v1464_v46, %v1468_v47  ;;  %v1261_v19 = vld [vmem:[%s12114_s9 + $0x130] sm:$0xff] }
 0x2bd   :  { %2859 = vmatpush1.bf16.msra.mxu1 %v7636_v0  ;;  %2945 = vmatpush1.bf16.msra.mxu0 %v7638_v2  ;;  %v1472_v0 = vld [vmem:[%s12114_s9 + $0x7c8] sm:$0xff] }
 0x2be   :  { %2860 = vmatprep.subr.bf16.mxu1 %v7645_v3  ;;  %2946 = vmatprep.subr.bf16.mxu0 %v7647_v4  ;;  %v1476_v2 = vld [vmem:[%s12114_s9 + $0x7e8] sm:$0xff]  ;;  %v7692_v3 = vcombine.low %v1463_v44, %v1467_v45  ;;  %v7694_v4 = vcombine.low %v1464_v46, %v1468_v47  ;;  %v1265_v45 = vld [vmem:[%s12114_s9 + $0x150] sm:$0xff]  ;;  %v1266_v47 = vld [vmem:[%s12114_s9 + $0x158] sm:$0xff] }
 0x2bf   :  { %v7703_v10 = vcombine.high %v1472_v0, %v1476_v2  ;;  %v1269_v46 = vld [vmem:[%s12114_s9 + $0x170] sm:$0xff] }
 0x2c1   :  { %2861 = vmatpush1.bf16.msra.mxu1 %v7644_v15  ;;  %2947 = vmatpush1.bf16.msra.mxu0 %v7646_v16  ;;  %v1226_v15 = vld [vmem:[%s12114_s9 + $0x18] sm:$0xff] }
 0x2c2   :  { %2862 = vmatprep.subr.bf16.mxu1 %v7653_v20  ;;  %2948 = vmatprep.subr.bf16.mxu0 %v7655_v31  ;;  %v1230_v16 = vld [vmem:[%s12114_s9 + $0x38] sm:$0xff]  ;;  %v7700_v20 = vcombine.low %v1471_v58, %v1475_v59  ;;  %v7702_v31 = vcombine.low %v1472_v0, %v1476_v2  ;;  %v1273_v59 = vld [vmem:[%s12114_s9 + $0x190] sm:$0xff] }
 0x2c3   :  { %v7459_v33 = vcombine.high %v1226_v15, %v1230_v16  ;;  %v1277_v0 = vld [vmem:[%s12114_s9 + $0x1b0] sm:$0xff]  ;;  %v1274_v2 = vld [vmem:[%s12114_s9 + $0x198] sm:$0xff] }
 0x2c5   :  { %2863 = vmatpush1.bf16.msra.mxu1 %v7652_v42  ;;  %2949 = vmatpush1.bf16.msra.mxu0 %v7654_v21  ;;  %v1234_v42 = vld [vmem:[%s12114_s9 + $0x58] sm:$0xff] }
 0x2c6   :  { %2864 = vmatprep.subr.bf16.mxu1 %v7661_v6  ;;  %2950 = vmatprep.subr.bf16.mxu0 %v7663_v26  ;;  %v1238_v21 = vld [vmem:[%s12114_s9 + $0x78] sm:$0xff]  ;;  %v7456_v6 = vcombine.low %v1225_v12, %v1229_v14  ;;  %v7458_v26 = vcombine.low %v1226_v15, %v1230_v16  ;;  %v1281_v14 = vld [vmem:[%s12114_s9 + $0x1d0] sm:$0xff] }
 0x2c7   :  { %v7467_v22 = vcombine.high %v1234_v42, %v1238_v21  ;;  %v1285_v15 = vld [vmem:[%s12114_s9 + $0x1f0] sm:$0xff]  ;;  %v1282_v16 = vld [vmem:[%s12114_s9 + $0x1d8] sm:$0xff] }
 0x2c9   :  { %2865 = vmatpush1.bf16.msra.mxu1 %v7660_v8  ;;  %2951 = vmatpush1.bf16.msra.mxu0 %v7662_v25  ;;  %v1242_v8 = vld [vmem:[%s12114_s9 + $0x98] sm:$0xff] }
 0x2ca   :  { %2866 = vmatprep.subr.bf16.mxu1 %v7669_v29  ;;  %2952 = vmatprep.subr.bf16.mxu0 %v7671_v30  ;;  %v1246_v25 = vld [vmem:[%s12114_s9 + $0xb8] sm:$0xff]  ;;  %v7464_v29 = vcombine.low %v1233_v38, %v1237_v41  ;;  %v7466_v30 = vcombine.low %v1234_v42, %v1238_v21  ;;  %v1289_v41 = vld [vmem:[%s12114_s9 + $0x210] sm:$0xff] }
 0x2cb   :  { %v7475_v36 = vcombine.high %v1242_v8, %v1246_v25  ;;  %v1293_v42 = vld [vmem:[%s12114_s9 + $0x230] sm:$0xff]  ;;  %v1290_v21 = vld [vmem:[%s12114_s9 + $0x218] sm:$0xff] }
 0x2cd   :  { %2867 = vmatpush1.bf16.msra.mxu1 %v7668_v37  ;;  %2953 = vmatpush1.bf16.msra.mxu0 %v7670_v56  ;;  %v1250_v37 = vld [vmem:[%s12114_s9 + $0xd8] sm:$0xff]  ;;  %v7472_v56 = vcombine.low %v1241_v9, %v1245_v24  ;;  %v1297_v24 = vld [vmem:[%s12114_s9 + $0x250] sm:$0xff] }
 0x2ce   :  { %2868 = vmatprep.subr.bf16.mxu1 %v7677_v39  ;;  %2954 = vmatprep.subr.bf16.mxu0 %v7679_v18  ;;  %v7474_v39 = vcombine.low %v1242_v8, %v1246_v25  ;;  %v7481_v18 = vcombine.high %v1249_v11, %v1253_v13  ;;  %v1301_v8 = vld [vmem:[%s12114_s9 + $0x270] sm:$0xff]  ;;  %v1298_v25 = vld [vmem:[%s12114_s9 + $0x258] sm:$0xff] }
 0x2d1   :  { %2869 = vmatpush1.bf16.msra.mxu1 %v7676_v50  ;;  %2955 = vmatpush1.bf16.msra.mxu0 %v7678_v51  ;;  %v1262_v50 = vld [vmem:[%s12114_s9 + $0x138] sm:$0xff]  ;;  %v7480_v51 = vcombine.low %v1249_v11, %v1253_v13  ;;  %v1305_v13 = vld [vmem:[%s12114_s9 + $0x290] sm:$0xff] }
 0x2d2   :  { %2870 = vmatprep.subr.bf16.mxu1 %v7685_v40  ;;  %2956 = vmatprep.subr.bf16.mxu0 %v7687_v43  ;;  %v7489_v43 = vcombine.high %v1257_v23, %v1261_v19  ;;  %v7491_v44 = vcombine.high %v1258_v54, %v1262_v50 }
 0x2d5   :  { %2871 = vmatpush1.bf16.msra.mxu1 %v7684_v48  ;;  %2957 = vmatpush1.bf16.msra.mxu0 %v7686_v49  ;;  %v1270_v48 = vld [vmem:[%s12114_s9 + $0x178] sm:$0xff]  ;;  %v7488_v49 = vcombine.low %v1257_v23, %v1261_v19  ;;  %v1313_v19 = vld [vmem:[%s12114_s9 + $0x2d0] sm:$0xff] }
 0x2d6   :  { %2872 = vmatprep.subr.bf16.mxu1 %v7693_v34  ;;  %2958 = vmatprep.subr.bf16.mxu0 %v7695_v57  ;;  %v7490_v34 = vcombine.low %v1258_v54, %v1262_v50  ;;  %v7497_v57 = vcombine.high %v1265_v45, %v1269_v46  ;;  %v7499_v58 = vcombine.high %v1266_v47, %v1270_v48  ;;  %v1317_v54 = vld [vmem:[%s12114_s9 + $0x2f0] sm:$0xff]  ;;  %v1314_v50 = vld [vmem:[%s12114_s9 + $0x2d8] sm:$0xff] }
 0x2d9   :  { %2873 = vmatpush1.bf16.msra.mxu1 %v7692_v3  ;;  %2959 = vmatpush1.bf16.msra.mxu0 %v7694_v4  ;;  %v1278_v3 = vld [vmem:[%s12114_s9 + $0x1b8] sm:$0xff]  ;;  %v7496_v4 = vcombine.low %v1265_v45, %v1269_v46  ;;  %v1321_v46 = vld [vmem:[%s12114_s9 + $0x310] sm:$0xff] }
 0x2da   :  { %2874 = vmatprep.subr.bf16.mxu1 %v7701_v5  ;;  %2960 = vmatprep.subr.bf16.mxu0 %v7703_v10  ;;  %v7498_v5 = vcombine.low %v1266_v47, %v1270_v48  ;;  %v7505_v10 = vcombine.high %v1273_v59, %v1277_v0  ;;  %v7507_v12 = vcombine.high %v1274_v2, %v1278_v3  ;;  %v1325_v47 = vld [vmem:[%s12114_s9 + $0x330] sm:$0xff]  ;;  %v1322_v48 = vld [vmem:[%s12114_s9 + $0x318] sm:$0xff] }
 0x2dd   :  { %2875 = vmatpush1.bf16.msra.mxu1 %v7700_v20  ;;  %2961 = vmatpush1.bf16.msra.mxu0 %v7702_v31  ;;  %v1286_v20 = vld [vmem:[%s12114_s9 + $0x1f8] sm:$0xff]  ;;  %v7504_v31 = vcombine.low %v1273_v59, %v1277_v0  ;;  %v1329_v0 = vld [vmem:[%s12114_s9 + $0x350] sm:$0xff] }
 0x2de   :  { %2973 = vmatprep.subr.bf16.mxu1 %v7457_v32  ;;  %3059 = vmatprep.subr.bf16.mxu0 %v7459_v33  ;;  %v7506_v32 = vcombine.low %v1274_v2, %v1278_v3  ;;  %v7513_v33 = vcombine.high %v1281_v14, %v1285_v15  ;;  %v7515_v38 = vcombine.high %v1282_v16, %v1286_v20  ;;  %v1333_v2 = vld [vmem:[%s12114_s9 + $0x370] sm:$0xff]  ;;  %v1330_v3 = vld [vmem:[%s12114_s9 + $0x358] sm:$0xff] }
 0x2e0   :  { %2877 = vmatmul.mubr.bf16.vlgmr.msra.gmra.mrb[0].mxu1 %v9897_v1  ;;  %2963 = vmatmul.mubr.bf16.vlgmr.msra.gmra.mrb[12].mxu0 %v9897_v1 }
 0x2e1   :  { %2974 = vmatpush1.bf16.msra.mxu1 %v7456_v6  ;;  %3005 = vmatprep.mubr.bf16.mxu1 %v9888_v60  ;;  %v1294_v6 = vld [vmem:[%s12114_s9 + $0x238] sm:$0xff] }
 0x2e2   :  { %3060 = vmatpush1.bf16.msra.mxu0 %v7458_v26  ;;  %3091 = vmatprep.mubr.bf16.mxu0 %v9888_v60  ;;  %v1254_v60 = vld [vmem:[%s12114_s9 + $0xf8] sm:$0xff]  ;;  %v7512_v26 = vcombine.low %v1281_v14, %v1285_v15  ;;  %v7523_v9 = vcombine.high %v1290_v21, %v1294_v6  ;;  %v1337_v15 = vld [vmem:[%s12114_s9 + $0x390] sm:$0xff] }
 0x2e3   :  { %2975 = vmatprep.subr.bf16.mxu1 %v7465_v7  ;;  %3061 = vmatprep.subr.bf16.mxu0 %v7467_v22  ;;  %v7483_v17 = vcombine.high %v1250_v37, %v1254_v60  ;;  %v7482_v40 = vcombine.low %v1250_v37, %v1254_v60  ;;  %v7514_v7 = vcombine.low %v1282_v16, %v1286_v20  ;;  %v1309_v37 = vld [vmem:[%s12114_s9 + $0x2b0] sm:$0xff]  ;;  %v1306_v60 = vld [vmem:[%s12114_s9 + $0x298] sm:$0xff] }
 0x2e4   :  { %v7521_v22 = vcombine.high %v1289_v41, %v1293_v42  ;;  %v1341_v16 = vld [vmem:[%s12114_s9 + $0x3b0] sm:$0xff]  ;;  %v1338_v20 = vld [vmem:[%s12114_s9 + $0x398] sm:$0xff] }
 0x2e5   :  { %2976 = vmatpush1.bf16.msra.mxu1 %v7464_v29  ;;  %v1302_v29 = vld [vmem:[%s12114_s9 + $0x278] sm:$0xff] }
 0x2e6   :  { %3062 = vmatpush1.bf16.msra.mxu0 %v7466_v30  ;;  %2977 = vmatprep.subr.bf16.mxu1 %v7473_v35  ;;  %v7520_v30 = vcombine.low %v1289_v41, %v1293_v42  ;;  %v7522_v35 = vcombine.low %v1290_v21, %v1294_v6  ;;  %v7531_v11 = vcombine.high %v1298_v25, %v1302_v29  ;;  %v1345_v42 = vld [vmem:[%s12114_s9 + $0x3d0] sm:$0xff]  ;;  %v1346_v6 = vld [vmem:[%s12114_s9 + $0x3d8] sm:$0xff] }
 0x2e7   :  { %3063 = vmatprep.subr.bf16.mxu0 %v7475_v36  ;;  %v7529_v36 = vcombine.high %v1297_v24, %v1301_v8  ;;  %v1349_v21 = vld [vmem:[%s12114_s9 + $0x3f0] sm:$0xff] }
 0x2e9   :  { %2978 = vmatpush1.bf16.msra.mxu1 %v7472_v56  ;;  %v1310_v56 = vld [vmem:[%s12114_s9 + $0x2b8] sm:$0xff] }
 0x2ea   :  { %3064 = vmatpush1.bf16.msra.mxu0 %v7474_v39  ;;  %2979 = vmatprep.subr.bf16.mxu1 %v7481_v18  ;;  %v7528_v39 = vcombine.low %v1297_v24, %v1301_v8  ;;  %v7530_v18 = vcombine.low %v1298_v25, %v1302_v29  ;;  %v7539_v23 = vcombine.high %v1306_v60, %v1310_v56  ;;  %v1353_v8 = vld [vmem:[%s12114_s9 + $0x410] sm:$0xff]  ;;  %v1354_v29 = vld [vmem:[%s12114_s9 + $0x418] sm:$0xff] }
 0x2eb   :  { %3065 = vmatprep.subr.bf16.mxu0 %v7483_v17  ;;  %v7537_v17 = vcombine.high %v1305_v13, %v1309_v37  ;;  %v1357_v25 = vld [vmem:[%s12114_s9 + $0x430] sm:$0xff] }
 0x2ed   :  { %2980 = vmatpush1.bf16.msra.mxu1 %v7480_v51  ;;  %v1318_v51 = vld [vmem:[%s12114_s9 + $0x2f8] sm:$0xff] }
 0x2ee   :  { %3066 = vmatpush1.bf16.msra.mxu0 %v7482_v40  ;;  %2981 = vmatprep.subr.bf16.mxu1 %v7489_v43  ;;  %v7536_v40 = vcombine.low %v1305_v13, %v1309_v37  ;;  %v7538_v43 = vcombine.low %v1306_v60, %v1310_v56  ;;  %v7547_v45 = vcombine.high %v1314_v50, %v1318_v51  ;;  %v1361_v37 = vld [vmem:[%s12114_s9 + $0x450] sm:$0xff] }
 0x2ef   :  { %3067 = vmatprep.subr.bf16.mxu0 %v7491_v44  ;;  %v7545_v44 = vcombine.high %v1313_v19, %v1317_v54  ;;  %v1365_v60 = vld [vmem:[%s12114_s9 + $0x470] sm:$0xff]  ;;  %v7584_v56 = vcombine.low %v1353_v8, %v1357_v25 }
 0x2f1   :  { %2982 = vmatpush1.bf16.msra.mxu1 %v7488_v49  ;;  %v1326_v49 = vld [vmem:[%s12114_s9 + $0x338] sm:$0xff] }
 0x2f2   :  { %3068 = vmatpush1.bf16.msra.mxu0 %v7490_v34  ;;  %2983 = vmatprep.subr.bf16.mxu1 %v7497_v57  ;;  %v7544_v34 = vcombine.low %v1313_v19, %v1317_v54  ;;  %v7546_v57 = vcombine.low %v1314_v50, %v1318_v51  ;;  %v7555_v59 = vcombine.high %v1322_v48, %v1326_v49  ;;  %v1369_v19 = vld [vmem:[%s12114_s9 + $0x490] sm:$0xff]  ;;  %v1370_v51 = vld [vmem:[%s12114_s9 + $0x498] sm:$0xff] }
 0x2f3   :  { %3069 = vmatprep.subr.bf16.mxu0 %v7499_v58  ;;  %v7553_v58 = vcombine.high %v1321_v46, %v1325_v47  ;;  %v1373_v54 = vld [vmem:[%s12114_s9 + $0x4b0] sm:$0xff] }
 0x2f5   :  { %2984 = vmatpush1.bf16.msra.mxu1 %v7496_v4  ;;  %v1334_v4 = vld [vmem:[%s12114_s9 + $0x378] sm:$0xff] }
 0x2f6   :  { %3070 = vmatpush1.bf16.msra.mxu0 %v7498_v5  ;;  %2985 = vmatprep.subr.bf16.mxu1 %v7505_v10  ;;  %v7552_v5 = vcombine.low %v1321_v46, %v1325_v47  ;;  %v7554_v10 = vcombine.low %v1322_v48, %v1326_v49  ;;  %v7563_v14 = vcombine.high %v1330_v3, %v1334_v4  ;;  %v1377_v47 = vld [vmem:[%s12114_s9 + $0x4d0] sm:$0xff]  ;;  %v1382_v49 = vld [vmem:[%s12114_s9 + $0x4f8] sm:$0xff] }
 0x2f7   :  { %3071 = vmatprep.subr.bf16.mxu0 %v7507_v12  ;;  %v7561_v12 = vcombine.high %v1329_v0, %v1333_v2  ;;  %v1381_v48 = vld [vmem:[%s12114_s9 + $0x4f0] sm:$0xff] }
 0x2f9   :  { %2986 = vmatpush1.bf16.msra.mxu1 %v7504_v31  ;;  %v1342_v31 = vld [vmem:[%s12114_s9 + $0x3b8] sm:$0xff] }
 0x2fa   :  { %3072 = vmatpush1.bf16.msra.mxu0 %v7506_v32  ;;  %2987 = vmatprep.subr.bf16.mxu1 %v7513_v33  ;;  %v7560_v32 = vcombine.low %v1329_v0, %v1333_v2  ;;  %v7562_v33 = vcombine.low %v1330_v3, %v1334_v4  ;;  %v7571_v41 = vcombine.high %v1338_v20, %v1342_v31  ;;  %v1389_v0 = vld [vmem:[%s12114_s9 + $0x530] sm:$0xff]  ;;  %v1386_v2 = vld [vmem:[%s12114_s9 + $0x518] sm:$0xff] }
 0x2fb   :  { %3073 = vmatprep.subr.bf16.mxu0 %v7515_v38  ;;  %v7569_v38 = vcombine.high %v1337_v15, %v1341_v16  ;;  %v1390_v3 = vld [vmem:[%s12114_s9 + $0x538] sm:$0xff]  ;;  %v7608_v4 = vcombine.low %v1377_v47, %v1381_v48 }
 0x2fd   :  { %2988 = vmatpush1.bf16.msra.mxu1 %v7512_v26  ;;  %v1350_v26 = vld [vmem:[%s12114_s9 + $0x3f8] sm:$0xff] }
 0x2fe   :  { %3074 = vmatpush1.bf16.msra.mxu0 %v7514_v7  ;;  %2989 = vmatprep.subr.bf16.mxu1 %v7521_v22  ;;  %v7568_v7 = vcombine.low %v1337_v15, %v1341_v16  ;;  %v7570_v22 = vcombine.low %v1338_v20, %v1342_v31  ;;  %v7579_v24 = vcombine.high %v1346_v6, %v1350_v26  ;;  %v1397_v15 = vld [vmem:[%s12114_s9 + $0x570] sm:$0xff]  ;;  %v1394_v16 = vld [vmem:[%s12114_s9 + $0x558] sm:$0xff] }
 0x2ff   :  { %3075 = vmatprep.subr.bf16.mxu0 %v7523_v9  ;;  %v7577_v9 = vcombine.high %v1345_v42, %v1349_v21  ;;  %v1398_v20 = vld [vmem:[%s12114_s9 + $0x578] sm:$0xff] }
 0x301   :  { %2990 = vmatpush1.bf16.msra.mxu1 %v7520_v30  ;;  %v1358_v30 = vld [vmem:[%s12114_s9 + $0x438] sm:$0xff] }
 0x302   :  { %3076 = vmatpush1.bf16.msra.mxu0 %v7522_v35  ;;  %2991 = vmatprep.subr.bf16.mxu1 %v7529_v36  ;;  %v7576_v35 = vcombine.low %v1345_v42, %v1349_v21  ;;  %v7578_v36 = vcombine.low %v1346_v6, %v1350_v26  ;;  %v7587_v13 = vcombine.high %v1354_v29, %v1358_v30  ;;  %v1405_v42 = vld [vmem:[%s12114_s9 + $0x5b0] sm:$0xff]  ;;  %v1402_v21 = vld [vmem:[%s12114_s9 + $0x598] sm:$0xff] }
 0x303   :  { %3077 = vmatprep.subr.bf16.mxu0 %v7531_v11  ;;  %v7585_v11 = vcombine.high %v1353_v8, %v1357_v25  ;;  %v1406_v6 = vld [vmem:[%s12114_s9 + $0x5b8] sm:$0xff]  ;;  %v1413_v8 = vld [vmem:[%s12114_s9 + $0x5f0] sm:$0xff] }
 0x304   :  { %v1410_v25 = vld [vmem:[%s12114_s9 + $0x5d8] sm:$0xff] }
 0x305   :  { %2992 = vmatpush1.bf16.msra.mxu1 %v7528_v39  ;;  %v1362_v39 = vld [vmem:[%s12114_s9 + $0x458] sm:$0xff] }
 0x306   :  { %3078 = vmatpush1.bf16.msra.mxu0 %v7530_v18  ;;  %2993 = vmatprep.subr.bf16.mxu1 %v7537_v17  ;;  %v1366_v18 = vld [vmem:[%s12114_s9 + $0x478] sm:$0xff]  ;;  %v7586_v17 = vcombine.low %v1354_v29, %v1358_v30 }
 0x307   :  { %3079 = vmatprep.subr.bf16.mxu0 %v7539_v23  ;;  %v7593_v23 = vcombine.high %v1361_v37, %v1365_v60  ;;  %v7595_v50 = vcombine.high %v1362_v39, %v1366_v18  ;;  %v1414_v29 = vld [vmem:[%s12114_s9 + $0x5f8] sm:$0xff] }
 0x309   :  { %2994 = vmatpush1.bf16.msra.mxu1 %v7536_v40  ;;  %v1374_v40 = vld [vmem:[%s12114_s9 + $0x4b8] sm:$0xff] }
 0x30a   :  { %3080 = vmatpush1.bf16.msra.mxu0 %v7538_v43  ;;  %2995 = vmatprep.subr.bf16.mxu1 %v7545_v44  ;;  %v7592_v43 = vcombine.low %v1361_v37, %v1365_v60  ;;  %v7594_v44 = vcombine.low %v1362_v39, %v1366_v18  ;;  %v7603_v46 = vcombine.high %v1370_v51, %v1374_v40  ;;  %v1421_v37 = vld [vmem:[%s12114_s9 + $0x630] sm:$0xff]  ;;  %v1418_v60 = vld [vmem:[%s12114_s9 + $0x618] sm:$0xff] }
 0x30b   :  { %3081 = vmatprep.subr.bf16.mxu0 %v7547_v45  ;;  %v7601_v45 = vcombine.high %v1369_v19, %v1373_v54  ;;  %v7642_v18 = vcombine.low %v1410_v25, %v1414_v29 }
 0x30d   :  { %2996 = vmatpush1.bf16.msra.mxu1 %v7544_v34  ;;  %v7602_v34 = vcombine.low %v1370_v51, %v1374_v40  ;;  %v1430_v51 = vld [vmem:[%s12114_s9 + $0x678] sm:$0xff] }
 0x30e   :  { %3082 = vmatpush1.bf16.msra.mxu0 %v7546_v57  ;;  %2997 = vmatprep.subr.bf16.mxu1 %v7553_v58  ;;  %v7609_v57 = vcombine.high %v1377_v47, %v1381_v48  ;;  %v1437_v47 = vld [vmem:[%s12114_s9 + $0x6b0] sm:$0xff]  ;;  %v1434_v48 = vld [vmem:[%s12114_s9 + $0x698] sm:$0xff] }
 0x30f   :  { %3083 = vmatprep.subr.bf16.mxu0 %v7555_v59  ;;  %v1385_v59 = vld [vmem:[%s12114_s9 + $0x510] sm:$0xff] }
 0x310   :  { %v7616_v31 = vcombine.low %v1385_v59, %v1389_v0 }
 0x311   :  { %2998 = vmatpush1.bf16.msra.mxu1 %v7552_v5 }
 0x312   :  { %3084 = vmatpush1.bf16.msra.mxu0 %v7554_v10  ;;  %2999 = vmatprep.subr.bf16.mxu1 %v7561_v12  ;;  %v7617_v10 = vcombine.high %v1385_v59, %v1389_v0  ;;  %v7619_v12 = vcombine.high %v1386_v2, %v1390_v3  ;;  %v1445_v59 = vld [vmem:[%s12114_s9 + $0x6f0] sm:$0xff]  ;;  %v1442_v0 = vld [vmem:[%s12114_s9 + $0x6d8] sm:$0xff] }
 0x313   :  { %3085 = vmatprep.subr.bf16.mxu0 %v7563_v14  ;;  %v1393_v14 = vld [vmem:[%s12114_s9 + $0x550] sm:$0xff] }
 0x314   :  { %v7624_v26 = vcombine.low %v1393_v14, %v1397_v15 }
 0x315   :  { %3000 = vmatpush1.bf16.msra.mxu1 %v7560_v32  ;;  %v7618_v32 = vcombine.low %v1386_v2, %v1390_v3  ;;  %v1446_v2 = vld [vmem:[%s12114_s9 + $0x6f8] sm:$0xff] }
 0x316   :  { %3086 = vmatpush1.bf16.msra.mxu0 %v7562_v33  ;;  %3001 = vmatprep.subr.bf16.mxu1 %v7569_v38  ;;  %v7625_v33 = vcombine.high %v1393_v14, %v1397_v15  ;;  %v7627_v38 = vcombine.high %v1394_v16, %v1398_v20  ;;  %v1453_v14 = vld [vmem:[%s12114_s9 + $0x730] sm:$0xff]  ;;  %v1450_v15 = vld [vmem:[%s12114_s9 + $0x718] sm:$0xff] }
 0x317   :  { %3087 = vmatprep.subr.bf16.mxu0 %v7571_v41  ;;  %v1401_v41 = vld [vmem:[%s12114_s9 + $0x590] sm:$0xff] }
 0x318   :  { %v7632_v30 = vcombine.low %v1401_v41, %v1405_v42 }
 0x319   :  { %3002 = vmatpush1.bf16.msra.mxu1 %v7568_v7  ;;  %v7626_v7 = vcombine.low %v1394_v16, %v1398_v20  ;;  %v1454_v16 = vld [vmem:[%s12114_s9 + $0x738] sm:$0xff] }
 0x31a   :  { %3088 = vmatpush1.bf16.msra.mxu0 %v7570_v22  ;;  %3003 = vmatprep.subr.bf16.mxu1 %v7577_v9  ;;  %v7633_v22 = vcombine.high %v1401_v41, %v1405_v42  ;;  %v7635_v9 = vcombine.high %v1402_v21, %v1406_v6  ;;  %v1461_v41 = vld [vmem:[%s12114_s9 + $0x770] sm:$0xff]  ;;  %v1458_v42 = vld [vmem:[%s12114_s9 + $0x758] sm:$0xff] }
 0x31b   :  { %3089 = vmatprep.subr.bf16.mxu0 %v7579_v24  ;;  %v1409_v24 = vld [vmem:[%s12114_s9 + $0x5d0] sm:$0xff] }
 0x31c   :  { %v7640_v39 = vcombine.low %v1409_v24, %v1413_v8 }
 0x31d   :  { %3004 = vmatpush1.bf16.msra.mxu1 %v7576_v35  ;;  %v7634_v35 = vcombine.low %v1402_v21, %v1406_v6  ;;  %v1462_v21 = vld [vmem:[%s12114_s9 + $0x778] sm:$0xff] }
 0x31e   :  { %3090 = vmatpush1.bf16.msra.mxu0 %v7578_v36  ;;  %3016 = vmatprep.subr.bf16.mxu1 %v7585_v11  ;;  %v7641_v36 = vcombine.high %v1409_v24, %v1413_v8  ;;  %v7643_v11 = vcombine.high %v1410_v25, %v1414_v29  ;;  %v1469_v24 = vld [vmem:[%s12114_s9 + $0x7b0] sm:$0xff]  ;;  %v1466_v8 = vld [vmem:[%s12114_s9 + $0x798] sm:$0xff] }
 0x31f   :  { %3102 = vmatprep.subr.bf16.mxu0 %v7587_v13  ;;  %v1417_v13 = vld [vmem:[%s12114_s9 + $0x610] sm:$0xff]  ;;  %v1470_v25 = vld [vmem:[%s12114_s9 + $0x7b8] sm:$0xff] }
 0x320   :  { %3006 = vmatmul.mubr.bf16.vlgmr.msra.gmra.mrb[4].mxu1 %v9890_v61  ;;  %v7648_v40 = vcombine.low %v1417_v13, %v1421_v37 }
 0x321   :  { %3092 = vmatmul.mubr.bf16.vlgmr.msra.gmra.mrb[16].mxu0 %v9890_v61  ;;  %3017 = vmatpush1.bf16.msra.mxu1 %v7584_v56  ;;  %v1378_v61 = vld [vmem:[%s12114_s9 + $0x4d8] sm:$0xff] }
 0x322   :  { %3048 = vmatprep.mubr.bf16.mxu1 %v9892_v62  ;;  %3103 = vmatpush1.bf16.msra.mxu0 %v7586_v17  ;;  %v7611_v58 = vcombine.high %v1378_v61, %v1382_v49  ;;  %v7610_v5 = vcombine.low %v1378_v61, %v1382_v49  ;;  %v1422_v56 = vld [vmem:[%s12114_s9 + $0x638] sm:$0xff]  ;;  %v7649_v17 = vcombine.high %v1417_v13, %v1421_v37  ;;  %v1477_v13 = vld [vmem:[%s12114_s9 + $0x7f0] sm:$0xff] }
 0x323   :  { %3134 = vmatprep.mubr.bf16.mxu0 %v9892_v62  ;;  %3018 = vmatprep.subr.bf16.mxu1 %v7593_v23  ;;  %v7600_v62 = vcombine.low %v1369_v19, %v1373_v54  ;;  %v7651_v23 = vcombine.high %v1418_v60, %v1422_v56  ;;  %v1425_v19 = vld [vmem:[%s12114_s9 + $0x650] sm:$0xff]  ;;  %v1438_v61 = vld [vmem:[%s12114_s9 + $0x6b8] sm:$0xff] }
 0x324   :  { %3104 = vmatprep.subr.bf16.mxu0 %v7595_v50  ;;  %v1429_v54 = vld [vmem:[%s12114_s9 + $0x670] sm:$0xff]  ;;  %v1426_v50 = vld [vmem:[%s12114_s9 + $0x658] sm:$0xff] }
 0x325   :  { %3019 = vmatpush1.bf16.msra.mxu1 %v7592_v43  ;;  %v7650_v43 = vcombine.low %v1418_v60, %v1422_v56  ;;  %v7656_v49 = vcombine.low %v1425_v19, %v1429_v54  ;;  %v1474_v37 = vld [vmem:[%s12114_s9 + $0x7d8] sm:$0xff] }
 0x326   :  { %3105 = vmatpush1.bf16.msra.mxu0 %v7594_v44  ;;  %3020 = vmatprep.subr.bf16.mxu1 %v7601_v45  ;;  %v7657_v44 = vcombine.high %v1425_v19, %v1429_v54  ;;  %v7659_v45 = vcombine.high %v1426_v50, %v1430_v51  ;;  %v1478_v60 = vld [vmem:[%s12114_s9 + $0x7f8] sm:$0xff]  ;;  %v10473_v54 = vld [vmem:[%s12115_s10] sm:$0xff] }
 0x327   :  { %3106 = vmatprep.subr.bf16.mxu0 %v7603_v46  ;;  %v1433_v46 = vld [vmem:[%s12114_s9 + $0x690] sm:$0xff]  ;;  %v7706_v19 = vcombine.low %v1474_v37, %v1478_v60 }
 0x328   :  { %v7664_v3 = vcombine.low %v1433_v46, %v1437_v47 }
 0x329   :  { %3021 = vmatpush1.bf16.msra.mxu1 %v7600_v62  ;;  %v7658_v62 = vcombine.low %v1426_v50, %v1430_v51  ;;  %v1484_v50 = vrot.slane %v10473_v54, %v9408_v53  ;;  %v1488_v51 = vrot.slane %v10473_v54, %v9414_v55 }
 0x32a   :  { %3107 = vmatpush1.bf16.msra.mxu0 %v7602_v34  ;;  %3022 = vmatprep.subr.bf16.mxu1 %v7609_v57  ;;  %v7665_v34 = vcombine.high %v1433_v46, %v1437_v47  ;;  %v7667_v57 = vcombine.high %v1434_v48, %v1438_v61 }
 0x32b   :  { %3108 = vmatprep.subr.bf16.mxu0 %v7611_v58  ;;  %v1441_v58 = vld [vmem:[%s12114_s9 + $0x6d0] sm:$0xff] }
 0x32c   :  { %v7672_v20 = vcombine.low %v1441_v58, %v1445_v59 }
 0x32d   :  { %3023 = vmatpush1.bf16.msra.mxu1 %v7608_v4  ;;  %v7666_v4 = vcombine.low %v1434_v48, %v1438_v61 }
 0x32e   :  { %3109 = vmatpush1.bf16.msra.mxu0 %v7610_v5  ;;  %3024 = vmatprep.subr.bf16.mxu1 %v7617_v10  ;;  %v7673_v5 = vcombine.high %v1441_v58, %v1445_v59  ;;  %v7675_v10 = vcombine.high %v1442_v0, %v1446_v2 }
 0x32f   :  { %3110 = vmatprep.subr.bf16.mxu0 %v7619_v12  ;;  %v1449_v12 = vld [vmem:[%s12114_s9 + $0x710] sm:$0xff] }
 0x330   :  { %v7680_v6 = vcombine.low %v1449_v12, %v1453_v14 }
 0x331   :  { %3025 = vmatpush1.bf16.msra.mxu1 %v7616_v31  ;;  %v7674_v31 = vcombine.low %v1442_v0, %v1446_v2 }
 0x332   :  { %3111 = vmatpush1.bf16.msra.mxu0 %v7618_v32  ;;  %3026 = vmatprep.subr.bf16.mxu1 %v7625_v33  ;;  %v7681_v32 = vcombine.high %v1449_v12, %v1453_v14  ;;  %v7683_v33 = vcombine.high %v1450_v15, %v1454_v16 }
 0x333   :  { %3112 = vmatprep.subr.bf16.mxu0 %v7627_v38  ;;  %v1457_v38 = vld [vmem:[%s12114_s9 + $0x750] sm:$0xff] }
 0x334   :  { %v7688_v29 = vcombine.low %v1457_v38, %v1461_v41 }
 0x335   :  { %3027 = vmatpush1.bf16.msra.mxu1 %v7624_v26  ;;  %v7682_v26 = vcombine.low %v1450_v15, %v1454_v16 }
 0x336   :  { %3113 = vmatpush1.bf16.msra.mxu0 %v7626_v7  ;;  %3028 = vmatprep.subr.bf16.mxu1 %v7633_v22  ;;  %v7689_v7 = vcombine.high %v1457_v38, %v1461_v41  ;;  %v7691_v22 = vcombine.high %v1458_v42, %v1462_v21 }
 0x337   :  { %3114 = vmatprep.subr.bf16.mxu0 %v7635_v9  ;;  %v1465_v9 = vld [vmem:[%s12114_s9 + $0x790] sm:$0xff] }
 0x338   :  { %v7696_v56 = vcombine.low %v1465_v9, %v1469_v24 }
 0x339   :  { %3029 = vmatpush1.bf16.msra.mxu1 %v7632_v30  ;;  %v7690_v30 = vcombine.low %v1458_v42, %v1462_v21 }
 0x33a   :  { %3115 = vmatpush1.bf16.msra.mxu0 %v7634_v35  ;;  %3030 = vmatprep.subr.bf16.mxu1 %v7641_v36  ;;  %v7697_v35 = vcombine.high %v1465_v9, %v1469_v24  ;;  %v7699_v36 = vcombine.high %v1466_v8, %v1470_v25 }
 0x33b   :  { %3116 = vmatprep.subr.bf16.mxu0 %v7643_v11  ;;  %v1473_v11 = vld [vmem:[%s12114_s9 + $0x7d0] sm:$0xff] }
 0x33d   :  { %3031 = vmatpush1.bf16.msra.mxu1 %v7640_v39  ;;  %v7698_v39 = vcombine.low %v1466_v8, %v1470_v25 }
 0x33e   :  { %3117 = vmatpush1.bf16.msra.mxu0 %v7642_v18  ;;  %3032 = vmatprep.subr.bf16.mxu1 %v7649_v17  ;;  %v7705_v18 = vcombine.high %v1473_v11, %v1477_v13  ;;  %v7707_v17 = vcombine.high %v1474_v37, %v1478_v60  ;;  %v8453_v37 = vld [vmem:[%s12118_s13 + $0x8] ss:$28 sps:$4 sm:$0xff]  }
 0x33f   :  { %3118 = vmatprep.subr.bf16.mxu0 %v7651_v23  ;;  %v7704_v23 = vcombine.low %v1473_v11, %v1477_v13  ;;  %v8450_v13 = vld [vmem:[%s12118_s13] ss:$28 sps:$4 sm:$0xff]  }
 0x341   :  { %3033 = vmatpush1.bf16.msra.mxu1 %v7648_v40 }
 0x342   :  { %3119 = vmatpush1.bf16.msra.mxu0 %v7650_v43  ;;  %3034 = vmatprep.subr.bf16.mxu1 %v7657_v44 }
 0x343   :  { %3120 = vmatprep.subr.bf16.mxu0 %v7659_v45 }
 0x345   :  { %3035 = vmatpush1.bf16.msra.mxu1 %v7656_v49 }
 0x346   :  { %3121 = vmatpush1.bf16.msra.mxu0 %v7658_v62  ;;  %3036 = vmatprep.subr.bf16.mxu1 %v7665_v34 }
 0x347   :  { %3122 = vmatprep.subr.bf16.mxu0 %v7667_v57 }
 0x349   :  { %3037 = vmatpush1.bf16.msra.mxu1 %v7664_v3 }
 0x34a   :  { %3123 = vmatpush1.bf16.msra.mxu0 %v7666_v4  ;;  %3038 = vmatprep.subr.bf16.mxu1 %v7673_v5 }
 0x34b   :  { %3124 = vmatprep.subr.bf16.mxu0 %v7675_v10 }
 0x34d   :  { %3039 = vmatpush1.bf16.msra.mxu1 %v7672_v20 }
 0x34e   :  { %3125 = vmatpush1.bf16.msra.mxu0 %v7674_v31  ;;  %3040 = vmatprep.subr.bf16.mxu1 %v7681_v32 }
 0x34f   :  { %3126 = vmatprep.subr.bf16.mxu0 %v7683_v33 }
 0x351   :  { %3041 = vmatpush1.bf16.msra.mxu1 %v7680_v6 }
 0x352   :  { %3127 = vmatpush1.bf16.msra.mxu0 %v7682_v26  ;;  %3042 = vmatprep.subr.bf16.mxu1 %v7689_v7 }
 0x353   :  { %3128 = vmatprep.subr.bf16.mxu0 %v7691_v22 }
 0x355   :  { %3043 = vmatpush1.bf16.msra.mxu1 %v7688_v29 }
 0x356   :  { %3129 = vmatpush1.bf16.msra.mxu0 %v7690_v30  ;;  %3044 = vmatprep.subr.bf16.mxu1 %v7697_v35  ;;  %v8452_v30 = vld [vmem:[%s12118_s13 + $0x4] ss:$28 sps:$4 sm:$0xff]   ;;  %v8455_v35 = vld [vmem:[%s12118_s13 + $0xc] ss:$28 sps:$4 sm:$0xff]  }
 0x357   :  { %3130 = vmatprep.subr.bf16.mxu0 %v7699_v36 }
 0x359   :  { %3045 = vmatpush1.bf16.msra.mxu1 %v7696_v56 }
 0x35a   :  { %3131 = vmatpush1.bf16.msra.mxu0 %v7698_v39  ;;  %3046 = vmatprep.subr.bf16.mxu1 %v7705_v18 }
 0x35b   :  { %3132 = vmatprep.subr.bf16.mxu0 %v7707_v17 }
 0x35d   :  { %3047 = vmatpush1.bf16.msra.mxu1 %v7704_v23 }
 0x35e   :  { %3133 = vmatpush1.bf16.msra.mxu0 %v7706_v19  ;;  %6646 = vmatprep.subr.bf16.mxu1 %v8452_v30  ;;  %v8458_v19 = vld [vmem:[%s12118_s13 + $0x3c] ss:$28 sps:$4 sm:$0xff]  }
 0x35f   :  { %6818 = vmatprep.subr.bf16.mxu0 %v8455_v35  ;;  %v8491_v30 = vld [vmem:[%s12118_s13 + $0x15c] ss:$28 sps:$4 sm:$0xff]   ;;  %v8486_v35 = vld [vmem:[%s12118_s13 + $0x150] ss:$28 sps:$4 sm:$0xff]  }
 0x360   :  { %3049 = vmatmul.mubr.bf16.vlgmr.msra.gmra.mrb[4].mxu1 %v9897_v1 }
 0x361   :  { %3135 = vmatmul.mubr.bf16.vlgmr.msra.gmra.mrb[16].mxu0 %v9897_v1  ;;  %6647 = vmatpush1.bf16.msra.mxu1 %v8450_v13 }
 0x362   :  { %6819 = vmatpush1.bf16.msra.mxu0 %v8453_v37  ;;  %6648 = vmatprep.subr.bf16.mxu1 %v8458_v19  ;;  %v8494_v37 = vld [vmem:[%s12118_s13 + $0x18c] ss:$28 sps:$4 sm:$0xff]   ;;  %v8498_v19 = vld [vmem:[%s12118_s13 + $0x1c0] ss:$28 sps:$4 sm:$0xff]  }
 0x3b3   :  { %v2878_v40 = vpop.f32.mrb[0].mxu1  ;;  %v10479_v43 = vpop.f32.mrb[12].mxu0 }
 0x3b4   :  { %v8244_v44 = vadd.f32 %v2878_v40, %v1484_v50  ;;  %v2880_v45 = vpop.f32.mrb[1].mxu1  ;;  %v10481_v46 = vpop.f32.mrb[13].mxu0 }
 0x3b5   :  { %v8245_v47 = vadd.f32 %v2880_v45, %v1488_v51  ;;  %v2882_v1 = vpop.f32.mrb[2].mxu1  ;;  %v10483_v48 = vpop.f32.mrb[14].mxu0  ;;  %v8459_v45 = vld [vmem:[%s12118_s13 + $0x40] ss:$28 sps:$4 sm:$0xff]  }
 0x3b6   :  { %v3145_v61 = vmul.f32 0.2, %v8244_v44  ;;  %v8246_v49 = vadd.f32 %v2882_v1, %v1484_v50  ;;  %v2884_v62 = vpop.f32.mrb[3].mxu1  ;;  %v10485_v34 = vpop.f32.mrb[15].mxu0  ;;  %v8461_v50 = vld [vmem:[%s12118_s13 + $0x44] ss:$28 sps:$4 sm:$0xff]  }
 0x3b7   :  { %v3146_v57 = vmul.f32 0.2, %v8245_v47  ;;  %v8247_v58 = vadd.f32 %v2884_v62, %v1488_v51  ;;  %6820 = vmatprep.subr.bf16.mxu0 %v8461_v50  ;;  %v8501_v50 = vld [vmem:[%s12118_s13 + $0x1c8] ss:$28 sps:$4 sm:$0xff]  }
 0x3b8   :  { %v3153_v59 = vmul.f32 0.2, %v8246_v49  ;;  %v10487_v2 = vmax.f32 %v8244_v44, %v3145_v61  ;;  %v8456_v44 = vld [vmem:[%s12118_s13 + $0x38] ss:$28 sps:$4 sm:$0xff]   ;;  %6821 = vmatpush1.bf16.msra.mxu0 %v8459_v45  ;;  %v8507_v45 = vld [vmem:[%s12118_s13 + $0x200] ss:$28 sps:$4 sm:$0xff]  }
 0x3b9   :  { %v3154_v0 = vmul.f32 0.2, %v8247_v58  ;;  %v10491_v4 = vmax.f32 %v8245_v47, %v3146_v57  ;;  %6649 = vmatpush1.bf16.msra.mxu1 %v8456_v44  ;;  %v8504_v44 = vld [vmem:[%s12118_s13 + $0x1f8] ss:$28 sps:$4 sm:$0xff]  }
 0x3ba   :  { %v10489_v3 = vmax.f32 %v8246_v49, %v3153_v59  ;;  %v3252_v14 = vmul.f32 %v10487_v2, %v10487_v2  ;;  %v8467_v59 = vld [vmem:[%s12118_s13 + $0x7c] ss:$28 sps:$4 sm:$0xff]  }
 0x3bb   :  { %v10493_v5 = vmax.f32 %v8247_v58, %v3154_v0  ;;  %v3253_v20 = vmul.f32 %v10491_v4, %v10491_v4  ;;  %v8464_v58 = vld [vmem:[%s12118_s13 + $0x74] ss:$28 sps:$4 sm:$0xff]   ;;  %6822 = vmatprep.subr.bf16.mxu0 %v8467_v59 }
 0x3bc   :  { %v3188_v10 = vmul.f32 0.0, %v10489_v3  ;;  %6650 = vmatprep.subr.bf16.mxu1 %v8464_v58  ;;  %v8518_v58 = vld [vmem:[%s12118_s13 + $0x26c] ss:$28 sps:$4 sm:$0xff]   ;;  %v8521_v59 = vld [vmem:[%s12118_s13 + $0x274] ss:$28 sps:$4 sm:$0xff]  }
 0x3bd   :  { %v3189_v12 = vmul.f32 0.0, %v10493_v5 }
 0x3be   :  { %v3196_v15 = vadd.f32 %v3188_v10, %v10487_v2  ;;  %v3260_v16 = vmul.f32 %v3188_v10, %v10489_v3 }
 0x3bf   :  { %v3203_v31 = vadd.f32 %v3189_v12, %v10491_v4  ;;  %v3261_v32 = vmul.f32 %v3189_v12, %v10493_v5  ;;  %v8462_v12 = vld [vmem:[%s12118_s13 + $0x70] ss:$28 sps:$4 sm:$0xff]  }
 0x3c0   :  { %v3197_v33 = vrot.slane %v3196_v15, 4  ;;  %v3268_v38 = vadd.f32 %v3260_v16, %v3252_v14  ;;  %v8465_v14 = vld [vmem:[%s12118_s13 + $0x78] ss:$28 sps:$4 sm:$0xff]   ;;  %6651 = vmatpush1.bf16.msra.mxu1 %v8462_v12  ;;  %v8524_v12 = vld [vmem:[%s12118_s13 + $0x2a4] ss:$28 sps:$4 sm:$0xff]  }
 0x3c1   :  { %v3204_v41 = vrot.slane %v3203_v31, 4  ;;  %v3275_v42 = vadd.f32 %v3261_v32, %v3253_v20  ;;  %6823 = vmatpush1.bf16.msra.mxu0 %v8465_v14  ;;  %v8473_v32 = vld [vmem:[%s12118_s13 + $0xb4] ss:$28 sps:$4 sm:$0xff]   ;;  %v8527_v14 = vld [vmem:[%s12118_s13 + $0x2ac] ss:$28 sps:$4 sm:$0xff]  }
 0x3c2   :  { %v3198_v21 = vadd.f32 %v3197_v33, %v3196_v15  ;;  %v3269_v6 = vrot.slane %v3268_v38, 4  ;;  %6824 = vmatprep.subr.bf16.mxu0 %v8473_v32  ;;  %v1492_v32 = vrot.slane %v10473_v54, %v9816_v27 }
 0x3c3   :  { %v3205_v26 = vadd.f32 %v3204_v41, %v3203_v31  ;;  %v3276_v7 = vrot.slane %v3275_v42, 4  ;;  %v8470_v31 = vld [vmem:[%s12118_s13 + $0xac] ss:$28 sps:$4 sm:$0xff]  }
 0x3c4   :  { %v3199_v22 = vrot.slane %v3198_v21, 2  ;;  %v3270_v9 = vadd.f32 %v3269_v6, %v3268_v38  ;;  %v8468_v38 = vld [vmem:[%s12118_s13 + $0xa8] ss:$28 sps:$4 sm:$0xff]   ;;  %v8471_v41 = vld [vmem:[%s12118_s13 + $0xb0] ss:$28 sps:$4 sm:$0xff]   ;;  %6652 = vmatprep.subr.bf16.mxu1 %v8470_v31 }
 0x3c5   :  { %v3206_v24 = vrot.slane %v3205_v26, 2  ;;  %v3277_v8 = vadd.f32 %v3276_v7, %v3275_v42  ;;  %6653 = vmatpush1.bf16.msra.mxu1 %v8468_v38  ;;  %6825 = vmatpush1.bf16.msra.mxu0 %v8471_v41  ;;  %v8476_v6 = vld [vmem:[%s12118_s13 + $0xe4] ss:$28 sps:$4 sm:$0xff]   ;;  %v1496_v41 = vrot.slane %v10473_v54, %v9819_v28 }
 0x3c6   :  { %v3200_v25 = vadd.f32 %v3199_v22, %v3198_v21  ;;  %v3271_v29 = vrot.slane %v3270_v9, 2  ;;  %v8474_v7 = vld [vmem:[%s12118_s13 + $0xe0] ss:$28 sps:$4 sm:$0xff]   ;;  %v8477_v22 = vld [vmem:[%s12118_s13 + $0xe8] ss:$28 sps:$4 sm:$0xff]   ;;  %6654 = vmatprep.subr.bf16.mxu1 %v8476_v6 }
 0x3c7   :  { %v3207_v36 = vadd.f32 %v3206_v24, %v3205_v26  ;;  %v3278_v11 = vrot.slane %v3277_v8, 2  ;;  %v8479_v26 = vld [vmem:[%s12118_s13 + $0xec] ss:$28 sps:$4 sm:$0xff]   ;;  %v8485_v24 = vld [vmem:[%s12118_s13 + $0x124] ss:$28 sps:$4 sm:$0xff]  }
 0x3c8   :  { %v3201_v60 = vrot.slane %v3200_v25, 1  ;;  %v3272_v56 = vadd.f32 %v3271_v29, %v3270_v9  ;;  %6826 = vmatprep.subr.bf16.mxu0 %v8479_v26  ;;  %v8482_v9 = vld [vmem:[%s12118_s13 + $0x11c] ss:$28 sps:$4 sm:$0xff]   ;;  %v8488_v29 = vld [vmem:[%s12118_s13 + $0x154] ss:$28 sps:$4 sm:$0xff]  }
 0x3c9   :  { %v3208_v39 = vrot.slane %v3207_v36, 1  ;;  %v3279_v18 = vadd.f32 %v3278_v11, %v3277_v8  ;;  %6655 = vmatpush1.bf16.msra.mxu1 %v8474_v7  ;;  %6827 = vmatpush1.bf16.msra.mxu0 %v8477_v22  ;;  %v8480_v8 = vld [vmem:[%s12118_s13 + $0x118] ss:$28 sps:$4 sm:$0xff]   ;;  %v8533_v31 = vld [vmem:[%s12118_s13 + $0x2e4] ss:$28 sps:$4 sm:$0xff]  }
 0x3ca   :  { %v3202_v17 = vadd.f32 %v3201_v60, %v3200_v25  ;;  %v3273_v23 = vrot.slane %v3272_v56, 1  ;;  %v8483_v25 = vld [vmem:[%s12118_s13 + $0x120] ss:$28 sps:$4 sm:$0xff]   ;;  %6656 = vmatprep.subr.bf16.mxu1 %v8482_v9  ;;  %6828 = vmatprep.subr.bf16.mxu0 %v8485_v24  ;;  %v8497_v60 = vld [vmem:[%s12118_s13 + $0x194] ss:$28 sps:$4 sm:$0xff]  }
 0x3cb   :  { %v3209_v51 = vadd.f32 %v3208_v39, %v3207_v36  ;;  %v3280_v40 = vrot.slane %v3279_v18, 1  ;;  %v8489_v36 = vld [vmem:[%s12118_s13 + $0x158] ss:$28 sps:$4 sm:$0xff]   ;;  %v8492_v39 = vld [vmem:[%s12118_s13 + $0x188] ss:$28 sps:$4 sm:$0xff]  }
 0x3cc   :  { %v3274_v47 = vadd.f32 %v3273_v23, %v3272_v56  ;;  %v10529_v1 = vmul.f32 0.125, %v3202_v17  ;;  %v8500_v17 = vld [vmem:[%s12118_s13 + $0x1c4] ss:$28 sps:$4 sm:$0xff]   ;;  %v8503_v23 = vld [vmem:[%s12118_s13 + $0x1cc] ss:$28 sps:$4 sm:$0xff]  }
 0x3cd   :  { %v3281_v61 = vadd.f32 %v3280_v40, %v3279_v18  ;;  %v10531_v49 = vmul.f32 0.125, %v3209_v51  ;;  %6657 = vmatpush1.bf16.msra.mxu1 %v8480_v8  ;;  %6829 = vmatpush1.bf16.msra.mxu0 %v8483_v25  ;;  %v8495_v18 = vld [vmem:[%s12118_s13 + $0x190] ss:$28 sps:$4 sm:$0xff]   ;;  %v8506_v51 = vld [vmem:[%s12118_s13 + $0x1fc] ss:$28 sps:$4 sm:$0xff]   ;;  %v8248_v8 = vadd.f32 %v10479_v43, %v1492_v32 }
 0x3ce   :  { %v3495_v62 = vmul.f32 0.125, %v3274_v47  ;;  %v3503_v57 = vmul.f32 %v10529_v1, %v10529_v1  ;;  %6658 = vmatprep.subr.bf16.mxu1 %v8488_v29  ;;  %6830 = vmatprep.subr.bf16.mxu0 %v8491_v30  ;;  %v8509_v40 = vld [vmem:[%s12118_s13 + $0x204] ss:$28 sps:$4 sm:$0xff]   ;;  %v8512_v47 = vld [vmem:[%s12118_s13 + $0x234] ss:$28 sps:$4 sm:$0xff]   ;;  %v8249_v30 = vadd.f32 %v10481_v46, %v1496_v41 }
 0x3cf   :  { %v3496_v0 = vmul.f32 0.125, %v3281_v61  ;;  %v3504_v10 = vmul.f32 %v10531_v49, %v10531_v49  ;;  %v8515_v61 = vld [vmem:[%s12118_s13 + $0x23c] ss:$28 sps:$4 sm:$0xff]   ;;  %v8536_v6 = vld [vmem:[%s12118_s13 + $0x314] ss:$28 sps:$4 sm:$0xff]  }
 0x3d0   :  { %v3511_v15 = vsub.f32 %v3495_v62, %v3503_v57  ;;  %v8510_v62 = vld [vmem:[%s12118_s13 + $0x230] ss:$28 sps:$4 sm:$0xff]   ;;  %v8513_v57 = vld [vmem:[%s12118_s13 + $0x238] ss:$28 sps:$4 sm:$0xff]   ;;  %v8531_v38 = vld [vmem:[%s12118_s13 + $0x2e0] ss:$28 sps:$4 sm:$0xff]  }
 0x3d1   :  { %v3512_v16 = vsub.f32 %v3496_v0, %v3504_v10  ;;  %6659 = vmatpush1.bf16.msra.mxu1 %v8486_v35  ;;  %6831 = vmatpush1.bf16.msra.mxu0 %v8489_v36  ;;  %v8516_v0 = vld [vmem:[%s12118_s13 + $0x268] ss:$28 sps:$4 sm:$0xff]   ;;  %v8519_v10 = vld [vmem:[%s12118_s13 + $0x270] ss:$28 sps:$4 sm:$0xff]   ;;  %v8539_v26 = vld [vmem:[%s12118_s13 + $0x31c] ss:$28 sps:$4 sm:$0xff]  }
 0x3d2   :  { %v3519_v20 = vmax.f32 %v3511_v15, 0.0  ;;  %6660 = vmatprep.subr.bf16.mxu1 %v8494_v37  ;;  %6832 = vmatprep.subr.bf16.mxu0 %v8497_v60  ;;  %v8522_v15 = vld [vmem:[%s12118_s13 + $0x2a0] ss:$28 sps:$4 sm:$0xff]   ;;  %v8534_v7 = vld [vmem:[%s12118_s13 + $0x310] ss:$28 sps:$4 sm:$0xff]  }
 0x3d3   :  { %v3520_v33 = vmax.f32 %v3512_v16, 0.0  ;;  %v8525_v16 = vld [vmem:[%s12118_s13 + $0x2a8] ss:$28 sps:$4 sm:$0xff]   ;;  %v8545_v24 = vld [vmem:[%s12118_s13 + $0x354] ss:$28 sps:$4 sm:$0xff]  }
 0x3d4   :  { %v3528_v42 = vadd.f32 1e-05, %v3519_v20  ;;  %v8530_v20 = vld [vmem:[%s12118_s13 + $0x2dc] ss:$28 sps:$4 sm:$0xff]   ;;  %v8542_v9 = vld [vmem:[%s12118_s13 + $0x34c] ss:$28 sps:$4 sm:$0xff]  }
 0x3d5   :  { %v3529_v21 = vadd.f32 1e-05, %v3520_v33  ;;  %6661 = vmatpush1.bf16.msra.mxu1 %v8492_v39  ;;  %6833 = vmatpush1.bf16.msra.mxu0 %v8495_v18  ;;  %v8528_v33 = vld [vmem:[%s12118_s13 + $0x2d8] ss:$28 sps:$4 sm:$0xff]   ;;  %v8540_v25 = vld [vmem:[%s12118_s13 + $0x348] ss:$28 sps:$4 sm:$0xff]  }
 0x3d6   :  { %9102 = vrsqrt.f32 %v3528_v42  ;;  %6662 = vmatprep.subr.bf16.mxu1 %v8500_v17  ;;  %6834 = vmatprep.subr.bf16.mxu0 %v8503_v23  ;;  %v8250_v42 = vadd.f32 %v10483_v48, %v1492_v32  ;;  %v8537_v48 = vld [vmem:[%s12118_s13 + $0x318] ss:$28 sps:$4 sm:$0xff]   ;;  %v8543_v29 = vld [vmem:[%s12118_s13 + $0x350] ss:$28 sps:$4 sm:$0xff]   ;;  %v3147_v37 = vmul.f32 0.2, %v8248_v8 }
 0x3d7   :  { %9104 = vrsqrt.f32 %v3529_v21  ;;  %v8251_v21 = vadd.f32 %v10485_v34, %v1496_v41  ;;  %v8548_v43 = vld [vmem:[%s12118_s13 + $0x384] ss:$28 sps:$4 sm:$0xff]   ;;  %v3148_v60 = vmul.f32 0.2, %v8249_v30  ;;  %v8551_v39 = vld [vmem:[%s12118_s13 + $0x38c] ss:$28 sps:$4 sm:$0xff]  }
 0x3d8   :  { %v3155_v22 = vmul.f32 0.2, %v8250_v42  ;;  %v10731_v17 = vmax.f32 %v8248_v8, %v3147_v37  ;;  %v10748_v8 = vsub.s32 4, %v9405_v52  ;;  %v10756_v37 = vsub.s32 5, %v9405_v52 }
 0x3d9   :  { %6663 = vmatpush1.bf16.msra.mxu1 %v8498_v19  ;;  %6835 = vmatpush1.bf16.msra.mxu0 %v8501_v50  ;;  %v3156_v34 = vmul.f32 0.2, %v8251_v21  ;;  %v10733_v23 = vmax.f32 %v8249_v30, %v3148_v60  ;;  %v10753_v30 = vsub.s32 6, %v9405_v52 }
 0x3da   :  { %6664 = vmatprep.subr.bf16.mxu1 %v8506_v51  ;;  %6836 = vmatprep.subr.bf16.mxu0 %v8509_v40  ;;  %v10719_v35 = vmax.f32 %v8250_v42, %v3155_v22  ;;  %12124 = vst [vmem:[#allocation6_spill] sm:$0xff] %v10731_v17 }
 0x3db   :  { %v10721_v36 = vmax.f32 %v8251_v21, %v3156_v34 }
 0x3dc   :  { %12123 = vst [vmem:[#allocation5_spill] sm:$0xff] %v10719_v35  ;;  %v3190_v46 = vmul.f32 0.0, %v10719_v35 }
 0x3dd   :  { %6665 = vmatpush1.bf16.msra.mxu1 %v8504_v44  ;;  %6837 = vmatpush1.bf16.msra.mxu0 %v8507_v45  ;;  %v3191_v18 = vmul.f32 0.0, %v10721_v36  ;;  %v3254_v44 = vmul.f32 %v10731_v17, %v10731_v17  ;;  %v3255_v45 = vmul.f32 %v10733_v23, %v10733_v23 }
 0x3de   :  { %6666 = vmatprep.subr.bf16.mxu1 %v8512_v47  ;;  %6838 = vmatprep.subr.bf16.mxu0 %v8515_v61  ;;  %v3210_v19 = vadd.f32 %v3190_v46, %v10731_v17  ;;  %v3262_v50 = vmul.f32 %v3190_v46, %v10719_v35  ;;  %v1500_v46 = vrot.slane %v10473_v54, %v10748_v8 }
 0x3df   :  { %v3217_v51 = vadd.f32 %v3191_v18, %v10733_v23  ;;  %v3263_v40 = vmul.f32 %v3191_v18, %v10721_v36 }
 0x3e0   :  { %v10597_v11 = vpop.eup %9102  ;;  %v3211_v47 = vrot.slane %v3210_v19, 4  ;;  %v3282_v61 = vadd.f32 %v3262_v50, %v3254_v44  ;;  %v1504_v50 = vrot.slane %v10473_v54, %v10756_v37 }
 0x3e1   :  { %v10599_v13 = vpop.eup %9104  ;;  %6667 = vmatpush1.bf16.msra.mxu1 %v8510_v62  ;;  %6839 = vmatpush1.bf16.msra.mxu0 %v8513_v57  ;;  %v3218_v62 = vrot.slane %v3217_v51, 4  ;;  %v3289_v57 = vadd.f32 %v3263_v40, %v3255_v45 }
 0x3e2   :  { %6668 = vmatprep.subr.bf16.mxu1 %v8518_v58  ;;  %6840 = vmatprep.subr.bf16.mxu0 %v8521_v59  ;;  %v3212_v58 = vadd.f32 %v3211_v47, %v3210_v19  ;;  %v3283_v59 = vrot.slane %v3282_v61, 4  ;;  %v1508_v19 = vrot.slane %v10473_v54, %v10753_v30 }
 0x3e5   :  { %6669 = vmatpush1.bf16.msra.mxu1 %v8516_v0  ;;  %6841 = vmatpush1.bf16.msra.mxu0 %v8519_v10  ;;  %v3219_v0 = vadd.f32 %v3218_v62, %v3217_v51  ;;  %v3290_v10 = vrot.slane %v3289_v57, 4 }
 0x3e6   :  { %6670 = vmatprep.subr.bf16.mxu1 %v8524_v12  ;;  %6842 = vmatprep.subr.bf16.mxu0 %v8527_v14  ;;  %v3213_v12 = vrot.slane %v3212_v58, 2  ;;  %v3284_v14 = vadd.f32 %v3283_v59, %v3282_v61 }
 0x3e9   :  { %6671 = vmatpush1.bf16.msra.mxu1 %v8522_v15  ;;  %6843 = vmatpush1.bf16.msra.mxu0 %v8525_v16  ;;  %v3220_v15 = vrot.slane %v3219_v0, 2  ;;  %v3291_v16 = vadd.f32 %v3290_v10, %v3289_v57 }
 0x3ea   :  { %6672 = vmatprep.subr.bf16.mxu1 %v8530_v20  ;;  %6844 = vmatprep.subr.bf16.mxu0 %v8533_v31  ;;  %v3214_v20 = vadd.f32 %v3213_v12, %v3212_v58  ;;  %v3285_v31 = vrot.slane %v3284_v14, 2 }
 0x3eb   :  { %v3221_v32 = vadd.f32 %v3220_v15, %v3219_v0 }
 0x3ec   :  { %v3286_v41 = vadd.f32 %v3285_v31, %v3284_v14 }
 0x3ed   :  { %6673 = vmatpush1.bf16.msra.mxu1 %v8528_v33  ;;  %6845 = vmatpush1.bf16.msra.mxu0 %v8531_v38  ;;  %v3292_v33 = vrot.slane %v3291_v16, 2  ;;  %v3215_v38 = vrot.slane %v3214_v20, 1  ;;  %v3222_v42 = vrot.slane %v3221_v32, 1 }
 0x3ee   :  { %6674 = vmatprep.subr.bf16.mxu1 %v8536_v6  ;;  %6846 = vmatprep.subr.bf16.mxu0 %v8539_v26  ;;  %v3287_v26 = vrot.slane %v3286_v41, 1 }
 0x3ef   :  { %v3293_v21 = vadd.f32 %v3292_v33, %v3291_v16  ;;  %v3216_v6 = vadd.f32 %v3215_v38, %v3214_v20 }
 0x3f0   :  { %v3288_v22 = vadd.f32 %v3287_v26, %v3286_v41 }
 0x3f1   :  { %6675 = vmatpush1.bf16.msra.mxu1 %v8534_v7  ;;  %6847 = vmatpush1.bf16.msra.mxu0 %v8537_v48  ;;  %v3223_v7 = vadd.f32 %v3222_v42, %v3221_v32  ;;  %v3294_v48 = vrot.slane %v3293_v21, 1  ;;  %v10743_v34 = vmul.f32 0.125, %v3216_v6 }
 0x3f2   :  { %6676 = vmatprep.subr.bf16.mxu1 %v8542_v9  ;;  %6848 = vmatprep.subr.bf16.mxu0 %v8545_v24 }
 0x3f3   :  { %v3295_v9 = vadd.f32 %v3294_v48, %v3293_v21  ;;  %v10745_v24 = vmul.f32 0.125, %v3223_v7 }
 0x3f5   :  { %6677 = vmatpush1.bf16.msra.mxu1 %v8540_v25  ;;  %6849 = vmatpush1.bf16.msra.mxu0 %v8543_v29  ;;  %v3497_v25 = vmul.f32 0.125, %v3288_v22  ;;  %v3505_v29 = vmul.f32 %v10743_v34, %v10743_v34  ;;  %v3506_v60 = vmul.f32 %v10745_v24, %v10745_v24 }
 0x3f6   :  { %6689 = vmatprep.subr.bf16.mxu1 %v8548_v43  ;;  %6861 = vmatprep.subr.bf16.mxu0 %v8551_v39  ;;  %v3498_v43 = vmul.f32 0.125, %v3295_v9  ;;  %v10761_v39 = vsub.s32 7, %v9405_v52 }
 0x3f7   :  { %v3513_v18 = vsub.f32 %v3497_v25, %v3505_v29 }
 0x3f8   :  { %v3514_v51 = vsub.f32 %v3498_v43, %v3506_v60  ;;  %v1512_v40 = vrot.slane %v10473_v54, %v10761_v39 }
 0x3f9   :  { %v3521_v52 = vmax.f32 %v3513_v18, 0.0 }
 0x3fa   :  { %v3522_v0 = vmax.f32 %v3514_v51, 0.0 }
 0x3fb   :  { %v10781_v29 = vadd.f32 1e-05, %v3521_v52 }
 0x3fd   :  { %9106 = vrsqrt.f32 %v10781_v29 }
 0x407   :  { %v9107_v29 = vpop.eup %9106 }
 0x433   :  { %v3050_v44 = vpop.f32.mrb[4].mxu1 }
 0x434   :  { %v8252_v45 = vadd.f32 %v3050_v44, %v1500_v46  ;;  %v3136_v47 = vpop.f32.mrb[16].mxu0  ;;  %v3052_v61 = vpop.f32.mrb[5].mxu1 }
 0x435   :  { %v8256_v62 = vadd.f32 %v3136_v47, %v1508_v19  ;;  %v8253_v57 = vadd.f32 %v3052_v61, %v1504_v50  ;;  %v3138_v58 = vpop.f32.mrb[17].mxu0  ;;  %v3054_v59 = vpop.f32.mrb[6].mxu1 }
 0x436   :  { %v3149_v10 = vmul.f32 0.2, %v8252_v45  ;;  %v8257_v12 = vadd.f32 %v3138_v58, %v1512_v40  ;;  %v8254_v14 = vadd.f32 %v3054_v59, %v1500_v46  ;;  %v3140_v15 = vpop.f32.mrb[18].mxu0  ;;  %v3056_v16 = vpop.f32.mrb[7].mxu1  ;;  %v10787_v46 = vadd.f32 1e-05, %v3522_v0 }
 0x437   :  { %v3151_v20 = vmul.f32 0.2, %v8256_v62  ;;  %v3150_v31 = vmul.f32 0.2, %v8253_v57  ;;  %v8258_v32 = vadd.f32 %v3140_v15, %v1508_v19  ;;  %v8255_v33 = vadd.f32 %v3056_v16, %v1504_v50  ;;  %v3142_v54 = vpop.f32.mrb[19].mxu0 }
 0x438   :  { %v10771_v38 = vmax.f32 %v8252_v45, %v3149_v10  ;;  %v3152_v41 = vmul.f32 0.2, %v8257_v12  ;;  %v3157_v42 = vmul.f32 0.2, %v8254_v14  ;;  %v8259_v21 = vadd.f32 %v3142_v54, %v1512_v40 }
 0x439   :  { %v10773_v6 = vmax.f32 %v8256_v62, %v3151_v20  ;;  %v10775_v26 = vmax.f32 %v8253_v57, %v3150_v31  ;;  %v3159_v7 = vmul.f32 0.2, %v8258_v32  ;;  %v3158_v48 = vmul.f32 0.2, %v8255_v33 }
 0x43a   :  { %v10777_v22 = vmax.f32 %v8257_v12, %v3152_v41  ;;  %v10779_v9 = vmax.f32 %v8254_v14, %v3157_v42  ;;  %v3160_v25 = vmul.f32 0.2, %v8259_v21  ;;  %v3256_v18 = vmul.f32 %v10771_v38, %v10771_v38 }
 0x43b   :  { %v10783_v43 = vmax.f32 %v8258_v32, %v3159_v7  ;;  %v10785_v60 = vmax.f32 %v8255_v33, %v3158_v48  ;;  %v3258_v51 = vmul.f32 %v10773_v6, %v10773_v6  ;;  %v3257_v40 = vmul.f32 %v10775_v26, %v10775_v26 }
 0x43c   :  { %v3192_v19 = vmul.f32 0.0, %v10779_v9  ;;  %v10792_v50 = vmax.f32 %v8259_v21, %v3160_v25  ;;  %v3259_v47 = vmul.f32 %v10777_v22, %v10777_v22  ;;  %9108 = vrsqrt.f32 %v10787_v46 }
 0x43d   :  { %v3194_v44 = vmul.f32 0.0, %v10783_v43  ;;  %v3193_v45 = vmul.f32 0.0, %v10785_v60 }
 0x43e   :  { %v3224_v61 = vadd.f32 %v3192_v19, %v10771_v38  ;;  %v3264_v52 = vmul.f32 %v3192_v19, %v10779_v9  ;;  %v3195_v62 = vmul.f32 0.0, %v10792_v50 }
 0x43f   :  { %v3238_v57 = vadd.f32 %v3194_v44, %v10773_v6  ;;  %v3266_v58 = vmul.f32 %v3194_v44, %v10783_v43  ;;  %v3231_v59 = vadd.f32 %v3193_v45, %v10775_v26  ;;  %v3265_v0 = vmul.f32 %v3193_v45, %v10785_v60 }
 0x440   :  { %v3225_v10 = vrot.slane %v3224_v61, 4  ;;  %v3296_v12 = vadd.f32 %v3264_v52, %v3256_v18  ;;  %v3245_v14 = vadd.f32 %v3195_v62, %v10777_v22  ;;  %v3267_v15 = vmul.f32 %v3195_v62, %v10792_v50 }
 0x441   :  { %v3239_v16 = vrot.slane %v3238_v57, 4  ;;  %v3310_v20 = vadd.f32 %v3266_v58, %v3258_v51  ;;  %v3232_v31 = vrot.slane %v3231_v59, 4  ;;  %v3303_v32 = vadd.f32 %v3265_v0, %v3257_v40 }
 0x442   :  { %v3226_v33 = vadd.f32 %v3225_v10, %v3224_v61  ;;  %v3297_v54 = vrot.slane %v3296_v12, 4  ;;  %v3246_v41 = vrot.slane %v3245_v14, 4  ;;  %v3317_v42 = vadd.f32 %v3267_v15, %v3259_v47 }
 0x443   :  { %v3240_v21 = vadd.f32 %v3239_v16, %v3238_v57  ;;  %v3311_v7 = vrot.slane %v3310_v20, 4  ;;  %v3233_v48 = vadd.f32 %v3232_v31, %v3231_v59  ;;  %v3304_v25 = vrot.slane %v3303_v32, 4 }
 0x444   :  { %v3227_v19 = vrot.slane %v3226_v33, 2  ;;  %v3298_v44 = vadd.f32 %v3297_v54, %v3296_v12  ;;  %v3247_v45 = vadd.f32 %v3246_v41, %v3245_v14  ;;  %v3318_v18 = vrot.slane %v3317_v42, 4 }
 0x445   :  { %v3241_v52 = vrot.slane %v3240_v21, 2  ;;  %v3312_v56 = vadd.f32 %v3311_v7, %v3310_v20  ;;  %v3234_v35 = vrot.slane %v3233_v48, 2  ;;  %v3305_v62 = vadd.f32 %v3304_v25, %v3303_v32 }
 0x446   :  { %v3228_v17 = vadd.f32 %v3227_v19, %v3226_v33  ;;  %v3299_v51 = vrot.slane %v3298_v44, 2  ;;  %v3248_v58 = vrot.slane %v3247_v45, 2  ;;  %v3319_v40 = vadd.f32 %v3318_v18, %v3317_v42 }
 0x447   :  { %v3242_v61 = vadd.f32 %v3241_v52, %v3240_v21  ;;  %v3313_v0 = vrot.slane %v3312_v56, 2  ;;  %v3235_v10 = vadd.f32 %v3234_v35, %v3233_v48  ;;  %v3306_v47 = vrot.slane %v3305_v62, 2 }
 0x448   :  { %v3229_v57 = vrot.slane %v3228_v17, 1  ;;  %v3300_v15 = vadd.f32 %v3299_v51, %v3298_v44  ;;  %v3249_v59 = vadd.f32 %v3248_v58, %v3247_v45  ;;  %v3320_v16 = vrot.slane %v3319_v40, 2 }
 0x449   :  { %v3243_v31 = vrot.slane %v3242_v61, 1  ;;  %v3314_v12 = vadd.f32 %v3313_v0, %v3312_v56  ;;  %v3236_v14 = vrot.slane %v3235_v10, 1  ;;  %v3307_v54 = vadd.f32 %v3306_v47, %v3305_v62 }
 0x44a   :  { %v3230_v41 = vadd.f32 %v3229_v57, %v3228_v17  ;;  %v3301_v20 = vrot.slane %v3300_v15, 1  ;;  %v3250_v7 = vrot.slane %v3249_v59, 1  ;;  %v3321_v32 = vadd.f32 %v3320_v16, %v3319_v40 }
 0x44b   :  { %v3244_v33 = vadd.f32 %v3243_v31, %v3242_v61  ;;  %v3315_v25 = vrot.slane %v3314_v12, 1  ;;  %v3237_v19 = vadd.f32 %v3236_v14, %v3235_v10  ;;  %v3308_v42 = vrot.slane %v3307_v54, 1 }
 0x44c   :  { %v3302_v21 = vadd.f32 %v3301_v20, %v3300_v15  ;;  %v10811_v18 = vmul.f32 0.125, %v3230_v41  ;;  %v3251_v35 = vadd.f32 %v3250_v7, %v3249_v59  ;;  %v3322_v48 = vrot.slane %v3321_v32, 1 }
 0x44d   :  { %v3316_v44 = vadd.f32 %v3315_v25, %v3314_v12  ;;  %v10813_v45 = vmul.f32 0.125, %v3244_v33  ;;  %v3309_v52 = vadd.f32 %v3308_v42, %v3307_v54  ;;  %v3492_v56 = vmul.f32 0.125, %v3237_v19  ;;  %v9109_v25 = vpop.eup %9108 }
 0x44e   :  { %v3499_v51 = vmul.f32 0.125, %v3302_v21  ;;  %v3507_v17 = vmul.f32 %v10811_v18, %v10811_v18  ;;  %v3323_v62 = vadd.f32 %v3322_v48, %v3321_v32  ;;  %v3494_v58 = vmul.f32 0.125, %v3251_v35 }
 0x44f   :  { %v3501_v40 = vmul.f32 0.125, %v3316_v44  ;;  %v3509_v61 = vmul.f32 %v10813_v45, %v10813_v45  ;;  %v3500_v0 = vmul.f32 0.125, %v3309_v52  ;;  %v3508_v10 = vmul.f32 %v3492_v56, %v3492_v56 }
 0x450   :  { %v3515_v47 = vsub.f32 %v3499_v51, %v3507_v17  ;;  %v3502_v57 = vmul.f32 0.125, %v3323_v62  ;;  %v3510_v15 = vmul.f32 %v3494_v58, %v3494_v58  ;;  %v3553_v19 = vcombine.low %v9107_v29, %v9109_v25 }
 0x451   :  { %v3517_v59 = vsub.f32 %v3501_v40, %v3509_v61  ;;  %v3516_v16 = vsub.f32 %v3500_v0, %v3508_v10  ;;  %v12125_v35 = vcombine.low %v10597_v11, %v10599_v13  ;;  %v3527_v11 = vld [vmem:[%s12116_s11] sm:$0xff] }
 0x452   :  { %v3523_v31 = vmax.f32 %v3515_v47, 0.0  ;;  %v3518_v12 = vsub.f32 %v3502_v57, %v3510_v15  ;;  %v3569_v44 = vrot.slane %v3553_v19, %v9437_v63 }
 0x453   :  { %v3525_v14 = vmax.f32 %v3517_v59, 0.0  ;;  %v3524_v54 = vmax.f32 %v3516_v16, 0.0  ;;  %v3562_v48 = vrot.slane %v12125_v35, %v9437_v63 }
 0x454   :  { %v3532_v41 = vadd.f32 1e-05, %v3523_v31  ;;  %v3526_v20 = vmax.f32 %v3518_v12, 0.0 }
 0x455   :  { %v3534_v7 = vadd.f32 1e-05, %v3525_v14  ;;  %v3533_v32 = vadd.f32 1e-05, %v3524_v54  ;;  %v3584_v40 = vcombine.low %v3562_v48, %v3569_v44 }
 0x456   :  { %9110 = vrsqrt.f32 %v3532_v41  ;;  %v3535_v33 = vadd.f32 1e-05, %v3526_v20 }
 0x457   :  { %9112 = vrsqrt.f32 %v3534_v7  ;;  %v3592_v10 = vrot.slane %v3584_v40, %v9437_v63 }
 0x458   :  { %9114 = vrsqrt.f32 %v3533_v32 }
 0x459   :  { %9116 = vrsqrt.f32 %v3535_v33 }
 0x460   :  { %v9111_v42 = vpop.eup %9110 }
 0x461   :  { %v9113_v46 = vpop.eup %9112 }
 0x462   :  { %v9115_v21 = vpop.eup %9114 }
 0x463   :  { %v9117_v52 = vpop.eup %9116  ;;  %v3554_v51 = vcombine.low %v9111_v42, %v9115_v21 }
 0x464   :  { %v3555_v17 = vcombine.low %v9113_v46, %v9117_v52 }
 0x465   :  { %v3576_v62 = vrot.slane %v3554_v51, %v9437_v63 }
 0x466   :  { %v3583_v61 = vrot.slane %v3555_v17, %v9437_v63 }
 0x468   :  { %v3585_v0 = vcombine.low %v3576_v62, %v3583_v61 }
 0x46a   :  { %v3599_v47 = vrot.slane %v3585_v0, %v9437_v63 }
 0x46c   :  { %v3600_v13 = vcombine.low %v3592_v10, %v3599_v47  ;;  %v12126_v47 = vld [vmem:[#allocation6_spill] sm:$0xff] }
 0x46e   :  { %v3602_v57 = vmul.f32 %v3600_v13, %v3527_v11  ;;  %v12127_v11 = vld [vmem:[#allocation5_spill] sm:$0xff] }
 0x470   :  { %v3608_v15 = vrot.slane %v3602_v57, %v9408_v53  ;;  %v3612_v59 = vrot.slane %v3602_v57, %v9414_v55  ;;  %v3616_v16 = vrot.slane %v3602_v57, %v9816_v27  ;;  %v3620_v31 = vrot.slane %v3602_v57, %v9819_v28 }
 0x471   :  { %v3624_v12 = vrot.slane %v3602_v57, %v10748_v8  ;;  %v3628_v14 = vrot.slane %v3602_v57, %v10756_v37  ;;  %v3632_v54 = vrot.slane %v3602_v57, %v10753_v30  ;;  %v3636_v41 = vrot.slane %v3602_v57, %v10761_v39 }
 0x472   :  { %v3645_v20 = vmul.f32 %v3608_v15, %v10529_v1  ;;  %v3646_v7 = vmul.f32 %v3612_v59, %v10531_v49  ;;  %v3647_v32 = vmul.f32 %v3616_v16, %v10743_v34  ;;  %v3648_v33 = vmul.f32 %v3620_v31, %v10745_v24 }
 0x473   :  { %v3649_v29 = vmul.f32 %v3624_v12, %v10811_v18  ;;  %v3650_v25 = vmul.f32 %v3628_v14, %v3492_v56  ;;  %v3651_v19 = vmul.f32 %v3632_v54, %v10813_v45  ;;  %v3652_v42 = vmul.f32 %v3636_v41, %v3494_v58 }
 0x474   :  { %v3661_v46 = vcombine.low %v3645_v20, %v3646_v7  ;;  %v3662_v21 = vcombine.low %v3647_v32, %v3648_v33  ;;  %v3727_v35 = vmul.f32 %v3636_v41, %v10792_v50  ;;  %v3713_v48 = vmul.f32 %v3612_v59, %v10491_v4  ;;  %v8546_v7 = vld [vmem:[%s12118_s13 + $0x380] ss:$28 sps:$4 sm:$0xff]   ;;  %v8549_v32 = vld [vmem:[%s12118_s13 + $0x388] ss:$28 sps:$4 sm:$0xff]  }
 0x475   :  { %v3663_v44 = vcombine.low %v3649_v29, %v3650_v25  ;;  %v3664_v1 = vcombine.low %v3651_v19, %v3652_v42  ;;  %v3712_v49 = vmul.f32 %v3608_v15, %v10487_v2  ;;  %v3717_v58 = vmul.f32 %v3628_v14, %v10775_v26  ;;  %v3603_v26 = vld [vmem:[%s12117_s12] sm:$0xff] }
 0x476   :  { %v3671_v34 = vrot.slane %v3661_v46, %v9437_v63  ;;  %v3678_v24 = vrot.slane %v3662_v21, %v9437_v63  ;;  %v3725_v52 = vmul.f32 %v3628_v14, %v10785_v60  ;;  %v3716_v4 = vmul.f32 %v3624_v12, %v10771_v38 }
 0x477   :  { %v3685_v18 = vrot.slane %v3663_v44, %v9437_v63  ;;  %v3692_v56 = vrot.slane %v3664_v1, %v9437_v63  ;;  %v3724_v51 = vmul.f32 %v3624_v12, %v10779_v9  ;;  %v3719_v2 = vmul.f32 %v3636_v41, %v10777_v22 }
 0x478   :  { %v3693_v45 = vcombine.low %v3671_v34, %v3678_v24  ;;  %v3718_v62 = vmul.f32 %v3632_v54, %v10773_v6  ;;  %v3726_v40 = vmul.f32 %v3632_v54, %v10783_v43  ;;  %v3721_v38 = vmul.f32 %v3612_v59, %v10493_v5 }
 0x479   :  { %v3694_v50 = vcombine.low %v3685_v18, %v3692_v56  ;;  %v3720_v9 = vmul.f32 %v3608_v15, %v10489_v3  ;;  %v3715_v22 = vmul.f32 %v3620_v31, %v10733_v23  ;;  %v3723_v10 = vmul.f32 %v3620_v31, %v10721_v36  ;;  %v8552_v56 = vld [vmem:[%s12118_s13 + $0x3b8] ss:$28 sps:$4 sm:$0xff]  }
 0x47a   :  { %v3701_v17 = vrot.slane %v3693_v45, %v9437_v63  ;;  %v3714_v6 = vmul.f32 %v3616_v16, %v12126_v47  ;;  %v3722_v43 = vmul.f32 %v3616_v16, %v12127_v11  ;;  %v8555_v45 = vld [vmem:[%s12118_s13 + $0x3c0] ss:$28 sps:$4 sm:$0xff]  }
 0x47b   :  { %v3708_v61 = vrot.slane %v3694_v50, %v9437_v63  ;;  %v8563_v50 = vld [vmem:[%s12118_s13 + $0x3fc] ss:$28 sps:$4 sm:$0xff]  }
 0x47c   :  { %v8579_v47 = vld [vmem:[%s12118_s13 + $0x4a0] ss:$28 sps:$4 sm:$0xff]  }
 0x47d   :  { %v3709_v60 = vcombine.low %v3701_v17, %v3708_v61  ;;  %v8566_v17 = vld [vmem:[%s12118_s13 + $0x42c] ss:$28 sps:$4 sm:$0xff]   ;;  %v8587_v11 = vld [vmem:[%s12118_s13 + $0x4dc] ss:$28 sps:$4 sm:$0xff]  }
 0x47e   :  { %v8567_v61 = vld [vmem:[%s12118_s13 + $0x430] ss:$28 sps:$4 sm:$0xff]  }
 0x47f   :  { %v3711_v0 = vsub.f32 %v3603_v26, %v3709_v60  ;;  %v8572_v26 = vld [vmem:[%s12118_s13 + $0x464] ss:$28 sps:$4 sm:$0xff]   ;;  %v8575_v60 = vld [vmem:[%s12118_s13 + $0x46c] ss:$28 sps:$4 sm:$0xff]  }
 0x481   :  { %v3760_v63 = vrot.slane %v3711_v0, %v10761_v39  ;;  %v3736_v13 = vrot.slane %v3711_v0, %v9414_v55  ;;  %v3732_v57 = vrot.slane %v3711_v0, %v9408_v53  ;;  %v3744_v12 = vrot.slane %v3711_v0, %v9819_v28 }
 0x482   :  { %v3740_v5 = vrot.slane %v3711_v0, %v9816_v27  ;;  %v3752_v3 = vrot.slane %v3711_v0, %v10756_v37  ;;  %v3748_v23 = vrot.slane %v3711_v0, %v10748_v8  ;;  %v3756_v36 = vrot.slane %v3711_v0, %v10753_v30  ;;  %v8570_v0 = vld [vmem:[%s12118_s13 + $0x460] ss:$28 sps:$4 sm:$0xff]  }
 0x483   :  { %v3784_v15 = vadd.f32 %v3760_v63, %v3727_v35  ;;  %v3770_v59 = vadd.f32 %v3736_v13, %v3713_v48  ;;  %v3778_v31 = vadd.f32 %v3736_v13, %v3721_v38  ;;  %v3769_v16 = vadd.f32 %v3732_v57, %v3712_v49  ;;  %v8554_v35 = vld [vmem:[%s12118_s13 + $0x3bc] ss:$28 sps:$4 sm:$0xff]   ;;  %v8557_v48 = vld [vmem:[%s12118_s13 + $0x3c4] ss:$28 sps:$4 sm:$0xff]   ;;  %v8590_v13 = vld [vmem:[%s12118_s13 + $0x50c] ss:$28 sps:$4 sm:$0xff]  }
 0x484   :  { %v3777_v14 = vadd.f32 %v3732_v57, %v3720_v9  ;;  %v3772_v39 = vadd.f32 %v3744_v12, %v3715_v22  ;;  %v3780_v54 = vadd.f32 %v3744_v12, %v3723_v10  ;;  %v3771_v41 = vadd.f32 %v3740_v5, %v3714_v6  ;;  %v8573_v38 = vld [vmem:[%s12118_s13 + $0x468] ss:$28 sps:$4 sm:$0xff]   ;;  %v8578_v9 = vld [vmem:[%s12118_s13 + $0x49c] ss:$28 sps:$4 sm:$0xff]   ;;  %v8584_v6 = vld [vmem:[%s12118_s13 + $0x4d4] ss:$28 sps:$4 sm:$0xff]  }
 0x485   :  { %v10880_v20 = vpack.c.bf16 %v3778_v31, %v3770_v59  ;;  %v3779_v33 = vadd.f32 %v3740_v5, %v3722_v43  ;;  %v3774_v29 = vadd.f32 %v3752_v3, %v3717_v58  ;;  %v3782_v25 = vadd.f32 %v3752_v3, %v3725_v52  ;;  %v8560_v52 = vld [vmem:[%s12118_s13 + $0x3f4] ss:$28 sps:$4 sm:$0xff]   ;;  %v8581_v22 = vld [vmem:[%s12118_s13 + $0x4a4] ss:$28 sps:$4 sm:$0xff]   ;;  %v8602_v59 = vld [vmem:[%s12118_s13 + $0x57c] ss:$28 sps:$4 sm:$0xff]  }
 0x486   :  { %v10888_v19 = vpack.c.bf16 %v3777_v14, %v3769_v16  ;;  %v10890_v42 = vpack.c.bf16 %v3780_v54, %v3772_v39  ;;  %v3773_v46 = vadd.f32 %v3748_v23, %v3716_v4  ;;  %v3781_v21 = vadd.f32 %v3748_v23, %v3724_v51  ;;  %v8558_v51 = vld [vmem:[%s12118_s13 + $0x3f0] ss:$28 sps:$4 sm:$0xff]   ;;  %v8576_v10 = vld [vmem:[%s12118_s13 + $0x498] ss:$28 sps:$4 sm:$0xff]   ;;  %v8588_v12 = vld [vmem:[%s12118_s13 + $0x508] ss:$28 sps:$4 sm:$0xff]  }
 0x487   :  { %6678 = vmatprep.mubr.bf16.mxu1 %v10880_v20  ;;  %6850 = vmatprep.mubr.bf16.mxu0 %v10880_v20  ;;  %v10900_v44 = vpack.c.bf16 %v3779_v33, %v3771_v41  ;;  %v10902_v1 = vpack.c.bf16 %v3782_v25, %v3774_v29  ;;  %v3776_v49 = vadd.f32 %v3760_v63, %v3719_v2  ;;  %v8561_v2 = vld [vmem:[%s12118_s13 + $0x3f8] ss:$28 sps:$4 sm:$0xff]   ;;  %v8582_v43 = vld [vmem:[%s12118_s13 + $0x4d0] ss:$28 sps:$4 sm:$0xff]   ;;  %v8596_v3 = vld [vmem:[%s12118_s13 + $0x544] ss:$28 sps:$4 sm:$0xff]  }
 0x488   :  { %6679 = vmatmul.mubr.bf16.vlgmr.msra.gmra.mrb[8].mxu1 %v10888_v19  ;;  %6851 = vmatmul.mubr.bf16.vlgmr.msra.gmra.mrb[20].mxu0 %v10888_v19  ;;  %v10906_v34 = vpack.c.bf16 %v3781_v21, %v3773_v46  ;;  %v3775_v24 = vadd.f32 %v3756_v36, %v3718_v62  ;;  %v3783_v18 = vadd.f32 %v3756_v36, %v3726_v40  ;;  %v8569_v62 = vld [vmem:[%s12118_s13 + $0x434] ss:$28 sps:$4 sm:$0xff]   ;;  %v8564_v40 = vld [vmem:[%s12118_s13 + $0x428] ss:$28 sps:$4 sm:$0xff]   ;;  %v8594_v36 = vld [vmem:[%s12118_s13 + $0x540] ss:$28 sps:$4 sm:$0xff]  }
 0x489   :  { %6690 = vmatpush1.bf16.msra.mxu1 %v8546_v7  ;;  %6862 = vmatpush1.bf16.msra.mxu0 %v8549_v32  ;;  %v10914_v58 = vpack.c.bf16 %v3784_v15, %v3776_v49  ;;  %v8585_v63 = vld [vmem:[%s12118_s13 + $0x4d8] ss:$28 sps:$4 sm:$0xff]   ;;  %v8591_v5 = vld [vmem:[%s12118_s13 + $0x510] ss:$28 sps:$4 sm:$0xff]   ;;  %v8597_v15 = vld [vmem:[%s12118_s13 + $0x548] ss:$28 sps:$4 sm:$0xff]  }
 0x48a   :  { %6721 = vmatprep.mubr.bf16.mxu1 %v10890_v42  ;;  %6893 = vmatprep.mubr.bf16.mxu0 %v10890_v42  ;;  %v10924_v4 = vpack.c.bf16 %v3783_v18, %v3775_v24  ;;  %v8593_v57 = vld [vmem:[%s12118_s13 + $0x514] ss:$28 sps:$4 sm:$0xff]   ;;  %v8599_v23 = vld [vmem:[%s12118_s13 + $0x54c] ss:$28 sps:$4 sm:$0xff]   ;;  %v8605_v31 = vld [vmem:[%s12118_s13 + $0x584] ss:$28 sps:$4 sm:$0xff]  }
 0x48b   :  { %6691 = vmatprep.subr.bf16.mxu1 %v8554_v35  ;;  %6863 = vmatprep.subr.bf16.mxu0 %v8557_v48  ;;  %v8600_v16 = vld [vmem:[%s12118_s13 + $0x578] ss:$28 sps:$4 sm:$0xff]   ;;  %v8603_v14 = vld [vmem:[%s12118_s13 + $0x580] ss:$28 sps:$4 sm:$0xff]   ;;  %v8606_v41 = vld [vmem:[%s12118_s13 + $0x5b0] ss:$28 sps:$4 sm:$0xff]  }
 0x48c   :  { %v8608_v39 = vld [vmem:[%s12118_s13 + $0x5b4] ss:$28 sps:$4 sm:$0xff]   ;;  %v8611_v54 = vld [vmem:[%s12118_s13 + $0x5bc] ss:$28 sps:$4 sm:$0xff]   ;;  %v8614_v32 = vld [vmem:[%s12118_s13 + $0x5ec] ss:$28 sps:$4 sm:$0xff]  }
 0x48d   :  { %6692 = vmatpush1.bf16.msra.mxu1 %v8552_v56  ;;  %6864 = vmatpush1.bf16.msra.mxu0 %v8555_v45  ;;  %v8609_v7 = vld [vmem:[%s12118_s13 + $0x5b8] ss:$28 sps:$4 sm:$0xff]   ;;  %v8612_v29 = vld [vmem:[%s12118_s13 + $0x5e8] ss:$28 sps:$4 sm:$0xff]   ;;  %v8615_v25 = vld [vmem:[%s12118_s13 + $0x5f0] ss:$28 sps:$4 sm:$0xff]  }
 0x48e   :  { %6693 = vmatprep.subr.bf16.mxu1 %v8560_v52  ;;  %6865 = vmatprep.subr.bf16.mxu0 %v8563_v50  ;;  %v8617_v33 = vld [vmem:[%s12118_s13 + $0x5f4] ss:$28 sps:$4 sm:$0xff]   ;;  %v8620_v46 = vld [vmem:[%s12118_s13 + $0x624] ss:$28 sps:$4 sm:$0xff]   ;;  %v8623_v21 = vld [vmem:[%s12118_s13 + $0x62c] ss:$28 sps:$4 sm:$0xff]  }
 0x48f   :  { %v8618_v35 = vld [vmem:[%s12118_s13 + $0x620] ss:$28 sps:$4 sm:$0xff]   ;;  %v8621_v48 = vld [vmem:[%s12118_s13 + $0x628] ss:$28 sps:$4 sm:$0xff]   ;;  %v8624_v18 = vld [vmem:[%s12118_s13 + $0x658] ss:$28 sps:$4 sm:$0xff]  }
 0x490   :  { %v8626_v49 = vld [vmem:[%s12118_s13 + $0x65c] ss:$28 sps:$4 sm:$0xff]   ;;  %v8629_v24 = vld [vmem:[%s12118_s13 + $0x664] ss:$28 sps:$4 sm:$0xff]   ;;  %v8632_v45 = vld [vmem:[%s12118_s13 + $0x694] ss:$28 sps:$4 sm:$0xff]  }
 0x491   :  { %6694 = vmatpush1.bf16.msra.mxu1 %v8558_v51  ;;  %6866 = vmatpush1.bf16.msra.mxu0 %v8561_v2  ;;  %v8627_v56 = vld [vmem:[%s12118_s13 + $0x660] ss:$28 sps:$4 sm:$0xff]   ;;  %v8630_v50 = vld [vmem:[%s12118_s13 + $0x690] ss:$28 sps:$4 sm:$0xff]   ;;  %v8633_v51 = vld [vmem:[%s12118_s13 + $0x698] ss:$28 sps:$4 sm:$0xff]  }
 0x492   :  { %6695 = vmatprep.subr.bf16.mxu1 %v8566_v17  ;;  %6867 = vmatprep.subr.bf16.mxu0 %v8569_v62  ;;  %v8635_v52 = vld [vmem:[%s12118_s13 + $0x69c] ss:$28 sps:$4 sm:$0xff]   ;;  %v8638_v2 = vld [vmem:[%s12118_s13 + $0x6cc] ss:$28 sps:$4 sm:$0xff]   ;;  %v8641_v17 = vld [vmem:[%s12118_s13 + $0x6d4] ss:$28 sps:$4 sm:$0xff]  }
 0x493   :  { %v8636_v62 = vld [vmem:[%s12118_s13 + $0x6c8] ss:$28 sps:$4 sm:$0xff]  }
 0x495   :  { %6696 = vmatpush1.bf16.msra.mxu1 %v8564_v40  ;;  %6868 = vmatpush1.bf16.msra.mxu0 %v8567_v61  ;;  %v8639_v40 = vld [vmem:[%s12118_s13 + $0x6d0] ss:$28 sps:$4 sm:$0xff]   ;;  %v8644_v61 = vld [vmem:[%s12118_s13 + $0x704] ss:$28 sps:$4 sm:$0xff]  }
 0x496   :  { %6697 = vmatprep.subr.bf16.mxu1 %v8572_v26  ;;  %6869 = vmatprep.subr.bf16.mxu0 %v8575_v60  ;;  %v8647_v26 = vld [vmem:[%s12118_s13 + $0x70c] ss:$28 sps:$4 sm:$0xff]   ;;  %v8642_v60 = vld [vmem:[%s12118_s13 + $0x700] ss:$28 sps:$4 sm:$0xff]  }
 0x499   :  { %6698 = vmatpush1.bf16.msra.mxu1 %v8570_v0  ;;  %6870 = vmatpush1.bf16.msra.mxu0 %v8573_v38  ;;  %v8645_v0 = vld [vmem:[%s12118_s13 + $0x708] ss:$28 sps:$4 sm:$0xff]   ;;  %v8650_v38 = vld [vmem:[%s12118_s13 + $0x73c] ss:$28 sps:$4 sm:$0xff]  }
 0x49a   :  { %6699 = vmatprep.subr.bf16.mxu1 %v8578_v9  ;;  %6871 = vmatprep.subr.bf16.mxu0 %v8581_v22  ;;  %v8653_v9 = vld [vmem:[%s12118_s13 + $0x744] ss:$28 sps:$4 sm:$0xff]   ;;  %v8648_v22 = vld [vmem:[%s12118_s13 + $0x738] ss:$28 sps:$4 sm:$0xff]  }
 0x49d   :  { %6700 = vmatpush1.bf16.msra.mxu1 %v8576_v10  ;;  %6872 = vmatpush1.bf16.msra.mxu0 %v8579_v47  ;;  %v8651_v10 = vld [vmem:[%s12118_s13 + $0x740] ss:$28 sps:$4 sm:$0xff]   ;;  %v8656_v47 = vld [vmem:[%s12118_s13 + $0x774] ss:$28 sps:$4 sm:$0xff]  }
 0x49e   :  { %6701 = vmatprep.subr.bf16.mxu1 %v8584_v6  ;;  %6873 = vmatprep.subr.bf16.mxu0 %v8587_v11  ;;  %v8659_v6 = vld [vmem:[%s12118_s13 + $0x77c] ss:$28 sps:$4 sm:$0xff]   ;;  %v8654_v11 = vld [vmem:[%s12118_s13 + $0x770] ss:$28 sps:$4 sm:$0xff]  }
 0x4a1   :  { %6702 = vmatpush1.bf16.msra.mxu1 %v8582_v43  ;;  %6874 = vmatpush1.bf16.msra.mxu0 %v8585_v63  ;;  %v8657_v43 = vld [vmem:[%s12118_s13 + $0x778] ss:$28 sps:$4 sm:$0xff]   ;;  %v8662_v63 = vld [vmem:[%s12118_s13 + $0x7ac] ss:$28 sps:$4 sm:$0xff]  }
 0x4a2   :  { %6703 = vmatprep.subr.bf16.mxu1 %v8590_v13  ;;  %6875 = vmatprep.subr.bf16.mxu0 %v8593_v57  ;;  %v8665_v13 = vld [vmem:[%s12118_s13 + $0x7b4] ss:$28 sps:$4 sm:$0xff]   ;;  %v8660_v57 = vld [vmem:[%s12118_s13 + $0x7a8] ss:$28 sps:$4 sm:$0xff]  }
 0x4a5   :  { %6704 = vmatpush1.bf16.msra.mxu1 %v8588_v12  ;;  %6876 = vmatpush1.bf16.msra.mxu0 %v8591_v5  ;;  %v8663_v12 = vld [vmem:[%s12118_s13 + $0x7b0] ss:$28 sps:$4 sm:$0xff]   ;;  %v8668_v5 = vld [vmem:[%s12118_s13 + $0x7e4] ss:$28 sps:$4 sm:$0xff]  }
 0x4a6   :  { %6705 = vmatprep.subr.bf16.mxu1 %v8596_v3  ;;  %6877 = vmatprep.subr.bf16.mxu0 %v8599_v23  ;;  %v8671_v3 = vld [vmem:[%s12118_s13 + $0x7ec] ss:$28 sps:$4 sm:$0xff]   ;;  %v8666_v23 = vld [vmem:[%s12118_s13 + $0x7e0] ss:$28 sps:$4 sm:$0xff]  }
 0x4a9   :  { %6706 = vmatpush1.bf16.msra.mxu1 %v8594_v36  ;;  %6878 = vmatpush1.bf16.msra.mxu0 %v8597_v15  ;;  %v8669_v36 = vld [vmem:[%s12118_s13 + $0x7e8] ss:$28 sps:$4 sm:$0xff]   ;;  %v8674_v15 = vld [vmem:[%s12118_s13 + $0x81c] ss:$28 sps:$4 sm:$0xff]  }
 0x4aa   :  { %6707 = vmatprep.subr.bf16.mxu1 %v8602_v59  ;;  %6879 = vmatprep.subr.bf16.mxu0 %v8605_v31  ;;  %v8677_v59 = vld [vmem:[%s12118_s13 + $0x824] ss:$28 sps:$4 sm:$0xff]   ;;  %v8672_v31 = vld [vmem:[%s12118_s13 + $0x818] ss:$28 sps:$4 sm:$0xff]  }
 0x4ad   :  { %6708 = vmatpush1.bf16.msra.mxu1 %v8600_v16  ;;  %6880 = vmatpush1.bf16.msra.mxu0 %v8603_v14  ;;  %v8675_v16 = vld [vmem:[%s12118_s13 + $0x820] ss:$28 sps:$4 sm:$0xff]   ;;  %v8680_v14 = vld [vmem:[%s12118_s13 + $0x854] ss:$28 sps:$4 sm:$0xff]  }
 0x4ae   :  { %6709 = vmatprep.subr.bf16.mxu1 %v8608_v39  ;;  %6881 = vmatprep.subr.bf16.mxu0 %v8611_v54  ;;  %v8683_v39 = vld [vmem:[%s12118_s13 + $0x85c] ss:$28 sps:$4 sm:$0xff]   ;;  %v8678_v54 = vld [vmem:[%s12118_s13 + $0x850] ss:$28 sps:$4 sm:$0xff]  }
 0x4b1   :  { %6710 = vmatpush1.bf16.msra.mxu1 %v8606_v41  ;;  %6882 = vmatpush1.bf16.msra.mxu0 %v8609_v7  ;;  %v8681_v41 = vld [vmem:[%s12118_s13 + $0x858] ss:$28 sps:$4 sm:$0xff]   ;;  %v8686_v7 = vld [vmem:[%s12118_s13 + $0x88c] ss:$28 sps:$4 sm:$0xff]  }
 0x4b2   :  { %6711 = vmatprep.subr.bf16.mxu1 %v8614_v32  ;;  %6883 = vmatprep.subr.bf16.mxu0 %v8617_v33  ;;  %v8689_v32 = vld [vmem:[%s12118_s13 + $0x894] ss:$28 sps:$4 sm:$0xff]   ;;  %v8684_v33 = vld [vmem:[%s12118_s13 + $0x888] ss:$28 sps:$4 sm:$0xff]  }
 0x4b5   :  { %6712 = vmatpush1.bf16.msra.mxu1 %v8612_v29  ;;  %6884 = vmatpush1.bf16.msra.mxu0 %v8615_v25  ;;  %v8687_v29 = vld [vmem:[%s12118_s13 + $0x890] ss:$28 sps:$4 sm:$0xff]   ;;  %v8692_v25 = vld [vmem:[%s12118_s13 + $0x8c4] ss:$28 sps:$4 sm:$0xff]  }
 0x4b6   :  { %6713 = vmatprep.subr.bf16.mxu1 %v8620_v46  ;;  %6885 = vmatprep.subr.bf16.mxu0 %v8623_v21  ;;  %v8695_v46 = vld [vmem:[%s12118_s13 + $0x8cc] ss:$28 sps:$4 sm:$0xff]   ;;  %v8690_v21 = vld [vmem:[%s12118_s13 + $0x8c0] ss:$28 sps:$4 sm:$0xff]  }
 0x4b9   :  { %6714 = vmatpush1.bf16.msra.mxu1 %v8618_v35  ;;  %6886 = vmatpush1.bf16.msra.mxu0 %v8621_v48  ;;  %v8693_v35 = vld [vmem:[%s12118_s13 + $0x8c8] ss:$28 sps:$4 sm:$0xff]   ;;  %v8698_v48 = vld [vmem:[%s12118_s13 + $0x8fc] ss:$28 sps:$4 sm:$0xff]  }
 0x4ba   :  { %6715 = vmatprep.subr.bf16.mxu1 %v8626_v49  ;;  %6887 = vmatprep.subr.bf16.mxu0 %v8629_v24  ;;  %v8701_v49 = vld [vmem:[%s12118_s13 + $0x904] ss:$28 sps:$4 sm:$0xff]   ;;  %v8696_v24 = vld [vmem:[%s12118_s13 + $0x8f8] ss:$28 sps:$4 sm:$0xff]  }
 0x4bd   :  { %6716 = vmatpush1.bf16.msra.mxu1 %v8624_v18  ;;  %6888 = vmatpush1.bf16.msra.mxu0 %v8627_v56  ;;  %v8699_v18 = vld [vmem:[%s12118_s13 + $0x900] ss:$28 sps:$4 sm:$0xff]   ;;  %v8704_v56 = vld [vmem:[%s12118_s13 + $0x934] ss:$28 sps:$4 sm:$0xff]  }
 0x4be   :  { %6717 = vmatprep.subr.bf16.mxu1 %v8632_v45  ;;  %6889 = vmatprep.subr.bf16.mxu0 %v8635_v52  ;;  %v8707_v45 = vld [vmem:[%s12118_s13 + $0x93c] ss:$28 sps:$4 sm:$0xff]   ;;  %v8702_v52 = vld [vmem:[%s12118_s13 + $0x930] ss:$28 sps:$4 sm:$0xff]  }
 0x4c1   :  { %6718 = vmatpush1.bf16.msra.mxu1 %v8630_v50  ;;  %6890 = vmatpush1.bf16.msra.mxu0 %v8633_v51  ;;  %v8705_v50 = vld [vmem:[%s12118_s13 + $0x938] ss:$28 sps:$4 sm:$0xff]   ;;  %v8710_v51 = vld [vmem:[%s12118_s13 + $0x96c] ss:$28 sps:$4 sm:$0xff]  }
 0x4c2   :  { %6719 = vmatprep.subr.bf16.mxu1 %v8638_v2  ;;  %6891 = vmatprep.subr.bf16.mxu0 %v8641_v17  ;;  %v8713_v2 = vld [vmem:[%s12118_s13 + $0x974] ss:$28 sps:$4 sm:$0xff]   ;;  %v8708_v17 = vld [vmem:[%s12118_s13 + $0x968] ss:$28 sps:$4 sm:$0xff]  }
 0x4c5   :  { %6720 = vmatpush1.bf16.msra.mxu1 %v8636_v62  ;;  %6892 = vmatpush1.bf16.msra.mxu0 %v8639_v40  ;;  %v8711_v62 = vld [vmem:[%s12118_s13 + $0x970] ss:$28 sps:$4 sm:$0xff]   ;;  %v8716_v40 = vld [vmem:[%s12118_s13 + $0x9a4] ss:$28 sps:$4 sm:$0xff]  }
 0x4c6   :  { %6732 = vmatprep.subr.bf16.mxu1 %v8644_v61  ;;  %6904 = vmatprep.subr.bf16.mxu0 %v8647_v26  ;;  %v8719_v61 = vld [vmem:[%s12118_s13 + $0x9ac] ss:$28 sps:$4 sm:$0xff]   ;;  %v8714_v26 = vld [vmem:[%s12118_s13 + $0x9a0] ss:$28 sps:$4 sm:$0xff]  }
 0x4c8   :  { %6722 = vmatmul.mubr.bf16.vlgmr.msra.gmra.mrb[8].mxu1 %v10900_v44  ;;  %6894 = vmatmul.mubr.bf16.vlgmr.msra.gmra.mrb[20].mxu0 %v10900_v44 }
 0x4c9   :  { %6733 = vmatpush1.bf16.msra.mxu1 %v8642_v60  ;;  %6764 = vmatprep.mubr.bf16.mxu1 %v10902_v1  ;;  %v8717_v60 = vld [vmem:[%s12118_s13 + $0x9a8] ss:$28 sps:$4 sm:$0xff]  }
 0x4ca   :  { %6905 = vmatpush1.bf16.msra.mxu0 %v8645_v0  ;;  %6936 = vmatprep.mubr.bf16.mxu0 %v10902_v1  ;;  %v8722_v0 = vld [vmem:[%s12118_s13 + $0x9dc] ss:$28 sps:$4 sm:$0xff]  }
 0x4cb   :  { %6734 = vmatprep.subr.bf16.mxu1 %v8650_v38  ;;  %6906 = vmatprep.subr.bf16.mxu0 %v8653_v9  ;;  %v8725_v38 = vld [vmem:[%s12118_s13 + $0x9e4] ss:$28 sps:$4 sm:$0xff]   ;;  %v8720_v9 = vld [vmem:[%s12118_s13 + $0x9d8] ss:$28 sps:$4 sm:$0xff]  }
 0x4cd   :  { %6735 = vmatpush1.bf16.msra.mxu1 %v8648_v22  ;;  %v8723_v22 = vld [vmem:[%s12118_s13 + $0x9e0] ss:$28 sps:$4 sm:$0xff]  }
 0x4ce   :  { %6907 = vmatpush1.bf16.msra.mxu0 %v8651_v10  ;;  %6736 = vmatprep.subr.bf16.mxu1 %v8656_v47  ;;  %v8728_v10 = vld [vmem:[%s12118_s13 + $0xa14] ss:$28 sps:$4 sm:$0xff]   ;;  %v8731_v47 = vld [vmem:[%s12118_s13 + $0xa1c] ss:$28 sps:$4 sm:$0xff]  }
 0x4cf   :  { %6908 = vmatprep.subr.bf16.mxu0 %v8659_v6  ;;  %v8726_v6 = vld [vmem:[%s12118_s13 + $0xa10] ss:$28 sps:$4 sm:$0xff]  }
 0x4d1   :  { %6737 = vmatpush1.bf16.msra.mxu1 %v8654_v11  ;;  %v8729_v11 = vld [vmem:[%s12118_s13 + $0xa18] ss:$28 sps:$4 sm:$0xff]  }
 0x4d2   :  { %6909 = vmatpush1.bf16.msra.mxu0 %v8657_v43  ;;  %6738 = vmatprep.subr.bf16.mxu1 %v8662_v63  ;;  %v8734_v43 = vld [vmem:[%s12118_s13 + $0xa4c] ss:$28 sps:$4 sm:$0xff]   ;;  %v8737_v63 = vld [vmem:[%s12118_s13 + $0xa54] ss:$28 sps:$4 sm:$0xff]  }
 0x4d3   :  { %6910 = vmatprep.subr.bf16.mxu0 %v8665_v13  ;;  %v8732_v13 = vld [vmem:[%s12118_s13 + $0xa48] ss:$28 sps:$4 sm:$0xff]  }
 0x4d5   :  { %6739 = vmatpush1.bf16.msra.mxu1 %v8660_v57  ;;  %v8735_v57 = vld [vmem:[%s12118_s13 + $0xa50] ss:$28 sps:$4 sm:$0xff]  }
 0x4d6   :  { %6911 = vmatpush1.bf16.msra.mxu0 %v8663_v12  ;;  %6740 = vmatprep.subr.bf16.mxu1 %v8668_v5  ;;  %v8740_v12 = vld [vmem:[%s12118_s13 + $0xa84] ss:$28 sps:$4 sm:$0xff]   ;;  %v8743_v5 = vld [vmem:[%s12118_s13 + $0xa8c] ss:$28 sps:$4 sm:$0xff]  }
 0x4d7   :  { %6912 = vmatprep.subr.bf16.mxu0 %v8671_v3  ;;  %v8738_v3 = vld [vmem:[%s12118_s13 + $0xa80] ss:$28 sps:$4 sm:$0xff]  }
 0x4d9   :  { %6741 = vmatpush1.bf16.msra.mxu1 %v8666_v23  ;;  %v8741_v23 = vld [vmem:[%s12118_s13 + $0xa88] ss:$28 sps:$4 sm:$0xff]  }
 0x4da   :  { %6913 = vmatpush1.bf16.msra.mxu0 %v8669_v36  ;;  %6742 = vmatprep.subr.bf16.mxu1 %v8674_v15  ;;  %v8746_v36 = vld [vmem:[%s12118_s13 + $0xabc] ss:$28 sps:$4 sm:$0xff]   ;;  %v8749_v15 = vld [vmem:[%s12118_s13 + $0xac4] ss:$28 sps:$4 sm:$0xff]  }
 0x4db   :  { %6914 = vmatprep.subr.bf16.mxu0 %v8677_v59  ;;  %v8744_v59 = vld [vmem:[%s12118_s13 + $0xab8] ss:$28 sps:$4 sm:$0xff]  }
 0x4dd   :  { %6743 = vmatpush1.bf16.msra.mxu1 %v8672_v31  ;;  %v8747_v31 = vld [vmem:[%s12118_s13 + $0xac0] ss:$28 sps:$4 sm:$0xff]  }
 0x4de   :  { %6915 = vmatpush1.bf16.msra.mxu0 %v8675_v16  ;;  %6744 = vmatprep.subr.bf16.mxu1 %v8680_v14  ;;  %v8752_v16 = vld [vmem:[%s12118_s13 + $0xaf4] ss:$28 sps:$4 sm:$0xff]   ;;  %v8755_v14 = vld [vmem:[%s12118_s13 + $0xafc] ss:$28 sps:$4 sm:$0xff]  }
 0x4df   :  { %6916 = vmatprep.subr.bf16.mxu0 %v8683_v39  ;;  %v8750_v39 = vld [vmem:[%s12118_s13 + $0xaf0] ss:$28 sps:$4 sm:$0xff]  }
 0x4e1   :  { %6745 = vmatpush1.bf16.msra.mxu1 %v8678_v54  ;;  %v8753_v54 = vld [vmem:[%s12118_s13 + $0xaf8] ss:$28 sps:$4 sm:$0xff]  }
 0x4e2   :  { %6917 = vmatpush1.bf16.msra.mxu0 %v8681_v41  ;;  %6746 = vmatprep.subr.bf16.mxu1 %v8686_v7  ;;  %v8758_v41 = vld [vmem:[%s12118_s13 + $0xb2c] ss:$28 sps:$4 sm:$0xff]   ;;  %v8761_v7 = vld [vmem:[%s12118_s13 + $0xb34] ss:$28 sps:$4 sm:$0xff]  }
 0x4e3   :  { %6918 = vmatprep.subr.bf16.mxu0 %v8689_v32  ;;  %v8756_v32 = vld [vmem:[%s12118_s13 + $0xb28] ss:$28 sps:$4 sm:$0xff]  }
 0x4e5   :  { %6747 = vmatpush1.bf16.msra.mxu1 %v8684_v33  ;;  %v8759_v33 = vld [vmem:[%s12118_s13 + $0xb30] ss:$28 sps:$4 sm:$0xff]  }
 0x4e6   :  { %6919 = vmatpush1.bf16.msra.mxu0 %v8687_v29  ;;  %6748 = vmatprep.subr.bf16.mxu1 %v8692_v25  ;;  %v8764_v29 = vld [vmem:[%s12118_s13 + $0xb64] ss:$28 sps:$4 sm:$0xff]   ;;  %v8767_v25 = vld [vmem:[%s12118_s13 + $0xb6c] ss:$28 sps:$4 sm:$0xff]  }
 0x4e7   :  { %6920 = vmatprep.subr.bf16.mxu0 %v8695_v46  ;;  %v8762_v46 = vld [vmem:[%s12118_s13 + $0xb60] ss:$28 sps:$4 sm:$0xff]  }
 0x4e9   :  { %6749 = vmatpush1.bf16.msra.mxu1 %v8690_v21  ;;  %v8765_v21 = vld [vmem:[%s12118_s13 + $0xb68] ss:$28 sps:$4 sm:$0xff]  }
 0x4ea   :  { %6921 = vmatpush1.bf16.msra.mxu0 %v8693_v35  ;;  %6750 = vmatprep.subr.bf16.mxu1 %v8698_v48  ;;  %v8770_v35 = vld [vmem:[%s12118_s13 + $0xb9c] ss:$28 sps:$4 sm:$0xff]   ;;  %v8773_v48 = vld [vmem:[%s12118_s13 + $0xba4] ss:$28 sps:$4 sm:$0xff]  }
 0x4eb   :  { %6922 = vmatprep.subr.bf16.mxu0 %v8701_v49  ;;  %v8768_v49 = vld [vmem:[%s12118_s13 + $0xb98] ss:$28 sps:$4 sm:$0xff]  }
 0x4ed   :  { %6751 = vmatpush1.bf16.msra.mxu1 %v8696_v24  ;;  %v8771_v24 = vld [vmem:[%s12118_s13 + $0xba0] ss:$28 sps:$4 sm:$0xff]  }
 0x4ee   :  { %6923 = vmatpush1.bf16.msra.mxu0 %v8699_v18  ;;  %6752 = vmatprep.subr.bf16.mxu1 %v8704_v56  ;;  %v8776_v18 = vld [vmem:[%s12118_s13 + $0xbd4] ss:$28 sps:$4 sm:$0xff]   ;;  %v8779_v56 = vld [vmem:[%s12118_s13 + $0xbdc] ss:$28 sps:$4 sm:$0xff]  }
 0x4ef   :  { %6924 = vmatprep.subr.bf16.mxu0 %v8707_v45  ;;  %v8774_v45 = vld [vmem:[%s12118_s13 + $0xbd0] ss:$28 sps:$4 sm:$0xff]  }
 0x4f1   :  { %6753 = vmatpush1.bf16.msra.mxu1 %v8702_v52  ;;  %v8777_v52 = vld [vmem:[%s12118_s13 + $0xbd8] ss:$28 sps:$4 sm:$0xff]  }
 0x4f2   :  { %6925 = vmatpush1.bf16.msra.mxu0 %v8705_v50  ;;  %6754 = vmatprep.subr.bf16.mxu1 %v8710_v51  ;;  %v8782_v50 = vld [vmem:[%s12118_s13 + $0xc0c] ss:$28 sps:$4 sm:$0xff]   ;;  %v8785_v51 = vld [vmem:[%s12118_s13 + $0xc14] ss:$28 sps:$4 sm:$0xff]  }
 0x4f3   :  { %6926 = vmatprep.subr.bf16.mxu0 %v8713_v2  ;;  %v8780_v2 = vld [vmem:[%s12118_s13 + $0xc08] ss:$28 sps:$4 sm:$0xff]  }
 0x4f5   :  { %6755 = vmatpush1.bf16.msra.mxu1 %v8708_v17  ;;  %v8783_v17 = vld [vmem:[%s12118_s13 + $0xc10] ss:$28 sps:$4 sm:$0xff]  }
 0x4f6   :  { %6927 = vmatpush1.bf16.msra.mxu0 %v8711_v62  ;;  %6756 = vmatprep.subr.bf16.mxu1 %v8716_v40  ;;  %v8788_v62 = vld [vmem:[%s12118_s13 + $0xc44] ss:$28 sps:$4 sm:$0xff]   ;;  %v8791_v40 = vld [vmem:[%s12118_s13 + $0xc4c] ss:$28 sps:$4 sm:$0xff]  }
 0x4f7   :  { %6928 = vmatprep.subr.bf16.mxu0 %v8719_v61  ;;  %v8786_v61 = vld [vmem:[%s12118_s13 + $0xc40] ss:$28 sps:$4 sm:$0xff]  }
 0x4f9   :  { %6757 = vmatpush1.bf16.msra.mxu1 %v8714_v26  ;;  %v8789_v26 = vld [vmem:[%s12118_s13 + $0xc48] ss:$28 sps:$4 sm:$0xff]  }
 0x4fa   :  { %6929 = vmatpush1.bf16.msra.mxu0 %v8717_v60  ;;  %6758 = vmatprep.subr.bf16.mxu1 %v8722_v0  ;;  %v8794_v60 = vld [vmem:[%s12118_s13 + $0xc7c] ss:$28 sps:$4 sm:$0xff]   ;;  %v8797_v0 = vld [vmem:[%s12118_s13 + $0xc84] ss:$28 sps:$4 sm:$0xff]  }
 0x4fb   :  { %6930 = vmatprep.subr.bf16.mxu0 %v8725_v38  ;;  %v8792_v38 = vld [vmem:[%s12118_s13 + $0xc78] ss:$28 sps:$4 sm:$0xff]  }
 0x4fd   :  { %6759 = vmatpush1.bf16.msra.mxu1 %v8720_v9  ;;  %v8795_v9 = vld [vmem:[%s12118_s13 + $0xc80] ss:$28 sps:$4 sm:$0xff]  }
 0x4fe   :  { %6931 = vmatpush1.bf16.msra.mxu0 %v8723_v22  ;;  %6760 = vmatprep.subr.bf16.mxu1 %v8728_v10  ;;  %v8800_v22 = vld [vmem:[%s12118_s13 + $0xcb4] ss:$28 sps:$4 sm:$0xff]   ;;  %v8803_v10 = vld [vmem:[%s12118_s13 + $0xcbc] ss:$28 sps:$4 sm:$0xff]  }
 0x4ff   :  { %6932 = vmatprep.subr.bf16.mxu0 %v8731_v47  ;;  %v8798_v47 = vld [vmem:[%s12118_s13 + $0xcb0] ss:$28 sps:$4 sm:$0xff]  }
 0x501   :  { %6761 = vmatpush1.bf16.msra.mxu1 %v8726_v6  ;;  %v8801_v6 = vld [vmem:[%s12118_s13 + $0xcb8] ss:$28 sps:$4 sm:$0xff]  }
 0x502   :  { %6933 = vmatpush1.bf16.msra.mxu0 %v8729_v11  ;;  %6762 = vmatprep.subr.bf16.mxu1 %v8734_v43  ;;  %v8806_v11 = vld [vmem:[%s12118_s13 + $0xcec] ss:$28 sps:$4 sm:$0xff]   ;;  %v8809_v43 = vld [vmem:[%s12118_s13 + $0xcf4] ss:$28 sps:$4 sm:$0xff]  }
 0x503   :  { %6934 = vmatprep.subr.bf16.mxu0 %v8737_v63  ;;  %v8804_v63 = vld [vmem:[%s12118_s13 + $0xce8] ss:$28 sps:$4 sm:$0xff]  }
 0x505   :  { %6763 = vmatpush1.bf16.msra.mxu1 %v8732_v13  ;;  %v8807_v13 = vld [vmem:[%s12118_s13 + $0xcf0] ss:$28 sps:$4 sm:$0xff]  }
 0x506   :  { %6935 = vmatpush1.bf16.msra.mxu0 %v8735_v57  ;;  %6775 = vmatprep.subr.bf16.mxu1 %v8740_v12  ;;  %v8812_v57 = vld [vmem:[%s12118_s13 + $0xd24] ss:$28 sps:$4 sm:$0xff]   ;;  %v8815_v12 = vld [vmem:[%s12118_s13 + $0xd2c] ss:$28 sps:$4 sm:$0xff]  }
 0x507   :  { %6947 = vmatprep.subr.bf16.mxu0 %v8743_v5  ;;  %v8810_v5 = vld [vmem:[%s12118_s13 + $0xd20] ss:$28 sps:$4 sm:$0xff]  }
 0x508   :  { %6765 = vmatmul.mubr.bf16.vlgmr.msra.gmra.mrb[8].mxu1 %v10906_v34 }
 0x509   :  { %6937 = vmatmul.mubr.bf16.vlgmr.msra.gmra.mrb[20].mxu0 %v10906_v34  ;;  %6776 = vmatpush1.bf16.msra.mxu1 %v8738_v3  ;;  %v8813_v3 = vld [vmem:[%s12118_s13 + $0xd28] ss:$28 sps:$4 sm:$0xff]  }
 0x50a   :  { %6807 = vmatprep.mubr.bf16.mxu1 %v10914_v58  ;;  %6948 = vmatpush1.bf16.msra.mxu0 %v8741_v23  ;;  %v8818_v23 = vld [vmem:[%s12118_s13 + $0xd5c] ss:$28 sps:$4 sm:$0xff]  }
 0x50b   :  { %6979 = vmatprep.mubr.bf16.mxu0 %v10914_v58  ;;  %6777 = vmatprep.subr.bf16.mxu1 %v8746_v36  ;;  %v8821_v36 = vld [vmem:[%s12118_s13 + $0xd64] ss:$28 sps:$4 sm:$0xff]  }
 0x50c   :  { %6949 = vmatprep.subr.bf16.mxu0 %v8749_v15  ;;  %v8816_v15 = vld [vmem:[%s12118_s13 + $0xd58] ss:$28 sps:$4 sm:$0xff]  }
 0x50d   :  { %6778 = vmatpush1.bf16.msra.mxu1 %v8744_v59  ;;  %v8819_v59 = vld [vmem:[%s12118_s13 + $0xd60] ss:$28 sps:$4 sm:$0xff]  }
 0x50e   :  { %6950 = vmatpush1.bf16.msra.mxu0 %v8747_v31  ;;  %6779 = vmatprep.subr.bf16.mxu1 %v8752_v16  ;;  %v8824_v31 = vld [vmem:[%s12118_s13 + $0xd94] ss:$28 sps:$4 sm:$0xff]   ;;  %v8827_v16 = vld [vmem:[%s12118_s13 + $0xd9c] ss:$28 sps:$4 sm:$0xff]  }
 0x50f   :  { %6951 = vmatprep.subr.bf16.mxu0 %v8755_v14  ;;  %v8822_v14 = vld [vmem:[%s12118_s13 + $0xd90] ss:$28 sps:$4 sm:$0xff]  }
 0x511   :  { %6780 = vmatpush1.bf16.msra.mxu1 %v8750_v39  ;;  %v8825_v39 = vld [vmem:[%s12118_s13 + $0xd98] ss:$28 sps:$4 sm:$0xff]  }
 0x512   :  { %6952 = vmatpush1.bf16.msra.mxu0 %v8753_v54  ;;  %6781 = vmatprep.subr.bf16.mxu1 %v8758_v41  ;;  %v8830_v54 = vld [vmem:[%s12118_s13 + $0xdcc] ss:$28 sps:$4 sm:$0xff]   ;;  %v8833_v41 = vld [vmem:[%s12118_s13 + $0xdd4] ss:$28 sps:$4 sm:$0xff]  }
 0x513   :  { %6953 = vmatprep.subr.bf16.mxu0 %v8761_v7  ;;  %v8828_v7 = vld [vmem:[%s12118_s13 + $0xdc8] ss:$28 sps:$4 sm:$0xff]  }
 0x515   :  { %6782 = vmatpush1.bf16.msra.mxu1 %v8756_v32  ;;  %v8831_v32 = vld [vmem:[%s12118_s13 + $0xdd0] ss:$28 sps:$4 sm:$0xff]  }
 0x516   :  { %6954 = vmatpush1.bf16.msra.mxu0 %v8759_v33  ;;  %6783 = vmatprep.subr.bf16.mxu1 %v8764_v29  ;;  %v8836_v33 = vld [vmem:[%s12118_s13 + $0x14] ss:$28 sps:$4 sm:$0xff]  }
 0x517   :  { %6955 = vmatprep.subr.bf16.mxu0 %v8767_v25  ;;  %v8837_v29 = vld [vmem:[%s12118_s13 + $0x1d8] ss:$28 sps:$4 sm:$0xff]   ;;  %v8834_v25 = vld [vmem:[%s12118_s13 + $0x10] ss:$28 sps:$4 sm:$0xff]  }
 0x519   :  { %6784 = vmatpush1.bf16.msra.mxu1 %v8762_v46  ;;  %v8838_v46 = vld [vmem:[%s12118_s13 + $0x18] ss:$28 sps:$4 sm:$0xff]  }
 0x51a   :  { %6956 = vmatpush1.bf16.msra.mxu0 %v8765_v21  ;;  %6785 = vmatprep.subr.bf16.mxu1 %v8770_v35  ;;  %v8841_v21 = vld [vmem:[%s12118_s13 + $0x4c] ss:$28 sps:$4 sm:$0xff]  }
 0x51b   :  { %6957 = vmatprep.subr.bf16.mxu0 %v8773_v48  ;;  %v8842_v35 = vld [vmem:[%s12118_s13 + $0x210] ss:$28 sps:$4 sm:$0xff]   ;;  %v8839_v48 = vld [vmem:[%s12118_s13 + $0x48] ss:$28 sps:$4 sm:$0xff]  }
 0x51d   :  { %6786 = vmatpush1.bf16.msra.mxu1 %v8768_v49  ;;  %v8843_v49 = vld [vmem:[%s12118_s13 + $0x50] ss:$28 sps:$4 sm:$0xff]  }
 0x51e   :  { %6958 = vmatpush1.bf16.msra.mxu0 %v8771_v24  ;;  %6787 = vmatprep.subr.bf16.mxu1 %v8776_v18  ;;  %v8846_v24 = vld [vmem:[%s12118_s13 + $0x84] ss:$28 sps:$4 sm:$0xff]  }
 0x51f   :  { %6959 = vmatprep.subr.bf16.mxu0 %v8779_v56  ;;  %v8847_v18 = vld [vmem:[%s12118_s13 + $0x248] ss:$28 sps:$4 sm:$0xff]   ;;  %v8844_v56 = vld [vmem:[%s12118_s13 + $0x80] ss:$28 sps:$4 sm:$0xff]  }
 0x521   :  { %6788 = vmatpush1.bf16.msra.mxu1 %v8774_v45  ;;  %v8848_v45 = vld [vmem:[%s12118_s13 + $0x88] ss:$28 sps:$4 sm:$0xff]  }
 0x522   :  { %6960 = vmatpush1.bf16.msra.mxu0 %v8777_v52  ;;  %6789 = vmatprep.subr.bf16.mxu1 %v8782_v50  ;;  %v8852_v52 = vld [vmem:[%s12118_s13 + $0x280] ss:$28 sps:$4 sm:$0xff]   ;;  %v8849_v50 = vld [vmem:[%s12118_s13 + $0xb8] ss:$28 sps:$4 sm:$0xff]  }
 0x523   :  { %6961 = vmatprep.subr.bf16.mxu0 %v8785_v51  ;;  %v8853_v51 = vld [vmem:[%s12118_s13 + $0xc0] ss:$28 sps:$4 sm:$0xff]  }
 0x525   :  { %6790 = vmatpush1.bf16.msra.mxu1 %v8780_v2  ;;  %v8856_v2 = vld [vmem:[%s12118_s13 + $0xf4] ss:$28 sps:$4 sm:$0xff]  }
 0x526   :  { %6962 = vmatpush1.bf16.msra.mxu0 %v8783_v17  ;;  %6791 = vmatprep.subr.bf16.mxu1 %v8788_v62  ;;  %v8857_v17 = vld [vmem:[%s12118_s13 + $0x2b8] ss:$28 sps:$4 sm:$0xff]   ;;  %v8854_v62 = vld [vmem:[%s12118_s13 + $0xf0] ss:$28 sps:$4 sm:$0xff]  }
 0x527   :  { %6963 = vmatprep.subr.bf16.mxu0 %v8791_v40  ;;  %v8858_v40 = vld [vmem:[%s12118_s13 + $0xf8] ss:$28 sps:$4 sm:$0xff]  }
 0x529   :  { %6792 = vmatpush1.bf16.msra.mxu1 %v8786_v61  ;;  %v8861_v61 = vld [vmem:[%s12118_s13 + $0x12c] ss:$28 sps:$4 sm:$0xff]  }
 0x52a   :  { %6964 = vmatpush1.bf16.msra.mxu0 %v8789_v26  ;;  %6793 = vmatprep.subr.bf16.mxu1 %v8794_v60  ;;  %v8862_v26 = vld [vmem:[%s12118_s13 + $0x2f0] ss:$28 sps:$4 sm:$0xff]   ;;  %v8859_v60 = vld [vmem:[%s12118_s13 + $0x128] ss:$28 sps:$4 sm:$0xff]  }
 0x52b   :  { %6965 = vmatprep.subr.bf16.mxu0 %v8797_v0  ;;  %v8863_v0 = vld [vmem:[%s12118_s13 + $0x130] ss:$28 sps:$4 sm:$0xff]  }
 0x52d   :  { %6794 = vmatpush1.bf16.msra.mxu1 %v8792_v38  ;;  %v8866_v38 = vld [vmem:[%s12118_s13 + $0x164] ss:$28 sps:$4 sm:$0xff]  }
 0x52e   :  { %6966 = vmatpush1.bf16.msra.mxu0 %v8795_v9  ;;  %6795 = vmatprep.subr.bf16.mxu1 %v8800_v22  ;;  %v8867_v9 = vld [vmem:[%s12118_s13 + $0x328] ss:$28 sps:$4 sm:$0xff]   ;;  %v8864_v22 = vld [vmem:[%s12118_s13 + $0x160] ss:$28 sps:$4 sm:$0xff]  }
 0x52f   :  { %6967 = vmatprep.subr.bf16.mxu0 %v8803_v10  ;;  %v8868_v10 = vld [vmem:[%s12118_s13 + $0x168] ss:$28 sps:$4 sm:$0xff]  }
 0x531   :  { %6796 = vmatpush1.bf16.msra.mxu1 %v8798_v47  ;;  %v8871_v47 = vld [vmem:[%s12118_s13 + $0x19c] ss:$28 sps:$4 sm:$0xff]  }
 0x532   :  { %6968 = vmatpush1.bf16.msra.mxu0 %v8801_v6  ;;  %6797 = vmatprep.subr.bf16.mxu1 %v8806_v11  ;;  %v8872_v6 = vld [vmem:[%s12118_s13 + $0x360] ss:$28 sps:$4 sm:$0xff]   ;;  %v8869_v11 = vld [vmem:[%s12118_s13 + $0x198] ss:$28 sps:$4 sm:$0xff]  }
 0x533   :  { %6969 = vmatprep.subr.bf16.mxu0 %v8809_v43  ;;  %v8873_v43 = vld [vmem:[%s12118_s13 + $0x1a0] ss:$28 sps:$4 sm:$0xff]  }
 0x535   :  { %6798 = vmatpush1.bf16.msra.mxu1 %v8804_v63  ;;  %v8876_v63 = vld [vmem:[%s12118_s13 + $0x1d4] ss:$28 sps:$4 sm:$0xff]  }
 0x536   :  { %6970 = vmatpush1.bf16.msra.mxu0 %v8807_v13  ;;  %6799 = vmatprep.subr.bf16.mxu1 %v8812_v57  ;;  %v8877_v13 = vld [vmem:[%s12118_s13 + $0x558] ss:$28 sps:$4 sm:$0xff]   ;;  %v8874_v57 = vld [vmem:[%s12118_s13 + $0x1d0] ss:$28 sps:$4 sm:$0xff]  }
 0x537   :  { %6971 = vmatprep.subr.bf16.mxu0 %v8815_v12  ;;  %v8878_v12 = vld [vmem:[%s12118_s13 + $0x398] ss:$28 sps:$4 sm:$0xff]  }
 0x539   :  { %6800 = vmatpush1.bf16.msra.mxu1 %v8810_v5  ;;  %v8881_v5 = vld [vmem:[%s12118_s13 + $0x20c] ss:$28 sps:$4 sm:$0xff]  }
 0x53a   :  { %6972 = vmatpush1.bf16.msra.mxu0 %v8813_v3  ;;  %6801 = vmatprep.subr.bf16.mxu1 %v8818_v23  ;;  %v8882_v3 = vld [vmem:[%s12118_s13 + $0x590] ss:$28 sps:$4 sm:$0xff]   ;;  %v8879_v23 = vld [vmem:[%s12118_s13 + $0x208] ss:$28 sps:$4 sm:$0xff]  }
 0x53b   :  { %6973 = vmatprep.subr.bf16.mxu0 %v8821_v36  ;;  %v8883_v36 = vld [vmem:[%s12118_s13 + $0x3d0] ss:$28 sps:$4 sm:$0xff]  }
 0x53d   :  { %6802 = vmatpush1.bf16.msra.mxu1 %v8816_v15  ;;  %v8886_v15 = vld [vmem:[%s12118_s13 + $0x244] ss:$28 sps:$4 sm:$0xff]  }
 0x53e   :  { %6974 = vmatpush1.bf16.msra.mxu0 %v8819_v59  ;;  %6803 = vmatprep.subr.bf16.mxu1 %v8824_v31  ;;  %v8887_v59 = vld [vmem:[%s12118_s13 + $0x5c8] ss:$28 sps:$4 sm:$0xff]   ;;  %v8884_v31 = vld [vmem:[%s12118_s13 + $0x240] ss:$28 sps:$4 sm:$0xff]  }
 0x53f   :  { %6975 = vmatprep.subr.bf16.mxu0 %v8827_v16  ;;  %v8888_v16 = vld [vmem:[%s12118_s13 + $0x408] ss:$28 sps:$4 sm:$0xff]  }
 0x541   :  { %6804 = vmatpush1.bf16.msra.mxu1 %v8822_v14  ;;  %v8891_v14 = vld [vmem:[%s12118_s13 + $0x27c] ss:$28 sps:$4 sm:$0xff]  }
 0x542   :  { %6976 = vmatpush1.bf16.msra.mxu0 %v8825_v39  ;;  %6805 = vmatprep.subr.bf16.mxu1 %v8830_v54  ;;  %v8892_v39 = vld [vmem:[%s12118_s13 + $0x600] ss:$28 sps:$4 sm:$0xff]   ;;  %v8889_v54 = vld [vmem:[%s12118_s13 + $0x278] ss:$28 sps:$4 sm:$0xff]  }
 0x543   :  { %6977 = vmatprep.subr.bf16.mxu0 %v8833_v41  ;;  %v8893_v41 = vld [vmem:[%s12118_s13 + $0x440] ss:$28 sps:$4 sm:$0xff]  }
 0x545   :  { %6806 = vmatpush1.bf16.msra.mxu1 %v8828_v7  ;;  %v8896_v7 = vld [vmem:[%s12118_s13 + $0x2b4] ss:$28 sps:$4 sm:$0xff]  }
 0x546   :  { %6978 = vmatpush1.bf16.msra.mxu0 %v8831_v32  ;;  %6990 = vmatprep.subr.bf16.mxu1 %v8836_v33  ;;  %v8897_v32 = vld [vmem:[%s12118_s13 + $0x638] ss:$28 sps:$4 sm:$0xff]   ;;  %v8894_v33 = vld [vmem:[%s12118_s13 + $0x2b0] ss:$28 sps:$4 sm:$0xff]  }
 0x547   :  { %8156 = vmatprep.subr.bf16.mxu0 %v8837_v29  ;;  %v8898_v29 = vld [vmem:[%s12118_s13 + $0x478] ss:$28 sps:$4 sm:$0xff]  }
 0x548   :  { %6808 = vmatmul.mubr.bf16.vlgmr.msra.gmra.mrb[8].mxu1 %v10924_v4 }
 0x549   :  { %6980 = vmatmul.mubr.bf16.vlgmr.msra.gmra.mrb[20].mxu0 %v10924_v4  ;;  %6991 = vmatpush1.bf16.msra.mxu1 %v8834_v25  ;;  %v8901_v25 = vld [vmem:[%s12118_s13 + $0x2ec] ss:$28 sps:$4 sm:$0xff]  }
 0x54a   :  { %7022 = vmatprep.mubr.bf16.mxu1 %v10880_v20  ;;  %8157 = vmatpush3.bf16.msra.mxu0 %v8838_v46  ;;  %v8902_v46 = vld [vmem:[%s12118_s13 + $0x670] ss:$28 sps:$4 sm:$0xff]  }
 0x54b   :  { %7194 = vmatprep.mubr.bf16.mxu0 %v10880_v20  ;;  %6992 = vmatprep.subr.bf16.mxu1 %v8841_v21  ;;  %v8851_v20 = vld [vmem:[%s12118_s13 + $0xbc] ss:$28 sps:$4 sm:$0xff]   ;;  %v8899_v21 = vld [vmem:[%s12118_s13 + $0x2e8] ss:$28 sps:$4 sm:$0xff]  }
 0x54c   :  { %8158 = vmatprep.subr.bf16.mxu0 %v8842_v35  ;;  %v8903_v35 = vld [vmem:[%s12118_s13 + $0x4b0] ss:$28 sps:$4 sm:$0xff]  }
 0x54d   :  { %6993 = vmatpush1.bf16.msra.mxu1 %v8839_v48  ;;  %v8906_v48 = vld [vmem:[%s12118_s13 + $0x324] ss:$28 sps:$4 sm:$0xff]  }
 0x54e   :  { %8159 = vmatpush3.bf16.msra.mxu0 %v8843_v49  ;;  %6994 = vmatprep.subr.bf16.mxu1 %v8846_v24  ;;  %v8907_v49 = vld [vmem:[%s12118_s13 + $0x6a8] ss:$28 sps:$4 sm:$0xff]   ;;  %v8904_v24 = vld [vmem:[%s12118_s13 + $0x320] ss:$28 sps:$4 sm:$0xff]  }
 0x54f   :  { %8160 = vmatprep.subr.bf16.mxu0 %v8847_v18  ;;  %v8908_v18 = vld [vmem:[%s12118_s13 + $0x4e8] ss:$28 sps:$4 sm:$0xff]  }
 0x551   :  { %6995 = vmatpush1.bf16.msra.mxu1 %v8844_v56  ;;  %v8911_v56 = vld [vmem:[%s12118_s13 + $0x35c] ss:$28 sps:$4 sm:$0xff]  }
 0x552   :  { %8161 = vmatpush3.bf16.msra.mxu0 %v8848_v45  ;;  %6996 = vmatprep.subr.bf16.mxu1 %v8851_v20  ;;  %v8912_v45 = vld [vmem:[%s12118_s13 + $0x6e0] ss:$28 sps:$4 sm:$0xff]   ;;  %v8909_v20 = vld [vmem:[%s12118_s13 + $0x358] ss:$28 sps:$4 sm:$0xff]  }
 0x553   :  { %8162 = vmatprep.subr.bf16.mxu0 %v8852_v52  ;;  %v8913_v52 = vld [vmem:[%s12118_s13 + $0x520] ss:$28 sps:$4 sm:$0xff]  }
 0x555   :  { %6997 = vmatpush1.bf16.msra.mxu1 %v8849_v50  ;;  %v8916_v50 = vld [vmem:[%s12118_s13 + $0x394] ss:$28 sps:$4 sm:$0xff]  }
 0x556   :  { %8163 = vmatpush3.bf16.msra.mxu0 %v8853_v51  ;;  %6998 = vmatprep.subr.bf16.mxu1 %v8856_v2  ;;  %v8917_v51 = vld [vmem:[%s12118_s13 + $0x8d8] ss:$28 sps:$4 sm:$0xff]   ;;  %v8914_v2 = vld [vmem:[%s12118_s13 + $0x390] ss:$28 sps:$4 sm:$0xff]  }
 0x557   :  { %8164 = vmatprep.subr.bf16.mxu0 %v8857_v17  ;;  %v8918_v17 = vld [vmem:[%s12118_s13 + $0x718] ss:$28 sps:$4 sm:$0xff]  }
 0x559   :  { %6999 = vmatpush1.bf16.msra.mxu1 %v8854_v62  ;;  %v8921_v62 = vld [vmem:[%s12118_s13 + $0x3cc] ss:$28 sps:$4 sm:$0xff]  }
 0x55a   :  { %8165 = vmatpush3.bf16.msra.mxu0 %v8858_v40  ;;  %7000 = vmatprep.subr.bf16.mxu1 %v8861_v61  ;;  %v8922_v40 = vld [vmem:[%s12118_s13 + $0x910] ss:$28 sps:$4 sm:$0xff]   ;;  %v8919_v61 = vld [vmem:[%s12118_s13 + $0x3c8] ss:$28 sps:$4 sm:$0xff]  }
 0x55b   :  { %8166 = vmatprep.subr.bf16.mxu0 %v8862_v26  ;;  %v8923_v26 = vld [vmem:[%s12118_s13 + $0x750] ss:$28 sps:$4 sm:$0xff]  }
 0x55d   :  { %7001 = vmatpush1.bf16.msra.mxu1 %v8859_v60  ;;  %v8927_v60 = vld [vmem:[%s12118_s13 + $0x948] ss:$28 sps:$4 sm:$0xff]  }
 0x55e   :  { %8167 = vmatpush3.bf16.msra.mxu0 %v8863_v0  ;;  %7002 = vmatprep.subr.bf16.mxu1 %v8866_v38  ;;  %v8928_v0 = vld [vmem:[%s12118_s13 + $0x788] ss:$28 sps:$4 sm:$0xff]   ;;  %v8931_v38 = vld [vmem:[%s12118_s13 + $0x43c] ss:$28 sps:$4 sm:$0xff]  }
 0x55f   :  { %8168 = vmatprep.subr.bf16.mxu0 %v8867_v9  ;;  %v8932_v9 = vld [vmem:[%s12118_s13 + $0x980] ss:$28 sps:$4 sm:$0xff]  }
 0x561   :  { %7003 = vmatpush1.bf16.msra.mxu1 %v8864_v22  ;;  %v8929_v22 = vld [vmem:[%s12118_s13 + $0x438] ss:$28 sps:$4 sm:$0xff]  }
 0x562   :  { %8169 = vmatpush3.bf16.msra.mxu0 %v8868_v10  ;;  %7004 = vmatprep.subr.bf16.mxu1 %v8871_v47  ;;  %v8933_v10 = vld [vmem:[%s12118_s13 + $0x7c0] ss:$28 sps:$4 sm:$0xff]   ;;  %v8936_v47 = vld [vmem:[%s12118_s13 + $0x474] ss:$28 sps:$4 sm:$0xff]  }
 0x563   :  { %8170 = vmatprep.subr.bf16.mxu0 %v8872_v6  ;;  %v8937_v6 = vld [vmem:[%s12118_s13 + $0x9b8] ss:$28 sps:$4 sm:$0xff]  }
 0x565   :  { %7005 = vmatpush1.bf16.msra.mxu1 %v8869_v11  ;;  %v8934_v11 = vld [vmem:[%s12118_s13 + $0x470] ss:$28 sps:$4 sm:$0xff]  }
 0x566   :  { %8171 = vmatpush3.bf16.msra.mxu0 %v8873_v43  ;;  %7006 = vmatprep.subr.bf16.mxu1 %v8876_v63  ;;  %v8938_v43 = vld [vmem:[%s12118_s13 + $0x7f8] ss:$28 sps:$4 sm:$0xff]   ;;  %v8941_v63 = vld [vmem:[%s12118_s13 + $0x4ac] ss:$28 sps:$4 sm:$0xff]  }
 0x567   :  { %8178 = vmatprep.subr.bf16.mxu0 %v8877_v13  ;;  %v8942_v13 = vld [vmem:[%s12118_s13 + $0x9f0] ss:$28 sps:$4 sm:$0xff]  }
 0x569   :  { %7195 = vmatmul.mubr.bf16.vlgmr.msra.gmra.mrb[24].mxu0 %v10888_v19  ;;  %7007 = vmatpush1.bf16.msra.mxu1 %v8874_v57  ;;  %v8939_v57 = vld [vmem:[%s12118_s13 + $0x4a8] ss:$28 sps:$4 sm:$0xff]  }
 0x56a   :  { %8179 = vmatpush3.bf16.msra.mxu0 %v8878_v12  ;;  %7235 = vmatprep.mubr.bf16.mxu0 %v10890_v42  ;;  %v8943_v12 = vld [vmem:[%s12118_s13 + $0x830] ss:$28 sps:$4 sm:$0xff]  }
 0x56b   :  { %7008 = vmatprep.subr.bf16.mxu1 %v8881_v5  ;;  %8180 = vmatprep.subr.bf16.mxu0 %v8882_v3  ;;  %v8946_v5 = vld [vmem:[%s12118_s13 + $0x4e4] ss:$28 sps:$4 sm:$0xff]  }
 0x56c   :  { %v8947_v3 = vld [vmem:[%s12118_s13 + $0xa28] ss:$28 sps:$4 sm:$0xff]  }
 0x56d   :  { %7009 = vmatpush1.bf16.msra.mxu1 %v8879_v23  ;;  %v8944_v23 = vld [vmem:[%s12118_s13 + $0x4e0] ss:$28 sps:$4 sm:$0xff]  }
 0x56e   :  { %8181 = vmatpush3.bf16.msra.mxu0 %v8883_v36  ;;  %7010 = vmatprep.subr.bf16.mxu1 %v8886_v15  ;;  %v8948_v36 = vld [vmem:[%s12118_s13 + $0x868] ss:$28 sps:$4 sm:$0xff]   ;;  %v8951_v15 = vld [vmem:[%s12118_s13 + $0x51c] ss:$28 sps:$4 sm:$0xff]  }
 0x56f   :  { %8182 = vmatprep.subr.bf16.mxu0 %v8887_v59  ;;  %v8952_v59 = vld [vmem:[%s12118_s13 + $0xa60] ss:$28 sps:$4 sm:$0xff]  }
 0x571   :  { %7011 = vmatpush1.bf16.msra.mxu1 %v8884_v31  ;;  %v8949_v31 = vld [vmem:[%s12118_s13 + $0x518] ss:$28 sps:$4 sm:$0xff]  }
 0x572   :  { %8183 = vmatpush3.bf16.msra.mxu0 %v8888_v16  ;;  %7012 = vmatprep.subr.bf16.mxu1 %v8891_v14  ;;  %v8953_v16 = vld [vmem:[%s12118_s13 + $0x8a0] ss:$28 sps:$4 sm:$0xff]   ;;  %v8956_v14 = vld [vmem:[%s12118_s13 + $0x554] ss:$28 sps:$4 sm:$0xff]  }
 0x573   :  { %8184 = vmatprep.subr.bf16.mxu0 %v8892_v39  ;;  %v8957_v39 = vld [vmem:[%s12118_s13 + $0xc58] ss:$28 sps:$4 sm:$0xff]  }
 0x575   :  { %7013 = vmatpush1.bf16.msra.mxu1 %v8889_v54  ;;  %v8954_v54 = vld [vmem:[%s12118_s13 + $0x550] ss:$28 sps:$4 sm:$0xff]  }
 0x576   :  { %8185 = vmatpush3.bf16.msra.mxu0 %v8893_v41  ;;  %7014 = vmatprep.subr.bf16.mxu1 %v8896_v7  ;;  %v8958_v41 = vld [vmem:[%s12118_s13 + $0xa98] ss:$28 sps:$4 sm:$0xff]   ;;  %v8961_v7 = vld [vmem:[%s12118_s13 + $0x58c] ss:$28 sps:$4 sm:$0xff]  }
 0x577   :  { %8186 = vmatprep.subr.bf16.mxu0 %v8897_v32  ;;  %v8962_v32 = vld [vmem:[%s12118_s13 + $0xc90] ss:$28 sps:$4 sm:$0xff]  }
 0x579   :  { %7015 = vmatpush1.bf16.msra.mxu1 %v8894_v33  ;;  %v8959_v33 = vld [vmem:[%s12118_s13 + $0x588] ss:$28 sps:$4 sm:$0xff]  }
 0x57a   :  { %8187 = vmatpush3.bf16.msra.mxu0 %v8898_v29  ;;  %7016 = vmatprep.subr.bf16.mxu1 %v8901_v25  ;;  %v8963_v29 = vld [vmem:[%s12118_s13 + $0xad0] ss:$28 sps:$4 sm:$0xff]   ;;  %v8966_v25 = vld [vmem:[%s12118_s13 + $0x5c4] ss:$28 sps:$4 sm:$0xff]  }
 0x57b   :  { %8188 = vmatprep.subr.bf16.mxu0 %v8902_v46  ;;  %v8967_v46 = vld [vmem:[%s12118_s13 + $0xcc8] ss:$28 sps:$4 sm:$0xff]  }
 0x57d   :  { %7017 = vmatpush1.bf16.msra.mxu1 %v8899_v21  ;;  %v8964_v21 = vld [vmem:[%s12118_s13 + $0x5c0] ss:$28 sps:$4 sm:$0xff]  }
 0x57e   :  { %8189 = vmatpush3.bf16.msra.mxu0 %v8903_v35  ;;  %7018 = vmatprep.subr.bf16.mxu1 %v8906_v48  ;;  %v8968_v35 = vld [vmem:[%s12118_s13 + $0xb08] ss:$28 sps:$4 sm:$0xff]   ;;  %v8971_v48 = vld [vmem:[%s12118_s13 + $0x5fc] ss:$28 sps:$4 sm:$0xff]  }
 0x57f   :  { %8190 = vmatprep.subr.bf16.mxu0 %v8907_v49  ;;  %v8972_v49 = vld [vmem:[%s12118_s13 + $0xd00] ss:$28 sps:$4 sm:$0xff]  }
 0x581   :  { %7019 = vmatpush1.bf16.msra.mxu1 %v8904_v24  ;;  %v8969_v24 = vld [vmem:[%s12118_s13 + $0x5f8] ss:$28 sps:$4 sm:$0xff]  }
 0x582   :  { %8191 = vmatpush3.bf16.msra.mxu0 %v8908_v18  ;;  %7020 = vmatprep.subr.bf16.mxu1 %v8911_v56  ;;  %v8973_v18 = vld [vmem:[%s12118_s13 + $0xb40] ss:$28 sps:$4 sm:$0xff]   ;;  %v8976_v56 = vld [vmem:[%s12118_s13 + $0x634] ss:$28 sps:$4 sm:$0xff]  }
 0x583   :  { %8192 = vmatprep.subr.bf16.mxu0 %v8912_v45  ;;  %v8977_v45 = vld [vmem:[%s12118_s13 + $0xd38] ss:$28 sps:$4 sm:$0xff]  }
 0x585   :  { %7021 = vmatpush1.bf16.msra.mxu1 %v8909_v20  ;;  %v8974_v20 = vld [vmem:[%s12118_s13 + $0x630] ss:$28 sps:$4 sm:$0xff]  }
 0x586   :  { %8193 = vmatpush3.bf16.msra.mxu0 %v8913_v52  ;;  %7033 = vmatprep.subr.bf16.mxu1 %v8916_v50  ;;  %v8978_v52 = vld [vmem:[%s12118_s13 + $0xb78] ss:$28 sps:$4 sm:$0xff]   ;;  %v8981_v50 = vld [vmem:[%s12118_s13 + $0x66c] ss:$28 sps:$4 sm:$0xff]  }
 0x587   :  { %8200 = vmatprep.subr.bf16.mxu0 %v8917_v51  ;;  %v8982_v51 = vld [vmem:[%s12118_s13 + $0xd70] ss:$28 sps:$4 sm:$0xff]  }
 0x588   :  { %7023 = vmatmul.mubr.bf16.vlgmr.msra.gmra.mrb[12].mxu1 %v10888_v19  ;;  %v8926_v19 = vld [vmem:[%s12118_s13 + $0x404] ss:$28 sps:$4 sm:$0xff]  }
 0x589   :  { %7236 = vmatmul.mubr.bf16.vlgmr.msra.gmra.mrb[28].mxu0 %v10900_v44  ;;  %7034 = vmatpush1.bf16.msra.mxu1 %v8914_v2  ;;  %v8979_v2 = vld [vmem:[%s12118_s13 + $0x668] ss:$28 sps:$4 sm:$0xff]  }
 0x58a   :  { %7065 = vmatprep.mubr.bf16.mxu1 %v10890_v42  ;;  %8201 = vmatpush3.bf16.msra.mxu0 %v8918_v17  ;;  %v8924_v42 = vld [vmem:[%s12118_s13 + $0x400] ss:$28 sps:$4 sm:$0xff]   ;;  %v8983_v17 = vld [vmem:[%s12118_s13 + $0xbb0] ss:$28 sps:$4 sm:$0xff]  }
 0x58b   :  { %7276 = vmatprep.mubr.bf16.mxu0 %v10902_v1  ;;  %7035 = vmatprep.subr.bf16.mxu1 %v8921_v62  ;;  %v8986_v62 = vld [vmem:[%s12118_s13 + $0x6a4] ss:$28 sps:$4 sm:$0xff]  }
 0x58c   :  { %8202 = vmatprep.subr.bf16.mxu0 %v8922_v40  ;;  %v8987_v40 = vld [vmem:[%s12118_s13 + $0xda8] ss:$28 sps:$4 sm:$0xff]  }
 0x58d   :  { %7036 = vmatpush1.bf16.msra.mxu1 %v8919_v61  ;;  %v8984_v61 = vld [vmem:[%s12118_s13 + $0x6a0] ss:$28 sps:$4 sm:$0xff]  }
 0x58e   :  { %8203 = vmatpush3.bf16.msra.mxu0 %v8923_v26  ;;  %7037 = vmatprep.subr.bf16.mxu1 %v8926_v19  ;;  %v8988_v26 = vld [vmem:[%s12118_s13 + $0xbe8] ss:$28 sps:$4 sm:$0xff]   ;;  %v8991_v19 = vld [vmem:[%s12118_s13 + $0x6dc] ss:$28 sps:$4 sm:$0xff]  }
 0x58f   :  { %8204 = vmatprep.subr.bf16.mxu0 %v8927_v60  ;;  %v8992_v60 = vld [vmem:[%s12118_s13 + $0xde0] ss:$28 sps:$4 sm:$0xff]  }
 0x591   :  { %7038 = vmatpush1.bf16.msra.mxu1 %v8924_v42  ;;  %v8989_v42 = vld [vmem:[%s12118_s13 + $0x6d8] ss:$28 sps:$4 sm:$0xff]  }
 0x592   :  { %8205 = vmatpush3.bf16.msra.mxu0 %v8928_v0  ;;  %7039 = vmatprep.subr.bf16.mxu1 %v8931_v38  ;;  %v8993_v0 = vld [vmem:[%s12118_s13 + $0xc20] ss:$28 sps:$4 sm:$0xff]   ;;  %v8996_v38 = vld [vmem:[%s12118_s13 + $0x714] ss:$28 sps:$4 sm:$0xff]  }
 0x593   :  { %8206 = vmatprep.subr.bf16.mxu0 %v8932_v9  ;;  %v8994_v9 = vld [vmem:[%s12118_s13 + $0x710] ss:$28 sps:$4 sm:$0xff]  }
 0x595   :  { %7040 = vmatpush1.bf16.msra.mxu1 %v8929_v22  ;;  %v8999_v22 = vld [vmem:[%s12118_s13 + $0x74c] ss:$28 sps:$4 sm:$0xff]  }
 0x596   :  { %8207 = vmatpush3.bf16.msra.mxu0 %v8933_v10  ;;  %7041 = vmatprep.subr.bf16.mxu1 %v8936_v47  ;;  %v8997_v10 = vld [vmem:[%s12118_s13 + $0x748] ss:$28 sps:$4 sm:$0xff]  }
 0x597   :  { %8208 = vmatprep.subr.bf16.mxu0 %v8937_v6  ;;  %v9002_v47 = vld [vmem:[%s12118_s13 + $0x784] ss:$28 sps:$4 sm:$0xff]  }
 0x598   :  { %v9000_v6 = vld [vmem:[%s12118_s13 + $0x780] ss:$28 sps:$4 sm:$0xff]  }
 0x599   :  { %7042 = vmatpush1.bf16.msra.mxu1 %v8934_v11  ;;  %v9008_v11 = vld [vmem:[%s12118_s13 + $0x7f4] ss:$28 sps:$4 sm:$0xff]  }
 0x59a   :  { %8209 = vmatpush3.bf16.msra.mxu0 %v8938_v43  ;;  %7043 = vmatprep.subr.bf16.mxu1 %v8941_v63  ;;  %v9006_v43 = vld [vmem:[%s12118_s13 + $0x7f0] ss:$28 sps:$4 sm:$0xff]  }
 0x59b   :  { %8210 = vmatprep.subr.bf16.mxu0 %v8942_v13  ;;  %v9011_v63 = vld [vmem:[%s12118_s13 + $0x82c] ss:$28 sps:$4 sm:$0xff]  }
 0x59c   :  { %v9009_v13 = vld [vmem:[%s12118_s13 + $0x828] ss:$28 sps:$4 sm:$0xff]  }
 0x59d   :  { %7044 = vmatpush1.bf16.msra.mxu1 %v8939_v57  ;;  %v9014_v57 = vld [vmem:[%s12118_s13 + $0x864] ss:$28 sps:$4 sm:$0xff]  }
 0x59e   :  { %8211 = vmatpush3.bf16.msra.mxu0 %v8943_v12  ;;  %7045 = vmatprep.subr.bf16.mxu1 %v8946_v5  ;;  %v9012_v12 = vld [vmem:[%s12118_s13 + $0x860] ss:$28 sps:$4 sm:$0xff]  }
 0x59f   :  { %8212 = vmatprep.subr.bf16.mxu0 %v8947_v3  ;;  %v9017_v5 = vld [vmem:[%s12118_s13 + $0x89c] ss:$28 sps:$4 sm:$0xff]  }
 0x5a0   :  { %v9015_v3 = vld [vmem:[%s12118_s13 + $0x898] ss:$28 sps:$4 sm:$0xff]  }
 0x5a1   :  { %7046 = vmatpush1.bf16.msra.mxu1 %v8944_v23  ;;  %v9020_v23 = vld [vmem:[%s12118_s13 + $0x8d4] ss:$28 sps:$4 sm:$0xff]  }
 0x5a2   :  { %8213 = vmatpush3.bf16.msra.mxu0 %v8948_v36  ;;  %7047 = vmatprep.subr.bf16.mxu1 %v8951_v15  ;;  %v9018_v36 = vld [vmem:[%s12118_s13 + $0x8d0] ss:$28 sps:$4 sm:$0xff]  }
 0x5a3   :  { %8214 = vmatprep.subr.bf16.mxu0 %v8952_v59  ;;  %v9023_v15 = vld [vmem:[%s12118_s13 + $0x90c] ss:$28 sps:$4 sm:$0xff]  }
 0x5a4   :  { %v9021_v59 = vld [vmem:[%s12118_s13 + $0x908] ss:$28 sps:$4 sm:$0xff]  }
 0x5a5   :  { %7048 = vmatpush1.bf16.msra.mxu1 %v8949_v31  ;;  %v9026_v31 = vld [vmem:[%s12118_s13 + $0x944] ss:$28 sps:$4 sm:$0xff]  }
 0x5a6   :  { %8215 = vmatpush3.bf16.msra.mxu0 %v8953_v16  ;;  %7049 = vmatprep.subr.bf16.mxu1 %v8956_v14  ;;  %v9024_v16 = vld [vmem:[%s12118_s13 + $0x940] ss:$28 sps:$4 sm:$0xff]  }
 0x5a7   :  { %8222 = vmatprep.subr.bf16.mxu0 %v8957_v39  ;;  %v9029_v14 = vld [vmem:[%s12118_s13 + $0x97c] ss:$28 sps:$4 sm:$0xff]  }
 0x5a8   :  { %v9027_v39 = vld [vmem:[%s12118_s13 + $0x978] ss:$28 sps:$4 sm:$0xff]  }
 0x5a9   :  { %7277 = vmatmul.mubr.bf16.vlgmr.msra.gmra.mrb[32].mxu0 %v10906_v34  ;;  %7050 = vmatpush1.bf16.msra.mxu1 %v8954_v54  ;;  %v9032_v54 = vld [vmem:[%s12118_s13 + $0x9b4] ss:$28 sps:$4 sm:$0xff]  }
 0x5aa   :  { %8223 = vmatpush3.bf16.msra.mxu0 %v8958_v41  ;;  %7317 = vmatprep.mubr.bf16.mxu0 %v10914_v58  ;;  %v9030_v41 = vld [vmem:[%s12118_s13 + $0x9b0] ss:$28 sps:$4 sm:$0xff]  }
 0x5ab   :  { %7051 = vmatprep.subr.bf16.mxu1 %v8961_v7  ;;  %8224 = vmatprep.subr.bf16.mxu0 %v8962_v32  ;;  %v9035_v7 = vld [vmem:[%s12118_s13 + $0x9ec] ss:$28 sps:$4 sm:$0xff]  }
 0x5ac   :  { %v9033_v32 = vld [vmem:[%s12118_s13 + $0x9e8] ss:$28 sps:$4 sm:$0xff]  }
 0x5ad   :  { %7052 = vmatpush1.bf16.msra.mxu1 %v8959_v33  ;;  %v9038_v33 = vld [vmem:[%s12118_s13 + $0xa24] ss:$28 sps:$4 sm:$0xff]  }
 0x5ae   :  { %8225 = vmatpush3.bf16.msra.mxu0 %v8963_v29  ;;  %7053 = vmatprep.subr.bf16.mxu1 %v8966_v25  ;;  %v9036_v29 = vld [vmem:[%s12118_s13 + $0xa20] ss:$28 sps:$4 sm:$0xff]  }
 0x5af   :  { %8226 = vmatprep.subr.bf16.mxu0 %v8967_v46  ;;  %v9041_v25 = vld [vmem:[%s12118_s13 + $0xa5c] ss:$28 sps:$4 sm:$0xff]  }
 0x5b0   :  { %v9039_v46 = vld [vmem:[%s12118_s13 + $0xa58] ss:$28 sps:$4 sm:$0xff]  }
 0x5b1   :  { %7054 = vmatpush1.bf16.msra.mxu1 %v8964_v21  ;;  %v9044_v21 = vld [vmem:[%s12118_s13 + $0xa94] ss:$28 sps:$4 sm:$0xff]  }
 0x5b2   :  { %8227 = vmatpush3.bf16.msra.mxu0 %v8968_v35  ;;  %7055 = vmatprep.subr.bf16.mxu1 %v8971_v48  ;;  %v9042_v35 = vld [vmem:[%s12118_s13 + $0xa90] ss:$28 sps:$4 sm:$0xff]  }
 0x5b3   :  { %8228 = vmatprep.subr.bf16.mxu0 %v8972_v49  ;;  %v9047_v48 = vld [vmem:[%s12118_s13 + $0xacc] ss:$28 sps:$4 sm:$0xff]  }
 0x5b4   :  { %v9045_v49 = vld [vmem:[%s12118_s13 + $0xac8] ss:$28 sps:$4 sm:$0xff]  }
 0x5b5   :  { %7056 = vmatpush1.bf16.msra.mxu1 %v8969_v24  ;;  %v9050_v24 = vld [vmem:[%s12118_s13 + $0xb04] ss:$28 sps:$4 sm:$0xff]  }
 0x5b6   :  { %8229 = vmatpush3.bf16.msra.mxu0 %v8973_v18  ;;  %7057 = vmatprep.subr.bf16.mxu1 %v8976_v56  ;;  %v9048_v18 = vld [vmem:[%s12118_s13 + $0xb00] ss:$28 sps:$4 sm:$0xff]   ;;  %v9056_v56 = vld [vmem:[%s12118_s13 + $0xb74] ss:$28 sps:$4 sm:$0xff]  }
 0x5b7   :  { %8230 = vmatprep.subr.bf16.mxu0 %v8977_v45  ;;  %v9054_v45 = vld [vmem:[%s12118_s13 + $0xb70] ss:$28 sps:$4 sm:$0xff]  }
 0x5b9   :  { %7058 = vmatpush1.bf16.msra.mxu1 %v8974_v20  ;;  %v12010_v20 = vld [vmem:[%s12119_s14] sm:$0x7f] }
 0x5ba   :  { %8231 = vmatpush3.bf16.msra.mxu0 %v8978_v52  ;;  %7059 = vmatprep.subr.bf16.mxu1 %v8981_v50  ;;  %v9059_v52 = vld [vmem:[%s12118_s13 + $0xbac] ss:$28 sps:$4 sm:$0xff]   ;;  %v4310_v50 = vrot.slane %v12010_v20, %v9408_v53 }
 0x5bb   :  { %8232 = vmatprep.subr.bf16.mxu0 %v8982_v51  ;;  %v4318_v51 = vrot.slane %v12010_v20, %v9816_v27 }
 0x5bd   :  { %7060 = vmatpush1.bf16.msra.mxu1 %v8979_v2  ;;  %v4314_v2 = vrot.slane %v12010_v20, %v9414_v55 }
 0x5be   :  { %8233 = vmatpush3.bf16.msra.mxu0 %v8983_v17  ;;  %7061 = vmatprep.subr.bf16.mxu1 %v8986_v62  ;;  %v9057_v17 = vld [vmem:[%s12118_s13 + $0xba8] ss:$28 sps:$4 sm:$0xff]   ;;  %v4322_v62 = vrot.slane %v12010_v20, %v9819_v28 }
 0x5bf   :  { %8234 = vmatprep.subr.bf16.mxu0 %v8987_v40  ;;  %v9062_v40 = vld [vmem:[%s12118_s13 + $0xbe4] ss:$28 sps:$4 sm:$0xff]  }
 0x5c1   :  { %7062 = vmatpush1.bf16.msra.mxu1 %v8984_v61 }
 0x5c2   :  { %8235 = vmatpush3.bf16.msra.mxu0 %v8988_v26  ;;  %7063 = vmatprep.subr.bf16.mxu1 %v8991_v19 }
 0x5c3   :  { %8236 = vmatprep.subr.bf16.mxu0 %v8992_v60 }
 0x5c5   :  { %7064 = vmatpush1.bf16.msra.mxu1 %v8989_v42 }
 0x5c6   :  { %8237 = vmatpush3.bf16.msra.mxu0 %v8993_v0  ;;  %7076 = vmatprep.subr.bf16.mxu1 %v8996_v38  ;;  %v9060_v0 = vld [vmem:[%s12118_s13 + $0xbe0] ss:$28 sps:$4 sm:$0xff]  }
 0x5c8   :  { %7066 = vmatmul.mubr.bf16.vlgmr.msra.gmra.mrb[12].mxu1 %v10900_v44  ;;  %v9005_v44 = vld [vmem:[%s12118_s13 + $0x7bc] ss:$28 sps:$4 sm:$0xff]  }
 0x5c9   :  { %7318 = vmatmul.mubr.bf16.vlgmr.msra.gmra.mrb[36].mxu0 %v10924_v4  ;;  %7077 = vmatpush1.bf16.msra.mxu1 %v8994_v9 }
 0x5ca   :  { %7108 = vmatprep.mubr.bf16.mxu1 %v10902_v1  ;;  %7078 = vmatprep.subr.bf16.mxu1 %v8999_v22  ;;  %v9003_v1 = vld [vmem:[%s12118_s13 + $0x7b8] ss:$28 sps:$4 sm:$0xff]  }
 0x5cd   :  { %7079 = vmatpush1.bf16.msra.mxu1 %v8997_v10  ;;  %v9065_v10 = vld [vmem:[%s12118_s13 + $0xc1c] ss:$28 sps:$4 sm:$0xff]  }
 0x5ce   :  { %7080 = vmatprep.subr.bf16.mxu1 %v9002_v47 }
 0x5d1   :  { %7081 = vmatpush1.bf16.msra.mxu1 %v9000_v6 }
 0x5d2   :  { %7082 = vmatprep.subr.bf16.mxu1 %v9005_v44 }
 0x5d5   :  { %7083 = vmatpush1.bf16.msra.mxu1 %v9003_v1 }
 0x5d6   :  { %7084 = vmatprep.subr.bf16.mxu1 %v9008_v11  ;;  %v9063_v11 = vld [vmem:[%s12118_s13 + $0xc18] ss:$28 sps:$4 sm:$0xff]  }
 0x5d9   :  { %7085 = vmatpush1.bf16.msra.mxu1 %v9006_v43  ;;  %v9068_v43 = vld [vmem:[%s12118_s13 + $0xc54] ss:$28 sps:$4 sm:$0xff]  }
 0x5da   :  { %7086 = vmatprep.subr.bf16.mxu1 %v9011_v63  ;;  %v9066_v63 = vld [vmem:[%s12118_s13 + $0xc50] ss:$28 sps:$4 sm:$0xff]  }
 0x5dd   :  { %7087 = vmatpush1.bf16.msra.mxu1 %v9009_v13  ;;  %v9071_v13 = vld [vmem:[%s12118_s13 + $0xc8c] ss:$28 sps:$4 sm:$0xff]  }
 0x5de   :  { %7088 = vmatprep.subr.bf16.mxu1 %v9014_v57 }
 0x5e1   :  { %7089 = vmatpush1.bf16.msra.mxu1 %v9012_v12 }
 0x5e2   :  { %7090 = vmatprep.subr.bf16.mxu1 %v9017_v5  ;;  %v9069_v5 = vld [vmem:[%s12118_s13 + $0xc88] ss:$28 sps:$4 sm:$0xff]  }
 0x5e5   :  { %7091 = vmatpush1.bf16.msra.mxu1 %v9015_v3 }
 0x5e6   :  { %7092 = vmatprep.subr.bf16.mxu1 %v9020_v23  ;;  %v9074_v23 = vld [vmem:[%s12118_s13 + $0xcc4] ss:$28 sps:$4 sm:$0xff]  }
 0x5e9   :  { %7093 = vmatpush1.bf16.msra.mxu1 %v9018_v36 }
 0x5ea   :  { %7094 = vmatprep.subr.bf16.mxu1 %v9023_v15 }
 0x5ed   :  { %7095 = vmatpush1.bf16.msra.mxu1 %v9021_v59 }
 0x5ee   :  { %7096 = vmatprep.subr.bf16.mxu1 %v9026_v31  ;;  %v9072_v31 = vld [vmem:[%s12118_s13 + $0xcc0] ss:$28 sps:$4 sm:$0xff]  }
 0x5f1   :  { %7097 = vmatpush1.bf16.msra.mxu1 %v9024_v16 }
 0x5f2   :  { %7098 = vmatprep.subr.bf16.mxu1 %v9029_v14  ;;  %v9077_v14 = vld [vmem:[%s12118_s13 + $0xcfc] ss:$28 sps:$4 sm:$0xff]  }
 0x5f5   :  { %7099 = vmatpush1.bf16.msra.mxu1 %v9027_v39 }
 0x5f6   :  { %7100 = vmatprep.subr.bf16.mxu1 %v9032_v54  ;;  %v9075_v54 = vld [vmem:[%s12118_s13 + $0xcf8] ss:$28 sps:$4 sm:$0xff]  }
 0x5f9   :  { %7101 = vmatpush1.bf16.msra.mxu1 %v9030_v41  ;;  %v9080_v41 = vld [vmem:[%s12118_s13 + $0xd34] ss:$28 sps:$4 sm:$0xff]  }
 0x5fa   :  { %7102 = vmatprep.subr.bf16.mxu1 %v9035_v7  ;;  %v9078_v7 = vld [vmem:[%s12118_s13 + $0xd30] ss:$28 sps:$4 sm:$0xff]  }
 0x5fd   :  { %7103 = vmatpush1.bf16.msra.mxu1 %v9033_v32  ;;  %v9083_v32 = vld [vmem:[%s12118_s13 + $0xd6c] ss:$28 sps:$4 sm:$0xff]  }
 0x5fe   :  { %7104 = vmatprep.subr.bf16.mxu1 %v9038_v33  ;;  %v9081_v33 = vld [vmem:[%s12118_s13 + $0xd68] ss:$28 sps:$4 sm:$0xff]  }
 0x601   :  { %7105 = vmatpush1.bf16.msra.mxu1 %v9036_v29  ;;  %v9086_v29 = vld [vmem:[%s12118_s13 + $0xda4] ss:$28 sps:$4 sm:$0xff]  }
 0x602   :  { %7106 = vmatprep.subr.bf16.mxu1 %v9041_v25 }
 0x605   :  { %7107 = vmatpush1.bf16.msra.mxu1 %v9039_v46 }
 0x606   :  { %7119 = vmatprep.subr.bf16.mxu1 %v9044_v21  ;;  %v9084_v21 = vld [vmem:[%s12118_s13 + $0xda0] ss:$28 sps:$4 sm:$0xff]  }
 0x608   :  { %7109 = vmatmul.mubr.bf16.vlgmr.msra.gmra.mrb[12].mxu1 %v10906_v34  ;;  %v9053_v34 = vld [vmem:[%s12118_s13 + $0xb3c] ss:$28 sps:$4 sm:$0xff]  }
 0x609   :  { %7120 = vmatpush1.bf16.msra.mxu1 %v9042_v35  ;;  %7151 = vmatprep.mubr.bf16.mxu1 %v10914_v58  ;;  %v9051_v58 = vld [vmem:[%s12118_s13 + $0xb38] ss:$28 sps:$4 sm:$0xff]  }
 0x60a   :  { %7121 = vmatprep.subr.bf16.mxu1 %v9047_v48 }
 0x60d   :  { %7122 = vmatpush1.bf16.msra.mxu1 %v9045_v49  ;;  %v9089_v49 = vld [vmem:[%s12118_s13 + $0xddc] ss:$28 sps:$4 sm:$0xff]  }
 0x60e   :  { %7123 = vmatprep.subr.bf16.mxu1 %v9050_v24 }
 0x611   :  { %7124 = vmatpush1.bf16.msra.mxu1 %v9048_v18 }
 0x612   :  { %7125 = vmatprep.subr.bf16.mxu1 %v9053_v34  ;;  %v9087_v34 = vld [vmem:[%s12118_s13 + $0xdd8] ss:$28 sps:$4 sm:$0xff]   ;;  %s9172_s13 = smov [#allocation2]  }
 0x613   :  { %s7360_s22 = sshll.u32 %s9172_s13, 4  ;;  %s7361_s22 = int_to_ptr.vmem [resolvable:$true] %s7360_s22 }
 0x614   :  { %s9146_s3 = scalar_lea.vmem %s7361_s22, 1792  ;;  %p9151_p1 = scmp.lt.s32.totalorder %s7361_s22, %s7361_s22 }
 0x615   :  { %7126 = vmatpush1.bf16.msra.mxu1 %v9051_v58  ;;  %v4334_v58 = vrot.slane %v12010_v20, %v10753_v30  ;;  %p9147_p0 = scmp.ne.s32.totalorder %s7361_s22, %s9146_s3  ;;  %p9152_p2 = scmp.lt.s32.totalorder %s9146_s3, %s9146_s3 }
 0x616   :  { %7127 = vmatprep.subr.bf16.mxu1 %v9056_v56 }
 0x617   :  { %p9153_p3 = por %p9152_p2, %p9151_p1 }
 0x619   :  { %7128 = vmatpush1.bf16.msra.mxu1 %v9054_v45  ;;  %p9154_p4 = pnand %p9153_p3, %p9147_p0 }
 0x61a   :  { %7129 = vmatprep.subr.bf16.mxu1 %v9059_v52 }
 0x61b   :  { %v6809_v53 = vpop.f32.mrb[8].mxu1 }
 0x61c   :  { %v8260_v61 = vadd.f32 %v6809_v53, %v4310_v50  ;;  %v6981_v26 = vpop.f32.mrb[20].mxu0  ;;  %v6811_v19 = vpop.f32.mrb[9].mxu1 }
 0x61d   :  { %v8264_v27 = vadd.f32 %v6981_v26, %v4318_v51  ;;  %v8261_v60 = vadd.f32 %v6811_v19, %v4314_v2  ;;  %v6983_v42 = vpop.f32.mrb[21].mxu0  ;;  %v6813_v55 = vpop.f32.mrb[10].mxu1  ;;  %7130 = vmatpush1.bf16.msra.mxu1 %v9057_v17 }
 0x61e   :  { %9118 = vtanh.f32 %v8260_v61  ;;  %v8265_v28 = vadd.f32 %v6983_v42, %v4322_v62  ;;  %v8262_v38 = vadd.f32 %v6813_v55, %v4310_v50  ;;  %v6985_v9 = vpop.f32.mrb[22].mxu0  ;;  %v6815_v22 = vpop.f32.mrb[11].mxu1  ;;  %7131 = vmatprep.subr.bf16.mxu1 %v9062_v40 }
 0x61f   :  { %9120 = vtanh.f32 %v8264_v27  ;;  %v8266_v47 = vadd.f32 %v6985_v9, %v4318_v51  ;;  %v6987_v6 = vpop.f32.mrb[23].mxu0  ;;  %v8263_v44 = vadd.f32 %v6815_v22, %v4314_v2 }
 0x620   :  { %9122 = vtanh.f32 %v8261_v60  ;;  %v8267_v1 = vadd.f32 %v6987_v6, %v4322_v62 }
 0x621   :  { %9124 = vtanh.f32 %v8265_v28  ;;  %7132 = vmatpush1.bf16.msra.mxu1 %v9060_v0 }
 0x622   :  { %9126 = vtanh.f32 %v8262_v38  ;;  %7133 = vmatprep.subr.bf16.mxu1 %v9065_v10 }
 0x623   :  { %9128 = vtanh.f32 %v8266_v47 }
 0x624   :  { %9130 = vtanh.f32 %v8263_v44 }
 0x625   :  { %9132 = vtanh.f32 %v8267_v1  ;;  %7134 = vmatpush1.bf16.msra.mxu1 %v9063_v11  ;;  %v4326_v1 = vrot.slane %v12010_v20, %v10748_v8  ;;  %v4330_v11 = vrot.slane %v12010_v20, %v10756_v37 }
 0x626   :  { %7135 = vmatprep.subr.bf16.mxu1 %v9068_v43 }
 0x628   :  { %v9119_v57 = vpop.eup %9118 }
 0x629   :  { %v9121_v12 = vpop.eup %9120  ;;  %7340 = vst [vmem:[#allocation2] sm:$0xff] %v9119_v57  ;;  %7136 = vmatpush1.bf16.msra.mxu1 %v9066_v63 }
 0x62a   :  { %v9123_v3 = vpop.eup %9122  ;;  %7342 = vst [vmem:[#allocation2 + $0x10] sm:$0xff] %v9121_v12  ;;  %7137 = vmatprep.subr.bf16.mxu1 %v9071_v13 }
 0x62b   :  { %v9125_v36 = vpop.eup %9124  ;;  %7341 = vst [vmem:[#allocation2 + $0x8] sm:$0xff] %v9123_v3 }
 0x62c   :  { %v9127_v15 = vpop.eup %9126  ;;  %7343 = vst [vmem:[#allocation2 + $0x18] sm:$0xff] %v9125_v36 }
 0x62d   :  { %v9129_v59 = vpop.eup %9128  ;;  %7348 = vst [vmem:[#allocation2 + $0x38] sm:$0xff] %v9127_v15  ;;  %7138 = vmatpush1.bf16.msra.mxu1 %v9069_v5 }
 0x62e   :  { %v9131_v16 = vpop.eup %9130  ;;  %7350 = vst [vmem:[#allocation2 + $0x48] sm:$0xff] %v9129_v59  ;;  %7139 = vmatprep.subr.bf16.mxu1 %v9074_v23 }
 0x62f   :  { %v9133_v39 = vpop.eup %9132  ;;  %7349 = vst [vmem:[#allocation2 + $0x40] sm:$0xff] %v9131_v16 }
 0x630   :  { %7351 = vst [vmem:[#allocation2 + $0x50] sm:$0xff] %v9133_v39 }
 0x631   :  { %7140 = vmatpush1.bf16.msra.mxu1 %v9072_v31 }
 0x632   :  { %7141 = vmatprep.subr.bf16.mxu1 %v9077_v14 }
 0x635   :  { %7142 = vmatpush1.bf16.msra.mxu1 %v9075_v54 }
 0x636   :  { %7143 = vmatprep.subr.bf16.mxu1 %v9080_v41 }
 0x639   :  { %7144 = vmatpush1.bf16.msra.mxu1 %v9078_v7 }
 0x63a   :  { %7145 = vmatprep.subr.bf16.mxu1 %v9083_v32 }
 0x63c   :  { %v8172_v25 = vpop.f32.mrb[24].mxu0 }
 0x63d   :  { %v8173_v46 = vpop.f32.mrb[25].mxu0  ;;  %7146 = vmatpush1.bf16.msra.mxu1 %v9081_v33 }
 0x63e   :  { %v8174_v35 = vadd.f32 %v8173_v46, %v8172_v25  ;;  %v8175_v48 = vpop.f32.mrb[26].mxu0  ;;  %7147 = vmatprep.subr.bf16.mxu1 %v9086_v29 }
 0x63f   :  { %v8176_v24 = vpop.f32.mrb[27].mxu0 }
 0x640   :  { %v8177_v18 = vadd.f32 %v8176_v24, %v8175_v48  ;;  %v7197_v52 = vadd.f32 %v8174_v35, %v4334_v58 }
 0x641   :  { %7148 = vmatpush1.bf16.msra.mxu1 %v9084_v21 }
 0x642   :  { %7149 = vmatprep.subr.bf16.mxu1 %v9089_v49  ;;  %v7200_v17 = vadd.f32 %v8177_v18, %v4334_v58 }
 0x645   :  { %7150 = vmatpush1.bf16.msra.mxu1 %v9087_v34 }
 0x648   :  { %7152 = vmatmul.mubr.bf16.vlgmr.msra.gmra.mrb[12].mxu1 %v10924_v4 }
 0x65c   :  { %v8194_v56 = vpop.f32.mrb[28].mxu0 }
 0x65d   :  { %v8195_v45 = vpop.f32.mrb[29].mxu0 }
 0x65e   :  { %v8196_v50 = vadd.f32 %v8195_v45, %v8194_v56  ;;  %v8197_v51 = vpop.f32.mrb[30].mxu0 }
 0x65f   :  { %v8198_v2 = vpop.f32.mrb[31].mxu0 }
 0x660   :  { %v7238_v62 = vadd.f32 %v8196_v50, %v7197_v52  ;;  %v8199_v40 = vadd.f32 %v8198_v2, %v8197_v51 }
 0x662   :  { %v7241_v53 = vadd.f32 %v8199_v40, %v7200_v17 }
 0x67c   :  { %v8216_v61 = vpop.f32.mrb[32].mxu0 }
 0x67d   :  { %v8217_v26 = vpop.f32.mrb[33].mxu0 }
 0x67e   :  { %v8218_v19 = vadd.f32 %v8217_v26, %v8216_v61  ;;  %v8219_v27 = vpop.f32.mrb[34].mxu0 }
 0x67f   :  { %v8220_v60 = vpop.f32.mrb[35].mxu0 }
 0x680   :  { %v7279_v42 = vadd.f32 %v8218_v19, %v7238_v62  ;;  %v8221_v4 = vadd.f32 %v8220_v60, %v8219_v27 }
 0x682   :  { %v7282_v55 = vadd.f32 %v8221_v4, %v7241_v53 }
 0x69c   :  { %v8238_v0 = vpop.f32.mrb[36].mxu0 }
 0x69d   :  { %v8239_v30 = vpop.f32.mrb[37].mxu0 }
 0x69e   :  { %v8240_v28 = vadd.f32 %v8239_v30, %v8238_v0  ;;  %v8241_v38 = vpop.f32.mrb[38].mxu0 }
 0x69f   :  { %v8242_v9 = vpop.f32.mrb[39].mxu0 }
 0x6a0   :  { %v7320_v22 = vadd.f32 %v8240_v28, %v7279_v42  ;;  %v8243_v10 = vadd.f32 %v8242_v9, %v8241_v38 }
 0x6a2   :  { %9134 = vtanh.f32 %v7320_v22  ;;  %v7323_v47 = vadd.f32 %v8243_v10, %v7282_v55 }
 0x6a4   :  { %9136 = vtanh.f32 %v7323_v47 }
 0x6ac   :  { %v9135_v6 = vpop.eup %9134 }
 0x6ad   :  { %7347 = vst.msk [vmem:[#allocation2 + $0x30] sm:$0xff] %vm7346_vm0, %v9135_v6 }
 0x6ae   :  { %v9137_v44 = vpop.eup %9136 }
 0x6af   :  { %7354 = vst.msk [vmem:[#allocation2 + $0x68] sm:$0xff] %vm7346_vm0, %v9137_v44 }
 0x71b   :  { %v7153_v43 = vpop.f32.mrb[12].mxu1 }
 0x71c   :  { %v8268_v63 = vadd.f32 %v7153_v43, %v4326_v1  ;;  %v7155_v13 = vpop.f32.mrb[13].mxu1 }
 0x71d   :  { %v8269_v57 = vadd.f32 %v7155_v13, %v4330_v11  ;;  %v7157_v12 = vpop.f32.mrb[14].mxu1 }
 0x71e   :  { %9138 = vtanh.f32 %v8268_v63  ;;  %v8270_v5 = vadd.f32 %v7157_v12, %v4326_v1  ;;  %v7159_v3 = vpop.f32.mrb[15].mxu1 }
 0x71f   :  { %9140 = vtanh.f32 %v8269_v57  ;;  %v8271_v23 = vadd.f32 %v7159_v3, %v4330_v11 }
 0x720   :  { %9142 = vtanh.f32 %v8270_v5 }
 0x721   :  { %9144 = vtanh.f32 %v8271_v23 }
 0x728   :  { %v9139_v36 = vpop.eup %9138 }
 0x729   :  { %v9141_v15 = vpop.eup %9140  ;;  %7344 = vst [vmem:[#allocation2 + $0x20] sm:$0xff] %v9139_v36 }
 0x72a   :  { %v9143_v8 = vpop.eup %9142  ;;  %7345 = vst [vmem:[#allocation2 + $0x28] sm:$0xff] %v9141_v15 }
 0x72b   :  { %v9145_v37 = vpop.eup %9144  ;;  %7352 = vst [vmem:[#allocation2 + $0x58] sm:$0xff] %v9143_v8 }
 0x72c   :  { %7353 = vst [vmem:[#allocation2 + $0x60] sm:$0xff] %v9145_v37 }
 0x72d   :  { %9157 = shalt.err (!%p9154_p4)
}
 0x72e   :  { %s9158_s25 = scalar_lea.hbm %s12120_s15, 1792 }
 0x72f   :  { %p9159_p5 = scmp.ne.s32.totalorder %s12120_s15, %s9158_s25  ;;  %p9162_p6 = scmp.lt.u32.totalorder %s9158_s25, %s12120_s15 }
 0x731   :  { %p9164_p7 = pnand %p9162_p6, %p9159_p5 }
 0x733   :  { %9167 = shalt.err (!%p9164_p7)
}
 0x734   :  { %s9173_s27 = smov 896   ;;  %s9174_s28 = smov 56  }
 0x735   :  { %7366 = dma.vmem_to_hbm [thread:$0]  %s7361_s22, 1792, %s12120_s15, [#allocation3], %s9173_s27, %s9173_s27, %s9174_s28  }
 0x736   :  { %9168 = dma.done.wait [#allocation3], 1792  }
 0x737   :  { %9169 = vsyncadd [#allocation3], 4294965504 }
 0x738   :  { %7370 = vsyncpa [#allocation3], 1 }

</bundles_post_ra>
